<compile_context>
chip_gen: v7x
topology: tpu7x:2x2x1
jax: 0.10.0
libtpu: 0.0.40
codegen_flags: <defaults>
</compile_context>

<pallas_src>
import jax
import jax.numpy as jnp
from jax.experimental import pallas as pl
from jax.experimental.pallas import tpu as pltpu


# ----------------------------------------------------------------------------
# helpers
# ----------------------------------------------------------------------------
def _round_up(x, m):
    return (x + m - 1) // m * m


def _pick_tile(m, cap=1024):
    for t in (1024, 512, 256, 128, 64, 32, 16, 8):
        if t <= cap and t <= m and m % t == 0:
            return t
    return m   # tiny / odd shapes: single block


# kernel-tap indices per output parity for ConvTranspose2d(k=4, s=2, p=1):
#   even output coord (parity 0) uses taps {1,3}; odd (parity 1) uses taps {0,2}.
_KIDX = ((1, 3), (0, 2))


# ----------------------------------------------------------------------------
# Pass 1: ConvTranspose2d as 4 parity x 4 tap MXU matmuls + BN partial sums
# ----------------------------------------------------------------------------
def conv_parity_kernel(xp_ref, w_ref, y_ref, stats_ref):
    """One batch image per grid step.

    xp_ref:    (1, H+2, W+2, Kp) bf16  spatially padded, channel-padded NHWC input
    w_ref:     (4, 4, Kp, Cp)    bf16  [parity(2a+b), tap(2dh+dw), Cin_pad, Cout_pad]
    y_ref:     (1, 4, H, W, Cp)  bf16  raw conv output per parity (bias NOT added)
    stats_ref: (1, 2, Cp)        f32   per-image [sum, sum_of_squares] over 4*H*W
    """
    _, hp2, wp2, kp = xp_ref.shape
    h, w = hp2 - 2, wp2 - 2
    cp = y_ref.shape[-1]

    s_acc = jnp.zeros((1, cp), jnp.float32)
    ss_acc = jnp.zeros((1, cp), jnp.float32)
    for a in range(2):                       # output-row parity
        for b in range(2):                   # output-col parity
            acc = jnp.zeros((h * w, cp), jnp.float32)
            for dh in range(2):
                for dw in range(2):
                    r0 = 1 + a - dh          # static offsets into the padded input
                    c0 = 1 + b - dw
                    xwin = xp_ref[0, r0:r0 + h, c0:c0 + w, :].reshape(h * w, kp)
                    wtap = w_ref[2 * a + b, 2 * dh + dw]        # (Kp, Cp)
                    acc = acc + jnp.dot(xwin, wtap,
                                        preferred_element_type=jnp.float32)
            y_ref[0, 2 * a + b] = acc.reshape(h, w, cp).astype(y_ref.dtype)
            s_acc = s_acc + jnp.sum(acc, axis=0, keepdims=True)
            ss_acc = ss_acc + jnp.sum(acc * acc, axis=0, keepdims=True)
    stats_ref[0, 0:1, :] = s_acc
    stats_ref[0, 1:2, :] = ss_acc


# ----------------------------------------------------------------------------
# Pass 2: fused BatchNorm affine (precomputed scale/shift) + LeakyReLU(0.1)
# ----------------------------------------------------------------------------
def bn_lrelu_kernel(y_ref, scale_ref, shift_ref, o_ref):
    z = y_ref[...].astype(jnp.float32) * scale_ref[...] + shift_ref[...]
    o_ref[...] = jnp.where(z >= 0, z, 0.1 * z)


# ----------------------------------------------------------------------------
# weight reshuffle: PyTorch (Cin, Cout, 4, 4) -> (4 parity, 4 tap, Kp, Cp) bf16
# ----------------------------------------------------------------------------
def _prep_weights(w_t, kp, cp):
    cin, cout = w_t.shape[0], w_t.shape[1]
    mats = []
    for a in range(2):
        for b in range(2):
            taps = []
            for dh in range(2):
                for dw in range(2):
                    wm = w_t[:, :, _KIDX[a][dh], _KIDX[b][dw]]        # (Cin, Cout)
                    wm = jnp.pad(wm, ((0, kp - cin), (0, cp - cout)))
                    taps.append(wm)
            mats.append(jnp.stack(taps, axis=0))
    return jnp.stack(mats, axis=0).astype(jnp.bfloat16)               # (4,4,Kp,Cp)


# ----------------------------------------------------------------------------
# Forward wrapper
# ----------------------------------------------------------------------------
def upsample_block_forward(x_nchw, w_t, bias, gamma, beta, injection=None,
                           eps=1e-5):
    N, Cin, H, W = x_nchw.shape
    Cout = w_t.shape[1]
    Kp = _round_up(Cin, 128)     # lane-dense matmul K
    Cp = _round_up(Cout, 128)    # lane-dense matmul N / output lanes

    # NCHW -> NHWC, spatial pad 1, channel pad to Kp, bf16 matmul operands.
    # TODO(synk): accept NHWC at the API boundary to drop this entry transpose.
    x = jnp.transpose(x_nchw, (0, 2, 3, 1)).astype(jnp.float32)
    xp = jnp.pad(x, ((0, 0), (1, 1), (1, 1), (0, Kp - Cin))).astype(jnp.bfloat16)
    w4 = _prep_weights(w_t.astype(jnp.float32), Kp, Cp)

    # ---- Pass 1: conv (per-image grid, pipelined, megacore-parallel) ----
    # TODO(synk): for very large single images, add an H-tiled halo pipeline
    # (memory_space=pl.ANY + manual DMA) instead of whole-image blocks.
    y_raw, stats = pl.pallas_call(
        conv_parity_kernel,
        out_shape=(jax.ShapeDtypeStruct((N, 4, H, W, Cp), jnp.bfloat16),
                   jax.ShapeDtypeStruct((N, 2, Cp), jnp.float32)),
        grid=(N,),
        in_specs=[
            pl.BlockSpec((1, H + 2, W + 2, Kp), lambda n: (n, 0, 0, 0)),
            pl.BlockSpec((4, 4, Kp, Cp), lambda n: (0, 0, 0, 0)),
        ],
        out_specs=(
            pl.BlockSpec((1, 4, H, W, Cp), lambda n: (n, 0, 0, 0, 0)),
            pl.BlockSpec((1, 2, Cp), lambda n: (n, 0, 0)),
        ),
        compiler_params=pltpu.CompilerParams(
            dimension_semantics=("parallel",),
            vmem_limit_bytes=32 * 1024 * 1024),
    )(xp, w4)

    # ---- tiny wrapper reduction: fold bias + batch-norm into (scale, shift) ----
    cnt = jnp.float32(N * 4 * H * W)
    s = jnp.sum(stats[:, 0, :], axis=0)                    # (Cp,)  f32
    ss = jnp.sum(stats[:, 1, :], axis=0)
    mean = s / cnt                                         # mean of conv (no bias)
    var = jnp.maximum(ss / cnt - mean * mean, 0.0)         # bias-invariant
    bias_p = jnp.pad(bias.astype(jnp.float32), (0, Cp - Cout))
    gamma_p = jnp.pad(gamma.astype(jnp.float32), (0, Cp - Cout))
    beta_p = jnp.pad(beta.astype(jnp.float32), (0, Cp - Cout))
    mean_full = mean + bias_p                              # mean of (conv + bias)
    scale = gamma_p * jax.lax.rsqrt(var + eps)
    shift = (bias_p - mean_full) * scale + beta_p          # == beta - mean*scale

    # ---- Pass 2: lane-dense, M-tiled affine + LeakyReLU sweep ----
    M4 = N * 4 * H * W
    TM = _pick_tile(M4)
    y_flat = y_raw.reshape(M4, Cp)                         # contiguous, free
    out_flat = pl.pallas_call(
        bn_lrelu_kernel,
        out_shape=jax.ShapeDtypeStruct((M4, Cp), jnp.float32),
        grid=(pl.cdiv(M4, TM),),
        in_specs=[
            pl.BlockSpec((TM, Cp), lambda i: (i, 0)),
            pl.BlockSpec((1, Cp), lambda i: (0, 0)),
            pl.BlockSpec((1, Cp), lambda i: (0, 0)),
        ],
        out_specs=pl.BlockSpec((TM, Cp), lambda i: (i, 0)),
        compiler_params=pltpu.CompilerParams(
            dimension_semantics=("parallel",),
            vmem_limit_bytes=32 * 1024 * 1024),
    )(y_flat, scale.reshape(1, Cp), shift.reshape(1, Cp))

    # Parity interleave + NHWC->NCHW fused into ONE transpose (drops channel pad).
    # TODO(synk): fuse this transpose and the injection concat into pass 2
    # (NCHW output blocks + input_output_aliases) to remove the last HBM round trip.
    y6 = out_flat.reshape(N, 2, 2, H, W, Cp)[..., :Cout]   # (n, a, b, h, w, c)
    out = jnp.transpose(y6, (0, 5, 3, 1, 4, 2)).reshape(N, Cout, 2 * H, 2 * W)
    if injection is not None:
        out = jnp.concatenate([out, injection.astype(out.dtype)], axis=1)
    return out


# ----------------------------------------------------------------------------
# Pure-JAX f32 reference (lax conv with lhs_dilation) for the correctness check
# ----------------------------------------------------------------------------
def reference_forward(x_nchw, w_t, bias, gamma, beta, injection=None):
    x = jnp.transpose(x_nchw, (0, 2, 3, 1)).astype(jnp.float32)
    w_conv = jnp.transpose(w_t[:, :, ::-1, ::-1], (2, 3, 0, 1))   # HWIO, flipped
    y = jax.lax.conv_general_dilated(
        x, w_conv.astype(jnp.float32), window_strides=(1, 1),
        padding=((2, 2), (2, 2)), lhs_dilation=(2, 2),
        dimension_numbers=('NHWC', 'HWIO', 'NHWC'))
    y = y + bias
    mean = jnp.mean(y, axis=(0, 1, 2), keepdims=True)
    var = jnp.mean((y - mean) ** 2, axis=(0, 1, 2), keepdims=True)
    yn = (y - mean) * jax.lax.rsqrt(var + 1e-5) * gamma + beta
    out = jnp.where(yn >= 0, yn, 0.1 * yn)
    out = jnp.transpose(out, (0, 3, 1, 2))
    if injection is not None:
        out = jnp.concatenate([out, injection.astype(out.dtype)], axis=1)
    return out


if __name__ == "__main__":
    N, Cin, Cout, H, W = 2, 4, 8, 16, 16

    key = jax.random.PRNGKey(0)
    k1, k2, k3, k4, k5, k6 = jax.random.split(key, 6)

    # ConvTranspose2d params (PyTorch layout: (Cin, Cout, kH, kW)) + BN affine.
    w_t = 0.1 * jax.random.normal(k1, (Cin, Cout, 4, 4), jnp.float32)
    bias = 0.1 * jax.random.normal(k2, (Cout,), jnp.float32)
    gamma = 1.0 + 0.1 * jax.random.normal(k3, (Cout,), jnp.float32)
    beta = 0.1 * jax.random.normal(k4, (Cout,), jnp.float32)

    x = jax.random.normal(k5, (N, Cin, H, W), jnp.float32)                # NCHW
    injection = jax.random.normal(k6, (N, 3, 2 * H, 2 * W), jnp.float32)  # concat

    out = upsample_block_forward(x, w_t, bias, gamma, beta, injection)
    out = jax.block_until_ready(out)

    ref = jax.block_until_ready(
        reference_forward(x, w_t, bias, gamma, beta, injection))

    assert out.shape == (N, Cout + 3, 2 * H, 2 * W), out.shape
    err = float(jnp.max(jnp.abs(out - ref)))
    # bf16 matmul operands + bf16 intermediate vs f32 reference -> O(1e-2) worst case.
    assert err < 3e-2, f"mismatch vs reference, max abs err = {err}"

    print("KERNEL_OK")
</pallas_src>

<mosaic_0001>
module attributes {stable_mosaic.version = 11 : i64} {
  func.func @conv_parity_kernel(%arg0: i32, %arg1: memref<1x18x18x128xbf16, #tpu.memory_space<vmem>>, %arg2: memref<4x4x128x128xbf16, #tpu.memory_space<vmem>>, %arg3: memref<1x4x16x16x128xbf16, #tpu.memory_space<vmem>>, %arg4: memref<1x2x128xf32, #tpu.memory_space<vmem>>) attributes {dimension_semantics = [#tpu.dimension_semantics<parallel>], iteration_bounds = array<i64: 2>, scalar_prefetch = 0 : i64, scratch_operands = 0 : i64, tpu.core_type = #tpu.core_type<tc>, window_params = [{transform_indices = @transform_0, window_bounds = array<i64: 1, 18, 18, 128>}, {pipeline_mode = #tpu.pipeline_mode<synchronous>, transform_indices = @transform_1, window_bounds = array<i64: 4, 4, 128, 128>}, {transform_indices = @transform_2, window_bounds = array<i64: 1, 4, 16, 16, 128>}, {transform_indices = @transform_3, window_bounds = array<i64: 1, 2, 128>}]} {
    %cst = arith.constant 0.000000e+00 : f32
    %0 = vector.broadcast %cst : f32 to vector<1x128xf32>
    %cst_0 = arith.constant 0.000000e+00 : f32
    %1 = vector.broadcast %cst_0 : f32 to vector<1x128xf32>
    %cst_1 = arith.constant 0.000000e+00 : f32
    %2 = vector.broadcast %cst_1 : f32 to vector<256x128xf32>
    %c0 = arith.constant 0 : index
    %c1 = arith.constant 1 : index
    %c1_2 = arith.constant 1 : index
    %c0_3 = arith.constant 0 : index
    %3 = vector.load %arg1[%c0, %c1, %c1_2, %c0_3] : memref<1x18x18x128xbf16, #tpu.memory_space<vmem>>, vector<1x16x16x128xbf16>
    %4 = vector.shape_cast %3 : vector<1x16x16x128xbf16> to vector<16x16x128xbf16>
    %5 = vector.shape_cast %4 : vector<16x16x128xbf16> to vector<256x128xbf16>
    %c0_4 = arith.constant 0 : index
    %c0_5 = arith.constant 0 : index
    %c0_6 = arith.constant 0 : index
    %c0_7 = arith.constant 0 : index
    %6 = vector.load %arg2[%c0_4, %c0_5, %c0_6, %c0_7] : memref<4x4x128x128xbf16, #tpu.memory_space<vmem>>, vector<1x1x128x128xbf16>
    %7 = vector.shape_cast %6 : vector<1x1x128x128xbf16> to vector<128x128xbf16>
    %cst_8 = arith.constant dense<0.000000e+00> : vector<256x128xf32>
    %8 = tpu.matmul %5, %7, %cst_8 {dimension_numbers = #tpu.dot_dimension_numbers<[1], [0], [0], [1], [0, 0, 1, 1], [], []>} : vector<256x128xbf16>, vector<128x128xbf16>, vector<256x128xf32> -> vector<256x128xf32>
    %9 = arith.addf %2, %8 : vector<256x128xf32>
    %c0_9 = arith.constant 0 : index
    %c1_10 = arith.constant 1 : index
    %c0_11 = arith.constant 0 : index
    %c0_12 = arith.constant 0 : index
    %10 = vector.load %arg1[%c0_9, %c1_10, %c0_11, %c0_12] : memref<1x18x18x128xbf16, #tpu.memory_space<vmem>>, vector<1x16x16x128xbf16>
    %11 = vector.shape_cast %10 : vector<1x16x16x128xbf16> to vector<16x16x128xbf16>
    %12 = vector.shape_cast %11 : vector<16x16x128xbf16> to vector<256x128xbf16>
    %c0_13 = arith.constant 0 : index
    %c1_14 = arith.constant 1 : index
    %c0_15 = arith.constant 0 : index
    %c0_16 = arith.constant 0 : index
    %13 = vector.load %arg2[%c0_13, %c1_14, %c0_15, %c0_16] : memref<4x4x128x128xbf16, #tpu.memory_space<vmem>>, vector<1x1x128x128xbf16>
    %14 = vector.shape_cast %13 : vector<1x1x128x128xbf16> to vector<128x128xbf16>
    %cst_17 = arith.constant dense<0.000000e+00> : vector<256x128xf32>
    %15 = tpu.matmul %12, %14, %cst_17 {dimension_numbers = #tpu.dot_dimension_numbers<[1], [0], [0], [1], [0, 0, 1, 1], [], []>} : vector<256x128xbf16>, vector<128x128xbf16>, vector<256x128xf32> -> vector<256x128xf32>
    %16 = arith.addf %9, %15 : vector<256x128xf32>
    %c0_18 = arith.constant 0 : index
    %c0_19 = arith.constant 0 : index
    %c1_20 = arith.constant 1 : index
    %c0_21 = arith.constant 0 : index
    %17 = vector.load %arg1[%c0_18, %c0_19, %c1_20, %c0_21] : memref<1x18x18x128xbf16, #tpu.memory_space<vmem>>, vector<1x16x16x128xbf16>
    %18 = vector.shape_cast %17 : vector<1x16x16x128xbf16> to vector<16x16x128xbf16>
    %19 = vector.shape_cast %18 : vector<16x16x128xbf16> to vector<256x128xbf16>
    %c0_22 = arith.constant 0 : index
    %c2 = arith.constant 2 : index
    %c0_23 = arith.constant 0 : index
    %c0_24 = arith.constant 0 : index
    %20 = vector.load %arg2[%c0_22, %c2, %c0_23, %c0_24] : memref<4x4x128x128xbf16, #tpu.memory_space<vmem>>, vector<1x1x128x128xbf16>
    %21 = vector.shape_cast %20 : vector<1x1x128x128xbf16> to vector<128x128xbf16>
    %cst_25 = arith.constant dense<0.000000e+00> : vector<256x128xf32>
    %22 = tpu.matmul %19, %21, %cst_25 {dimension_numbers = #tpu.dot_dimension_numbers<[1], [0], [0], [1], [0, 0, 1, 1], [], []>} : vector<256x128xbf16>, vector<128x128xbf16>, vector<256x128xf32> -> vector<256x128xf32>
    %23 = arith.addf %16, %22 : vector<256x128xf32>
    %c0_26 = arith.constant 0 : index
    %c0_27 = arith.constant 0 : index
    %c0_28 = arith.constant 0 : index
    %c0_29 = arith.constant 0 : index
    %24 = vector.load %arg1[%c0_26, %c0_27, %c0_28, %c0_29] : memref<1x18x18x128xbf16, #tpu.memory_space<vmem>>, vector<1x16x16x128xbf16>
    %25 = vector.shape_cast %24 : vector<1x16x16x128xbf16> to vector<16x16x128xbf16>
    %26 = vector.shape_cast %25 : vector<16x16x128xbf16> to vector<256x128xbf16>
    %c0_30 = arith.constant 0 : index
    %c3 = arith.constant 3 : index
    %c0_31 = arith.constant 0 : index
    %c0_32 = arith.constant 0 : index
    %27 = vector.load %arg2[%c0_30, %c3, %c0_31, %c0_32] : memref<4x4x128x128xbf16, #tpu.memory_space<vmem>>, vector<1x1x128x128xbf16>
    %28 = vector.shape_cast %27 : vector<1x1x128x128xbf16> to vector<128x128xbf16>
    %cst_33 = arith.constant dense<0.000000e+00> : vector<256x128xf32>
    %29 = tpu.matmul %26, %28, %cst_33 {dimension_numbers = #tpu.dot_dimension_numbers<[1], [0], [0], [1], [0, 0, 1, 1], [], []>} : vector<256x128xbf16>, vector<128x128xbf16>, vector<256x128xf32> -> vector<256x128xf32>
    %30 = arith.addf %23, %29 : vector<256x128xf32>
    %31 = vector.shape_cast %30 : vector<256x128xf32> to vector<16x16x128xf32>
    %32 = arith.truncf %31 : vector<16x16x128xf32> to vector<16x16x128xbf16>
    %c0_34 = arith.constant 0 : index
    %c0_35 = arith.constant 0 : index
    %c0_36 = arith.constant 0 : index
    %c0_37 = arith.constant 0 : index
    %c0_38 = arith.constant 0 : index
    %33 = vector.load %arg3[%c0_34, %c0_35, %c0_36, %c0_37, %c0_38] : memref<1x4x16x16x128xbf16, #tpu.memory_space<vmem>>, vector<1x1x16x16x128xbf16>
    %34 = vector.shape_cast %33 : vector<1x1x16x16x128xbf16> to vector<16x16x128xbf16>
    %35 = vector.shape_cast %32 : vector<16x16x128xbf16> to vector<1x1x16x16x128xbf16>
    tpu.vector_store %arg3[%c0_34, %c0_35, %c0_36, %c0_37, %c0_38], %35 {strides = array<i32>} : memref<1x4x16x16x128xbf16, #tpu.memory_space<vmem>>, vector<1x1x16x16x128xbf16>,
    %cst_39 = arith.constant dense<0.000000e+00> : vector<128xf32>
    %36 = vector.multi_reduction <add>, %30, %cst_39 [0] : vector<256x128xf32> to vector<128xf32>
    %37 = vector.shape_cast %36 : vector<128xf32> to vector<1x128xf32>
    %38 = arith.addf %0, %37 : vector<1x128xf32>
    %39 = arith.mulf %30, %30 : vector<256x128xf32>
    %cst_40 = arith.constant dense<0.000000e+00> : vector<128xf32>
    %40 = vector.multi_reduction <add>, %39, %cst_40 [0] : vector<256x128xf32> to vector<128xf32>
    %41 = vector.shape_cast %40 : vector<128xf32> to vector<1x128xf32>
    %42 = arith.addf %1, %41 : vector<1x128xf32>
    %cst_41 = arith.constant 0.000000e+00 : f32
    %43 = vector.broadcast %cst_41 : f32 to vector<256x128xf32>
    %c0_42 = arith.constant 0 : index
    %c1_43 = arith.constant 1 : index
    %c2_44 = arith.constant 2 : index
    %c0_45 = arith.constant 0 : index
    %44 = vector.load %arg1[%c0_42, %c1_43, %c2_44, %c0_45] : memref<1x18x18x128xbf16, #tpu.memory_space<vmem>>, vector<1x16x16x128xbf16>
    %45 = vector.shape_cast %44 : vector<1x16x16x128xbf16> to vector<16x16x128xbf16>
    %46 = vector.shape_cast %45 : vector<16x16x128xbf16> to vector<256x128xbf16>
    %c1_46 = arith.constant 1 : index
    %c0_47 = arith.constant 0 : index
    %c0_48 = arith.constant 0 : index
    %c0_49 = arith.constant 0 : index
    %47 = vector.load %arg2[%c1_46, %c0_47, %c0_48, %c0_49] : memref<4x4x128x128xbf16, #tpu.memory_space<vmem>>, vector<1x1x128x128xbf16>
    %48 = vector.shape_cast %47 : vector<1x1x128x128xbf16> to vector<128x128xbf16>
    %cst_50 = arith.constant dense<0.000000e+00> : vector<256x128xf32>
    %49 = tpu.matmul %46, %48, %cst_50 {dimension_numbers = #tpu.dot_dimension_numbers<[1], [0], [0], [1], [0, 0, 1, 1], [], []>} : vector<256x128xbf16>, vector<128x128xbf16>, vector<256x128xf32> -> vector<256x128xf32>
    %50 = arith.addf %43, %49 : vector<256x128xf32>
    %c0_51 = arith.constant 0 : index
    %c1_52 = arith.constant 1 : index
    %c1_53 = arith.constant 1 : index
    %c0_54 = arith.constant 0 : index
    %51 = vector.load %arg1[%c0_51, %c1_52, %c1_53, %c0_54] : memref<1x18x18x128xbf16, #tpu.memory_space<vmem>>, vector<1x16x16x128xbf16>
    %52 = vector.shape_cast %51 : vector<1x16x16x128xbf16> to vector<16x16x128xbf16>
    %53 = vector.shape_cast %52 : vector<16x16x128xbf16> to vector<256x128xbf16>
    %c1_55 = arith.constant 1 : index
    %c1_56 = arith.constant 1 : index
    %c0_57 = arith.constant 0 : index
    %c0_58 = arith.constant 0 : index
    %54 = vector.load %arg2[%c1_55, %c1_56, %c0_57, %c0_58] : memref<4x4x128x128xbf16, #tpu.memory_space<vmem>>, vector<1x1x128x128xbf16>
    %55 = vector.shape_cast %54 : vector<1x1x128x128xbf16> to vector<128x128xbf16>
    %cst_59 = arith.constant dense<0.000000e+00> : vector<256x128xf32>
    %56 = tpu.matmul %53, %55, %cst_59 {dimension_numbers = #tpu.dot_dimension_numbers<[1], [0], [0], [1], [0, 0, 1, 1], [], []>} : vector<256x128xbf16>, vector<128x128xbf16>, vector<256x128xf32> -> vector<256x128xf32>
    %57 = arith.addf %50, %56 : vector<256x128xf32>
    %c0_60 = arith.constant 0 : index
    %c0_61 = arith.constant 0 : index
    %c2_62 = arith.constant 2 : index
    %c0_63 = arith.constant 0 : index
    %58 = vector.load %arg1[%c0_60, %c0_61, %c2_62, %c0_63] : memref<1x18x18x128xbf16, #tpu.memory_space<vmem>>, vector<1x16x16x128xbf16>
    %59 = vector.shape_cast %58 : vector<1x16x16x128xbf16> to vector<16x16x128xbf16>
    %60 = vector.shape_cast %59 : vector<16x16x128xbf16> to vector<256x128xbf16>
    %c1_64 = arith.constant 1 : index
    %c2_65 = arith.constant 2 : index
    %c0_66 = arith.constant 0 : index
    %c0_67 = arith.constant 0 : index
    %61 = vector.load %arg2[%c1_64, %c2_65, %c0_66, %c0_67] : memref<4x4x128x128xbf16, #tpu.memory_space<vmem>>, vector<1x1x128x128xbf16>
    %62 = vector.shape_cast %61 : vector<1x1x128x128xbf16> to vector<128x128xbf16>
    %cst_68 = arith.constant dense<0.000000e+00> : vector<256x128xf32>
    %63 = tpu.matmul %60, %62, %cst_68 {dimension_numbers = #tpu.dot_dimension_numbers<[1], [0], [0], [1], [0, 0, 1, 1], [], []>} : vector<256x128xbf16>, vector<128x128xbf16>, vector<256x128xf32> -> vector<256x128xf32>
    %64 = arith.addf %57, %63 : vector<256x128xf32>
    %c0_69 = arith.constant 0 : index
    %c0_70 = arith.constant 0 : index
    %c1_71 = arith.constant 1 : index
    %c0_72 = arith.constant 0 : index
    %65 = vector.load %arg1[%c0_69, %c0_70, %c1_71, %c0_72] : memref<1x18x18x128xbf16, #tpu.memory_space<vmem>>, vector<1x16x16x128xbf16>
    %66 = vector.shape_cast %65 : vector<1x16x16x128xbf16> to vector<16x16x128xbf16>
    %67 = vector.shape_cast %66 : vector<16x16x128xbf16> to vector<256x128xbf16>
    %c1_73 = arith.constant 1 : index
    %c3_74 = arith.constant 3 : index
    %c0_75 = arith.constant 0 : index
    %c0_76 = arith.constant 0 : index
    %68 = vector.load %arg2[%c1_73, %c3_74, %c0_75, %c0_76] : memref<4x4x128x128xbf16, #tpu.memory_space<vmem>>, vector<1x1x128x128xbf16>
    %69 = vector.shape_cast %68 : vector<1x1x128x128xbf16> to vector<128x128xbf16>
    %cst_77 = arith.constant dense<0.000000e+00> : vector<256x128xf32>
    %70 = tpu.matmul %67, %69, %cst_77 {dimension_numbers = #tpu.dot_dimension_numbers<[1], [0], [0], [1], [0, 0, 1, 1], [], []>} : vector<256x128xbf16>, vector<128x128xbf16>, vector<256x128xf32> -> vector<256x128xf32>
    %71 = arith.addf %64, %70 : vector<256x128xf32>
    %72 = vector.shape_cast %71 : vector<256x128xf32> to vector<16x16x128xf32>
    %73 = arith.truncf %72 : vector<16x16x128xf32> to vector<16x16x128xbf16>
    %c0_78 = arith.constant 0 : index
    %c1_79 = arith.constant 1 : index
    %c0_80 = arith.constant 0 : index
    %c0_81 = arith.constant 0 : index
    %c0_82 = arith.constant 0 : index
    %74 = vector.load %arg3[%c0_78, %c1_79, %c0_80, %c0_81, %c0_82] : memref<1x4x16x16x128xbf16, #tpu.memory_space<vmem>>, vector<1x1x16x16x128xbf16>
    %75 = vector.shape_cast %74 : vector<1x1x16x16x128xbf16> to vector<16x16x128xbf16>
    %76 = vector.shape_cast %73 : vector<16x16x128xbf16> to vector<1x1x16x16x128xbf16>
    tpu.vector_store %arg3[%c0_78, %c1_79, %c0_80, %c0_81, %c0_82], %76 {strides = array<i32>} : memref<1x4x16x16x128xbf16, #tpu.memory_space<vmem>>, vector<1x1x16x16x128xbf16>,
    %cst_83 = arith.constant dense<0.000000e+00> : vector<128xf32>
    %77 = vector.multi_reduction <add>, %71, %cst_83 [0] : vector<256x128xf32> to vector<128xf32>
    %78 = vector.shape_cast %77 : vector<128xf32> to vector<1x128xf32>
    %79 = arith.addf %38, %78 : vector<1x128xf32>
    %80 = arith.mulf %71, %71 : vector<256x128xf32>
    %cst_84 = arith.constant dense<0.000000e+00> : vector<128xf32>
    %81 = vector.multi_reduction <add>, %80, %cst_84 [0] : vector<256x128xf32> to vector<128xf32>
    %82 = vector.shape_cast %81 : vector<128xf32> to vector<1x128xf32>
    %83 = arith.addf %42, %82 : vector<1x128xf32>
    %cst_85 = arith.constant 0.000000e+00 : f32
    %84 = vector.broadcast %cst_85 : f32 to vector<256x128xf32>
    %c0_86 = arith.constant 0 : index
    %c2_87 = arith.constant 2 : index
    %c1_88 = arith.constant 1 : index
    %c0_89 = arith.constant 0 : index
    %85 = vector.load %arg1[%c0_86, %c2_87, %c1_88, %c0_89] : memref<1x18x18x128xbf16, #tpu.memory_space<vmem>>, vector<1x16x16x128xbf16>
    %86 = vector.shape_cast %85 : vector<1x16x16x128xbf16> to vector<16x16x128xbf16>
    %87 = vector.shape_cast %86 : vector<16x16x128xbf16> to vector<256x128xbf16>
    %c2_90 = arith.constant 2 : index
    %c0_91 = arith.constant 0 : index
    %c0_92 = arith.constant 0 : index
    %c0_93 = arith.constant 0 : index
    %88 = vector.load %arg2[%c2_90, %c0_91, %c0_92, %c0_93] : memref<4x4x128x128xbf16, #tpu.memory_space<vmem>>, vector<1x1x128x128xbf16>
    %89 = vector.shape_cast %88 : vector<1x1x128x128xbf16> to vector<128x128xbf16>
    %cst_94 = arith.constant dense<0.000000e+00> : vector<256x128xf32>
    %90 = tpu.matmul %87, %89, %cst_94 {dimension_numbers = #tpu.dot_dimension_numbers<[1], [0], [0], [1], [0, 0, 1, 1], [], []>} : vector<256x128xbf16>, vector<128x128xbf16>, vector<256x128xf32> -> vector<256x128xf32>
    %91 = arith.addf %84, %90 : vector<256x128xf32>
    %c0_95 = arith.constant 0 : index
    %c2_96 = arith.constant 2 : index
    %c0_97 = arith.constant 0 : index
    %c0_98 = arith.constant 0 : index
    %92 = vector.load %arg1[%c0_95, %c2_96, %c0_97, %c0_98] : memref<1x18x18x128xbf16, #tpu.memory_space<vmem>>, vector<1x16x16x128xbf16>
    %93 = vector.shape_cast %92 : vector<1x16x16x128xbf16> to vector<16x16x128xbf16>
    %94 = vector.shape_cast %93 : vector<16x16x128xbf16> to vector<256x128xbf16>
    %c2_99 = arith.constant 2 : index
    %c1_100 = arith.constant 1 : index
    %c0_101 = arith.constant 0 : index
    %c0_102 = arith.constant 0 : index
    %95 = vector.load %arg2[%c2_99, %c1_100, %c0_101, %c0_102] : memref<4x4x128x128xbf16, #tpu.memory_space<vmem>>, vector<1x1x128x128xbf16>
    %96 = vector.shape_cast %95 : vector<1x1x128x128xbf16> to vector<128x128xbf16>
    %cst_103 = arith.constant dense<0.000000e+00> : vector<256x128xf32>
    %97 = tpu.matmul %94, %96, %cst_103 {dimension_numbers = #tpu.dot_dimension_numbers<[1], [0], [0], [1], [0, 0, 1, 1], [], []>} : vector<256x128xbf16>, vector<128x128xbf16>, vector<256x128xf32> -> vector<256x128xf32>
    %98 = arith.addf %91, %97 : vector<256x128xf32>
    %c0_104 = arith.constant 0 : index
    %c1_105 = arith.constant 1 : index
    %c1_106 = arith.constant 1 : index
    %c0_107 = arith.constant 0 : index
    %99 = vector.load %arg1[%c0_104, %c1_105, %c1_106, %c0_107] : memref<1x18x18x128xbf16, #tpu.memory_space<vmem>>, vector<1x16x16x128xbf16>
    %100 = vector.shape_cast %99 : vector<1x16x16x128xbf16> to vector<16x16x128xbf16>
    %101 = vector.shape_cast %100 : vector<16x16x128xbf16> to vector<256x128xbf16>
    %c2_108 = arith.constant 2 : index
    %c2_109 = arith.constant 2 : index
    %c0_110 = arith.constant 0 : index
    %c0_111 = arith.constant 0 : index
    %102 = vector.load %arg2[%c2_108, %c2_109, %c0_110, %c0_111] : memref<4x4x128x128xbf16, #tpu.memory_space<vmem>>, vector<1x1x128x128xbf16>
    %103 = vector.shape_cast %102 : vector<1x1x128x128xbf16> to vector<128x128xbf16>
    %cst_112 = arith.constant dense<0.000000e+00> : vector<256x128xf32>
    %104 = tpu.matmul %101, %103, %cst_112 {dimension_numbers = #tpu.dot_dimension_numbers<[1], [0], [0], [1], [0, 0, 1, 1], [], []>} : vector<256x128xbf16>, vector<128x128xbf16>, vector<256x128xf32> -> vector<256x128xf32>
    %105 = arith.addf %98, %104 : vector<256x128xf32>
    %c0_113 = arith.constant 0 : index
    %c1_114 = arith.constant 1 : index
    %c0_115 = arith.constant 0 : index
    %c0_116 = arith.constant 0 : index
    %106 = vector.load %arg1[%c0_113, %c1_114, %c0_115, %c0_116] : memref<1x18x18x128xbf16, #tpu.memory_space<vmem>>, vector<1x16x16x128xbf16>
    %107 = vector.shape_cast %106 : vector<1x16x16x128xbf16> to vector<16x16x128xbf16>
    %108 = vector.shape_cast %107 : vector<16x16x128xbf16> to vector<256x128xbf16>
    %c2_117 = arith.constant 2 : index
    %c3_118 = arith.constant 3 : index
    %c0_119 = arith.constant 0 : index
    %c0_120 = arith.constant 0 : index
    %109 = vector.load %arg2[%c2_117, %c3_118, %c0_119, %c0_120] : memref<4x4x128x128xbf16, #tpu.memory_space<vmem>>, vector<1x1x128x128xbf16>
    %110 = vector.shape_cast %109 : vector<1x1x128x128xbf16> to vector<128x128xbf16>
    %cst_121 = arith.constant dense<0.000000e+00> : vector<256x128xf32>
    %111 = tpu.matmul %108, %110, %cst_121 {dimension_numbers = #tpu.dot_dimension_numbers<[1], [0], [0], [1], [0, 0, 1, 1], [], []>} : vector<256x128xbf16>, vector<128x128xbf16>, vector<256x128xf32> -> vector<256x128xf32>
    %112 = arith.addf %105, %111 : vector<256x128xf32>
    %113 = vector.shape_cast %112 : vector<256x128xf32> to vector<16x16x128xf32>
    %114 = arith.truncf %113 : vector<16x16x128xf32> to vector<16x16x128xbf16>
    %c0_122 = arith.constant 0 : index
    %c2_123 = arith.constant 2 : index
    %c0_124 = arith.constant 0 : index
    %c0_125 = arith.constant 0 : index
    %c0_126 = arith.constant 0 : index
    %115 = vector.load %arg3[%c0_122, %c2_123, %c0_124, %c0_125, %c0_126] : memref<1x4x16x16x128xbf16, #tpu.memory_space<vmem>>, vector<1x1x16x16x128xbf16>
    %116 = vector.shape_cast %115 : vector<1x1x16x16x128xbf16> to vector<16x16x128xbf16>
    %117 = vector.shape_cast %114 : vector<16x16x128xbf16> to vector<1x1x16x16x128xbf16>
    tpu.vector_store %arg3[%c0_122, %c2_123, %c0_124, %c0_125, %c0_126], %117 {strides = array<i32>} : memref<1x4x16x16x128xbf16, #tpu.memory_space<vmem>>, vector<1x1x16x16x128xbf16>,
    %cst_127 = arith.constant dense<0.000000e+00> : vector<128xf32>
    %118 = vector.multi_reduction <add>, %112, %cst_127 [0] : vector<256x128xf32> to vector<128xf32>
    %119 = vector.shape_cast %118 : vector<128xf32> to vector<1x128xf32>
    %120 = arith.addf %79, %119 : vector<1x128xf32>
    %121 = arith.mulf %112, %112 : vector<256x128xf32>
    %cst_128 = arith.constant dense<0.000000e+00> : vector<128xf32>
    %122 = vector.multi_reduction <add>, %121, %cst_128 [0] : vector<256x128xf32> to vector<128xf32>
    %123 = vector.shape_cast %122 : vector<128xf32> to vector<1x128xf32>
    %124 = arith.addf %83, %123 : vector<1x128xf32>
    %cst_129 = arith.constant 0.000000e+00 : f32
    %125 = vector.broadcast %cst_129 : f32 to vector<256x128xf32>
    %c0_130 = arith.constant 0 : index
    %c2_131 = arith.constant 2 : index
    %c2_132 = arith.constant 2 : index
    %c0_133 = arith.constant 0 : index
    %126 = vector.load %arg1[%c0_130, %c2_131, %c2_132, %c0_133] : memref<1x18x18x128xbf16, #tpu.memory_space<vmem>>, vector<1x16x16x128xbf16>
    %127 = vector.shape_cast %126 : vector<1x16x16x128xbf16> to vector<16x16x128xbf16>
    %128 = vector.shape_cast %127 : vector<16x16x128xbf16> to vector<256x128xbf16>
    %c3_134 = arith.constant 3 : index
    %c0_135 = arith.constant 0 : index
    %c0_136 = arith.constant 0 : index
    %c0_137 = arith.constant 0 : index
    %129 = vector.load %arg2[%c3_134, %c0_135, %c0_136, %c0_137] : memref<4x4x128x128xbf16, #tpu.memory_space<vmem>>, vector<1x1x128x128xbf16>
    %130 = vector.shape_cast %129 : vector<1x1x128x128xbf16> to vector<128x128xbf16>
    %cst_138 = arith.constant dense<0.000000e+00> : vector<256x128xf32>
    %131 = tpu.matmul %128, %130, %cst_138 {dimension_numbers = #tpu.dot_dimension_numbers<[1], [0], [0], [1], [0, 0, 1, 1], [], []>} : vector<256x128xbf16>, vector<128x128xbf16>, vector<256x128xf32> -> vector<256x128xf32>
    %132 = arith.addf %125, %131 : vector<256x128xf32>
    %c0_139 = arith.constant 0 : index
    %c2_140 = arith.constant 2 : index
    %c1_141 = arith.constant 1 : index
    %c0_142 = arith.constant 0 : index
    %133 = vector.load %arg1[%c0_139, %c2_140, %c1_141, %c0_142] : memref<1x18x18x128xbf16, #tpu.memory_space<vmem>>, vector<1x16x16x128xbf16>
    %134 = vector.shape_cast %133 : vector<1x16x16x128xbf16> to vector<16x16x128xbf16>
    %135 = vector.shape_cast %134 : vector<16x16x128xbf16> to vector<256x128xbf16>
    %c3_143 = arith.constant 3 : index
    %c1_144 = arith.constant 1 : index
    %c0_145 = arith.constant 0 : index
    %c0_146 = arith.constant 0 : index
    %136 = vector.load %arg2[%c3_143, %c1_144, %c0_145, %c0_146] : memref<4x4x128x128xbf16, #tpu.memory_space<vmem>>, vector<1x1x128x128xbf16>
    %137 = vector.shape_cast %136 : vector<1x1x128x128xbf16> to vector<128x128xbf16>
    %cst_147 = arith.constant dense<0.000000e+00> : vector<256x128xf32>
    %138 = tpu.matmul %135, %137, %cst_147 {dimension_numbers = #tpu.dot_dimension_numbers<[1], [0], [0], [1], [0, 0, 1, 1], [], []>} : vector<256x128xbf16>, vector<128x128xbf16>, vector<256x128xf32> -> vector<256x128xf32>
    %139 = arith.addf %132, %138 : vector<256x128xf32>
    %c0_148 = arith.constant 0 : index
    %c1_149 = arith.constant 1 : index
    %c2_150 = arith.constant 2 : index
    %c0_151 = arith.constant 0 : index
    %140 = vector.load %arg1[%c0_148, %c1_149, %c2_150, %c0_151] : memref<1x18x18x128xbf16, #tpu.memory_space<vmem>>, vector<1x16x16x128xbf16>
    %141 = vector.shape_cast %140 : vector<1x16x16x128xbf16> to vector<16x16x128xbf16>
    %142 = vector.shape_cast %141 : vector<16x16x128xbf16> to vector<256x128xbf16>
    %c3_152 = arith.constant 3 : index
    %c2_153 = arith.constant 2 : index
    %c0_154 = arith.constant 0 : index
    %c0_155 = arith.constant 0 : index
    %143 = vector.load %arg2[%c3_152, %c2_153, %c0_154, %c0_155] : memref<4x4x128x128xbf16, #tpu.memory_space<vmem>>, vector<1x1x128x128xbf16>
    %144 = vector.shape_cast %143 : vector<1x1x128x128xbf16> to vector<128x128xbf16>
    %cst_156 = arith.constant dense<0.000000e+00> : vector<256x128xf32>
    %145 = tpu.matmul %142, %144, %cst_156 {dimension_numbers = #tpu.dot_dimension_numbers<[1], [0], [0], [1], [0, 0, 1, 1], [], []>} : vector<256x128xbf16>, vector<128x128xbf16>, vector<256x128xf32> -> vector<256x128xf32>
    %146 = arith.addf %139, %145 : vector<256x128xf32>
    %c0_157 = arith.constant 0 : index
    %c1_158 = arith.constant 1 : index
    %c1_159 = arith.constant 1 : index
    %c0_160 = arith.constant 0 : index
    %147 = vector.load %arg1[%c0_157, %c1_158, %c1_159, %c0_160] : memref<1x18x18x128xbf16, #tpu.memory_space<vmem>>, vector<1x16x16x128xbf16>
    %148 = vector.shape_cast %147 : vector<1x16x16x128xbf16> to vector<16x16x128xbf16>
    %149 = vector.shape_cast %148 : vector<16x16x128xbf16> to vector<256x128xbf16>
    %c3_161 = arith.constant 3 : index
    %c3_162 = arith.constant 3 : index
    %c0_163 = arith.constant 0 : index
    %c0_164 = arith.constant 0 : index
    %150 = vector.load %arg2[%c3_161, %c3_162, %c0_163, %c0_164] : memref<4x4x128x128xbf16, #tpu.memory_space<vmem>>, vector<1x1x128x128xbf16>
    %151 = vector.shape_cast %150 : vector<1x1x128x128xbf16> to vector<128x128xbf16>
    %cst_165 = arith.constant dense<0.000000e+00> : vector<256x128xf32>
    %152 = tpu.matmul %149, %151, %cst_165 {dimension_numbers = #tpu.dot_dimension_numbers<[1], [0], [0], [1], [0, 0, 1, 1], [], []>} : vector<256x128xbf16>, vector<128x128xbf16>, vector<256x128xf32> -> vector<256x128xf32>
    %153 = arith.addf %146, %152 : vector<256x128xf32>
    %154 = vector.shape_cast %153 : vector<256x128xf32> to vector<16x16x128xf32>
    %155 = arith.truncf %154 : vector<16x16x128xf32> to vector<16x16x128xbf16>
    %c0_166 = arith.constant 0 : index
    %c3_167 = arith.constant 3 : index
    %c0_168 = arith.constant 0 : index
    %c0_169 = arith.constant 0 : index
    %c0_170 = arith.constant 0 : index
    %156 = vector.load %arg3[%c0_166, %c3_167, %c0_168, %c0_169, %c0_170] : memref<1x4x16x16x128xbf16, #tpu.memory_space<vmem>>, vector<1x1x16x16x128xbf16>
    %157 = vector.shape_cast %156 : vector<1x1x16x16x128xbf16> to vector<16x16x128xbf16>
    %158 = vector.shape_cast %155 : vector<16x16x128xbf16> to vector<1x1x16x16x128xbf16>
    tpu.vector_store %arg3[%c0_166, %c3_167, %c0_168, %c0_169, %c0_170], %158 {strides = array<i32>} : memref<1x4x16x16x128xbf16, #tpu.memory_space<vmem>>, vector<1x1x16x16x128xbf16>,
    %cst_171 = arith.constant dense<0.000000e+00> : vector<128xf32>
    %159 = vector.multi_reduction <add>, %153, %cst_171 [0] : vector<256x128xf32> to vector<128xf32>
    %160 = vector.shape_cast %159 : vector<128xf32> to vector<1x128xf32>
    %161 = arith.addf %120, %160 : vector<1x128xf32>
    %162 = arith.mulf %153, %153 : vector<256x128xf32>
    %cst_172 = arith.constant dense<0.000000e+00> : vector<128xf32>
    %163 = vector.multi_reduction <add>, %162, %cst_172 [0] : vector<256x128xf32> to vector<128xf32>
    %164 = vector.shape_cast %163 : vector<128xf32> to vector<1x128xf32>
    %165 = arith.addf %124, %164 : vector<1x128xf32>
    %c0_173 = arith.constant 0 : index
    %c0_174 = arith.constant 0 : index
    %c0_175 = arith.constant 0 : index
    %166 = vector.load %arg4[%c0_173, %c0_174, %c0_175] : memref<1x2x128xf32, #tpu.memory_space<vmem>>, vector<1x1x128xf32>
    %167 = vector.shape_cast %166 : vector<1x1x128xf32> to vector<1x128xf32>
    %168 = vector.shape_cast %161 : vector<1x128xf32> to vector<1x1x128xf32>
    tpu.vector_store %arg4[%c0_173, %c0_174, %c0_175], %168 {strides = array<i32>} : memref<1x2x128xf32, #tpu.memory_space<vmem>>, vector<1x1x128xf32>,
    %c0_176 = arith.constant 0 : index
    %c1_177 = arith.constant 1 : index
    %c0_178 = arith.constant 0 : index
    %169 = vector.load %arg4[%c0_176, %c1_177, %c0_178] : memref<1x2x128xf32, #tpu.memory_space<vmem>>, vector<1x1x128xf32>
    %170 = vector.shape_cast %169 : vector<1x1x128xf32> to vector<1x128xf32>
    %171 = vector.shape_cast %165 : vector<1x128xf32> to vector<1x1x128xf32>
    tpu.vector_store %arg4[%c0_176, %c1_177, %c0_178], %171 {strides = array<i32>} : memref<1x2x128xf32, #tpu.memory_space<vmem>>, vector<1x1x128xf32>,
    return
  }
  func.func @transform_0(%arg0: i32) -> (i32, i32, i32, i32) {
    %c0_i32 = arith.constant 0 : i32
    %c0_i32_0 = arith.constant 0 : i32
    %c0_i32_1 = arith.constant 0 : i32
    %c0_i32_2 = arith.constant 0 : i32
    return %arg0, %c0_i32, %c0_i32_0, %c0_i32_1 : i32, i32, i32, i32
  }
  func.func @transform_1(%arg0: i32) -> (i32, i32, i32, i32) {
    %c0_i32 = arith.constant 0 : i32
    %c0_i32_0 = arith.constant 0 : i32
    %c0_i32_1 = arith.constant 0 : i32
    %c0_i32_2 = arith.constant 0 : i32
    %c0_i32_3 = arith.constant 0 : i32
    return %c0_i32, %c0_i32_0, %c0_i32_1, %c0_i32_2 : i32, i32, i32, i32
  }
  func.func @transform_2(%arg0: i32) -> (i32, i32, i32, i32, i32) {
    %c0_i32 = arith.constant 0 : i32
    %c0_i32_0 = arith.constant 0 : i32
    %c0_i32_1 = arith.constant 0 : i32
    %c0_i32_2 = arith.constant 0 : i32
    %c0_i32_3 = arith.constant 0 : i32
    return %arg0, %c0_i32, %c0_i32_0, %c0_i32_1, %c0_i32_2 : i32, i32, i32, i32, i32
  }
  func.func @transform_3(%arg0: i32) -> (i32, i32, i32) {
    %c0_i32 = arith.constant 0 : i32
    %c0_i32_0 = arith.constant 0 : i32
    %c0_i32_1 = arith.constant 0 : i32
    return %arg0, %c0_i32, %c0_i32_0 : i32, i32, i32
  }
}

</mosaic_0001>

<bundles_post_ra>
// kernel: tpu_custom_call.1
= control target key start
LH: loop header
LB: loop body
LE: loop exit
PB: predicated region body
PF: predicated region fallthrough
CT: control target
= control target key end

     0   :  { %9 = vsyncpa [#allocation3], 0  ;;  %s17058_s0 = inlined_call_operand.vmem [shape: bf16[2,18,18,128], index: 0, kind: input, shape index: {}]   ;;  %s17059_s1 = inlined_call_operand.hbm [shape: bf16[4,4,128,128], index: 1, kind: input, shape index: {}]   ;;  %s17060_s2 = inlined_call_operand.hbm [shape: bf16[2,4,16,16,128], index: 2, kind: output, shape index: {0}]   ;;  %s17061_s3 = inlined_call_operand.hbm [shape: f32[2,2,128], index: 3, kind: output, shape index: {1}]  }
   0x1   :  { %10 = vsyncpa [#allocation4], 0 }
   0x2   :  { %12 = vsyncpa [#allocation4 + $0x1], 0 }
   0x3   :  { %13 = vsyncpa [#allocation7], 0 }
   0x4   :  { %15 = vsyncpa [#allocation7 + $0x1], 0  ;;  %s14253_s12 = smov 0   ;;  %s14255_s13 = smov 0  }
   0x5   :  { %s14257_s14 = smov 0   ;;  %s14259_s15 = smov 0  }
   0x6 LB: > { %s14274_s16 = sadd.s32 4294967295, %s14224_s15   ;;  %s10666_s17 = sadd.s32 4294967294, %s14224_s15   ;;  %s14224_s15 = sphi %s14259_s15, %s17387_s15   ;;  %s14220_s14 = sphi %s14257_s14, %s17386_s14   ;;  %s14216_s13 = sphi %s14255_s13, %s17385_s13   ;;  %s14212_s12 = sphi %s14253_s12, %s17384_s12  }
   0x7   : > { %s14278_s18 = sadd.s32 1, %s14224_s15   ;;  %s75_s19 = sadd.s32 1, %s14220_s14 }
   0x8   : > { %s72_s20 = ssub.s32 %s14224_s15, %s14278_s18  ;;  %p85_p0 = scmp.ne.s32.totalorder %s14220_s14, %s14216_s13 }
   0x9   : > { %p73_p1 = scmp.eq.s32.totalorder %s72_s20, 0  ;;  %p86_p2 = scmp.eq.s32.totalorder %s14274_s16, 1 }
   0xa   : > { %p91_p3 = scmp.ne.s32.totalorder %s14216_s13, %s14212_s12  ;;  %p92_p4 = scmp.eq.s32.totalorder %s10666_s17, 1 }
   0xb   : > { %s14289_s21 = scalar_select %p73_p1, %s14220_s14, %s75_s19  }
   0xc   : > { %p14291_p5 = por %p86_p2, %p85_p0  ;;  %p14295_p6 = por %p92_p4, %p91_p3 }
   0xd   : > { %p10667_p7 = scmp.ge.s32.totalorder %s14224_s15, 1  ;;  %p125_p8 = scmp.lt.s32.totalorder %s14224_s15, 3 }
   0xe   : > { %s17138_s22 = scalar_select %p14291_p5, 1, 0 }
   0xf   : > { %s17139_s23 = scalar_select %p14295_p6, 1, 0 }
  0x10   : > { %p17062_p9 = scmp.eq.s32.totalorder %s14274_s16, 0  ;;  %p14302_p10 = pnand %p10667_p7, %p125_p8 }
  0x11   : > { %s14226_s25 = smov [#allocation2]   ;;  %s14098_s30 = scalar_lea.hbm %s17059_s1, 16384 }
  0x12   : > { %s17140_s24 = scalar_select %p14302_p10, 1, 0 }
  0x13   : > { %s137_s26 = sshll.u32 %s14226_s25, 4  ;;  %p13779_p11 = pneg %p14302_p10  ;;  %s138_s26 = int_to_ptr.vmem [resolvable:$true] %s137_s26 }
  0x14   : > { %p14099_p13 = scmp.ne.s32.totalorder %s17059_s1, %s14098_s30  ;;  %p14105_p3 = scmp.lt.u32.totalorder %s14098_s30, %s17059_s1 }
  0x15   : > { %p14310_p12 = pnand %p17062_p9, %p13779_p11 }
  0x17   : > { %p14100_p0 = pneg %p14310_p12 }
  0x19   : > { %p14101_p1 = pnand %p14100_p0, %p14099_p13 }
  0x1b   : > { %p14102_p2 = pneg %p14101_p1 }
  0x1d   : > { %p14107_p4 = pnand %p14105_p3, %p14102_p2 }
  0x1f   : > { %14110 = shalt.err (!%p14107_p4)
}
  0x20   : > { %s14111_s8 = scalar_lea.vmem %s138_s26, 16384  ;;  %p14119_p9 = scmp.lt.s32.totalorder %s138_s26, %s138_s26 }
  0x21   : > { %p14112_p7 = scmp.ne.s32.totalorder %s138_s26, %s14111_s8  ;;  %p14120_p6 = scmp.lt.s32.totalorder %s14111_s8, %s14111_s8 }
  0x23   : > { %p14114_p8 = pnand %p14112_p7, %p14100_p0  ;;  %p14121_p5 = por %p14120_p6, %p14119_p9 }
  0x25   : > { %p14115_p11 = pneg %p14114_p8 }
  0x27   : > { %p14122_p10 = pnand %p14121_p5, %p14115_p11 }
  0x29   : > { %14125 = shalt.err (!%p14122_p10)
}
  0x2a   : > { %s14227_s9 = smov 64   ;;  %s14228_s10 = smov 4  }
  0x2b   : > { %13782 = dma.hbm_to_vmem [thread:$0]  (!%p14310_p12), %s17059_s1, 16384, %s138_s26, [#allocation3], %s14227_s9, %s14227_s9, %s14228_s10  }
  0x2c   : > { %p17142_p13 = scmp.ne.s32.totalorder %s17140_s24, 0 }
  0x2e   : > { %161 = sbr.rel (%p17142_p13) target bundleno = 1062 (0x426), region = 28 }
  0x35   : > { %p17143_p1 = scmp.eq.s32.totalorder %s14274_s16, 0 }
  0x37   : > { %14199 = dma.done.wait (%p17143_p1), [#allocation3], 16384   ;;  %p17144_p0 = pmov %p17143_p1 }
  0x38   : > { %v13830_v0 = vld [vmem:[#allocation2 + $0x40] sm:$0xff]   ;;  %p190_p5 = scmp.lt.s32.totalorder %s14274_s16, 1  ;;  %v13832_v2 = vld [vmem:[#allocation2 + $0x48] sm:$0xff]   ;;  %v13834_v4 = vld [vmem:[#allocation2 + $0x50] sm:$0xff]   ;;  %vm245_vm0 = vsmask.f32 3328 }
  0x39   : > { %14201 = vsyncadd (%p17144_p0), [#allocation3], 4294950912  ;;  %v13831_v1 = vld [vmem:[#allocation2 + $0x140] sm:$0xff]   ;;  %12618 = vmatprep.subr.bf16.mxu0 %v13830_v0  ;;  %v13833_v3 = vld [vmem:[#allocation2 + $0x148] sm:$0xff]   ;;  %vm246_vm1 = vsmask.f32 7440 }
  0x3a   : > { %12810 = vmatprep.subr.bf16.mxu1 %v13831_v1  ;;  %12619 = vmatpush3.bf16.msra.mxu0 %v13830_v0  ;;  %v13835_v5 = vld [vmem:[#allocation2 + $0x150] sm:$0xff]   ;;  %s191_s19 = scalar_select %p190_p5, %s14274_s16, 1  ;;  %v13836_v6 = vld [vmem:[#allocation2 + $0x58] sm:$0xff]   ;;  %v13838_v8 = vld [vmem:[#allocation2 + $0x60] sm:$0xff]   ;;  %vm2747_vm3 = vcmask 1042432   ;;  %vm2748_vm4 = vcmask 1046532  }
  0x3b   : > { %12811 = vmatpush3.bf16.msra.mxu1 %v13831_v1  ;;  %12620 = vmatprep.subr.bf16.mxu0 %v13832_v2  ;;  %v13837_v7 = vld [vmem:[#allocation2 + $0x158] sm:$0xff]   ;;  %v13839_v9 = vld [vmem:[#allocation2 + $0x160] sm:$0xff]   ;;  %v13840_v10 = vld [vmem:[#allocation2 + $0x68] sm:$0xff]   ;;  %s16200_s27 = sand.u32 1, %s14216_s13   ;;  %s11850_s30 = sshll.u32 %s14274_s16, 13 }
  0x3c   : > { %12812 = vmatprep.subr.bf16.mxu1 %v13833_v3  ;;  %s13770_s20 = smul.u32 216, %s191_s19  ;;  %v13841_v11 = vld [vmem:[#allocation2 + $0x168] sm:$0xff]   ;;  %v13842_v20 = vld [vmem:[#allocation2 + $0x70] sm:$0xff]   ;;  %vm14372_vm2 = vmor %vm245_vm0, %vm246_vm1  ;;  %s10672_s28 = sshll.u32 %s16200_s27, 9 }
  0x3d   : > { %v13843_v26 = vld [vmem:[#allocation2 + $0x170] sm:$0xff]   ;;  %v13844_v52 = vld [vmem:[#allocation2 + $0x78] sm:$0xff]   ;;  %vm14722_vm5 = vmor %vm2747_vm3, %vm2748_vm4  ;;  %s16296_s29 = scalar_lea.vmem [#allocation5], %s10672_s28  ;;  %s16978_s7 = scalar_lea.hbm %s17060_s2, %s11850_s30 }
  0x3e   : > { %12621 = vmatpush3.bf16.msra.mxu0 %v13832_v2  ;;  %s14341_s26 = scalar_lea.vmem %s17058_s0, %s13770_s20  ;;  %v13845_v58 = vld [vmem:[#allocation2 + $0x178] sm:$0xff]   ;;  %s10547_s4 = sshll.u32 %s16296_s29, 4  ;;  %s16980_s4 = int_to_ptr.vmem [resolvable:$true] %s10547_s4 }
  0x3f   : > { %12813 = vmatpush3.bf16.msra.mxu1 %v13833_v3  ;;  %12622 = vmatprep.subr.bf16.mxu0 %v13834_v4  ;;  %v10675_v12 = vld [vmem:[%s14341_s26 + $0xc] sm:$0xf]  ;;  %v10676_v13 = vld [vmem:[%s14341_s26 + $0x10] sm:$0xf]  ;;  %v14347_v19 = vld [vmem:[%s14341_s26 + $0x14] sm:$0x1] }
  0x40   : > { %12814 = vmatprep.subr.bf16.mxu1 %v13835_v5  ;;  %v10852_v14 = vld [vmem:[%s14341_s26 + $0x10] sm:$0xf]  ;;  %v249_v15 = vshrl.u32 %v10675_v12, 16  ;;  %v252_v16 = vshll.u32 %v10675_v12, 16  ;;  %v258_v17 = vshll.u32 %v10676_v13, 16  ;;  %v262_v18 = vshrl.u32 %v10676_v13, 16 }
  0x41   : > { %v10723_v21 = vcombine.low %v10675_v12, %v10676_v13  ;;  %v10915_v23 = vld [vmem:[%s14341_s26 + $0xc] sm:$0xf]  ;;  %v2905_v24 = vshll.u32 %v10852_v14, 16  ;;  %v2909_v25 = vshrl.u32 %v10852_v14, 16  ;;  %v14354_v31 = vld [vmem:[%s14341_s26 + $0x18] sm:$0xf] }
  0x42   : > { %12623 = vmatpush3.bf16.msra.mxu0 %v13834_v4  ;;  %v251_v27 = vrot.slane %v249_v15, 4  ;;  %v254_v28 = vrot.slane %v252_v16, 5  ;;  %v14351_v29 = vrot.slane %v258_v17, 5  ;;  %v264_v30 = vrot.slane %v262_v18, 4  ;;  %v14357_v36 = vld [vmem:[%s14341_s26 + $0x1c] sm:$0xf] }
  0x43   : > { %12815 = vmatpush3.bf16.msra.mxu1 %v13835_v5  ;;  %12624 = vmatprep.subr.bf16.mxu0 %v13836_v6  ;;  %v2896_v32 = vshrl.u32 %v10915_v23, 16  ;;  %v2899_v33 = vshll.u32 %v10915_v23, 16  ;;  %v2907_v34 = vrot.slane %v2905_v24, 5  ;;  %v2911_v35 = vrot.slane %v2909_v25, 4  ;;  %v14364_v45 = vld [vmem:[%s14341_s26 + $0x1c] sm:$0xf] }
  0x44   : > { %12816 = vmatprep.subr.bf16.mxu1 %v13837_v7  ;;  %v255_v37 = vor.u32 %v254_v28, %v251_v27  ;;  %v265_v38 = vor.u32 %v264_v30, %v14351_v29  ;;  %12634 = vmatprep.mubr.bf16.mxu0 %v10723_v21  ;;  %v2915_v39 = vshll.u32 %v14347_v19, 16  ;;  %v273_v40 = vshrl.u32 %v14354_v31, 16  ;;  %v14377_v51 = vld [vmem:[%s14341_s26 + $0x20] sm:$0x1]  ;;  %v10916_v57 = vld [vmem:[%s14341_s26 + $0x18] sm:$0xf] }
  0x45   : > { %v2898_v41 = vrot.slane %v2896_v32, 4  ;;  %v2901_v42 = vrot.slane %v2899_v33, 5  ;;  %v2912_v43 = vor.u32 %v2911_v35, %v2907_v34  ;;  %v276_v44 = vshll.u32 %v14354_v31, 16  ;;  %v14400_v12 = vld [vmem:[#allocation2 + $0x100] sm:$0xff]   ;;  %v10682_v18 = vld [vmem:[%s14341_s26 + $0x28] sm:$0xf] }
  0x46   : > { %12625 = vmatpush3.bf16.msra.mxu0 %v13836_v6  ;;  %v14366_v46 = vrot.slane %v255_v37, 4  ;;  %v14368_v47 = vrot.slane %v265_v38, 4  ;;  %v2917_v49 = vrot.slane %v2915_v39, 5  ;;  %v275_v50 = vrot.slane %v273_v40, 4  ;;  %v10681_v17 = vld [vmem:[%s14341_s26 + $0x24] sm:$0xf] }
  0x47   : > { %12817 = vmatpush3.bf16.msra.mxu1 %v13837_v7  ;;  %12626 = vmatprep.subr.bf16.mxu0 %v13838_v8  ;;  %v2902_v53 = vor.u32 %v2901_v42, %v2898_v41  ;;  %v2913_v54 = vrot.slane %v2912_v43, 4  ;;  %v278_v55 = vrot.slane %v276_v44, 5  ;;  %v282_v56 = vshll.u32 %v14357_v36, 16  ;;  %v10858_v25 = vld [vmem:[%s14341_s26 + $0x28] sm:$0xf]  ;;  %s10529_s8 = scalar_lea.sflag [#allocation4], %s16200_s27 }
  0x48   : > { %12818 = vmatprep.subr.bf16.mxu1 %v13839_v9  ;;  %v286_v59 = vshrl.u32 %v14357_v36, 16  ;;  %v10724_v60 = vcombine.low %v14354_v31, %v14357_v36  ;;  %v17065_v61 = vrot.slane %v14364_v45, 5  ;;  %v2920_v5 = vshrl.u32 %v10916_v57, 16  ;;  %v10917_v32 = vld [vmem:[%s14341_s26 + $0x24] sm:$0xf]  ;;  %v13852_v37 = vld [vmem:[#allocation2 + $0x8] sm:$0xff]  }
  0x49   : > { %v2903_v63 = vrot.slane %v2902_v53, 4  ;;  %v2918_v0 = vsel %vm14372_vm2, %v2913_v54, %v2917_v49  ;;  %v279_v1 = vor.u32 %v278_v55, %v275_v50  ;;  %v14388_v2 = vrot.slane %v282_v56, 5  ;;  %v10684_v50 = vld [vmem:[%s14341_s26 + $0x30] sm:$0xf]  ;;  %v10685_v56 = vld [vmem:[%s14341_s26 + $0x34] sm:$0xf] }
  0x4a   : > { %12627 = vmatpush3.bf16.msra.mxu0 %v13838_v8  ;;  %v288_v3 = vrot.slane %v286_v59, 4  ;;  %v14392_v4 = vrot.slane %v17065_v61, 4  ;;  %v2923_v6 = vshll.u32 %v10916_v57, 16  ;;  %v2922_v15 = vrot.slane %v2920_v5, 4  ;;  %v14524_v62 = vld [vmem:[%s14341_s26 + $0x70] sm:$0xf] }
  0x4b   : > { %12819 = vmatpush3.bf16.msra.mxu1 %v13839_v9  ;;  %12628 = vmatprep.subr.bf16.mxu0 %v13840_v10  ;;  %v2908_v7 = vsel %vm14372_vm2, %v2903_v63, %v2907_v34  ;;  %v14396_v8 = vrot.slane %v279_v1, 4  ;;  %v13848_v9 = vld [vmem:[#allocation2] sm:$0xff]   ;;  %v2939_v23 = vshll.u32 %v14377_v51, 16  ;;  %v297_v24 = vshrl.u32 %v10681_v17, 16  ;;  %v10861_v63 = vld [vmem:[%s14341_s26 + $0x34] sm:$0xf] }
  0x4c   : > { %12820 = vmatprep.subr.bf16.mxu1 %v13841_v11  ;;  %v10931_v13 = vcombine.low %v2908_v7, %v2918_v0  ;;  %v289_v14 = vor.u32 %v288_v3, %v14388_v2  ;;  %v2925_v16 = vrot.slane %v2923_v6, 5  ;;  %v300_v30 = vshll.u32 %v10681_v17, 16  ;;  %v10918_v0 = vld [vmem:[%s14341_s26 + $0x30] sm:$0xf]  ;;  %17148 = vst [vmem:[#allocation12_spill] sm:$0xff] %v14524_v62  ;;  %s14126_s9 = scalar_lea.vmem %s16980_s4, 8192 }
  0x4d   : > { %v306_v31 = vshll.u32 %v10682_v18, 16  ;;  %v2941_v34 = vrot.slane %v2939_v23, 5  ;;  %v14411_v35 = vrot.slane %v297_v24, 4  ;;  %v310_v36 = vshrl.u32 %v10682_v18, 16  ;;  %v13856_v1 = vld [vmem:[#allocation2 + $0x10] sm:$0xff]   ;;  %p14127_p6 = scmp.ne.s32.totalorder %s16980_s4, %s14126_s9  ;;  %p17382_p9 = scmp.ne.s32.totalorder %s17138_s22, 0 }
  0x4e   : > { %12629 = vmatpush3.bf16.msra.mxu0 %v13840_v10  ;;  %v2929_v10 = vshll.u32 %v14364_v45, 16  ;;  %12826 = vmatprep.mubr.bf16.mxu1 %v10931_v13  ;;  %v14408_v27 = vrot.slane %v289_v14, 4  ;;  %v2926_v28 = vor.u32 %v2925_v16, %v2922_v15  ;;  %v14414_v39 = vrot.slane %v300_v30, 5  ;;  %s14229_s10 = smov [#allocation5]  }
  0x4f   : > { %12821 = vmatpush3.bf16.msra.mxu1 %v13841_v11  ;;  %12630 = vmatprep.subr.bf16.mxu0 %v13842_v20  ;;  %v2933_v11 = vshrl.u32 %v14364_v45, 16  ;;  %v14416_v40 = vrot.slane %v306_v31, 5  ;;  %v10725_v41 = vcombine.low %v10681_v17, %v10682_v18  ;;  %v14418_v43 = vrot.slane %v310_v36, 4  ;;  %v10862_v18 = vld [vmem:[%s14341_s26 + $0x38] sm:$0x1]  ;;  %p14128_p10 = pnand %p14127_p6, %p17382_p9  ;;  %s14130_s11 = sshll.u32 %s14229_s10, 4  ;;  %s14131_s11 = int_to_ptr.vmem [resolvable:$false] %s14130_s11 }
  0x50   : > { %12822 = vmatprep.subr.bf16.mxu1 %v13843_v26  ;;  %v2927_v38 = vrot.slane %v2926_v28, 4  ;;  %v2944_v44 = vshrl.u32 %v10917_v32, 16  ;;  %v2947_v49 = vshll.u32 %v10917_v32, 16  ;;  %v2953_v53 = vshll.u32 %v10858_v25, 16  ;;  %v13860_v28 = vld [vmem:[#allocation2 + $0x18] sm:$0xff]   ;;  %s14132_s17 = scalar_lea.vmem %s14131_s11, 16384  ;;  %p14133_p2 = scmp.lt.s32.totalorder %s16980_s4, %s14131_s11 }
  0x51   : > { %v2935_v21 = vrot.slane %v2933_v11, 4  ;;  %v2957_v54 = vshrl.u32 %v10858_v25, 16  ;;  %v324_v13 = vshll.u32 %v10684_v50, 16  ;;  %v330_v14 = vshll.u32 %v10685_v56, 16  ;;  %p14129_p12 = pneg %p14128_p10  ;;  %p14134_p3 = scmp.lt.s32.totalorder %s14132_s17, %s14126_s9 }
  0x52   : > { %12631 = vmatpush3.bf16.msra.mxu0 %v13842_v20  ;;  %v2931_v20 = vrot.slane %v2929_v10, 5  ;;  %v2949_v59 = vrot.slane %v2947_v49, 5  ;;  %v2955_v5 = vrot.slane %v2953_v53, 5  ;;  %v334_v16 = vshrl.u32 %v10685_v56, 16  ;;  %v13861_v53 = vld [vmem:[#allocation2 + $0x118] sm:$0xff]  }
  0x53   : > { %12823 = vmatpush3.bf16.msra.mxu1 %v13843_v26  ;;  %12632 = vmatprep.subr.bf16.mxu0 %v13844_v52  ;;  %v10859_v26 = vld [vmem:[%s14341_s26 + $0x2c] sm:$0x1]  ;;  %v2959_v6 = vrot.slane %v2957_v54, 4  ;;  %v10726_v17 = vcombine.low %v10684_v50, %v10685_v56  ;;  %v14432_v23 = vrot.slane %v324_v13, 5  ;;  %v14434_v24 = vrot.slane %v330_v14, 5  ;;  %v13864_v54 = vld [vmem:[#allocation2 + $0x20] sm:$0xff]   ;;  %p14135_p4 = por %p14134_p3, %p14133_p2 }
  0x54   : > { %12824 = vmatprep.subr.bf16.mxu1 %v13845_v58  ;;  %v2936_v33 = vor.u32 %v2935_v21, %v2931_v20  ;;  %v2963_v55 = vshll.u32 %v10859_v26, 16  ;;  %v2971_v25 = vshll.u32 %v10918_v0, 16  ;;  %v13857_v26 = vld [vmem:[#allocation2 + $0x110] sm:$0xff]   ;;  %v14436_v31 = vrot.slane %v334_v16, 4  ;;  %v10690_v13 = vld [vmem:[%s14341_s26 + $0x48] sm:$0xf] }
  0x55   : > { %v2960_v15 = vor.u32 %v2959_v6, %v2955_v5  ;;  %p14136_p7 = pnand %p14135_p4, %p14129_p12 }
  0x56   : > { %12633 = vmatpush3.bf16.msra.mxu0 %v13844_v52  ;;  %v2937_v42 = vrot.slane %v2936_v33, 4  ;;  %v2932_v52 = vsel %vm14372_vm2, %v2927_v38, %v2931_v20  ;;  %v2965_v7 = vrot.slane %v2963_v55, 5  ;;  %v2968_v20 = vshrl.u32 %v10918_v0, 16 }
  0x57   : > { %12825 = vmatpush3.bf16.msra.mxu1 %v13845_v58  ;;  %12666 = vmatprep.subr.bf16.mxu0 %v13848_v9  ;;  %v2946_v58 = vrot.slane %v2944_v44, 4  ;;  %v2961_v30 = vrot.slane %v2960_v15, 4  ;;  %v2977_v33 = vshll.u32 %v10861_v63, 16  ;;  %v2973_v36 = vrot.slane %v2971_v25, 5 }
  0x58   : > { %12858 = vmatprep.subr.bf16.mxu1 %v14400_v12  ;;  %v2942_v57 = vsel %vm14372_vm2, %v2937_v42, %v2941_v34  ;;  %v2970_v32 = vrot.slane %v2968_v20, 4  ;;  %v10687_v34 = vld [vmem:[%s14341_s26 + $0x3c] sm:$0xf]  ;;  %v2987_v38 = vshll.u32 %v10862_v18, 16  ;;  %v13865_v18 = vld [vmem:[#allocation2 + $0x120] sm:$0xff]  }
  0x59   : > { %12635 = vmatmul.mubr.bf16.vlgmr.msra.gmra.mrb[0].mxu0 %v10724_v60  ;;  %v321_v60 = vshrl.u32 %v10684_v50, 16  ;;  %v10932_v3 = vcombine.low %v2932_v52, %v2942_v57  ;;  %v2950_v10 = vor.u32 %v2949_v59, %v2946_v58  ;;  %v2966_v42 = vsel %vm14372_vm2, %v2961_v30, %v2965_v7  ;;  %v10919_v52 = vld [vmem:[%s14341_s26 + $0x3c] sm:$0xf]  ;;  %v10864_v59 = vld [vmem:[%s14341_s26 + $0x40] sm:$0xf] }
  0x5a   : > { %12667 = vmatpush3.bf16.msra.mxu0 %v13848_v9  ;;  %12638 = vmatprep.mubr.bf16.mxu0 %v10725_v41  ;;  %v13853_v9 = vld [vmem:[#allocation2 + $0x108] sm:$0xff]   ;;  %v10688_v41 = vld [vmem:[%s14341_s26 + $0x40] sm:$0xf]  ;;  %v2979_v44 = vrot.slane %v2977_v33, 5  ;;  %v345_v49 = vshrl.u32 %v10687_v34, 16  ;;  %v348_v50 = vshll.u32 %v10687_v34, 16  ;;  %v2974_v56 = vor.u32 %v2973_v36, %v2970_v32 }
  0x5b   : > { %12668 = vmatprep.subr.bf16.mxu0 %v13852_v37  ;;  %v14428_v11 = vrot.slane %v321_v60, 4  ;;  %12827 = vmatmul.mubr.bf16.vlgmr.msra.gmra.mrb[0].mxu1 %v10932_v3  ;;  %v2951_v21 = vrot.slane %v2950_v10, 4  ;;  %v2989_v58 = vrot.slane %v2987_v38, 5  ;;  %v354_v0 = vshll.u32 %v10688_v41, 16  ;;  %v10865_v7 = vld [vmem:[%s14341_s26 + $0x44] sm:$0x1] }
  0x5c   : > { %12859 = vmatpush3.bf16.msra.mxu1 %v14400_v12  ;;  %v14446_v60 = vrot.slane %v345_v49, 4  ;;  %v358_v3 = vshrl.u32 %v10688_v41, 16  ;;  %v10727_v6 = vcombine.low %v10687_v34, %v10688_v41  ;;  %v2992_v10 = vshrl.u32 %v10919_v52, 16  ;;  %v13868_v32 = vld [vmem:[#allocation2 + $0x28] sm:$0xff]  }
  0x5d   : > { %12860 = vmatprep.subr.bf16.mxu1 %v13853_v9  ;;  %v2956_v12 = vsel %vm14372_vm2, %v2951_v21, %v2955_v5  ;;  %v14452_v14 = vrot.slane %v354_v0, 5  ;;  %v2995_v15 = vshll.u32 %v10919_v52, 16  ;;  %v3001_v16 = vshll.u32 %v10864_v59, 16  ;;  %v10867_v52 = vld [vmem:[%s14341_s26 + $0x4c] sm:$0xf] }
  0x5e   : > { %12669 = vmatpush3.bf16.msra.mxu0 %v13852_v37  ;;  %v2981_v37 = vshrl.u32 %v10861_v63, 16  ;;  %v10933_v55 = vcombine.low %v2956_v12, %v2966_v42  ;;  %v14448_v63 = vrot.slane %v348_v50, 5  ;;  %v2994_v25 = vrot.slane %v2992_v10, 4  ;;  %v10920_v42 = vld [vmem:[%s14341_s26 + $0x48] sm:$0xf] }
  0x5f   : > { %12670 = vmatprep.subr.bf16.mxu0 %v13856_v1  ;;  %v3005_v30 = vshrl.u32 %v10864_v59, 16  ;;  %v2997_v33 = vrot.slane %v2995_v15, 5  ;;  %v3003_v34 = vrot.slane %v3001_v16, 5  ;;  %v3011_v12 = vshll.u32 %v10865_v7, 16  ;;  %v10868_v0 = vld [vmem:[%s14341_s26 + $0x50] sm:$0x1] }
  0x60   : > { %v2983_v57 = vrot.slane %v2981_v37, 4  ;;  %12861 = vmatpush3.bf16.msra.mxu1 %v13853_v9  ;;  %12830 = vmatprep.mubr.bf16.mxu1 %v10933_v55  ;;  %v14454_v9 = vrot.slane %v358_v3, 4  ;;  %v369_v36 = vshrl.u32 %v10690_v13, 16  ;;  %v372_v38 = vshll.u32 %v10690_v13, 16  ;;  %v10693_v7 = vld [vmem:[%s14341_s26 + $0x54] sm:$0xf] }
  0x61   : > { %12639 = vmatmul.mubr.bf16.gmra.mrb[4].mxu0 %v10726_v17  ;;  %12862 = vmatprep.subr.bf16.mxu1 %v13857_v26  ;;  %v10691_v17 = vld [vmem:[%s14341_s26 + $0x4c] sm:$0xf]  ;;  %v3007_v37 = vrot.slane %v3005_v30, 4  ;;  %v2998_v49 = vor.u32 %v2997_v33, %v2994_v25  ;;  %v3013_v50 = vrot.slane %v3011_v12, 5  ;;  %v3025_v16 = vshll.u32 %v10867_v52, 16 }
  0x62   : > { %12671 = vmatpush3.bf16.msra.mxu0 %v13856_v1  ;;  %v2975_v1 = vrot.slane %v2974_v56, 4  ;;  %v2984_v5 = vor.u32 %v2983_v57, %v2979_v44  ;;  %12642 = vmatprep.mubr.bf16.mxu0 %v10727_v6  ;;  %v378_v41 = vshll.u32 %v10691_v17, 16  ;;  %v14465_v56 = vrot.slane %v372_v38, 5 }
  0x63   : > { %12672 = vmatprep.subr.bf16.mxu0 %v13860_v28  ;;  %v3008_v55 = vor.u32 %v3007_v37, %v3003_v34  ;;  %v382_v59 = vshrl.u32 %v10691_v17, 16  ;;  %v2999_v3 = vrot.slane %v2998_v49, 4  ;;  %v3019_v6 = vshll.u32 %v10920_v42, 16  ;;  %v13873_v37 = vld [vmem:[#allocation2 + $0x130] sm:$0xff]  }
  0x64   : > { %v2980_v20 = vsel %vm14372_vm2, %v2975_v1, %v2979_v44  ;;  %v2985_v21 = vrot.slane %v2984_v5, 4  ;;  %12863 = vmatpush3.bf16.msra.mxu1 %v13857_v26  ;;  %v14462_v26 = vrot.slane %v369_v36, 4  ;;  %v14467_v57 = vrot.slane %v378_v41, 5 }
  0x65   : > { %12864 = vmatprep.subr.bf16.mxu1 %v13861_v53  ;;  %v10728_v1 = vcombine.low %v10690_v13, %v10691_v17  ;;  %v3016_v5 = vshrl.u32 %v10920_v42, 16  ;;  %v3009_v10 = vrot.slane %v3008_v55, 4  ;;  %v14471_v15 = vrot.slane %v382_v59, 4  ;;  %v10921_v17 = vld [vmem:[%s14341_s26 + $0x54] sm:$0xf] }
  0x66   : > { %12673 = vmatpush3.bf16.msra.mxu0 %v13860_v28  ;;  %v2990_v28 = vsel %vm14372_vm2, %v2985_v21, %v2989_v58  ;;  %v13869_v58 = vld [vmem:[#allocation2 + $0x128] sm:$0xff]   ;;  %v10694_v21 = vld [vmem:[%s14341_s26 + $0x58] sm:$0xf]  ;;  %v3021_v30 = vrot.slane %v3019_v6, 5  ;;  %v3035_v13 = vshll.u32 %v10868_v0, 16  ;;  %v3027_v12 = vrot.slane %v3025_v16, 5 }
  0x67   : > { %12674 = vmatprep.subr.bf16.mxu0 %v13864_v54  ;;  %v10934_v44 = vcombine.low %v2980_v20, %v2990_v28  ;;  %v3029_v20 = vshrl.u32 %v10867_v52, 16  ;;  %v3018_v25 = vrot.slane %v3016_v5, 4  ;;  %v3014_v33 = vsel %vm14372_vm2, %v3009_v10, %v3013_v50  ;;  %v10871_v59 = vld [vmem:[%s14341_s26 + $0x5c] sm:$0x1]  ;;  %v10696_v5 = vld [vmem:[%s14341_s26 + $0x60] sm:$0xf] }
  0x68   : > { %12865 = vmatpush3.bf16.msra.mxu1 %v13861_v53  ;;  %v3004_v53 = vsel %vm14372_vm2, %v2999_v3, %v3003_v34  ;;  %v393_v28 = vshrl.u32 %v10693_v7, 16  ;;  %v3037_v42 = vrot.slane %v3035_v13, 5  ;;  %v396_v34 = vshll.u32 %v10693_v7, 16  ;;  %v13876_v0 = vld [vmem:[#allocation2 + $0x38] sm:$0xff]  }
  0x69   : > { %12831 = vmatmul.mubr.bf16.gmra.mrb[4].mxu1 %v10934_v44  ;;  %12866 = vmatprep.subr.bf16.mxu1 %v13865_v18  ;;  %v3031_v36 = vrot.slane %v3029_v20, 4  ;;  %v10935_v38 = vcombine.low %v3004_v53, %v3014_v33  ;;  %v3022_v41 = vor.u32 %v3021_v30, %v3018_v25  ;;  %v10870_v44 = vld [vmem:[%s14341_s26 + $0x58] sm:$0xf]  ;;  %v402_v55 = vshll.u32 %v10694_v21, 16 }
  0x6a   : > { %12675 = vmatpush3.bf16.msra.mxu0 %v13864_v54  ;;  %v13872_v54 = vld [vmem:[#allocation2 + $0x30] sm:$0xff]   ;;  %v14480_v52 = vrot.slane %v393_v28, 4  ;;  %v406_v50 = vshrl.u32 %v10694_v21, 16  ;;  %v3043_v20 = vshll.u32 %v10921_v17, 16  ;;  %v3049_v30 = vshll.u32 %v10870_v44, 16 }
  0x6b   : > { %12676 = vmatprep.subr.bf16.mxu0 %v13868_v32  ;;  %12643 = vmatmul.mubr.bf16.gmra.mrb[8].mxu0 %v10728_v1  ;;  %v3032_v49 = vor.u32 %v3031_v36, %v3027_v12  ;;  %v3023_v3 = vrot.slane %v3022_v41, 4  ;;  %v3040_v1 = vshrl.u32 %v10921_v17, 16  ;;  %v14486_v10 = vrot.slane %v402_v55, 5  ;;  %v10697_v28 = vld [vmem:[%s14341_s26 + $0x64] sm:$0xf] }
  0x6c   : > { %12867 = vmatpush3.bf16.msra.mxu1 %v13865_v18  ;;  %12834 = vmatprep.mubr.bf16.mxu1 %v10935_v38  ;;  %v14483_v18 = vrot.slane %v396_v34, 5  ;;  %v14488_v16 = vrot.slane %v406_v50, 4  ;;  %v3053_v13 = vshrl.u32 %v10870_v44, 16  ;;  %v3045_v33 = vrot.slane %v3043_v20, 5  ;;  %v10922_v34 = vld [vmem:[%s14341_s26 + $0x60] sm:$0xf] }
  0x6d   : > { %12868 = vmatprep.subr.bf16.mxu1 %v13869_v58  ;;  %v3033_v6 = vrot.slane %v3032_v49, 4  ;;  %v3028_v53 = vsel %vm14372_vm2, %v3023_v3, %v3027_v12  ;;  %v3042_v25 = vrot.slane %v3040_v1, 4  ;;  %v3059_v36 = vshll.u32 %v10871_v59, 16  ;;  %v14506_v20 = vld [vmem:[#allocation2 + $0x180] sm:$0xff]  }
  0x6e   : > { %12677 = vmatpush3.bf16.msra.mxu0 %v13868_v32  ;;  %v10729_v32 = vcombine.low %v10693_v7, %v10694_v21  ;;  %v13877_v7 = vld [vmem:[#allocation2 + $0x138] sm:$0xff]   ;;  %v417_v17 = vshrl.u32 %v10696_v5, 16  ;;  %v3051_v12 = vrot.slane %v3049_v30, 5  ;;  %v3055_v38 = vrot.slane %v3053_v13, 4 }
  0x6f   : > { %12678 = vmatprep.subr.bf16.mxu0 %v13872_v54  ;;  %v3038_v21 = vsel %vm14372_vm2, %v3033_v6, %v3037_v42  ;;  %v420_v41 = vshll.u32 %v10696_v5, 16  ;;  %v3046_v44 = vor.u32 %v3045_v33, %v3042_v25  ;;  %v3061_v49 = vrot.slane %v3059_v36, 5  ;;  %v14501_v42 = vld [vmem:[%s14341_s26 + $0x64] sm:$0xf]  ;;  %v10874_v6 = vld [vmem:[%s14341_s26 + $0x68] sm:$0x1] }
  0x70   : > { %12869 = vmatpush3.bf16.msra.mxu1 %v13869_v58  ;;  %12646 = vmatprep.mubr.bf16.mxu0 %v10729_v32  ;;  %v14495_v58 = vld [vmem:[#allocation2 + $0x80] sm:$0xff]   ;;  %v14498_v55 = vrot.slane %v417_v17, 4  ;;  %v426_v50 = vshll.u32 %v10697_v28, 16  ;;  %17147 = vst [vmem:[#allocation11_spill] sm:$0xff] %v14501_v42  ;;  %v3056_v59 = vor.u32 %v3055_v38, %v3051_v12  ;;  %v430_v32 = vshrl.u32 %v10697_v28, 16 }
  0x71   : > { %12870 = vmatprep.subr.bf16.mxu1 %v13873_v37  ;;  %v14503_v3 = vrot.slane %v420_v41, 5  ;;  %v10730_v1 = vcombine.low %v10696_v5, %v10697_v28  ;;  %v3064_v30 = vshrl.u32 %v10922_v34, 16  ;;  %v3067_v13 = vshll.u32 %v10922_v34, 16  ;;  %v10700_v36 = vld [vmem:[%s14341_s26 + $0x70] sm:$0xf] }
  0x72   : > { %12679 = vmatpush3.bf16.msra.mxu0 %v13872_v54  ;;  %v10936_v54 = vcombine.low %v3028_v53, %v3038_v21  ;;  %v3047_v53 = vrot.slane %v3046_v44, 4  ;;  %v14508_v25 = vrot.slane %v426_v50, 5  ;;  %v10699_v21 = vld [vmem:[%s14341_s26 + $0x6c] sm:$0xf]  ;;  %v3073_v33 = vshll.u32 %v14501_v42, 16 }
  0x73   : > { %12680 = vmatprep.subr.bf16.mxu0 %v13876_v0  ;;  %12647 = vmatmul.mubr.bf16.gmra.mrb[12].mxu0 %v10730_v1  ;;  %v3077_v5 = vshrl.u32 %v14501_v42, 16  ;;  %v10923_v28 = vld [vmem:[%s14341_s26 + $0x6c] sm:$0xf]  ;;  %v3069_v38 = vrot.slane %v3067_v13, 5  ;;  %v3083_v41 = vshll.u32 %v10874_v6, 16  ;;  %v444_v61 = vshll.u32 %v10699_v21, 16 }
  0x74   : > { %12871 = vmatpush3.bf16.msra.mxu1 %v13873_v37  ;;  %v3057_v37 = vrot.slane %v3056_v59, 4  ;;  %v3052_v17 = vsel %vm14372_vm2, %v3047_v53, %v3051_v12  ;;  %v3075_v44 = vrot.slane %v3073_v33, 5  ;;  %v441_v59 = vshrl.u32 %v10699_v21, 16  ;;  %v10851_v42 = vld [vmem:[%s14341_s26 + $0xc] sm:$0xe] }
  0x75   : > { %12835 = vmatmul.mubr.bf16.gmra.mrb[8].mxu1 %v10936_v54  ;;  %12872 = vmatprep.subr.bf16.mxu1 %v13877_v7  ;;  %v3066_v54 = vrot.slane %v3064_v30, 4  ;;  %v3079_v50 = vrot.slane %v3077_v5, 4  ;;  %v3085_v22 = vrot.slane %v3083_v41, 5  ;;  %v450_v6 = vshll.u32 %v10700_v36, 16 }
  0x76   : > { %12681 = vmatpush3.bf16.msra.mxu0 %v13876_v0  ;;  %v14512_v0 = vrot.slane %v430_v32, 4  ;;  %v3062_v34 = vsel %vm14372_vm2, %v3057_v37, %v3061_v49  ;;  %v14526_v53 = vrot.slane %v441_v59, 4  ;;  %v454_v30 = vshrl.u32 %v10700_v36, 16  ;;  %v10702_v59 = vld [vmem:[%s14341_s26 + $0x78] sm:$0xf] }
  0x77   : > { %12714 = vmatprep.subr.bf16.mxu0 %v14495_v58  ;;  %v10937_v32 = vcombine.low %v3052_v17, %v3062_v34  ;;  %v3070_v1 = vor.u32 %v3069_v38, %v3066_v54  ;;  %v3080_v12 = vor.u32 %v3079_v50, %v3075_v44  ;;  %v14531_v13 = vrot.slane %v444_v61, 5 }
  0x78   : > { %12873 = vmatpush3.bf16.msra.mxu1 %v13877_v7  ;;  %17149 = vst [vmem:[#allocation13_spill] sm:$0xff] %v14526_v53  ;;  %v14529_v7 = vld [vmem:[%s14341_s26 + $0x74] sm:$0x1]  ;;  %v10731_v37 = vcombine.low %v10699_v21, %v10700_v36  ;;  %v3088_v33 = vshrl.u32 %v10923_v28, 16  ;;  %v14533_v17 = vrot.slane %v450_v6, 5  ;;  %v14535_v54 = vrot.slane %v454_v30, 4 }
  0x79   : > { %12906 = vmatprep.subr.bf16.mxu1 %v14506_v20  ;;  %17150 = vst [vmem:[#allocation14_spill] sm:$0xff] %v14529_v7  ;;  %12838 = vmatprep.mubr.bf16.mxu1 %v10937_v32  ;;  %v3071_v49 = vrot.slane %v3070_v1, 4  ;;  %17151 = vst [vmem:[#allocation15_spill] sm:$0xff] %v14531_v13  ;;  %v3081_v5 = vrot.slane %v3080_v12, 4  ;;  %v3091_v38 = vshll.u32 %v10923_v28, 16  ;;  %v3097_v50 = vshll.u32 %v14524_v62, 16 }
  0x7a   : > { %17152 = vst [vmem:[#allocation16_spill] sm:$0xff] %v14533_v17  ;;  %17153 = vst [vmem:[#allocation17_spill] sm:$0xff] %v14535_v54  ;;  %12650 = vmatprep.mubr.bf16.mxu0 %v10731_v37  ;;  %v3090_v34 = vrot.slane %v3088_v33, 4  ;;  %v3101_v61 = vshrl.u32 %v14524_v62, 16  ;;  %v3107_v32 = vshll.u32 %v14529_v7, 16  ;;  %v465_v28 = vshrl.u32 %v10702_v59, 16 }
  0x7b   : > { %v3076_v41 = vsel %vm14372_vm2, %v3071_v49, %v3075_v44  ;;  %v3086_v21 = vsel %vm14372_vm2, %v3081_v5, %v3085_v22  ;;  %v3093_v36 = vrot.slane %v3091_v38, 5  ;;  %v10703_v1 = vld [vmem:[%s14341_s26 + $0x7c] sm:$0xf]  ;;  %v3099_v6 = vrot.slane %v3097_v50, 5  ;;  %v10924_v49 = vld [vmem:[%s14341_s26 + $0x78] sm:$0xf] }
  0x7c   : > { %v10938_v12 = vcombine.low %v3076_v41, %v3086_v21  ;;  %v3103_v44 = vrot.slane %v3101_v61, 4  ;;  %v468_v30 = vshll.u32 %v10702_v59, 16  ;;  %v3109_v33 = vrot.slane %v3107_v32, 5  ;;  %v14550_v17 = vld [vmem:[%s14341_s26 + $0x7c] sm:$0xf] }
  0x7d   : > { %v3094_v37 = vor.u32 %v3093_v36, %v3090_v34  ;;  %v14547_v62 = vrot.slane %v465_v28, 4  ;;  %v474_v54 = vshll.u32 %v10703_v1, 16  ;;  %17155 = vst [vmem:[#allocation19_spill] sm:$0xff] %v14550_v17  ;;  %v478_v38 = vshrl.u32 %v10703_v1, 16  ;;  %v14555_v41 = vld [vmem:[%s14341_s26 + $0x80] sm:$0x1] }
  0x7e   : > { %12839 = vmatmul.mubr.bf16.gmra.mrb[12].mxu1 %v10938_v12  ;;  %v3104_v22 = vor.u32 %v3103_v44, %v3099_v6  ;;  %v14552_v5 = vrot.slane %v468_v30, 5  ;;  %v10732_v7 = vcombine.low %v10702_v59, %v10703_v1  ;;  %17157 = vst [vmem:[#allocation21_spill] sm:$0xff] %v14555_v41  ;;  %v3112_v21 = vshrl.u32 %v10924_v49, 16  ;;  %v10705_v36 = vld [vmem:[%s14341_s26 + $0x84] sm:$0xf] }
  0x7f   : > { %17154 = vst [vmem:[#allocation18_spill] sm:$0xff] %v14547_v62  ;;  %v3095_v50 = vrot.slane %v3094_v37, 4  ;;  %v14557_v61 = vrot.slane %v474_v54, 5  ;;  %v3115_v34 = vshll.u32 %v10924_v49, 16  ;;  %v14560_v28 = vrot.slane %v478_v38, 4 }
  0x80   : > { %17156 = vst [vmem:[#allocation20_spill] sm:$0xff] %v14552_v5  ;;  %v3105_v32 = vrot.slane %v3104_v22, 4  ;;  %12651 = vmatmul.mubr.bf16.gmra.mrb[16].mxu0 %v10732_v7  ;;  %v3121_v12 = vshll.u32 %v14550_v17, 16  ;;  %v3125_v44 = vshrl.u32 %v14550_v17, 16  ;;  %v10706_v59 = vld [vmem:[%s14341_s26 + $0x88] sm:$0xf] }
  0x81   : > { %17158 = vst [vmem:[#allocation22_spill] sm:$0xff] %v14557_v61  ;;  %17159 = vst [vmem:[#allocation23_spill] sm:$0xff] %v14560_v28  ;;  %v3100_v1 = vsel %vm14372_vm2, %v3095_v50, %v3099_v6  ;;  %v3114_v54 = vrot.slane %v3112_v21, 4  ;;  %v3117_v30 = vrot.slane %v3115_v34, 5  ;;  %v3131_v49 = vshll.u32 %v14555_v41, 16 }
  0x82   : > { %v3110_v37 = vsel %vm14372_vm2, %v3105_v32, %v3109_v33  ;;  %v3123_v22 = vrot.slane %v3121_v12, 5  ;;  %v3127_v38 = vrot.slane %v3125_v44, 4  ;;  %v489_v7 = vshrl.u32 %v10705_v36, 16  ;;  %v10925_v28 = vld [vmem:[%s14341_s26 + $0x84] sm:$0xf] }
  0x83   : > { %v10939_v61 = vcombine.low %v3100_v1, %v3110_v37  ;;  %v3118_v5 = vor.u32 %v3117_v30, %v3114_v54  ;;  %v3133_v62 = vrot.slane %v3131_v49, 5  ;;  %v492_v17 = vshll.u32 %v10705_v36, 16  ;;  %v14572_v13 = vld [vmem:[%s14341_s26 + $0x88] sm:$0xf]  ;;  %v14575_v53 = vld [vmem:[%s14341_s26 + $0x8c] sm:$0x1] }
  0x84   : > { %17160 = vst [vmem:[#allocation24_spill] sm:$0xff] %v14572_v13  ;;  %17161 = vst [vmem:[#allocation25_spill] sm:$0xff] %v14575_v53  ;;  %v3128_v6 = vor.u32 %v3127_v38, %v3123_v22  ;;  %v14577_v50 = vrot.slane %v489_v7, 4  ;;  %v498_v21 = vshll.u32 %v10706_v59, 16  ;;  %v502_v34 = vshrl.u32 %v10706_v59, 16 }
  0x85   : > { %12842 = vmatprep.mubr.bf16.mxu1 %v10939_v61  ;;  %v3119_v33 = vrot.slane %v3118_v5, 4  ;;  %v14579_v32 = vrot.slane %v492_v17, 5  ;;  %v10733_v12 = vcombine.low %v10705_v36, %v10706_v59  ;;  %v3136_v44 = vshrl.u32 %v10925_v28, 16  ;;  %v10708_v5 = vld [vmem:[%s14341_s26 + $0x90] sm:$0xf] }
  0x86   : > { %17162 = vst [vmem:[#allocation26_spill] sm:$0xff] %v14577_v50  ;;  %v3129_v1 = vrot.slane %v3128_v6, 4  ;;  %v14581_v54 = vrot.slane %v498_v21, 5  ;;  %v14583_v30 = vrot.slane %v502_v34, 4  ;;  %v3139_v49 = vshll.u32 %v10925_v28, 16 }
  0x87   : > { %17163 = vst [vmem:[#allocation27_spill] sm:$0xff] %v14579_v32  ;;  %v3124_v37 = vsel %vm14372_vm2, %v3119_v33, %v3123_v22  ;;  %12654 = vmatprep.mubr.bf16.mxu0 %v10733_v12  ;;  %v3138_v38 = vrot.slane %v3136_v44, 4  ;;  %v3145_v61 = vshll.u32 %v14572_v13, 16  ;;  %v3149_v17 = vshrl.u32 %v14572_v13, 16  ;;  %v10709_v6 = vld [vmem:[%s14341_s26 + $0x94] sm:$0xf] }
  0x88   : > { %17164 = vst [vmem:[#allocation28_spill] sm:$0xff] %v14581_v54  ;;  %17165 = vst [vmem:[#allocation29_spill] sm:$0xff] %v14583_v30  ;;  %v3134_v36 = vsel %vm14372_vm2, %v3129_v1, %v3133_v62  ;;  %v3141_v59 = vrot.slane %v3139_v49, 5  ;;  %v3155_v7 = vshll.u32 %v14575_v53, 16  ;;  %v513_v28 = vshrl.u32 %v10708_v5, 16 }
  0x89   : > { %v10940_v21 = vcombine.low %v3124_v37, %v3134_v36  ;;  %v3147_v34 = vrot.slane %v3145_v61, 5  ;;  %v3151_v22 = vrot.slane %v3149_v17, 4  ;;  %v516_v33 = vshll.u32 %v10708_v5, 16  ;;  %v10926_v12 = vld [vmem:[%s14341_s26 + $0x90] sm:$0xf] }
  0x8a   : > { %v3142_v44 = vor.u32 %v3141_v59, %v3138_v38  ;;  %v3157_v30 = vrot.slane %v3155_v7, 5  ;;  %v14595_v13 = vrot.slane %v513_v28, 4  ;;  %v522_v54 = vshll.u32 %v10709_v6, 16  ;;  %v14598_v32 = vld [vmem:[%s14341_s26 + $0x94] sm:$0xf] }
  0x8b   : > { %17167 = vst [vmem:[#allocation31_spill] sm:$0xff] %v14598_v32  ;;  %12843 = vmatmul.mubr.bf16.gmra.mrb[16].mxu1 %v10940_v21  ;;  %v3152_v62 = vor.u32 %v3151_v22, %v3147_v34  ;;  %v14600_v1 = vrot.slane %v516_v33, 5  ;;  %v526_v49 = vshrl.u32 %v10709_v6, 16  ;;  %v10734_v53 = vcombine.low %v10708_v5, %v10709_v6  ;;  %v14603_v37 = vld [vmem:[%s14341_s26 + $0x98] sm:$0x1] }
  0x8c   : > { %17166 = vst [vmem:[#allocation30_spill] sm:$0xff] %v14595_v13  ;;  %17169 = vst [vmem:[#allocation33_spill] sm:$0xff] %v14603_v37  ;;  %v3143_v61 = vrot.slane %v3142_v44, 4  ;;  %v14605_v17 = vrot.slane %v522_v54, 5  ;;  %v3160_v36 = vshrl.u32 %v10926_v12, 16  ;;  %v3163_v38 = vshll.u32 %v10926_v12, 16 }
  0x8d   : > { %17168 = vst [vmem:[#allocation32_spill] sm:$0xff] %v14600_v1  ;;  %v10711_v59 = vld [vmem:[%s14341_s26 + $0x9c] sm:$0xf]  ;;  %v3153_v7 = vrot.slane %v3152_v62, 4  ;;  %v14608_v28 = vrot.slane %v526_v49, 4  ;;  %12655 = vmatmul.mubr.bf16.gmra.mrb[20].mxu0 %v10734_v53  ;;  %v3169_v21 = vshll.u32 %v14598_v32, 16 }
  0x8e   : > { %17170 = vst [vmem:[#allocation34_spill] sm:$0xff] %v14605_v17  ;;  %v3173_v22 = vshrl.u32 %v14598_v32, 16  ;;  %v3148_v5 = vsel %vm14372_vm2, %v3143_v61, %v3147_v34  ;;  %v3162_v6 = vrot.slane %v3160_v36, 4  ;;  %v3165_v33 = vrot.slane %v3163_v38, 5  ;;  %v10712_v44 = vld [vmem:[%s14341_s26 + $0xa0] sm:$0xf] }
  0x8f   : > { %17171 = vst [vmem:[#allocation35_spill] sm:$0xff] %v14608_v28  ;;  %v3179_v54 = vshll.u32 %v14603_v37, 16  ;;  %v3158_v12 = vsel %vm14372_vm2, %v3153_v7, %v3157_v30  ;;  %v3171_v62 = vrot.slane %v3169_v21, 5  ;;  %v537_v53 = vshrl.u32 %v10711_v59, 16  ;;  %v10927_v28 = vld [vmem:[%s14341_s26 + $0x9c] sm:$0xf] }
  0x90   : > { %v3175_v49 = vrot.slane %v3173_v22, 4  ;;  %v10941_v17 = vcombine.low %v3148_v5, %v3158_v12  ;;  %v3166_v1 = vor.u32 %v3165_v33, %v3162_v6  ;;  %v540_v32 = vshll.u32 %v10711_v59, 16  ;;  %v14620_v50 = vld [vmem:[%s14341_s26 + $0xa0] sm:$0xf]  ;;  %v14627_v21 = vld [vmem:[%s14341_s26 + $0xa4] sm:$0x1] }
  0x91   : > { %v3181_v13 = vrot.slane %v3179_v54, 5  ;;  %17172 = vst [vmem:[#allocation36_spill] sm:$0xff] %v14620_v50  ;;  %v14622_v61 = vrot.slane %v537_v53, 4  ;;  %v546_v36 = vshll.u32 %v10712_v44, 16  ;;  %v550_v38 = vshrl.u32 %v10712_v44, 16  ;;  %17175 = vst [vmem:[#allocation39_spill] sm:$0xff] %v14627_v21 }
  0x92   : > { %v3176_v34 = vor.u32 %v3175_v49, %v3171_v62  ;;  %12846 = vmatprep.mubr.bf16.mxu1 %v10941_v17  ;;  %v3167_v37 = vrot.slane %v3166_v1, 4  ;;  %v14624_v30 = vrot.slane %v540_v32, 5  ;;  %v10735_v7 = vcombine.low %v10711_v59, %v10712_v44  ;;  %v10714_v59 = vld [vmem:[%s14341_s26 + $0xa8] sm:$0xf]  ;;  %v10720_v41 = vld [vmem:[%s14341_s26 + $0xc0] sm:$0xf] }
  0x93   : > { %17173 = vst [vmem:[#allocation37_spill] sm:$0xff] %v14622_v61  ;;  %v3184_v22 = vshrl.u32 %v10927_v28, 16  ;;  %v14629_v6 = vrot.slane %v546_v36, 5  ;;  %v14631_v33 = vrot.slane %v550_v38, 4  ;;  %v3187_v54 = vshll.u32 %v10927_v28, 16 }
  0x94   : > { %17174 = vst [vmem:[#allocation38_spill] sm:$0xff] %v14624_v30  ;;  %v3177_v5 = vrot.slane %v3176_v34, 4  ;;  %v3172_v12 = vsel %vm14372_vm2, %v3167_v37, %v3171_v62  ;;  %12658 = vmatprep.mubr.bf16.mxu0 %v10735_v7  ;;  %v3193_v32 = vshll.u32 %v14620_v50, 16  ;;  %v3197_v1 = vshrl.u32 %v14620_v50, 16  ;;  %v10715_v34 = vld [vmem:[%s14341_s26 + $0xac] sm:$0xf] }
  0x95   : > { %17176 = vst [vmem:[#allocation40_spill] sm:$0xff] %v14629_v6  ;;  %17177 = vst [vmem:[#allocation41_spill] sm:$0xff] %v14631_v33  ;;  %v3186_v17 = vrot.slane %v3184_v22, 4  ;;  %v3189_v49 = vrot.slane %v3187_v54, 5  ;;  %v3203_v53 = vshll.u32 %v14627_v21, 16  ;;  %v561_v28 = vshrl.u32 %v10714_v59, 16 }
  0x96   : > { %v3182_v44 = vsel %vm14372_vm2, %v3177_v5, %v3181_v13  ;;  %v3195_v38 = vrot.slane %v3193_v32, 5  ;;  %v3199_v37 = vrot.slane %v3197_v1, 4  ;;  %v564_v62 = vshll.u32 %v10714_v59, 16  ;;  %v10928_v7 = vld [vmem:[%s14341_s26 + $0xa8] sm:$0xf] }
  0x97   : > { %v10942_v36 = vcombine.low %v3172_v12, %v3182_v44  ;;  %v3190_v22 = vor.u32 %v3189_v49, %v3186_v17  ;;  %v3205_v33 = vrot.slane %v3203_v53, 5  ;;  %v14643_v6 = vrot.slane %v561_v28, 4  ;;  %v14646_v30 = vld [vmem:[%s14341_s26 + $0xac] sm:$0xf]  ;;  %v14651_v12 = vld [vmem:[%s14341_s26 + $0xb0] sm:$0x1] }
  0x98   : > { %v570_v50 = vshll.u32 %v10715_v34, 16  ;;  %17179 = vst [vmem:[#allocation43_spill] sm:$0xff] %v14646_v30  ;;  %v3200_v13 = vor.u32 %v3199_v37, %v3195_v38  ;;  %v14648_v5 = vrot.slane %v564_v62, 5  ;;  %v574_v54 = vshrl.u32 %v10715_v34, 16  ;;  %17181 = vst [vmem:[#allocation45_spill] sm:$0xff] %v14651_v12 }
  0x99   : > { %17178 = vst [vmem:[#allocation42_spill] sm:$0xff] %v14643_v6  ;;  %12847 = vmatmul.mubr.bf16.gmra.mrb[20].mxu1 %v10942_v36  ;;  %v10736_v21 = vcombine.low %v10714_v59, %v10715_v34  ;;  %v3191_v32 = vrot.slane %v3190_v22, 4  ;;  %v3208_v17 = vshrl.u32 %v10928_v7, 16  ;;  %v3211_v44 = vshll.u32 %v10928_v7, 16  ;;  %v10717_v37 = vld [vmem:[%s14341_s26 + $0xb4] sm:$0xf] }
  0x9a   : > { %17180 = vst [vmem:[#allocation44_spill] sm:$0xff] %v14648_v5  ;;  %v14653_v1 = vrot.slane %v570_v50, 5  ;;  %v3201_v49 = vrot.slane %v3200_v13, 4  ;;  %v14655_v53 = vrot.slane %v574_v54, 4  ;;  %v3217_v28 = vshll.u32 %v14646_v30, 16 }
  0x9b   : > { %12659 = vmatmul.mubr.bf16.gmra.mrb[24].mxu0 %v10736_v21  ;;  %v3221_v36 = vshrl.u32 %v14646_v30, 16  ;;  %v3196_v59 = vsel %vm14372_vm2, %v3191_v32, %v3195_v38  ;;  %v3210_v34 = vrot.slane %v3208_v17, 4  ;;  %v3213_v62 = vrot.slane %v3211_v44, 5  ;;  %v10718_v7 = vld [vmem:[%s14341_s26 + $0xb8] sm:$0xf] }
  0x9c   : > { %17182 = vst [vmem:[#allocation46_spill] sm:$0xff] %v14653_v1  ;;  %17183 = vst [vmem:[#allocation47_spill] sm:$0xff] %v14655_v53  ;;  %v3227_v50 = vshll.u32 %v14651_v12, 16  ;;  %v3206_v22 = vsel %vm14372_vm2, %v3201_v49, %v3205_v33  ;;  %v3219_v13 = vrot.slane %v3217_v28, 5  ;;  %v585_v21 = vshrl.u32 %v10717_v37, 16 }
  0x9d   : > { %v3223_v54 = vrot.slane %v3221_v36, 4  ;;  %v14667_v53 = vld [vmem:[%s14341_s26 + $0xb8] sm:$0xf]  ;;  %v10929_v30 = vld [vmem:[%s14341_s26 + $0xb4] sm:$0xf]  ;;  %v10943_v1 = vcombine.low %v3196_v59, %v3206_v22  ;;  %v3214_v5 = vor.u32 %v3213_v62, %v3210_v34  ;;  %v588_v38 = vshll.u32 %v10717_v37, 16 }
  0x9e   : > { %17184 = vst [vmem:[#allocation48_spill] sm:$0xff] %v14667_v53  ;;  %v3229_v6 = vrot.slane %v3227_v50, 5  ;;  %v14670_v17 = vrot.slane %v585_v21, 4  ;;  %v594_v44 = vshll.u32 %v10718_v7, 16  ;;  %v598_v12 = vshrl.u32 %v10718_v7, 16 }
  0x9f   : > { %v3224_v32 = vor.u32 %v3223_v54, %v3219_v13  ;;  %v14673_v61 = vld [vmem:[%s14341_s26 + $0xbc] sm:$0x1]  ;;  %12850 = vmatprep.mubr.bf16.mxu1 %v10943_v1  ;;  %v3215_v33 = vrot.slane %v3214_v5, 4  ;;  %v14675_v49 = vrot.slane %v588_v38, 5  ;;  %v10737_v28 = vcombine.low %v10717_v37, %v10718_v7  ;;  %v10721_v22 = vld [vmem:[%s14341_s26 + $0xc4] sm:$0xf] }
  0xa0   : > { %17185 = vst [vmem:[#allocation49_spill] sm:$0xff] %v14670_v17  ;;  %17186 = vst [vmem:[#allocation50_spill] sm:$0xff] %v14673_v61  ;;  %v3232_v36 = vshrl.u32 %v10929_v30, 16  ;;  %v14678_v34 = vrot.slane %v594_v44, 5  ;;  %v14680_v62 = vrot.slane %v598_v12, 4  ;;  %v3235_v50 = vshll.u32 %v10929_v30, 16 }
  0xa1   : > { %17187 = vst [vmem:[#allocation51_spill] sm:$0xff] %v14675_v49  ;;  %v3225_v59 = vrot.slane %v3224_v32, 4  ;;  %v3220_v5 = vsel %vm14372_vm2, %v3215_v33, %v3219_v13  ;;  %12662 = vmatprep.mubr.bf16.mxu0 %v10737_v28  ;;  %v3241_v37 = vshll.u32 %v14667_v53, 16  ;;  %v3245_v7 = vshrl.u32 %v14667_v53, 16  ;;  %v14691_v30 = vld [vmem:[%s14341_s26 + $0xc4] sm:$0xf] }
  0xa2   : > { %17188 = vst [vmem:[#allocation52_spill] sm:$0xff] %v14678_v34  ;;  %17189 = vst [vmem:[#allocation53_spill] sm:$0xff] %v14680_v62  ;;  %v3234_v1 = vrot.slane %v3232_v36, 4  ;;  %v3237_v21 = vrot.slane %v3235_v50, 5  ;;  %v3251_v12 = vshll.u32 %v14673_v61, 16  ;;  %v609_v38 = vshrl.u32 %v10720_v41, 16 }
  0xa3   : > { %v3230_v54 = vsel %vm14372_vm2, %v3225_v59, %v3229_v6  ;;  %17190 = vst [vmem:[#allocation54_spill] sm:$0xff] %v14691_v30  ;;  %v3243_v44 = vrot.slane %v3241_v37, 5  ;;  %v3247_v62 = vrot.slane %v3245_v7, 4  ;;  %v612_v13 = vshll.u32 %v10720_v41, 16  ;;  %v14694_v33 = vld [vmem:[%s14341_s26 + $0xc8] sm:$0x1] }
  0xa4   : > { %v10944_v32 = vcombine.low %v3220_v5, %v3230_v54  ;;  %v10930_v28 = vld [vmem:[%s14341_s26 + $0xc0] sm:$0xf]  ;;  %v3238_v36 = vor.u32 %v3237_v21, %v3234_v1  ;;  %v3253_v53 = vrot.slane %v3251_v12, 5  ;;  %v14697_v34 = vrot.slane %v609_v38, 4  ;;  %v10677_v5 = vld [vmem:[%s14341_s26 + $0x14] sm:$0x1] }
  0xa5   : > { %v618_v6 = vshll.u32 %v10721_v22, 16  ;;  %v3248_v59 = vor.u32 %v3247_v62, %v3243_v44  ;;  %v14699_v50 = vrot.slane %v612_v13, 5  ;;  %v622_v61 = vshrl.u32 %v10721_v22, 16  ;;  %v10680_v38 = vld [vmem:[%s14341_s26 + $0x20] sm:$0x1] }
  0xa6   : > { %12851 = vmatmul.mubr.bf16.gmra.mrb[24].mxu1 %v10944_v32  ;;  %v10738_v49 = vcombine.low %v10720_v41, %v10721_v22  ;;  %v3239_v37 = vrot.slane %v3238_v36, 4  ;;  %v3256_v54 = vshrl.u32 %v10930_v28, 16  ;;  %v3259_v17 = vshll.u32 %v10930_v28, 16 }
  0xa7   : > { %v14702_v7 = vrot.slane %v618_v6, 5  ;;  %v3249_v1 = vrot.slane %v3248_v59, 4  ;;  %v14705_v21 = vrot.slane %v622_v61, 4  ;;  %v3265_v12 = vshll.u32 %v14691_v30, 16  ;;  %v10854_v6 = vld [vmem:[%s14341_s26 + $0x18] sm:$0xe] }
  0xa8   : > { %12663 = vmatmul.mubr.bf16.gmra.mrb[28].mxu0 %v10738_v49  ;;  %v3269_v62 = vshrl.u32 %v14691_v30, 16  ;;  %v3244_v41 = vsel %vm14372_vm2, %v3239_v37, %v3243_v44  ;;  %v3258_v22 = vrot.slane %v3256_v54, 4  ;;  %v3261_v32 = vrot.slane %v3259_v17, 5 }
  0xa9   : > { %v3275_v13 = vshll.u32 %v14694_v33, 16  ;;  %v3254_v28 = vsel %vm14372_vm2, %v3249_v1, %v3253_v53  ;;  %v3267_v36 = vrot.slane %v3265_v12, 5  ;;  %v261_v49 = vsel %vm14372_vm2, %v14366_v46, %v14351_v29  ;;  %v14022_v1 = vld [vmem:[%s14341_s26 + $0x10] sm:$0xf] }
  0xaa   : > { %v3271_v61 = vrot.slane %v3269_v62, 4  ;;  %v10945_v59 = vcombine.low %v3244_v41, %v3254_v28  ;;  %v3262_v30 = vor.u32 %v3261_v32, %v3258_v22  ;;  %v268_v37 = vshll.u32 %v10677_v5, 16  ;;  %v10683_v22 = vld [vmem:[%s14341_s26 + $0x2c] sm:$0x1] }
  0xab   : > { %v3277_v44 = vrot.slane %v3275_v13, 5  ;;  %v10899_v54 = vrot.slane %v10851_v42, 9  ;;  %v2752_v12 = vrot.slane %v14022_v1, 5  ;;  %v285_v29 = vsel %vm14372_vm2, %v14396_v8, %v14388_v2 }
  0xac   : > { %v3272_v53 = vor.u32 %v3271_v61, %v3267_v36  ;;  %12854 = vmatprep.mubr.bf16.mxu1 %v10945_v59  ;;  %v3263_v46 = vrot.slane %v3262_v30, 4  ;;  %v270_v62 = vrot.slane %v268_v37, 5  ;;  %v292_v5 = vshll.u32 %v10680_v38, 16 }
  0xad   : > { %v10900_v41 = vrot.slane %v10854_v6, 9  ;;  %v2753_v13 = vsel %vm14722_vm5, %v10899_v54, %v2752_v12  ;;  %v2754_v28 = vrot.slane %v2752_v12, 4  ;;  %v17193_v42 = vrot.slane %v14377_v51, 5  ;;  %v10857_v51 = vld [vmem:[%s14341_s26 + $0x24] sm:$0xe] }
  0xae   : > { %v3273_v32 = vrot.slane %v3272_v53, 4  ;;  %v3268_v2 = vsel %vm14372_vm2, %v3263_v46, %v3267_v36  ;;  %v271_v8 = vsel %vm14372_vm2, %v14368_v47, %v270_v62  ;;  %v294_v30 = vrot.slane %v292_v5, 5  ;;  %v10860_v5 = vld [vmem:[%s14341_s26 + $0x30] sm:$0xe] }
  0xaf   : > { %v14739_v61 = vsel %vm14722_vm5, %v14392_v4, %v17193_v42  ;;  %v17194_v38 = vrot.slane %v14364_v45, 5  ;;  %v10747_v59 = vcombine.low %v261_v49, %v271_v8  ;;  %v17195_v37 = vrot.slane %v14347_v19, 5  ;;  %v13880_v45 = vld [vmem:[#allocation2 + $0x88] sm:$0xff]   ;;  %v10689_v8 = vld [vmem:[%s14341_s26 + $0x44] sm:$0x1] }
  0xb0   : > { %v3278_v4 = vsel %vm14372_vm2, %v3273_v32, %v3277_v44  ;;  %v295_v1 = vsel %vm14372_vm2, %v14408_v27, %v294_v30  ;;  %v303_v49 = vor.u32 %v14414_v39, %v14411_v35  ;;  %v10686_v44 = vld [vmem:[%s14341_s26 + $0x38] sm:$0x1]  ;;  %v313_v12 = vor.u32 %v14418_v43, %v14416_v40  ;;  %v14023_v32 = vld [vmem:[%s14341_s26 + $0x28] sm:$0xf] }
  0xb1   : > { %v14750_v6 = vsel %vm14722_vm5, %v10900_v41, %v17194_v38  ;;  %v2756_v36 = vsel %vm14722_vm5, %v2754_v28, %v17195_v37  ;;  %v10946_v53 = vcombine.low %v3268_v2, %v3278_v4  ;;  %12682 = vmatprep.mubr.bf16.mxu0 %v10747_v59  ;;  %v10748_v19 = vcombine.low %v285_v29, %v295_v1  ;;  %v14024_v28 = vld [vmem:[%s14341_s26 + $0x2c] sm:$0x1]  ;;  %v14025_v37 = vld [vmem:[%s14341_s26 + $0x34] sm:$0xf] }
  0xb2   : > { %v10956_v47 = vcombine.low %v14750_v6, %v14739_v61  ;;  %v10955_v54 = vcombine.low %v2753_v13, %v2756_v36  ;;  %v316_v46 = vshll.u32 %v10683_v22, 16  ;;  %v10901_v62 = vrot.slane %v10857_v51, 9 }
  0xb3   : > { %12855 = vmatmul.mubr.bf16.gmra.mrb[28].mxu1 %v10946_v53  ;;  %v304_v41 = vrot.slane %v303_v49, 4  ;;  %v2766_v13 = vrot.slane %v14023_v32, 5  ;;  %v2769_v42 = vrot.slane %v14024_v28, 5  ;;  %v327_v27 = vor.u32 %v14432_v23, %v14428_v11  ;;  %12683 = vmatmul.mubr.bf16.vlgmr.msra.gmra.mrb[0].mxu0 %v10748_v19  ;;  %v10863_v53 = vld [vmem:[%s14341_s26 + $0x3c] sm:$0xe] }
  0xb4   : > { %12874 = vmatprep.mubr.bf16.mxu1 %v10955_v54  ;;  %v314_v35 = vrot.slane %v313_v12, 4  ;;  %v318_v39 = vrot.slane %v316_v46, 5  ;;  %v337_v43 = vor.u32 %v14436_v31, %v14434_v24  ;;  %v340_v29 = vshll.u32 %v10686_v44, 16  ;;  %12715 = vmatpush3.bf16.msra.mxu0 %v14495_v58  ;;  %v13882_v58 = vld [vmem:[#allocation2 + $0x90] sm:$0xff]   ;;  %v14026_v49 = vld [vmem:[%s14341_s26 + $0x38] sm:$0x1] }
  0xb5   : > { %v309_v22 = vsel %vm14372_vm2, %v304_v41, %v14416_v40  ;;  %v2767_v2 = vsel %vm14722_vm5, %v10901_v62, %v2766_v13  ;;  %v2768_v11 = vrot.slane %v2766_v13, 4  ;;  %v328_v23 = vrot.slane %v327_v27, 4  ;;  %12716 = vmatprep.subr.bf16.mxu0 %v13880_v45  ;;  %v13881_v62 = vld [vmem:[#allocation2 + $0x188] sm:$0xff]   ;;  %v10692_v41 = vld [vmem:[%s14341_s26 + $0x50] sm:$0x1]  ;;  %v13884_v32 = vld [vmem:[#allocation2 + $0x98] sm:$0xff]  }
  0xb6   : > { %v319_v30 = vsel %vm14372_vm2, %v314_v35, %v318_v39  ;;  %v338_v31 = vrot.slane %v337_v43, 4  ;;  %v342_v38 = vrot.slane %v340_v29, 5  ;;  %v10902_v51 = vrot.slane %v10860_v5, 9  ;;  %v10866_v27 = vld [vmem:[%s14341_s26 + $0x48] sm:$0xe] }
  0xb7   : > { %v10749_v4 = vcombine.low %v309_v22, %v319_v30  ;;  %v2770_v40 = vsel %vm14722_vm5, %v2768_v11, %v2769_v42  ;;  %v333_v59 = vsel %vm14372_vm2, %v328_v23, %v14434_v24  ;;  %v2773_v36 = vrot.slane %v14025_v37, 5  ;;  %v14028_v39 = vld [vmem:[%s14341_s26 + $0x44] sm:$0x1]  ;;  %v10695_v22 = vld [vmem:[%s14341_s26 + $0x5c] sm:$0x1]  ;;  %v13883_v11 = vld [vmem:[#allocation2 + $0x190] sm:$0xff]  }
  0xb8   : > { %v10957_v54 = vcombine.low %v2767_v2, %v2770_v40  ;;  %v343_v1 = vsel %vm14372_vm2, %v338_v31, %v342_v38  ;;  %v2776_v44 = vrot.slane %v14026_v49, 5  ;;  %v351_v19 = vor.u32 %v14448_v63, %v14446_v60  ;;  %12717 = vmatpush3.bf16.msra.mxu0 %v13880_v45  ;;  %v14027_v60 = vld [vmem:[%s14341_s26 + $0x40] sm:$0xf]  ;;  %v14030_v31 = vld [vmem:[%s14341_s26 + $0x50] sm:$0x1]  ;;  %v13885_v37 = vld [vmem:[#allocation2 + $0x198] sm:$0xff]  }
  0xb9   : > { %12686 = vmatprep.mubr.bf16.mxu0 %v10749_v4  ;;  %v10750_v12 = vcombine.low %v333_v59, %v343_v1  ;;  %v14799_v24 = vsel %vm14722_vm5, %v10902_v51, %v2773_v36  ;;  %v2775_v46 = vrot.slane %v2773_v36, 4  ;;  %v361_v5 = vor.u32 %v14454_v9, %v14452_v14  ;;  %12718 = vmatprep.subr.bf16.mxu0 %v13882_v58  ;;  %v10869_v51 = vld [vmem:[%s14341_s26 + $0x54] sm:$0xe]  ;;  %v13886_v36 = vld [vmem:[#allocation2 + $0xa0] sm:$0xff]  }
  0xba   : > { %v352_v13 = vrot.slane %v351_v19, 4  ;;  %v364_v28 = vshll.u32 %v10689_v8, 16  ;;  %v10903_v42 = vrot.slane %v10863_v53, 9  ;;  %v2780_v63 = vrot.slane %v14027_v60, 5  ;;  %v13888_v60 = vld [vmem:[#allocation2 + $0xa8] sm:$0xff]  }
  0xbb   : > { %12875 = vmatmul.mubr.bf16.vlgmr.msra.gmra.mrb[0].mxu1 %v10956_v47  ;;  %v2777_v45 = vsel %vm14722_vm5, %v2775_v46, %v2776_v44  ;;  %v362_v35 = vrot.slane %v361_v5, 4  ;;  %v2783_v9 = vrot.slane %v14028_v39, 5  ;;  %v375_v43 = vor.u32 %v14465_v56, %v14462_v26  ;;  %12687 = vmatmul.mubr.bf16.gmra.mrb[4].mxu0 %v10750_v12  ;;  %v10698_v12 = vld [vmem:[%s14341_s26 + $0x68] sm:$0x1] }
  0xbc   : > { %12907 = vmatpush3.bf16.msra.mxu1 %v14506_v20  ;;  %12878 = vmatprep.mubr.bf16.mxu1 %v10957_v54  ;;  %v10958_v29 = vcombine.low %v14799_v24, %v2777_v45  ;;  %v357_v61 = vsel %vm14372_vm2, %v352_v13, %v14452_v14  ;;  %v366_v6 = vrot.slane %v364_v28, 5  ;;  %v2781_v47 = vsel %vm14722_vm5, %v10903_v42, %v2780_v63  ;;  %v14029_v14 = vld [vmem:[%s14341_s26 + $0x4c] sm:$0xf]  ;;  %v10872_v28 = vld [vmem:[%s14341_s26 + $0x60] sm:$0xe] }
  0xbd   : > { %12908 = vmatprep.subr.bf16.mxu1 %v13881_v62  ;;  %v2782_v26 = vrot.slane %v2780_v63, 4  ;;  %v376_v56 = vrot.slane %v375_v43, 4  ;;  %v385_v20 = vor.u32 %v14471_v15, %v14467_v57  ;;  %v388_v2 = vshll.u32 %v10692_v41, 16  ;;  %12719 = vmatpush3.bf16.msra.mxu0 %v13882_v58  ;;  %v14032_v41 = vld [vmem:[%s14341_s26 + $0x5c] sm:$0x1] }
  0xbe   : > { %v367_v23 = vsel %vm14372_vm2, %v362_v35, %v366_v6  ;;  %v10904_v8 = vrot.slane %v10866_v27, 9  ;;  %v2787_v30 = vrot.slane %v14029_v14, 5  ;;  %v2790_v38 = vrot.slane %v14030_v31, 5  ;;  %12720 = vmatprep.subr.bf16.mxu0 %v13884_v32  ;;  %v17196_v6 = vld [vmem:[#allocation11_spill] sm:$0xff] }
  0xbf   : > { %v10751_v4 = vcombine.low %v357_v61, %v367_v23  ;;  %v2784_v40 = vsel %vm14722_vm5, %v2782_v26, %v2783_v9  ;;  %v381_v15 = vsel %vm14372_vm2, %v376_v56, %v14467_v57  ;;  %v386_v59 = vrot.slane %v385_v20, 4  ;;  %v10875_v20 = vld [vmem:[%s14341_s26 + $0x6c] sm:$0xe]  ;;  %v14033_v14 = vld [vmem:[%s14341_s26 + $0x68] sm:$0x1] }
  0xc0   : > { %12909 = vmatpush3.bf16.msra.mxu1 %v13881_v62  ;;  %v10959_v53 = vcombine.low %v2781_v47, %v2784_v40  ;;  %v390_v54 = vrot.slane %v388_v2, 5  ;;  %v14836_v58 = vsel %vm14722_vm5, %v10904_v8, %v2787_v30  ;;  %v2789_v1 = vrot.slane %v2787_v30, 4  ;;  %v14031_v62 = vld [vmem:[%s14341_s26 + $0x58] sm:$0xf]  ;;  %v13890_v2 = vld [vmem:[#allocation2 + $0xb0] sm:$0xff]  }
  0xc1   : > { %12690 = vmatprep.mubr.bf16.mxu0 %v10751_v4  ;;  %12910 = vmatprep.subr.bf16.mxu1 %v13883_v11  ;;  %v399_v57 = vor.u32 %v14483_v18, %v14480_v52  ;;  %v409_v49 = vor.u32 %v14488_v16, %v14486_v10  ;;  %v412_v44 = vshll.u32 %v10695_v22, 16  ;;  %v10905_v19 = vrot.slane %v10869_v51, 9  ;;  %v10701_v22 = vld [vmem:[%s14341_s26 + $0x74] sm:$0x1]  ;;  %v17198_v51 = vld [vmem:[#allocation15_spill] sm:$0xff]  ;;  %v17199_v40 = vld [vmem:[#allocation16_spill] sm:$0xff] }
  0xc2   : > { %v391_v24 = vsel %vm14372_vm2, %v386_v59, %v390_v54  ;;  %v2791_v46 = vsel %vm14722_vm5, %v2789_v1, %v2790_v38  ;;  %v2794_v5 = vrot.slane %v14031_v62, 5  ;;  %v2797_v13 = vrot.slane %v14032_v41, 5  ;;  %12721 = vmatpush3.bf16.msra.mxu0 %v13884_v32  ;;  %v17197_v38 = vld [vmem:[#allocation13_spill] sm:$0xff]  ;;  %v17201_v1 = vld [vmem:[#allocation12_spill] sm:$0xff]  ;;  %v17202_v41 = vld [vmem:[#allocation14_spill] sm:$0xff] }
  0xc3   : > { %12879 = vmatmul.mubr.bf16.gmra.mrb[4].mxu1 %v10958_v29  ;;  %v10752_v52 = vcombine.low %v381_v15, %v391_v24  ;;  %v10960_v18 = vcombine.low %v14836_v58, %v2791_v46  ;;  %v400_v16 = vrot.slane %v399_v57, 4  ;;  %v410_v42 = vrot.slane %v409_v49, 4  ;;  %12722 = vmatprep.subr.bf16.mxu0 %v13886_v36  ;;  %v13887_v29 = vld [vmem:[#allocation2 + $0x1a0] sm:$0xff]   ;;  %v17200_v15 = vld [vmem:[#allocation17_spill] sm:$0xff] }
  0xc4   : > { %12882 = vmatprep.mubr.bf16.mxu1 %v10959_v53  ;;  %12911 = vmatpush3.bf16.msra.mxu1 %v13883_v11  ;;  %v414_v63 = vrot.slane %v412_v44, 5  ;;  %v2795_v27 = vsel %vm14722_vm5, %v10905_v19, %v2794_v5  ;;  %v2796_v45 = vrot.slane %v2794_v5, 4  ;;  %v423_v35 = vor.u32 %v14503_v3, %v14498_v55  ;;  %v10704_v57 = vld [vmem:[%s14341_s26 + $0x80] sm:$0x1]  ;;  %v10878_v49 = vld [vmem:[%s14341_s26 + $0x78] sm:$0xe] }
  0xc5   : > { %12691 = vmatmul.mubr.bf16.gmra.mrb[8].mxu0 %v10752_v52  ;;  %v405_v32 = vsel %vm14372_vm2, %v400_v16, %v14486_v10  ;;  %v433_v39 = vor.u32 %v14512_v0, %v14508_v25  ;;  %v436_v9 = vshll.u32 %v10698_v12, 16  ;;  %v10906_v43 = vrot.slane %v10872_v28, 9  ;;  %12912 = vmatprep.subr.bf16.mxu1 %v13885_v37  ;;  %v13892_v46 = vld [vmem:[#allocation2 + $0xb8] sm:$0xff]   ;;  %v17204_v52 = vld [vmem:[#allocation20_spill] sm:$0xff] }
  0xc6   : > { %v415_v61 = vsel %vm14372_vm2, %v410_v42, %v414_v63  ;;  %v2798_v55 = vsel %vm14722_vm5, %v2796_v45, %v2797_v13  ;;  %v424_v3 = vrot.slane %v423_v35, 4  ;;  %v2801_v47 = vrot.slane %v17196_v6, 5  ;;  %12723 = vmatpush3.bf16.msra.mxu0 %v13886_v36  ;;  %v13889_v36 = vld [vmem:[#allocation2 + $0x1a8] sm:$0xff]   ;;  %v17203_v28 = vld [vmem:[#allocation18_spill] sm:$0xff] }
  0xc7   : > { %v10753_v10 = vcombine.low %v405_v32, %v415_v61  ;;  %v10961_v26 = vcombine.low %v2795_v27, %v2798_v55  ;;  %v434_v56 = vrot.slane %v433_v39, 4  ;;  %v438_v0 = vrot.slane %v436_v9, 5  ;;  %12724 = vmatprep.subr.bf16.mxu0 %v13888_v60  ;;  %v17206_v63 = vld [vmem:[#allocation23_spill] sm:$0xff]  ;;  %v10707_v35 = vld [vmem:[%s14341_s26 + $0x8c] sm:$0x1]  ;;  %v13891_v32 = vld [vmem:[#allocation2 + $0x1b0] sm:$0xff]  }
  0xc8   : > { %v429_v11 = vsel %vm14372_vm2, %v424_v3, %v14508_v25  ;;  %v14872_v23 = vsel %vm14722_vm5, %v10906_v43, %v2801_v47  ;;  %v2803_v8 = vrot.slane %v2801_v47, 4  ;;  %v2804_v30 = vrot.slane %v14033_v14, 5  ;;  %12913 = vmatpush3.bf16.msra.mxu1 %v13885_v37  ;;  %v17207_v6 = vld [vmem:[#allocation19_spill] sm:$0xff] }
  0xc9   : > { %12694 = vmatprep.mubr.bf16.mxu0 %v10753_v10  ;;  %v439_v31 = vsel %vm14372_vm2, %v434_v56, %v438_v0  ;;  %v447_v4 = vor.u32 %v17198_v51, %v17197_v38  ;;  %v457_v25 = vor.u32 %v17200_v15, %v17199_v40  ;;  %v460_v59 = vshll.u32 %v10701_v22, 16  ;;  %12914 = vmatprep.subr.bf16.mxu1 %v13887_v29  ;;  %v10881_v22 = vld [vmem:[%s14341_s26 + $0x84] sm:$0xe]  ;;  %v17208_v56 = vld [vmem:[#allocation21_spill] sm:$0xff] }
  0xca   : > { %v10754_v53 = vcombine.low %v429_v11, %v439_v31  ;;  %v2805_v54 = vsel %vm14722_vm5, %v2803_v8, %v2804_v30  ;;  %v10907_v58 = vrot.slane %v10875_v20, 9  ;;  %v2808_v37 = vrot.slane %v17201_v1, 5  ;;  %12725 = vmatpush3.bf16.msra.mxu0 %v13888_v60  ;;  %v17205_v60 = vld [vmem:[#allocation22_spill] sm:$0xff]  ;;  %v17210_v11 = vld [vmem:[#allocation27_spill] sm:$0xff]  ;;  %v17212_v8 = vld [vmem:[#allocation29_spill] sm:$0xff] }
  0xcb   : > { %12883 = vmatmul.mubr.bf16.gmra.mrb[8].mxu1 %v10960_v18  ;;  %v10962_v44 = vcombine.low %v14872_v23, %v2805_v54  ;;  %v448_v19 = vrot.slane %v447_v4, 4  ;;  %v458_v12 = vrot.slane %v457_v25, 4  ;;  %v462_v24 = vrot.slane %v460_v59, 5  ;;  %12726 = vmatprep.subr.bf16.mxu0 %v13890_v2  ;;  %v14904_v10 = vld [vmem:[#allocation2 + $0xc0] sm:$0xff]   ;;  %v17211_v23 = vld [vmem:[#allocation28_spill] sm:$0xff] }
  0xcc   : > { %12886 = vmatprep.mubr.bf16.mxu1 %v10961_v26  ;;  %v2809_v62 = vsel %vm14722_vm5, %v10907_v58, %v2808_v37  ;;  %v2810_v5 = vrot.slane %v2808_v37, 4  ;;  %v2811_v13 = vrot.slane %v17202_v41, 5  ;;  %v471_v16 = vor.u32 %v17204_v52, %v17203_v28  ;;  %12915 = vmatpush3.bf16.msra.mxu1 %v13887_v29  ;;  %v17209_v20 = vld [vmem:[#allocation26_spill] sm:$0xff]  ;;  %v10710_v59 = vld [vmem:[%s14341_s26 + $0x98] sm:$0x1]  ;;  %v17213_v58 = vld [vmem:[#allocation24_spill] sm:$0xff] }
  0xcd   : > { %12695 = vmatmul.mubr.bf16.gmra.mrb[12].mxu0 %v10754_v53  ;;  %v453_v18 = vsel %vm14372_vm2, %v448_v19, %v17199_v40  ;;  %v463_v42 = vsel %vm14372_vm2, %v458_v12, %v462_v24  ;;  %v481_v27 = vor.u32 %v17206_v63, %v17205_v60  ;;  %v484_v45 = vshll.u32 %v10704_v57, 16  ;;  %12916 = vmatprep.subr.bf16.mxu1 %v13889_v36  ;;  %v13893_v53 = vld [vmem:[#allocation2 + $0x1b8] sm:$0xff]  }
  0xce   : > { %v10755_v39 = vcombine.low %v453_v18, %v463_v42  ;;  %v2812_v9 = vsel %vm14722_vm5, %v2810_v5, %v2811_v13  ;;  %v472_v43 = vrot.slane %v471_v16, 4  ;;  %v10908_v29 = vrot.slane %v10878_v49, 9  ;;  %12727 = vmatpush3.bf16.msra.mxu0 %v13890_v2  ;;  %v17214_v37 = vld [vmem:[#allocation25_spill] sm:$0xff]  ;;  %v10884_v49 = vld [vmem:[%s14341_s26 + $0x90] sm:$0xe]  ;;  %v17215_v24 = vld [vmem:[#allocation30_spill] sm:$0xff] }
  0xcf   : > { %v10963_v61 = vcombine.low %v2809_v62, %v2812_v9  ;;  %v482_v55 = vrot.slane %v481_v27, 4  ;;  %v486_v3 = vrot.slane %v484_v45, 5  ;;  %v2815_v47 = vrot.slane %v17207_v6, 5  ;;  %12728 = vmatprep.subr.bf16.mxu0 %v13892_v46  ;;  %v17217_v62 = vld [vmem:[#allocation34_spill] sm:$0xff]  ;;  %v17218_v5 = vld [vmem:[#allocation35_spill] sm:$0xff]  ;;  %v17221_v6 = vld [vmem:[#allocation37_spill] sm:$0xff] }
  0xd0   : > { %12698 = vmatprep.mubr.bf16.mxu0 %v10755_v39  ;;  %v477_v26 = vsel %vm14372_vm2, %v472_v43, %v17205_v60  ;;  %v2818_v0 = vrot.slane %v17208_v56, 5  ;;  %v495_v2 = vor.u32 %v17210_v11, %v17209_v20  ;;  %v505_v14 = vor.u32 %v17212_v8, %v17211_v23  ;;  %12917 = vmatpush3.bf16.msra.mxu1 %v13889_v36  ;;  %v10713_v27 = vld [vmem:[%s14341_s26 + $0xa4] sm:$0x1]  ;;  %v17224_v56 = vld [vmem:[#allocation41_spill] sm:$0xff] }
  0xd1   : > { %v487_v30 = vsel %vm14372_vm2, %v482_v55, %v486_v3  ;;  %v2816_v31 = vsel %vm14722_vm5, %v10908_v29, %v2815_v47  ;;  %v2817_v38 = vrot.slane %v2815_v47, 4  ;;  %v508_v51 = vshll.u32 %v10707_v35, 16  ;;  %12918 = vmatprep.subr.bf16.mxu1 %v13891_v32  ;;  %v14937_v45 = vld [vmem:[#allocation2 + $0x1c0] sm:$0xff]   ;;  %v17220_v29 = vld [vmem:[#allocation33_spill] sm:$0xff]  ;;  %v10887_v55 = vld [vmem:[%s14341_s26 + $0x9c] sm:$0xe] }
  0xd2   : > { %v10756_v4 = vcombine.low %v477_v26, %v487_v30  ;;  %v496_v40 = vrot.slane %v495_v2, 4  ;;  %v506_v15 = vrot.slane %v505_v14, 4  ;;  %v10909_v25 = vrot.slane %v10881_v22, 9  ;;  %12729 = vmatpush3.bf16.msra.mxu0 %v13892_v46  ;;  %v17219_v9 = vld [vmem:[#allocation31_spill] sm:$0xff]  ;;  %v17222_v47 = vld [vmem:[#allocation38_spill] sm:$0xff]  ;;  %v17223_v26 = vld [vmem:[#allocation40_spill] sm:$0xff] }
  0xd3   : > { %12887 = vmatmul.mubr.bf16.gmra.mrb[12].mxu1 %v10962_v44  ;;  %v2819_v36 = vsel %vm14722_vm5, %v2817_v38, %v2818_v0  ;;  %v510_v54 = vrot.slane %v508_v51, 5  ;;  %v2822_v1 = vrot.slane %v17213_v58, 5  ;;  %v2825_v57 = vrot.slane %v17214_v37, 5  ;;  %12762 = vmatprep.subr.bf16.mxu0 %v14904_v10  ;;  %v17216_v44 = vld [vmem:[#allocation32_spill] sm:$0xff]  ;;  %v17227_v58 = vld [vmem:[#allocation42_spill] sm:$0xff] }
  0xd4   : > { %12890 = vmatprep.mubr.bf16.mxu1 %v10963_v61  ;;  %v10964_v19 = vcombine.low %v2816_v31, %v2819_v36  ;;  %v501_v12 = vsel %vm14372_vm2, %v496_v40, %v17211_v23  ;;  %v519_v46 = vor.u32 %v17216_v44, %v17215_v24  ;;  %v529_v41 = vor.u32 %v17218_v5, %v17217_v62  ;;  %v10716_v38 = vld [vmem:[%s14341_s26 + $0xb0] sm:$0x1]  ;;  %v10890_v36 = vld [vmem:[%s14341_s26 + $0xa8] sm:$0xe] }
  0xd5   : > { %12699 = vmatmul.mubr.bf16.gmra.mrb[16].mxu0 %v10756_v4  ;;  %v511_v13 = vsel %vm14372_vm2, %v506_v15, %v510_v54  ;;  %v2823_v28 = vsel %vm14722_vm5, %v10909_v25, %v2822_v1  ;;  %v2824_v52 = vrot.slane %v2822_v1, 4  ;;  %v532_v16 = vshll.u32 %v10710_v59, 16  ;;  %12919 = vmatpush3.bf16.msra.mxu1 %v13891_v32  ;;  %v17225_v40 = vld [vmem:[#allocation36_spill] sm:$0xff]  ;;  %v17226_v25 = vld [vmem:[#allocation39_spill] sm:$0xff] }
  0xd6   : > { %v10757_v18 = vcombine.low %v501_v12, %v511_v13  ;;  %v520_v42 = vrot.slane %v519_v46, 4  ;;  %v530_v60 = vrot.slane %v529_v41, 4  ;;  %v10910_v63 = vrot.slane %v10884_v49, 9  ;;  %12920 = vmatprep.subr.bf16.mxu1 %v13893_v53  ;;  %v17228_v1 = vld [vmem:[#allocation44_spill] sm:$0xff]  ;;  %v17230_v49 = vld [vmem:[#allocation47_spill] sm:$0xff] }
  0xd7   : > { %v2826_v35 = vsel %vm14722_vm5, %v2824_v52, %v2825_v57  ;;  %v534_v39 = vrot.slane %v532_v16, 5  ;;  %v2829_v43 = vrot.slane %v17219_v9, 5  ;;  %v2832_v61 = vrot.slane %v17220_v29, 5  ;;  %v17229_v57 = vld [vmem:[#allocation46_spill] sm:$0xff]  ;;  %v17233_v9 = vld [vmem:[#allocation49_spill] sm:$0xff] }
  0xd8   : > { %12702 = vmatprep.mubr.bf16.mxu0 %v10757_v18  ;;  %v10965_v32 = vcombine.low %v2823_v28, %v2826_v35  ;;  %v525_v3 = vsel %vm14372_vm2, %v520_v42, %v17217_v62  ;;  %v543_v22 = vor.u32 %v17222_v47, %v17221_v6  ;;  %v553_v0 = vor.u32 %v17224_v56, %v17223_v26  ;;  %v10719_v62 = vld [vmem:[%s14341_s26 + $0xbc] sm:$0x1]  ;;  %v17231_v18 = vld [vmem:[#allocation43_spill] sm:$0xff] }
  0xd9   : > { %v535_v20 = vsel %vm14372_vm2, %v530_v60, %v534_v39  ;;  %v2830_v11 = vsel %vm14722_vm5, %v10910_v63, %v2829_v43  ;;  %v2831_v2 = vrot.slane %v2829_v43, 4  ;;  %v556_v23 = vshll.u32 %v10713_v27, 16  ;;  %12921 = vmatpush3.bf16.msra.mxu1 %v13893_v53  ;;  %v17232_v60 = vld [vmem:[#allocation45_spill] sm:$0xff]  ;;  %v17234_v43 = vld [vmem:[#allocation51_spill] sm:$0xff] }
  0xda   : > { %v10758_v8 = vcombine.low %v525_v3, %v535_v20  ;;  %v544_v14 = vrot.slane %v543_v22, 4  ;;  %v554_v30 = vrot.slane %v553_v0, 4  ;;  %v10911_v31 = vrot.slane %v10887_v55, 9  ;;  %12954 = vmatprep.subr.bf16.mxu1 %v14937_v45  ;;  %v10893_v27 = vld [vmem:[%s14341_s26 + $0xb4] sm:$0xe] }
  0xdb   : > { %12891 = vmatmul.mubr.bf16.gmra.mrb[16].mxu1 %v10964_v19  ;;  %v2833_v51 = vsel %vm14722_vm5, %v2831_v2, %v2832_v61  ;;  %v558_v4 = vrot.slane %v556_v23, 5  ;;  %v2836_v15 = vrot.slane %v17225_v40, 5  ;;  %v2839_v59 = vrot.slane %v17226_v25, 5  ;;  %v17235_v61 = vld [vmem:[#allocation52_spill] sm:$0xff]  ;;  %v17236_v55 = vld [vmem:[#allocation53_spill] sm:$0xff] }
  0xdc   : > { %12894 = vmatprep.mubr.bf16.mxu1 %v10965_v32  ;;  %v10966_v53 = vcombine.low %v2830_v11, %v2833_v51  ;;  %v549_v54 = vsel %vm14372_vm2, %v544_v14, %v17223_v26  ;;  %v567_v37 = vor.u32 %v17228_v1, %v17227_v58  ;;  %v577_v19 = vor.u32 %v17230_v49, %v17229_v57  ;;  %v10722_v11 = vld [vmem:[%s14341_s26 + $0xc8] sm:$0x1]  ;;  %v1244_v58 = vld [vmem:[%s14341_s26 + $0x4] sm:$0xf] }
  0xdd   : > { %12703 = vmatmul.mubr.bf16.gmra.mrb[20].mxu0 %v10758_v8  ;;  %v559_v12 = vsel %vm14372_vm2, %v554_v30, %v558_v4  ;;  %v2837_v24 = vsel %vm14722_vm5, %v10911_v31, %v2836_v15  ;;  %v2838_v44 = vrot.slane %v2836_v15, 4  ;;  %v580_v46 = vshll.u32 %v10716_v38, 16  ;;  %v17237_v8 = vld [vmem:[#allocation48_spill] sm:$0xff]  ;;  %v17238_v30 = vld [vmem:[#allocation50_spill] sm:$0xff] }
  0xde   : > { %v10759_v5 = vcombine.low %v549_v54, %v559_v12  ;;  %v568_v41 = vrot.slane %v567_v37, 4  ;;  %v578_v13 = vrot.slane %v577_v19, 4  ;;  %v10912_v28 = vrot.slane %v10890_v36, 9  ;;  %v10896_v38 = vld [vmem:[%s14341_s26 + $0xc0] sm:$0xe] }
  0xdf   : > { %v2840_v52 = vsel %vm14722_vm5, %v2838_v44, %v2839_v59  ;;  %v582_v16 = vrot.slane %v580_v46, 5  ;;  %v2843_v42 = vrot.slane %v17231_v18, 5  ;;  %v2846_v63 = vrot.slane %v17232_v60, 5  ;;  %v1243_v54 = vld [vmem:[%s14341_s26] sm:$0xf] }
  0xe0   : > { %12706 = vmatprep.mubr.bf16.mxu0 %v10759_v5  ;;  %v10967_v35 = vcombine.low %v2837_v24, %v2840_v52  ;;  %v573_v39 = vsel %vm14372_vm2, %v568_v41, %v17229_v57  ;;  %v591_v29 = vor.u32 %v17234_v43, %v17233_v9  ;;  %v601_v32 = vor.u32 %v17236_v55, %v17235_v61  ;;  %v17239_v12 = vld [vmem:[#allocation54_spill] sm:$0xff] }
  0xe1   : > { %v583_v3 = vsel %vm14372_vm2, %v578_v13, %v582_v16  ;;  %v2844_v6 = vsel %vm14722_vm5, %v10912_v28, %v2843_v42  ;;  %v2845_v47 = vrot.slane %v2843_v42, 4  ;;  %v604_v22 = vshll.u32 %v10719_v62, 16  ;;  %v3843_v13 = vld [vmem:[%s14341_s26 + $0x4] sm:$0xf]  ;;  %v3844_v42 = vld [vmem:[%s14341_s26 + $0x8] sm:$0x1] }
  0xe2   : > { %v10760_v26 = vcombine.low %v573_v39, %v583_v3  ;;  %v592_v56 = vrot.slane %v591_v29, 4  ;;  %v602_v0 = vrot.slane %v601_v32, 4  ;;  %v10913_v20 = vrot.slane %v10893_v27, 9  ;;  %v1247_v3 = vld [vmem:[%s14341_s26 + $0x10] sm:$0xf] }
  0xe3   : > { %12895 = vmatmul.mubr.bf16.gmra.mrb[20].mxu1 %v10966_v53  ;;  %v2847_v2 = vsel %vm14722_vm5, %v2845_v47, %v2846_v63  ;;  %v606_v23 = vrot.slane %v604_v22, 5  ;;  %v2850_v14 = vrot.slane %v17237_v8, 5  ;;  %v2853_v31 = vrot.slane %v17238_v30, 5  ;;  %v1248_v22 = vld [vmem:[%s14341_s26 + $0x14] sm:$0x1] }
  0xe4   : > { %12898 = vmatprep.mubr.bf16.mxu1 %v10967_v35  ;;  %v10968_v51 = vcombine.low %v2844_v6, %v2847_v2  ;;  %v597_v4 = vsel %vm14372_vm2, %v592_v56, %v17235_v61  ;;  %v615_v40 = vor.u32 %v14699_v50, %v14697_v34  ;;  %v625_v15 = vor.u32 %v14705_v21, %v14702_v7  ;;  %v1245_v34 = vld [vmem:[%s14341_s26 + $0x8] sm:$0x1]  ;;  %v3842_v50 = vld [vmem:[%s14341_s26] sm:$0xe] }
  0xe5   : > { %12707 = vmatmul.mubr.bf16.gmra.mrb[24].mxu0 %v10760_v26  ;;  %v607_v25 = vsel %vm14372_vm2, %v602_v0, %v606_v23  ;;  %v2851_v59 = vsel %vm14722_vm5, %v10913_v20, %v2850_v14  ;;  %v2852_v36 = vrot.slane %v2850_v14, 4  ;;  %v628_v53 = vshll.u32 %v10722_v11, 16  ;;  %v3845_v23 = vld [vmem:[%s14341_s26 + $0xc] sm:$0xe] }
  0xe6   : > { %v10761_v1 = vcombine.low %v597_v4, %v607_v25  ;;  %v616_v37 = vrot.slane %v615_v40, 4  ;;  %v626_v57 = vrot.slane %v625_v15, 4  ;;  %v10914_v49 = vrot.slane %v10896_v38, 9  ;;  %v3846_v38 = vld [vmem:[%s14341_s26 + $0x10] sm:$0xf] }
  0xe7   : > { %v2854_v21 = vsel %vm14722_vm5, %v2852_v36, %v2853_v31  ;;  %v630_v19 = vrot.slane %v628_v53, 5  ;;  %v2857_v24 = vrot.slane %v17239_v12, 5  ;;  %v2860_v44 = vrot.slane %v14694_v33, 5  ;;  %v1246_v33 = vld [vmem:[%s14341_s26 + $0xc] sm:$0xf] }
  0xe8   : > { %12710 = vmatprep.mubr.bf16.mxu0 %v10761_v1  ;;  %v10969_v46 = vcombine.low %v2851_v59, %v2854_v21  ;;  %v621_v62 = vsel %vm14372_vm2, %v616_v37, %v14702_v7  ;;  %v1292_v5 = vshrl.u32 %v1243_v54, 16  ;;  %v1295_v41 = vshll.u32 %v1243_v54, 16  ;;  %v3847_v25 = vld [vmem:[%s14341_s26 + $0x14] sm:$0x1]  ;;  %v1249_v59 = vld [vmem:[%s14341_s26 + $0x18] sm:$0xf] }
  0xe9   : > { %v631_v28 = vsel %vm14372_vm2, %v626_v57, %v630_v19  ;;  %v2858_v52 = vsel %vm14722_vm5, %v10914_v49, %v2857_v24  ;;  %v2859_v16 = vrot.slane %v2857_v24, 4  ;;  %v1301_v18 = vshll.u32 %v1244_v58, 16  ;;  %v1250_v1 = vld [vmem:[%s14341_s26 + $0x1c] sm:$0xf]  ;;  %v1251_v24 = vld [vmem:[%s14341_s26 + $0x20] sm:$0x1] }
  0xea   : > { %v10762_v60 = vcombine.low %v621_v62, %v631_v28  ;;  %v1294_v63 = vrot.slane %v1292_v5, 4  ;;  %v1297_v27 = vrot.slane %v1295_v41, 5  ;;  %v1305_v35 = vshrl.u32 %v1244_v58, 16  ;;  %v3850_v28 = vld [vmem:[%s14341_s26 + $0x20] sm:$0x1] }
  0xeb   : > { %12899 = vmatmul.mubr.bf16.gmra.mrb[24].mxu1 %v10968_v51  ;;  %v2861_v7 = vsel %vm14722_vm5, %v2859_v16, %v2860_v44  ;;  %v1303_v39 = vrot.slane %v1301_v18, 5  ;;  %v1311_v9 = vshll.u32 %v1245_v34, 16  ;;  %v10979_v43 = vrot.slane %v3842_v50, 9  ;;  %v3848_v44 = vld [vmem:[%s14341_s26 + $0x18] sm:$0xe] }
  0xec   : > { %12902 = vmatprep.mubr.bf16.mxu1 %v10969_v46  ;;  %v10970_v29 = vcombine.low %v2858_v52, %v2861_v7  ;;  %v1298_v61 = vor.u32 %v1297_v27, %v1294_v63  ;;  %v1307_v55 = vrot.slane %v1305_v35, 4  ;;  %v3940_v32 = vrot.slane %v3843_v13, 5  ;;  %v3849_v13 = vld [vmem:[%s14341_s26 + $0x1c] sm:$0xf]  ;;  %v1252_v52 = vld [vmem:[%s14341_s26 + $0x24] sm:$0xf] }
  0xed   : > { %12711 = vmatmul.mubr.bf16.gmra.mrb[28].mxu0 %v10762_v60  ;;  %v1313_v6 = vrot.slane %v1311_v9, 5  ;;  %v3943_v47 = vrot.slane %v3844_v42, 5  ;;  %v1316_v26 = vshrl.u32 %v1246_v33, 16  ;;  %v1319_v56 = vshll.u32 %v1246_v33, 16 }
  0xee   : > { %v1299_v0 = vrot.slane %v1298_v61, 4  ;;  %v1308_v20 = vor.u32 %v1307_v55, %v1303_v39  ;;  %v3941_v11 = vsel %vm14722_vm5, %v10979_v43, %v3940_v32  ;;  %v3942_v2 = vrot.slane %v3940_v32, 4 }
  0xef   : > { %v1318_v8 = vrot.slane %v1316_v26, 4  ;;  %v1321_v14 = vrot.slane %v1319_v56, 5  ;;  %v1325_v30 = vshll.u32 %v1247_v3, 16  ;;  %v1329_v31 = vshrl.u32 %v1247_v3, 16 }
  0xf0   : > { %v1304_v51 = vsel %vm14372_vm2, %v1299_v0, %v1303_v39  ;;  %v1309_v4 = vrot.slane %v1308_v20, 4  ;;  %v3944_v40 = vsel %vm14722_vm5, %v3942_v2, %v3943_v47  ;;  %v1335_v15 = vshll.u32 %v1248_v22, 16  ;;  %v13896_v47 = vld [vmem:[#allocation2 + $0xc8] sm:$0xff]   ;;  %v3851_v20 = vld [vmem:[%s14341_s26 + $0x24] sm:$0xe] }
  0xf1   : > { %v10995_v36 = vcombine.low %v3941_v11, %v3944_v40  ;;  %v1322_v53 = vor.u32 %v1321_v14, %v1318_v8  ;;  %v1327_v54 = vrot.slane %v1325_v30, 5  ;;  %v1331_v58 = vrot.slane %v1329_v31, 4  ;;  %v13897_v11 = vld [vmem:[#allocation2 + $0x1c8] sm:$0xff]  }
  0xf2   : > { %v1314_v37 = vsel %vm14372_vm2, %v1309_v4, %v1313_v6  ;;  %v1337_v57 = vrot.slane %v1335_v15, 5  ;;  %v10980_v49 = vrot.slane %v3845_v23, 9  ;;  %v3947_v34 = vrot.slane %v3846_v38, 5  ;;  %v1254_v6 = vld [vmem:[%s14341_s26 + $0x2c] sm:$0x1]  ;;  %v13898_v15 = vld [vmem:[#allocation2 + $0xd0] sm:$0xff]  }
  0xf3   : > { %12903 = vmatmul.mubr.bf16.gmra.mrb[28].mxu1 %v10970_v29  ;;  %v10771_v50 = vcombine.low %v1304_v51, %v1314_v37  ;;  %v1323_v21 = vrot.slane %v1322_v53, 4  ;;  %v1332_v19 = vor.u32 %v1331_v58, %v1327_v54  ;;  %v3950_v12 = vrot.slane %v3847_v25, 5  ;;  %v1253_v29 = vld [vmem:[%s14341_s26 + $0x28] sm:$0xf]  ;;  %v3853_v40 = vld [vmem:[%s14341_s26 + $0x2c] sm:$0x1] }
  0xf4   : > { %12922 = vmatprep.mubr.bf16.mxu1 %v10995_v36  ;;  %v3948_v46 = vsel %vm14722_vm5, %v10980_v49, %v3947_v34  ;;  %v3949_v62 = vrot.slane %v3947_v34, 4  ;;  %v1340_v5 = vshrl.u32 %v1249_v59, 16  ;;  %v1343_v41 = vshll.u32 %v1249_v59, 16  ;;  %v3852_v30 = vld [vmem:[%s14341_s26 + $0x28] sm:$0xf] }
  0xf5   : > { %12730 = vmatprep.mubr.bf16.mxu0 %v10771_v50  ;;  %v1328_v16 = vsel %vm14372_vm2, %v1323_v21, %v1327_v54  ;;  %v1333_v18 = vrot.slane %v1332_v19, 4  ;;  %v1349_v42 = vshll.u32 %v1250_v1, 16  ;;  %v1353_v33 = vshrl.u32 %v1250_v1, 16  ;;  %v13899_v54 = vld [vmem:[#allocation2 + $0x1d0] sm:$0xff]   ;;  %v1257_v19 = vld [vmem:[%s14341_s26 + $0x38] sm:$0x1] }
  0xf6   : > { %v3951_v60 = vsel %vm14722_vm5, %v3949_v62, %v3950_v12  ;;  %v1342_v63 = vrot.slane %v1340_v5, 4  ;;  %v1345_v27 = vrot.slane %v1343_v41, 5  ;;  %v1359_v35 = vshll.u32 %v1251_v24, 16  ;;  %v13900_v12 = vld [vmem:[#allocation2 + $0xd8] sm:$0xff]   ;;  %v3854_v5 = vld [vmem:[%s14341_s26 + $0x30] sm:$0xe] }
  0xf7   : > { %v1338_v7 = vsel %vm14372_vm2, %v1333_v18, %v1337_v57  ;;  %v10996_v39 = vcombine.low %v3948_v46, %v3951_v60  ;;  %v1351_v9 = vrot.slane %v1349_v42, 5  ;;  %v1355_v43 = vrot.slane %v1353_v33, 4  ;;  %v1256_v57 = vld [vmem:[%s14341_s26 + $0x34] sm:$0xf] }
  0xf8   : > { %v10772_v61 = vcombine.low %v1328_v16, %v1338_v7  ;;  %v1346_v55 = vor.u32 %v1345_v27, %v1342_v63  ;;  %v1361_v32 = vrot.slane %v1359_v35, 5  ;;  %v10981_v3 = vrot.slane %v3848_v44, 9  ;;  %v3855_v41 = vld [vmem:[%s14341_s26 + $0x34] sm:$0xf]  ;;  %v13901_v63 = vld [vmem:[#allocation2 + $0x1d8] sm:$0xff]  }
  0xf9   : > { %v1356_v22 = vor.u32 %v1355_v43, %v1351_v9  ;;  %v3954_v26 = vrot.slane %v3849_v13, 5  ;;  %v3957_v56 = vrot.slane %v3850_v28, 5  ;;  %v1364_v0 = vshrl.u32 %v1252_v52, 16  ;;  %v1258_v43 = vld [vmem:[%s14341_s26 + $0x3c] sm:$0xf] }
  0xfa   : > { %12731 = vmatmul.mubr.bf16.vlgmr.msra.gmra.mrb[0].mxu0 %v10772_v61  ;;  %v1347_v2 = vrot.slane %v1346_v55, 4  ;;  %v1367_v23 = vshll.u32 %v1252_v52, 16  ;;  %v1373_v8 = vshll.u32 %v1253_v29, 16  ;;  %v1377_v14 = vshrl.u32 %v1253_v29, 16 }
  0xfb   : > { %12923 = vmatmul.mubr.bf16.vlgmr.msra.gmra.mrb[0].mxu1 %v10996_v39  ;;  %12763 = vmatpush3.bf16.msra.mxu0 %v14904_v10  ;;  %v1357_v31 = vrot.slane %v1356_v22, 4  ;;  %v3955_v38 = vsel %vm14722_vm5, %v10981_v3, %v3954_v26  ;;  %v3956_v51 = vrot.slane %v3954_v26, 4  ;;  %v1366_v4 = vrot.slane %v1364_v0, 4  ;;  %v1255_v10 = vld [vmem:[%s14341_s26 + $0x30] sm:$0xf]  ;;  %v13902_v3 = vld [vmem:[#allocation2 + $0xe0] sm:$0xff]  }
  0xfc   : > { %12955 = vmatpush3.bf16.msra.mxu1 %v14937_v45  ;;  %v1352_v25 = vsel %vm14372_vm2, %v1347_v2, %v1351_v9  ;;  %v1369_v59 = vrot.slane %v1367_v23, 5  ;;  %v1375_v36 = vrot.slane %v1373_v8, 5  ;;  %v1379_v53 = vrot.slane %v1377_v14, 4  ;;  %12764 = vmatprep.subr.bf16.mxu0 %v13896_v47  ;;  %v3856_v9 = vld [vmem:[%s14341_s26 + $0x38] sm:$0x1]  ;;  %v13903_v14 = vld [vmem:[#allocation2 + $0x1e0] sm:$0xff]  }
  0xfd   : > { %v1362_v58 = vsel %vm14372_vm2, %v1357_v31, %v1361_v32  ;;  %v3958_v1 = vsel %vm14722_vm5, %v3956_v51, %v3957_v56  ;;  %v1383_v37 = vshll.u32 %v1254_v6, 16  ;;  %v10982_v45 = vrot.slane %v3851_v20, 9  ;;  %12956 = vmatprep.subr.bf16.mxu1 %v13897_v11  ;;  %v1259_v56 = vld [vmem:[%s14341_s26 + $0x40] sm:$0xf]  ;;  %v1260_v0 = vld [vmem:[%s14341_s26 + $0x44] sm:$0x1] }
  0xfe   : > { %v10773_v49 = vcombine.low %v1352_v25, %v1362_v58  ;;  %v10997_v34 = vcombine.low %v3955_v38, %v3958_v1  ;;  %v1370_v50 = vor.u32 %v1369_v59, %v1366_v4  ;;  %v1380_v21 = vor.u32 %v1379_v53, %v1375_v36  ;;  %v3857_v8 = vld [vmem:[%s14341_s26 + $0x3c] sm:$0xe]  ;;  %v3858_v4 = vld [vmem:[%s14341_s26 + $0x40] sm:$0xf] }
  0xff   : > { %v1385_v24 = vrot.slane %v1383_v37, 5  ;;  %v3961_v44 = vrot.slane %v3852_v30, 5  ;;  %v3964_v46 = vrot.slane %v3853_v40, 5  ;;  %12765 = vmatpush3.bf16.msra.mxu0 %v13896_v47  ;;  %v1388_v62 = vshrl.u32 %v1255_v10, 16  ;;  %v3859_v40 = vld [vmem:[%s14341_s26 + $0x44] sm:$0x1] }
 0x100   : > { %12734 = vmatprep.mubr.bf16.mxu0 %v10773_v49  ;;  %12926 = vmatprep.mubr.bf16.mxu1 %v10997_v34  ;;  %v1371_v13 = vrot.slane %v1370_v50, 4  ;;  %v1381_v28 = vrot.slane %v1380_v21, 4  ;;  %v1391_v52 = vshll.u32 %v1255_v10, 16  ;;  %v1397_v16 = vshll.u32 %v1256_v57, 16  ;;  %v1261_v10 = vld [vmem:[%s14341_s26 + $0x48] sm:$0xf] }
 0x101   : > { %v3962_v18 = vsel %vm14722_vm5, %v10982_v45, %v3961_v44  ;;  %v3963_v42 = vrot.slane %v3961_v44, 4  ;;  %12957 = vmatpush3.bf16.msra.mxu1 %v13897_v11  ;;  %v1390_v33 = vrot.slane %v1388_v62, 4  ;;  %v1401_v60 = vshrl.u32 %v1256_v57, 16  ;;  %12766 = vmatprep.subr.bf16.mxu0 %v13898_v15  ;;  %v1262_v50 = vld [vmem:[%s14341_s26 + $0x4c] sm:$0xf] }
 0x102   : > { %v1376_v27 = vsel %vm14372_vm2, %v1371_v13, %v1375_v36  ;;  %v1386_v35 = vsel %vm14372_vm2, %v1381_v28, %v1385_v24  ;;  %v1393_v7 = vrot.slane %v1391_v52, 5  ;;  %v1399_v39 = vrot.slane %v1397_v16, 5  ;;  %12958 = vmatprep.subr.bf16.mxu1 %v13899_v54  ;;  %v13905_v21 = vld [vmem:[#allocation2 + $0x1e8] sm:$0xff]   ;;  %v13906_v52 = vld [vmem:[#allocation2 + $0xf0] sm:$0xff]  }
 0x103   : > { %v10774_v29 = vcombine.low %v1376_v27, %v1386_v35  ;;  %v3965_v61 = vsel %vm14722_vm5, %v3963_v42, %v3964_v46  ;;  %v1403_v55 = vrot.slane %v1401_v60, 4  ;;  %v1407_v32 = vshll.u32 %v1257_v19, 16  ;;  %12767 = vmatpush3.bf16.msra.mxu0 %v13898_v15  ;;  %v13904_v15 = vld [vmem:[#allocation2 + $0xe8] sm:$0xff]   ;;  %v1263_v46 = vld [vmem:[%s14341_s26 + $0x50] sm:$0x1] }
 0x104   : > { %v10998_v6 = vcombine.low %v3962_v18, %v3965_v61  ;;  %v1394_v47 = vor.u32 %v1393_v7, %v1390_v33  ;;  %v10983_v22 = vrot.slane %v3854_v5, 9  ;;  %v3968_v26 = vrot.slane %v3855_v41, 5  ;;  %12768 = vmatprep.subr.bf16.mxu0 %v13900_v12  ;;  %v3860_v62 = vld [vmem:[%s14341_s26 + $0x48] sm:$0xe]  ;;  %v3861_v60 = vld [vmem:[%s14341_s26 + $0x4c] sm:$0xf] }
 0x105   : > { %12735 = vmatmul.mubr.bf16.gmra.mrb[4].mxu0 %v10774_v29  ;;  %v1404_v20 = vor.u32 %v1403_v55, %v1399_v39  ;;  %v1409_v11 = vrot.slane %v1407_v32, 5  ;;  %v3971_v2 = vrot.slane %v3856_v9, 5  ;;  %v1412_v23 = vshrl.u32 %v1258_v43, 16  ;;  %12959 = vmatpush3.bf16.msra.mxu1 %v13899_v54  ;;  %v1264_v55 = vld [vmem:[%s14341_s26 + $0x54] sm:$0xf] }
 0x106   : > { %12927 = vmatmul.mubr.bf16.gmra.mrb[4].mxu1 %v10998_v6  ;;  %v1395_v30 = vrot.slane %v1394_v47, 4  ;;  %v3969_v31 = vsel %vm14722_vm5, %v10983_v22, %v3968_v26  ;;  %v3970_v38 = vrot.slane %v3968_v26, 4  ;;  %v1415_v51 = vshll.u32 %v1258_v43, 16  ;;  %12960 = vmatprep.subr.bf16.mxu1 %v13901_v63  ;;  %v1265_v22 = vld [vmem:[%s14341_s26 + $0x58] sm:$0xf]  ;;  %v13907_v26 = vld [vmem:[#allocation2 + $0x1f0] sm:$0xff]  }
 0x107   : > { %v1405_v25 = vrot.slane %v1404_v20, 4  ;;  %v1414_v59 = vrot.slane %v1412_v23, 4  ;;  %v1421_v36 = vshll.u32 %v1259_v56, 16  ;;  %v1425_v53 = vshrl.u32 %v1259_v56, 16  ;;  %12769 = vmatpush3.bf16.msra.mxu0 %v13900_v12  ;;  %v13908_v23 = vld [vmem:[#allocation2 + $0xf8] sm:$0xff]  }
 0x108   : > { %v1400_v54 = vsel %vm14372_vm2, %v1395_v30, %v1399_v39  ;;  %v3972_v58 = vsel %vm14722_vm5, %v3970_v38, %v3971_v2  ;;  %v1417_v1 = vrot.slane %v1415_v51, 5  ;;  %v1431_v37 = vshll.u32 %v1260_v0, 16  ;;  %12770 = vmatprep.subr.bf16.mxu0 %v13902_v3  ;;  %v3862_v39 = vld [vmem:[%s14341_s26 + $0x50] sm:$0x1]  ;;  %v1266_v2 = vld [vmem:[%s14341_s26 + $0x5c] sm:$0x1] }
 0x109   : > { %v1410_v45 = vsel %vm14372_vm2, %v1405_v25, %v1409_v11  ;;  %v10999_v57 = vcombine.low %v3969_v31, %v3972_v58  ;;  %v1423_v49 = vrot.slane %v1421_v36, 5  ;;  %v1427_v34 = vrot.slane %v1425_v53, 4  ;;  %12961 = vmatpush3.bf16.msra.mxu1 %v13901_v63  ;;  %v3863_v51 = vld [vmem:[%s14341_s26 + $0x54] sm:$0xe]  ;;  %v3865_v36 = vld [vmem:[%s14341_s26 + $0x5c] sm:$0x1] }
 0x10a   : > { %v10775_v19 = vcombine.low %v1400_v54, %v1410_v45  ;;  %v1418_v12 = vor.u32 %v1417_v1, %v1414_v59  ;;  %v1433_v24 = vrot.slane %v1431_v37, 5  ;;  %v10984_v44 = vrot.slane %v3857_v8, 9  ;;  %12962 = vmatprep.subr.bf16.mxu1 %v13903_v14  ;;  %v13909_v8 = vld [vmem:[#allocation2 + $0x1f8] sm:$0xff]   ;;  %v15120_v1 = vld [vmem:[#allocation2 + $0x240] sm:$0xff]  }
 0x10b   : > { %12930 = vmatprep.mubr.bf16.mxu1 %v10999_v57  ;;  %v1428_v5 = vor.u32 %v1427_v34, %v1423_v49  ;;  %v3975_v41 = vrot.slane %v3858_v4, 5  ;;  %v3978_v13 = vrot.slane %v3859_v40, 5  ;;  %v1436_v28 = vshrl.u32 %v1261_v10, 16  ;;  %12771 = vmatpush3.bf16.msra.mxu0 %v13902_v3  ;;  %v3864_v4 = vld [vmem:[%s14341_s26 + $0x58] sm:$0xf] }
 0x10c   : > { %12738 = vmatprep.mubr.bf16.mxu0 %v10775_v19  ;;  %v1419_v16 = vrot.slane %v1418_v12, 4  ;;  %v1439_v18 = vshll.u32 %v1261_v10, 16  ;;  %v1445_v42 = vshll.u32 %v1262_v50, 16  ;;  %v1449_v33 = vshrl.u32 %v1262_v50, 16  ;;  %12772 = vmatprep.subr.bf16.mxu0 %v13904_v15  ;;  %v1267_v34 = vld [vmem:[%s14341_s26 + $0x60] sm:$0xf] }
 0x10d   : > { %v1429_v63 = vrot.slane %v1428_v5, 4  ;;  %v3976_v27 = vsel %vm14722_vm5, %v10984_v44, %v3975_v41  ;;  %v3977_v35 = vrot.slane %v3975_v41, 4  ;;  %v1438_v7 = vrot.slane %v1436_v28, 4  ;;  %12963 = vmatpush3.bf16.msra.mxu1 %v13903_v14  ;;  %v1268_v50 = vld [vmem:[%s14341_s26 + $0x64] sm:$0xf] }
 0x10e   : > { %v1424_v9 = vsel %vm14372_vm2, %v1419_v16, %v1423_v49  ;;  %v1441_v43 = vrot.slane %v1439_v18, 5  ;;  %v1447_v29 = vrot.slane %v1445_v42, 5  ;;  %v1451_v61 = vrot.slane %v1449_v33, 4  ;;  %12964 = vmatprep.subr.bf16.mxu1 %v13905_v21  ;;  %v3866_v42 = vld [vmem:[%s14341_s26 + $0x60] sm:$0xe] }
 0x10f   : > { %v1434_v32 = vsel %vm14372_vm2, %v1429_v63, %v1433_v24  ;;  %v3979_v3 = vsel %vm14722_vm5, %v3977_v35, %v3978_v13  ;;  %v1455_v6 = vshll.u32 %v1263_v46, 16  ;;  %v10985_v47 = vrot.slane %v3860_v62, 9  ;;  %12773 = vmatpush3.bf16.msra.mxu0 %v13904_v15  ;;  %v1269_v46 = vld [vmem:[%s14341_s26 + $0x68] sm:$0x1]  ;;  %v3867_v35 = vld [vmem:[%s14341_s26 + $0x64] sm:$0xf] }
 0x110   : > { %v10776_v56 = vcombine.low %v1424_v9, %v1434_v32  ;;  %v11000_v0 = vcombine.low %v3976_v27, %v3979_v3  ;;  %v1442_v20 = vor.u32 %v1441_v43, %v1438_v7  ;;  %v1452_v11 = vor.u32 %v1451_v61, %v1447_v29  ;;  %12774 = vmatprep.subr.bf16.mxu0 %v13906_v52  ;;  %v3868_v7 = vld [vmem:[%s14341_s26 + $0x68] sm:$0x1] }
 0x111   : > { %v1457_v14 = vrot.slane %v1455_v6, 5  ;;  %v3982_v30 = vrot.slane %v3861_v60, 5  ;;  %v3985_v31 = vrot.slane %v3862_v39, 5  ;;  %v1460_v38 = vshrl.u32 %v1264_v55, 16  ;;  %12965 = vmatpush3.bf16.msra.mxu1 %v13905_v21  ;;  %v15128_v21 = vld [vmem:[#allocation2 + $0x340] sm:$0xff]  }
 0x112   : > { %12739 = vmatmul.mubr.bf16.gmra.mrb[8].mxu0 %v10776_v56  ;;  %12931 = vmatmul.mubr.bf16.gmra.mrb[8].mxu1 %v11000_v0  ;;  %v1443_v40 = vrot.slane %v1442_v20, 4  ;;  %v1453_v15 = vrot.slane %v1452_v11, 4  ;;  %v1463_v25 = vshll.u32 %v1264_v55, 16  ;;  %v1469_v59 = vshll.u32 %v1265_v22, 16  ;;  %v1270_v39 = vld [vmem:[%s14341_s26 + $0x6c] sm:$0xf] }
 0x113   : > { %v3983_v53 = vsel %vm14722_vm5, %v10985_v47, %v3982_v30  ;;  %v3984_v10 = vrot.slane %v3982_v30, 4  ;;  %v1462_v54 = vrot.slane %v1460_v38, 4  ;;  %v1473_v58 = vshrl.u32 %v1265_v22, 16  ;;  %12775 = vmatpush3.bf16.msra.mxu0 %v13906_v52  ;;  %12966 = vmatprep.subr.bf16.mxu1 %v13907_v26  ;;  %v1271_v47 = vld [vmem:[%s14341_s26 + $0x70] sm:$0xf] }
 0x114   : > { %v1448_v37 = vsel %vm14372_vm2, %v1443_v40, %v1447_v29  ;;  %v1458_v45 = vsel %vm14372_vm2, %v1453_v15, %v1457_v14  ;;  %v1465_v57 = vrot.slane %v1463_v25, 5  ;;  %v1471_v49 = vrot.slane %v1469_v59, 5  ;;  %12776 = vmatprep.subr.bf16.mxu0 %v13908_v23  ;;  %v3869_v14 = vld [vmem:[%s14341_s26 + $0x6c] sm:$0xe]  ;;  %v15151_v59 = vld [vmem:[%s14341_s26 + $0x70] sm:$0xf] }
 0x115   : > { %v10777_v19 = vcombine.low %v1448_v37, %v1458_v45  ;;  %v3986_v12 = vsel %vm14722_vm5, %v3984_v10, %v3985_v31  ;;  %v1475_v24 = vrot.slane %v1473_v58, 4  ;;  %v1479_v44 = vshll.u32 %v1266_v2, 16  ;;  %12967 = vmatpush3.bf16.msra.mxu1 %v13907_v26  ;;  %v1273_v37 = vld [vmem:[%s14341_s26 + $0x78] sm:$0xf] }
 0x116   : > { %v11001_v62 = vcombine.low %v3983_v53, %v3986_v12  ;;  %v1466_v5 = vor.u32 %v1465_v57, %v1462_v54  ;;  %v10986_v41 = vrot.slane %v3863_v51, 9  ;;  %v3989_v13 = vrot.slane %v3864_v4, 5  ;;  %12968 = vmatprep.subr.bf16.mxu1 %v13909_v8 }
 0x117   : > { %12742 = vmatprep.mubr.bf16.mxu0 %v10777_v19  ;;  %v1476_v28 = vor.u32 %v1475_v24, %v1471_v49  ;;  %v1481_v52 = vrot.slane %v1479_v44, 5  ;;  %v3992_v16 = vrot.slane %v3865_v36, 5  ;;  %v1484_v18 = vshrl.u32 %v1267_v34, 16  ;;  %12777 = vmatpush3.bf16.msra.mxu0 %v13908_v23  ;;  %v3871_v36 = vld [vmem:[%s14341_s26 + $0x74] sm:$0x1] }
 0x118   : > { %12934 = vmatprep.mubr.bf16.mxu1 %v11001_v62  ;;  %v1467_v33 = vrot.slane %v1466_v5, 4  ;;  %v3990_v60 = vsel %vm14722_vm5, %v10986_v41, %v3989_v13  ;;  %v3991_v63 = vrot.slane %v3989_v13, 4  ;;  %v1487_v27 = vshll.u32 %v1267_v34, 16  ;;  %13002 = vmatprep.subr.bf16.mxu0 %v15120_v1  ;;  %v1274_v44 = vld [vmem:[%s14341_s26 + $0x7c] sm:$0xf] }
 0x119   : > { %v1477_v9 = vrot.slane %v1476_v28, 4  ;;  %v1486_v43 = vrot.slane %v1484_v18, 4  ;;  %v1493_v29 = vshll.u32 %v1268_v50, 16  ;;  %v1497_v61 = vshrl.u32 %v1268_v50, 16  ;;  %12969 = vmatpush3.bf16.msra.mxu1 %v13909_v8  ;;  %v1272_v8 = vld [vmem:[%s14341_s26 + $0x74] sm:$0x1] }
 0x11a   : > { %v1472_v55 = vsel %vm14372_vm2, %v1467_v33, %v1471_v49  ;;  %v3993_v32 = vsel %vm14722_vm5, %v3991_v63, %v3992_v16  ;;  %v1489_v3 = vrot.slane %v1487_v27, 5  ;;  %v1503_v6 = vshll.u32 %v1269_v46, 16  ;;  %13194 = vmatprep.subr.bf16.mxu1 %v15128_v21  ;;  %v1275_v13 = vld [vmem:[%s14341_s26 + $0x80] sm:$0x1]  ;;  %v15168_v33 = vld [vmem:[%s14341_s26 + $0x7c] sm:$0xf] }
 0x11b   : > { %v1482_v22 = vsel %vm14372_vm2, %v1477_v9, %v1481_v52  ;;  %v11002_v26 = vcombine.low %v3990_v60, %v3993_v32  ;;  %v1495_v56 = vrot.slane %v1493_v29, 5  ;;  %v1499_v0 = vrot.slane %v1497_v61, 4 }
 0x11c   : > { %v10778_v20 = vcombine.low %v1472_v55, %v1482_v22  ;;  %v1490_v11 = vor.u32 %v1489_v3, %v1486_v43  ;;  %v1505_v2 = vrot.slane %v1503_v6, 5  ;;  %v10987_v23 = vrot.slane %v3866_v42, 9  ;;  %v3872_v42 = vld [vmem:[%s14341_s26 + $0x78] sm:$0xe] }
 0x11d   : > { %12935 = vmatmul.mubr.bf16.gmra.mrb[12].mxu1 %v11002_v26  ;;  %v1500_v30 = vor.u32 %v1499_v0, %v1495_v56  ;;  %v3996_v31 = vrot.slane %v3867_v35, 5  ;;  %v3999_v38 = vrot.slane %v3868_v7, 5  ;;  %v1508_v51 = vshrl.u32 %v1270_v39, 16  ;;  %v15171_v7 = vld [vmem:[%s14341_s26 + $0x80] sm:$0x1] }
 0x11e   : > { %12743 = vmatmul.mubr.bf16.gmra.mrb[12].mxu0 %v10778_v20  ;;  %v1491_v4 = vrot.slane %v1490_v11, 4  ;;  %v1511_v40 = vshll.u32 %v1270_v39, 16  ;;  %v1517_v15 = vshll.u32 %v1271_v47, 16  ;;  %v1521_v25 = vshrl.u32 %v1271_v47, 16  ;;  %v1276_v39 = vld [vmem:[%s14341_s26 + $0x84] sm:$0xf] }
 0x11f   : > { %v1501_v53 = vrot.slane %v1500_v30, 4  ;;  %v3997_v10 = vsel %vm14722_vm5, %v10987_v23, %v3996_v31  ;;  %v3998_v54 = vrot.slane %v3996_v31, 4  ;;  %v1510_v58 = vrot.slane %v1508_v51, 4  ;;  %v1277_v47 = vld [vmem:[%s14341_s26 + $0x88] sm:$0xf] }
 0x120   : > { %v1496_v45 = vsel %vm14372_vm2, %v1491_v4, %v1495_v56  ;;  %v1513_v57 = vrot.slane %v1511_v40, 5  ;;  %v1519_v49 = vrot.slane %v1517_v15, 5  ;;  %v1523_v34 = vrot.slane %v1521_v25, 4  ;;  %v1278_v20 = vld [vmem:[%s14341_s26 + $0x8c] sm:$0x1] }
 0x121   : > { %v1506_v50 = vsel %vm14372_vm2, %v1501_v53, %v1505_v2  ;;  %v4000_v19 = vsel %vm14722_vm5, %v3998_v54, %v3999_v38  ;;  %v1527_v12 = vshll.u32 %v1272_v8, 16  ;;  %v10988_v24 = vrot.slane %v3869_v14, 9  ;;  %v3875_v51 = vld [vmem:[%s14341_s26 + $0x84] sm:$0xe]  ;;  %v15193_v53 = vld [vmem:[%s14341_s26 + $0x8c] sm:$0x1] }
 0x122   : > { %v10779_v46 = vcombine.low %v1496_v45, %v1506_v50  ;;  %v11003_v62 = vcombine.low %v3997_v10, %v4000_v19  ;;  %v1514_v5 = vor.u32 %v1513_v57, %v1510_v58  ;;  %v1524_v41 = vor.u32 %v1523_v34, %v1519_v49  ;;  %v1279_v10 = vld [vmem:[%s14341_s26 + $0x90] sm:$0xf]  ;;  %v1280_v19 = vld [vmem:[%s14341_s26 + $0x94] sm:$0xf] }
 0x123   : > { %v1529_v28 = vrot.slane %v1527_v12, 5  ;;  %v4003_v52 = vrot.slane %v15151_v59, 5  ;;  %v4006_v16 = vrot.slane %v3871_v36, 5  ;;  %v1532_v18 = vshrl.u32 %v1273_v37, 16  ;;  %v15190_v36 = vld [vmem:[%s14341_s26 + $0x88] sm:$0xf] }
 0x124   : > { %12746 = vmatprep.mubr.bf16.mxu0 %v10779_v46  ;;  %12938 = vmatprep.mubr.bf16.mxu1 %v11003_v62  ;;  %v1515_v60 = vrot.slane %v1514_v5, 4  ;;  %v1525_v63 = vrot.slane %v1524_v41, 4  ;;  %v1535_v27 = vshll.u32 %v1273_v37, 16  ;;  %v1541_v35 = vshll.u32 %v1274_v44, 16 }
 0x125   : > { %v4004_v9 = vsel %vm14722_vm5, %v10988_v24, %v4003_v52  ;;  %v4005_v43 = vrot.slane %v4003_v52, 4  ;;  %v1534_v29 = vrot.slane %v1532_v18, 4  ;;  %v1545_v61 = vshrl.u32 %v1274_v44, 16  ;;  %v3878_v52 = vld [vmem:[%s14341_s26 + $0x90] sm:$0xe] }
 0x126   : > { %v1520_v55 = vsel %vm14372_vm2, %v1515_v60, %v1519_v49  ;;  %v1530_v32 = vsel %vm14372_vm2, %v1525_v63, %v1529_v28  ;;  %v1537_v3 = vrot.slane %v1535_v27, 5  ;;  %v1543_v6 = vrot.slane %v1541_v35, 5  ;;  %v1281_v28 = vld [vmem:[%s14341_s26 + $0x98] sm:$0x1] }
 0x127   : > { %v10780_v22 = vcombine.low %v1520_v55, %v1530_v32  ;;  %v4007_v26 = vsel %vm14722_vm5, %v4005_v43, %v4006_v16  ;;  %v1547_v56 = vrot.slane %v1545_v61, 4  ;;  %v1551_v0 = vshll.u32 %v1275_v13, 16  ;;  %v15211_v43 = vld [vmem:[%s14341_s26 + $0x98] sm:$0x1] }
 0x128   : > { %v11004_v11 = vcombine.low %v4004_v9, %v4007_v26  ;;  %v1538_v2 = vor.u32 %v1537_v3, %v1534_v29  ;;  %v10989_v23 = vrot.slane %v3872_v42, 9  ;;  %v4010_v8 = vrot.slane %v15168_v33, 5  ;;  %v15208_v9 = vld [vmem:[%s14341_s26 + $0x94] sm:$0xf]  ;;  %v1282_v29 = vld [vmem:[%s14341_s26 + $0x9c] sm:$0xf] }
 0x129   : > { %12747 = vmatmul.mubr.bf16.gmra.mrb[16].mxu0 %v10780_v22  ;;  %v1548_v14 = vor.u32 %v1547_v56, %v1543_v6  ;;  %v1553_v30 = vrot.slane %v1551_v0, 5  ;;  %v4013_v31 = vrot.slane %v15171_v7, 5  ;;  %v1556_v38 = vshrl.u32 %v1276_v39, 16 }
 0x12a   : > { %12939 = vmatmul.mubr.bf16.gmra.mrb[16].mxu1 %v11004_v11  ;;  %v1539_v4 = vrot.slane %v1538_v2, 4  ;;  %v4011_v40 = vsel %vm14722_vm5, %v10989_v23, %v4010_v8  ;;  %v4012_v15 = vrot.slane %v4010_v8, 4  ;;  %v1559_v25 = vshll.u32 %v1276_v39, 16  ;;  %v1283_v2 = vld [vmem:[%s14341_s26 + $0xa0] sm:$0xf] }
 0x12b   : > { %v1549_v54 = vrot.slane %v1548_v14, 4  ;;  %v1558_v58 = vrot.slane %v1556_v38, 4  ;;  %v1565_v37 = vshll.u32 %v1277_v47, 16  ;;  %v1569_v45 = vshrl.u32 %v1277_v47, 16 }
 0x12c   : > { %v1544_v57 = vsel %vm14372_vm2, %v1539_v4, %v1543_v6  ;;  %v4014_v49 = vsel %vm14722_vm5, %v4012_v15, %v4013_v31  ;;  %v1561_v34 = vrot.slane %v1559_v25, 5  ;;  %v1575_v50 = vshll.u32 %v1278_v20, 16  ;;  %v1284_v31 = vld [vmem:[%s14341_s26 + $0xa4] sm:$0x1]  ;;  %v3881_v15 = vld [vmem:[%s14341_s26 + $0x9c] sm:$0xe] }
 0x12d   : > { %v1554_v12 = vsel %vm14372_vm2, %v1549_v54, %v1553_v30  ;;  %v11005_v24 = vcombine.low %v4011_v40, %v4014_v49  ;;  %v1567_v44 = vrot.slane %v1565_v37, 5  ;;  %v1571_v46 = vrot.slane %v1569_v45, 4  ;;  %v15228_v25 = vld [vmem:[%s14341_s26 + $0xa0] sm:$0xf]  ;;  %v15231_v45 = vld [vmem:[%s14341_s26 + $0xa4] sm:$0x1] }
 0x12e   : > { %v10781_v62 = vcombine.low %v1544_v57, %v1554_v12  ;;  %v1562_v5 = vor.u32 %v1561_v34, %v1558_v58  ;;  %v1577_v41 = vrot.slane %v1575_v50, 5  ;;  %v10990_v13 = vrot.slane %v3875_v51, 9  ;;  %v1285_v57 = vld [vmem:[%s14341_s26 + $0xa8] sm:$0xf] }
 0x12f   : > { %12942 = vmatprep.mubr.bf16.mxu1 %v11005_v24  ;;  %v1572_v16 = vor.u32 %v1571_v46, %v1567_v44  ;;  %v4017_v18 = vrot.slane %v15190_v36, 5  ;;  %v4020_v42 = vrot.slane %v15193_v53, 5  ;;  %v1580_v60 = vshrl.u32 %v1279_v10, 16 }
 0x130   : > { %12750 = vmatprep.mubr.bf16.mxu0 %v10781_v62  ;;  %v1563_v63 = vrot.slane %v1562_v5, 4  ;;  %v1583_v27 = vshll.u32 %v1279_v10, 16  ;;  %v1589_v35 = vshll.u32 %v1280_v19, 16  ;;  %v1593_v39 = vshrl.u32 %v1280_v19, 16  ;;  %v1286_v62 = vld [vmem:[%s14341_s26 + $0xac] sm:$0xf] }
 0x131   : > { %v1573_v61 = vrot.slane %v1572_v16, 4  ;;  %v4018_v55 = vsel %vm14722_vm5, %v10990_v13, %v4017_v18  ;;  %v4019_v32 = vrot.slane %v4017_v18, 4  ;;  %v1582_v3 = vrot.slane %v1580_v60, 4 }
 0x132   : > { %v1568_v6 = vsel %vm14372_vm2, %v1563_v63, %v1567_v44  ;;  %v1585_v47 = vrot.slane %v1583_v27, 5  ;;  %v1591_v22 = vrot.slane %v1589_v35, 5  ;;  %v1595_v26 = vrot.slane %v1593_v39, 4 }
 0x133   : > { %v1578_v56 = vsel %vm14372_vm2, %v1573_v61, %v1577_v41  ;;  %v4021_v0 = vsel %vm14722_vm5, %v4019_v32, %v4020_v42  ;;  %v1599_v20 = vshll.u32 %v1281_v28, 16  ;;  %v10991_v11 = vrot.slane %v3878_v52, 9  ;;  %v1287_v52 = vld [vmem:[%s14341_s26 + $0xb0] sm:$0x1] }
 0x134   : > { %v10782_v23 = vcombine.low %v1568_v6, %v1578_v56  ;;  %v11006_v8 = vcombine.low %v4018_v55, %v4021_v0  ;;  %v1586_v14 = vor.u32 %v1585_v47, %v1582_v3  ;;  %v1596_v30 = vor.u32 %v1595_v26, %v1591_v22  ;;  %v15250_v6 = vld [vmem:[%s14341_s26 + $0xac] sm:$0xf]  ;;  %v15253_v47 = vld [vmem:[%s14341_s26 + $0xb0] sm:$0x1] }
 0x135   : > { %v1601_v38 = vrot.slane %v1599_v20, 5  ;;  %v4024_v51 = vrot.slane %v15208_v9, 5  ;;  %v4027_v4 = vrot.slane %v15211_v43, 5  ;;  %v1604_v40 = vshrl.u32 %v1282_v29, 16 }
 0x136   : > { %12751 = vmatmul.mubr.bf16.gmra.mrb[20].mxu0 %v10782_v23  ;;  %12943 = vmatmul.mubr.bf16.gmra.mrb[20].mxu1 %v11006_v8  ;;  %v1587_v10 = vrot.slane %v1586_v14, 4  ;;  %v1597_v54 = vrot.slane %v1596_v30, 4  ;;  %v1607_v58 = vshll.u32 %v1282_v29, 16  ;;  %v1613_v37 = vshll.u32 %v1283_v2, 16  ;;  %v3884_v29 = vld [vmem:[%s14341_s26 + $0xa8] sm:$0xe] }
 0x137   : > { %v4025_v49 = vsel %vm14722_vm5, %v10991_v11, %v4024_v51  ;;  %v4026_v34 = vrot.slane %v4024_v51, 4  ;;  %v1606_v50 = vrot.slane %v1604_v40, 4  ;;  %v1617_v19 = vshrl.u32 %v1283_v2, 16  ;;  %v1289_v11 = vld [vmem:[%s14341_s26 + $0xb8] sm:$0xf] }
 0x138   : > { %v1592_v12 = vsel %vm14372_vm2, %v1587_v10, %v1591_v22  ;;  %v1602_v24 = vsel %vm14372_vm2, %v1597_v54, %v1601_v38  ;;  %v1609_v44 = vrot.slane %v1607_v58, 5  ;;  %v1615_v46 = vrot.slane %v1613_v37, 5  ;;  %v1288_v22 = vld [vmem:[%s14341_s26 + $0xb4] sm:$0xf]  ;;  %v1290_v54 = vld [vmem:[%s14341_s26 + $0xbc] sm:$0x1] }
 0x139   : > { %v10783_v5 = vcombine.low %v1592_v12, %v1602_v24  ;;  %v4028_v41 = vsel %vm14722_vm5, %v4026_v34, %v4027_v4  ;;  %v1619_v13 = vrot.slane %v1617_v19, 4  ;;  %v1623_v28 = vshll.u32 %v1284_v31, 16  ;;  %v3887_v58 = vld [vmem:[%s14341_s26 + $0xb4] sm:$0xe] }
 0x13a   : > { %v11007_v16 = vcombine.low %v4025_v49, %v4028_v41  ;;  %v1610_v18 = vor.u32 %v1609_v44, %v1606_v50  ;;  %v10992_v42 = vrot.slane %v3881_v15, 9  ;;  %v4031_v60 = vrot.slane %v15228_v25, 5  ;;  %v15268_v44 = vld [vmem:[%s14341_s26 + $0xb8] sm:$0xf] }
 0x13b   : > { %12754 = vmatprep.mubr.bf16.mxu0 %v10783_v5  ;;  %v1620_v63 = vor.u32 %v1619_v13, %v1615_v46  ;;  %v1625_v27 = vrot.slane %v1623_v28, 5  ;;  %v4034_v35 = vrot.slane %v15231_v45, 5  ;;  %v1628_v39 = vshrl.u32 %v1285_v57, 16 }
 0x13c   : > { %12946 = vmatprep.mubr.bf16.mxu1 %v11007_v16  ;;  %v1611_v61 = vrot.slane %v1610_v18, 4  ;;  %v4032_v55 = vsel %vm14722_vm5, %v10992_v42, %v4031_v60  ;;  %v4033_v32 = vrot.slane %v4031_v60, 4  ;;  %v1631_v3 = vshll.u32 %v1285_v57, 16 }
 0x13d   : > { %v1621_v26 = vrot.slane %v1620_v63, 4  ;;  %v1630_v56 = vrot.slane %v1628_v39, 4  ;;  %v1637_v0 = vshll.u32 %v1286_v62, 16  ;;  %v1641_v20 = vshrl.u32 %v1286_v62, 16  ;;  %v4372_v62 = vld [vmem:[%s14341_s26] sm:$0xf] }
 0x13e   : > { %v1616_v2 = vsel %vm14372_vm2, %v1611_v61, %v1615_v46  ;;  %v4035_v23 = vsel %vm14722_vm5, %v4033_v32, %v4034_v35  ;;  %v1633_v8 = vrot.slane %v1631_v3, 5  ;;  %v1647_v14 = vshll.u32 %v1287_v52, 16  ;;  %v15271_v46 = vld [vmem:[%s14341_s26 + $0xbc] sm:$0x1] }
 0x13f   : > { %v1626_v30 = vsel %vm14372_vm2, %v1621_v26, %v1625_v27  ;;  %v11008_v31 = vcombine.low %v4032_v55, %v4035_v23  ;;  %v1639_v38 = vrot.slane %v1637_v0, 5  ;;  %v1643_v51 = vrot.slane %v1641_v20, 4 }
 0x140   : > { %v10784_v4 = vcombine.low %v1616_v2, %v1626_v30  ;;  %v1634_v40 = vor.u32 %v1633_v8, %v1630_v56  ;;  %v1649_v15 = vrot.slane %v1647_v14, 5  ;;  %v10993_v10 = vrot.slane %v3884_v29, 9  ;;  %v13910_v14 = vld [vmem:[%s14341_s26] sm:$0xff]  }
 0x141   : > { %12947 = vmatmul.mubr.bf16.gmra.mrb[24].mxu1 %v11008_v31  ;;  %v1644_v37 = vor.u32 %v1643_v51, %v1639_v38  ;;  %v4038_v57 = vrot.slane %v15250_v6, 5  ;;  %v4041_v49 = vrot.slane %v15253_v47, 5  ;;  %v1652_v34 = vshrl.u32 %v1288_v22, 16 }
 0x142   : > { %12755 = vmatmul.mubr.bf16.gmra.mrb[24].mxu0 %v10784_v4  ;;  %v1635_v50 = vrot.slane %v1634_v40, 4  ;;  %v1655_v19 = vshll.u32 %v1288_v22, 16  ;;  %v1661_v12 = vshll.u32 %v1289_v11, 16  ;;  %v1665_v24 = vshrl.u32 %v1289_v11, 16  ;;  %v14034_v11 = vld [vmem:[%s14341_s26 + $0x4] sm:$0xf] }
 0x143   : > { %v1645_v5 = vrot.slane %v1644_v37, 4  ;;  %v4039_v41 = vsel %vm14722_vm5, %v10993_v10, %v4038_v57  ;;  %v4040_v13 = vrot.slane %v4038_v57, 4  ;;  %v1654_v28 = vrot.slane %v1652_v34, 4  ;;  %v14035_v37 = vld [vmem:[%s14341_s26 + $0x8] sm:$0x1] }
 0x144   : > { %v1640_v52 = vsel %vm14372_vm2, %v1635_v50, %v1639_v38  ;;  %v1657_v16 = vrot.slane %v1655_v19, 5  ;;  %v1663_v18 = vrot.slane %v1661_v12, 5  ;;  %v1667_v42 = vrot.slane %v1665_v24, 4  ;;  %v4373_v38 = vld [vmem:[%s14341_s26 + $0xc] sm:$0xf] }
 0x145   : > { %v1650_v60 = vsel %vm14372_vm2, %v1645_v5, %v1649_v15  ;;  %v4042_v63 = vsel %vm14722_vm5, %v4040_v13, %v4041_v49  ;;  %v1671_v27 = vshll.u32 %v1290_v54, 16  ;;  %v10994_v35 = vrot.slane %v3887_v58, 9  ;;  %v4374_v12 = vld [vmem:[%s14341_s26 + $0x18] sm:$0xf]  ;;  %v14036_v5 = vld [vmem:[%s14341_s26 + $0x10] sm:$0xf] }
 0x146   : > { %v10785_v39 = vcombine.low %v1640_v52, %v1650_v60  ;;  %v11009_v29 = vcombine.low %v4039_v41, %v4042_v63  ;;  %v1658_v61 = vor.u32 %v1657_v16, %v1654_v28  ;;  %v1668_v55 = vor.u32 %v1667_v42, %v1663_v18 }
 0x147   : > { %v1673_v32 = vrot.slane %v1671_v27, 5  ;;  %v4045_v3 = vrot.slane %v15268_v44, 5  ;;  %v4048_v22 = vrot.slane %v15271_v46, 5  ;;  %v4389_v26 = vshrl.u32 %v4372_v62, 16 }
 0x148   : > { %12758 = vmatprep.mubr.bf16.mxu0 %v10785_v39  ;;  %12950 = vmatprep.mubr.bf16.mxu1 %v11009_v29  ;;  %v1659_v56 = vrot.slane %v1658_v61, 4  ;;  %v1669_v0 = vrot.slane %v1668_v55, 4  ;;  %v4392_v20 = vshll.u32 %v4372_v62, 16  ;;  %v4398_v2 = vshll.u32 %v14034_v11, 16  ;;  %v13911_v29 = vld [vmem:[%s14341_s26 + $0xc] sm:$0xff]  }
 0x149   : > { %v4046_v23 = vsel %vm14722_vm5, %v10994_v35, %v4045_v3  ;;  %v4047_v8 = vrot.slane %v4045_v3, 4  ;;  %v4391_v30 = vrot.slane %v4389_v26, 4  ;;  %v4402_v31 = vshrl.u32 %v14034_v11, 16  ;;  %v4375_v3 = vld [vmem:[%s14341_s26 + $0x24] sm:$0xf] }
 0x14a   : > { %v1664_v51 = vsel %vm14372_vm2, %v1659_v56, %v1663_v18  ;;  %v1674_v4 = vsel %vm14372_vm2, %v1669_v0, %v1673_v32  ;;  %v4394_v40 = vrot.slane %v4392_v20, 5  ;;  %v4400_v15 = vrot.slane %v4398_v2, 5  ;;  %v14037_v18 = vld [vmem:[%s14341_s26 + $0x14] sm:$0x1]  ;;  %v14038_v0 = vld [vmem:[%s14341_s26 + $0x1c] sm:$0xf] }
 0x14b   : > { %v10786_v10 = vcombine.low %v1664_v51, %v1674_v4  ;;  %v4049_v54 = vsel %vm14722_vm5, %v4047_v8, %v4048_v22  ;;  %v4404_v58 = vrot.slane %v4402_v31, 4  ;;  %v4408_v57 = vshll.u32 %v14035_v37, 16  ;;  %v4376_v37 = vld [vmem:[%s14341_s26 + $0x30] sm:$0xf] }
 0x14c   : > { %v11010_v49 = vcombine.low %v4046_v23, %v4049_v54  ;;  %v4395_v34 = vor.u32 %v4394_v40, %v4391_v30  ;;  %v4413_v50 = vshrl.u32 %v4373_v38, 16  ;;  %v4416_v19 = vshll.u32 %v4373_v38, 16  ;;  %v13914_v23 = vld [vmem:[%s14341_s26 + $0x18] sm:$0xff]   ;;  %v14039_v38 = vld [vmem:[%s14341_s26 + $0x20] sm:$0x1]  ;;  %v13916_v40 = vld [vmem:[#allocation2 + $0x248] sm:$0xff]  }
 0x14d   : > { %12759 = vmatmul.mubr.bf16.gmra.mrb[28].mxu0 %v10786_v10  ;;  %v4405_v24 = vor.u32 %v4404_v58, %v4400_v15  ;;  %v4410_v62 = vrot.slane %v4408_v57, 5  ;;  %v4422_v41 = vshll.u32 %v14036_v5, 16  ;;  %v4426_v13 = vshrl.u32 %v14036_v5, 16 }
 0x14e   : > { %12951 = vmatmul.mubr.bf16.gmra.mrb[28].mxu1 %v11010_v49  ;;  %12778 = vmatprep.mubr.bf16.mxu0 %v13910_v14  ;;  %v4396_v28 = vrot.slane %v4395_v34, 4  ;;  %v4415_v52 = vrot.slane %v4413_v50, 4  ;;  %v4418_v16 = vrot.slane %v4416_v19, 5  ;;  %v4432_v42 = vshll.u32 %v14037_v18, 16  ;;  %v14040_v50 = vld [vmem:[%s14341_s26 + $0x28] sm:$0xf] }
 0x14f   : > { %v4406_v60 = vrot.slane %v4405_v24, 4  ;;  %v4424_v63 = vrot.slane %v4422_v41, 5  ;;  %v4428_v27 = vrot.slane %v4426_v13, 4  ;;  %v4437_v35 = vshrl.u32 %v4374_v12, 16  ;;  %v13917_v41 = vld [vmem:[#allocation2 + $0x348] sm:$0xff]  }
 0x150   : > { %v4401_v39 = vsel %vm14372_vm2, %v4396_v28, %v4400_v15  ;;  %v4419_v61 = vor.u32 %v4418_v16, %v4415_v52  ;;  %v4434_v55 = vrot.slane %v4432_v42, 5  ;;  %v4440_v32 = vshll.u32 %v4374_v12, 16  ;;  %v14041_v52 = vld [vmem:[%s14341_s26 + $0x2c] sm:$0x1]  ;;  %v13920_v42 = vld [vmem:[#allocation2 + $0x250] sm:$0xff]  }
 0x151   : > { %v4411_v22 = vsel %vm14372_vm2, %v4406_v60, %v4410_v62  ;;  %v4429_v26 = vor.u32 %v4428_v27, %v4424_v63  ;;  %v4439_v56 = vrot.slane %v4437_v35, 4  ;;  %v4446_v20 = vshll.u32 %v14038_v0, 16 }
 0x152   : > { %v11019_v11 = vcombine.low %v4401_v39, %v4411_v22  ;;  %v4420_v2 = vrot.slane %v4419_v61, 4  ;;  %v4442_v8 = vrot.slane %v4440_v32, 5  ;;  %v4450_v14 = vshrl.u32 %v14038_v0, 16 }
 0x153   : > { %v4430_v30 = vrot.slane %v4429_v26, 4  ;;  %v4448_v31 = vrot.slane %v4446_v20, 5  ;;  %v4456_v51 = vshll.u32 %v14039_v38, 16  ;;  %v4461_v4 = vshrl.u32 %v4375_v3, 16 }
 0x154   : > { %12970 = vmatprep.mubr.bf16.mxu1 %v11019_v11  ;;  %v4425_v15 = vsel %vm14372_vm2, %v4420_v2, %v4424_v63  ;;  %v4443_v10 = vor.u32 %v4442_v8, %v4439_v56  ;;  %v4452_v54 = vrot.slane %v4450_v14, 4  ;;  %v4464_v58 = vshll.u32 %v4375_v3, 16  ;;  %v13915_v63 = vld [vmem:[%s14341_s26 + $0x24] sm:$0xff]   ;;  %v4377_v3 = vld [vmem:[%s14341_s26 + $0x3c] sm:$0xf]  ;;  %v13918_v56 = vld [vmem:[%s14341_s26 + $0x30] sm:$0xff]  }
 0x155   : > { %12779 = vmatmul.mubr.bf16.vlgmr.msra.gmra.mrb[0].mxu0 %v13911_v29  ;;  %v4435_v57 = vsel %vm14372_vm2, %v4430_v30, %v4434_v55  ;;  %v4458_v49 = vrot.slane %v4456_v51, 5  ;;  %v4463_v34 = vrot.slane %v4461_v4, 4  ;;  %v4470_v19 = vshll.u32 %v14040_v50, 16  ;;  %v14042_v55 = vld [vmem:[%s14341_s26 + $0x34] sm:$0xf]  ;;  %v13924_v4 = vld [vmem:[#allocation2 + $0x258] sm:$0xff]  }
 0x156   : > { %v11020_v12 = vcombine.low %v4425_v15, %v4435_v57  ;;  %13003 = vmatpush3.bf16.msra.mxu0 %v15120_v1  ;;  %12782 = vmatprep.mubr.bf16.mxu0 %v13914_v23  ;;  %v4444_v24 = vrot.slane %v4443_v10, 4  ;;  %v4453_v62 = vor.u32 %v4452_v54, %v4448_v31  ;;  %v4466_v5 = vrot.slane %v4464_v58, 5  ;;  %v13921_v11 = vld [vmem:[#allocation2 + $0x350] sm:$0xff]   ;;  %v14043_v8 = vld [vmem:[%s14341_s26 + $0x38] sm:$0x1] }
 0x157   : > { %v4472_v13 = vrot.slane %v4470_v19, 5  ;;  %v4474_v28 = vshrl.u32 %v14040_v50, 16  ;;  %v4480_v16 = vshll.u32 %v14041_v52, 16  ;;  %13004 = vmatprep.subr.bf16.mxu0 %v13916_v40  ;;  %v4485_v18 = vshrl.u32 %v4376_v37, 16  ;;  %v14044_v54 = vld [vmem:[%s14341_s26 + $0x40] sm:$0xf] }
 0x158   : > { %12971 = vmatmul.mubr.bf16.vlgmr.msra.gmra.mrb[0].mxu1 %v11020_v12  ;;  %v4449_v60 = vsel %vm14372_vm2, %v4444_v24, %v4448_v31  ;;  %v4454_v1 = vrot.slane %v4453_v62, 4  ;;  %v4467_v27 = vor.u32 %v4466_v5, %v4463_v34  ;;  %v4488_v35 = vshll.u32 %v4376_v37, 16  ;;  %v4378_v37 = vld [vmem:[%s14341_s26 + $0x48] sm:$0xf]  ;;  %v14045_v62 = vld [vmem:[%s14341_s26 + $0x44] sm:$0x1] }
 0x159   : > { %13195 = vmatpush3.bf16.msra.mxu1 %v15128_v21  ;;  %v4476_v39 = vrot.slane %v4474_v28, 4  ;;  %v4482_v29 = vrot.slane %v4480_v16, 5  ;;  %v4487_v61 = vrot.slane %v4485_v18, 4  ;;  %v4494_v32 = vshll.u32 %v14042_v55, 16  ;;  %v13925_v16 = vld [vmem:[#allocation2 + $0x358] sm:$0xff]   ;;  %v13928_v18 = vld [vmem:[#allocation2 + $0x260] sm:$0xff]  }
 0x15a   : > { %v4459_v22 = vsel %vm14372_vm2, %v4454_v1, %v4458_v49  ;;  %v4468_v26 = vrot.slane %v4467_v27, 4  ;;  %13005 = vmatpush3.bf16.msra.mxu0 %v13916_v40  ;;  %13196 = vmatprep.subr.bf16.mxu1 %v13917_v41  ;;  %v4490_v0 = vrot.slane %v4488_v35, 5  ;;  %v4498_v20 = vshrl.u32 %v14042_v55, 16 }
 0x15b   : > { %v11021_v2 = vcombine.low %v4449_v60, %v4459_v22  ;;  %v4477_v21 = vor.u32 %v4476_v39, %v4472_v13  ;;  %v4496_v23 = vrot.slane %v4494_v32, 5  ;;  %v4504_v14 = vshll.u32 %v14043_v8, 16  ;;  %13006 = vmatprep.subr.bf16.mxu0 %v13920_v42  ;;  %v13919_v60 = vld [vmem:[%s14341_s26 + $0x3c] sm:$0xff]  }
 0x15c   : > { %v4473_v30 = vsel %vm14372_vm2, %v4468_v26, %v4472_v13  ;;  %v4491_v31 = vor.u32 %v4490_v0, %v4487_v61  ;;  %v4500_v38 = vrot.slane %v4498_v20, 4  ;;  %v4509_v51 = vshrl.u32 %v4377_v3, 16  ;;  %v14046_v61 = vld [vmem:[%s14341_s26 + $0x4c] sm:$0xf] }
 0x15d   : > { %12974 = vmatprep.mubr.bf16.mxu1 %v11021_v2  ;;  %12783 = vmatmul.mubr.bf16.gmra.mrb[4].mxu0 %v13915_v63  ;;  %v4478_v40 = vrot.slane %v4477_v21, 4  ;;  %v4506_v15 = vrot.slane %v4504_v14, 5  ;;  %v4512_v10 = vshll.u32 %v4377_v3, 16  ;;  %v4518_v58 = vshll.u32 %v14044_v54, 16  ;;  %v4379_v3 = vld [vmem:[%s14341_s26 + $0x54] sm:$0xf] }
 0x15e   : > { %13197 = vmatpush3.bf16.msra.mxu1 %v13917_v41  ;;  %12786 = vmatprep.mubr.bf16.mxu0 %v13918_v56  ;;  %v4492_v57 = vrot.slane %v4491_v31, 4  ;;  %v4501_v49 = vor.u32 %v4500_v38, %v4496_v23  ;;  %v4511_v34 = vrot.slane %v4509_v51, 4  ;;  %v4522_v50 = vshrl.u32 %v14044_v54, 16  ;;  %v13929_v14 = vld [vmem:[#allocation2 + $0x360] sm:$0xff]  }
 0x15f   : > { %v4483_v19 = vsel %vm14372_vm2, %v4478_v40, %v4482_v29  ;;  %v4514_v12 = vrot.slane %v4512_v10, 5  ;;  %v4520_v24 = vrot.slane %v4518_v58, 5  ;;  %v4528_v5 = vshll.u32 %v14045_v62, 16  ;;  %13007 = vmatpush3.bf16.msra.mxu0 %v13920_v42  ;;  %13198 = vmatprep.subr.bf16.mxu1 %v13921_v11  ;;  %v13922_v29 = vld [vmem:[%s14341_s26 + $0x48] sm:$0xff]   ;;  %v14048_v10 = vld [vmem:[%s14341_s26 + $0x58] sm:$0xf] }
 0x160   : > { %v11022_v13 = vcombine.low %v4473_v30, %v4483_v19  ;;  %v4497_v41 = vsel %vm14372_vm2, %v4492_v57, %v4496_v23  ;;  %v4502_v28 = vrot.slane %v4501_v49, 4  ;;  %v4524_v52 = vrot.slane %v4522_v50, 4  ;;  %13008 = vmatprep.subr.bf16.mxu0 %v13924_v4  ;;  %v14047_v23 = vld [vmem:[%s14341_s26 + $0x50] sm:$0x1]  ;;  %v13932_v30 = vld [vmem:[#allocation2 + $0x268] sm:$0xff]  }
 0x161   : > { %v4515_v1 = vor.u32 %v4514_v12, %v4511_v34  ;;  %v4530_v63 = vrot.slane %v4528_v5, 5  ;;  %v4533_v27 = vshrl.u32 %v4378_v37, 16  ;;  %v4536_v35 = vshll.u32 %v4378_v37, 16  ;;  %v4380_v58 = vld [vmem:[%s14341_s26 + $0x60] sm:$0xf]  ;;  %v13933_v50 = vld [vmem:[#allocation2 + $0x368] sm:$0xff]  }
 0x162   : > { %12975 = vmatmul.mubr.bf16.gmra.mrb[4].mxu1 %v11022_v13  ;;  %v4507_v42 = vsel %vm14372_vm2, %v4502_v28, %v4506_v15  ;;  %v4525_v39 = vor.u32 %v4524_v52, %v4520_v24  ;;  %v4542_v55 = vshll.u32 %v14046_v61, 16  ;;  %v4546_v32 = vshrl.u32 %v14046_v61, 16  ;;  %v13936_v19 = vld [vmem:[#allocation2 + $0x270] sm:$0xff]   ;;  %v14049_v5 = vld [vmem:[%s14341_s26 + $0x5c] sm:$0x1] }
 0x163   : > { %v11023_v22 = vcombine.low %v4497_v41, %v4507_v42  ;;  %v4516_v26 = vrot.slane %v4515_v1, 4  ;;  %13199 = vmatpush3.bf16.msra.mxu1 %v13921_v11  ;;  %v4535_v56 = vrot.slane %v4533_v27, 4  ;;  %v4538_v0 = vrot.slane %v4536_v35, 5  ;;  %13009 = vmatpush3.bf16.msra.mxu0 %v13924_v4  ;;  %v13923_v28 = vld [vmem:[%s14341_s26 + $0x54] sm:$0xff]   ;;  %v13926_v27 = vld [vmem:[%s14341_s26 + $0x60] sm:$0xff]  }
 0x164   : > { %v4526_v20 = vrot.slane %v4525_v39, 4  ;;  %v4544_v2 = vrot.slane %v4542_v55, 5  ;;  %v4548_v21 = vrot.slane %v4546_v32, 4  ;;  %v4552_v8 = vshll.u32 %v14047_v23, 16  ;;  %13200 = vmatprep.subr.bf16.mxu1 %v13925_v16  ;;  %13010 = vmatprep.subr.bf16.mxu0 %v13928_v18  ;;  %v14050_v35 = vld [vmem:[%s14341_s26 + $0x64] sm:$0xf] }
 0x165   : > { %12978 = vmatprep.mubr.bf16.mxu1 %v11023_v22  ;;  %12787 = vmatmul.mubr.bf16.gmra.mrb[8].mxu0 %v13919_v60  ;;  %v4521_v31 = vsel %vm14372_vm2, %v4516_v26, %v4520_v24  ;;  %v4539_v11 = vor.u32 %v4538_v0, %v4535_v56  ;;  %v4557_v38 = vshrl.u32 %v4379_v3, 16  ;;  %v4560_v51 = vshll.u32 %v4379_v3, 16  ;;  %v4381_v39 = vld [vmem:[%s14341_s26 + $0x6c] sm:$0xf]  ;;  %v14051_v56 = vld [vmem:[%s14341_s26 + $0x68] sm:$0x1] }
 0x166   : > { %v4531_v4 = vsel %vm14372_vm2, %v4526_v20, %v4530_v63  ;;  %12790 = vmatprep.mubr.bf16.mxu0 %v13922_v29  ;;  %v4549_v40 = vor.u32 %v4548_v21, %v4544_v2  ;;  %v4554_v15 = vrot.slane %v4552_v8, 5  ;;  %v4566_v54 = vshll.u32 %v14048_v10, 16  ;;  %v13937_v20 = vld [vmem:[#allocation2 + $0x370] sm:$0xff]  }
 0x167   : > { %v11024_v37 = vcombine.low %v4521_v31, %v4531_v4  ;;  %v4540_v57 = vrot.slane %v4539_v11, 4  ;;  %v4559_v49 = vrot.slane %v4557_v38, 4  ;;  %v4562_v34 = vrot.slane %v4560_v51, 5  ;;  %13201 = vmatpush3.bf16.msra.mxu1 %v13925_v16  ;;  %13011 = vmatpush3.bf16.msra.mxu0 %v13928_v18  ;;  %v4382_v51 = vld [vmem:[%s14341_s26 + $0x78] sm:$0xf] }
 0x168   : > { %v4550_v12 = vrot.slane %v4549_v40, 4  ;;  %v15348_v24 = vrot.slane %v4566_v54, 5  ;;  %v4570_v62 = vshrl.u32 %v14048_v10, 16  ;;  %v4576_v13 = vshll.u32 %v14049_v5, 16  ;;  %13202 = vmatprep.subr.bf16.mxu1 %v13929_v14  ;;  %13012 = vmatprep.subr.bf16.mxu0 %v13932_v30  ;;  %v14052_v10 = vld [vmem:[%s14341_s26 + $0x70] sm:$0xf] }
 0x169   : > { %v4545_v41 = vsel %vm14372_vm2, %v4540_v57, %v4544_v2  ;;  %v4563_v52 = vor.u32 %v4562_v34, %v4559_v49  ;;  %v4581_v16 = vshrl.u32 %v4380_v58, 16  ;;  %v4584_v18 = vshll.u32 %v4380_v58, 16  ;;  %v13940_v2 = vld [vmem:[#allocation2 + $0x278] sm:$0xff]   ;;  %v13927_v57 = vld [vmem:[%s14341_s26 + $0x6c] sm:$0xff]   ;;  %v14053_v34 = vld [vmem:[%s14341_s26 + $0x74] sm:$0x1] }
 0x16a   : > { %12979 = vmatmul.mubr.bf16.gmra.mrb[8].mxu1 %v11024_v37  ;;  %v4555_v60 = vsel %vm14372_vm2, %v4550_v12, %v4554_v15  ;;  %v4572_v1 = vrot.slane %v4570_v62, 4  ;;  %v4578_v63 = vrot.slane %v4576_v13, 5  ;;  %v4590_v42 = vshll.u32 %v14050_v35, 16  ;;  %v4383_v13 = vld [vmem:[%s14341_s26 + $0x84] sm:$0xf] }
 0x16b   : > { %v11025_v29 = vcombine.low %v4545_v41, %v4555_v60  ;;  %v4564_v61 = vrot.slane %v4563_v52, 4  ;;  %v4583_v55 = vrot.slane %v4581_v16, 4  ;;  %v4586_v32 = vrot.slane %v4584_v18, 5  ;;  %13203 = vmatpush3.bf16.msra.mxu1 %v13929_v14  ;;  %13013 = vmatpush3.bf16.msra.mxu0 %v13932_v30  ;;  %v13941_v41 = vld [vmem:[#allocation2 + $0x378] sm:$0xff]  }
 0x16c   : > { %v4573_v3 = vor.u32 %v4572_v1, %v15348_v24  ;;  %v4592_v22 = vrot.slane %v4590_v42, 5  ;;  %v4594_v26 = vshrl.u32 %v14050_v35, 16  ;;  %v4600_v0 = vshll.u32 %v14051_v56, 16  ;;  %13204 = vmatprep.subr.bf16.mxu1 %v13933_v50  ;;  %13014 = vmatprep.subr.bf16.mxu0 %v13936_v19 }
 0x16d   : > { %12982 = vmatprep.mubr.bf16.mxu1 %v11025_v29  ;;  %12791 = vmatmul.mubr.bf16.gmra.mrb[12].mxu0 %v13923_v28  ;;  %v4569_v21 = vsel %vm14372_vm2, %v4564_v61, %v15348_v24  ;;  %v4587_v23 = vor.u32 %v4586_v32, %v4583_v55  ;;  %v4605_v8 = vshrl.u32 %v4381_v39, 16  ;;  %v4608_v14 = vshll.u32 %v4381_v39, 16 }
 0x16e   : > { %v4574_v30 = vrot.slane %v4573_v3, 4  ;;  %12794 = vmatprep.mubr.bf16.mxu0 %v13926_v27  ;;  %v4596_v31 = vrot.slane %v4594_v26, 4  ;;  %v4602_v11 = vrot.slane %v4600_v0, 5  ;;  %v4614_v38 = vshll.u32 %v15151_v59, 16  ;;  %v15371_v59 = vld [vmem:[#allocation2 + $0x200] sm:$0xff]  }
 0x16f   : > { %v4588_v4 = vrot.slane %v4587_v23, 4  ;;  %v4607_v40 = vrot.slane %v4605_v8, 4  ;;  %v4610_v15 = vrot.slane %v4608_v14, 5  ;;  %v4618_v54 = vshrl.u32 %v14052_v10, 16  ;;  %13205 = vmatpush3.bf16.msra.mxu1 %v13933_v50  ;;  %13015 = vmatpush3.bf16.msra.mxu0 %v13936_v19  ;;  %v13930_v19 = vld [vmem:[%s14341_s26 + $0x78] sm:$0xff]  }
 0x170   : > { %v4579_v58 = vsel %vm14372_vm2, %v4574_v30, %v4578_v63  ;;  %v4597_v37 = vor.u32 %v4596_v31, %v4592_v22  ;;  %v4616_v49 = vrot.slane %v4614_v38, 5  ;;  %v4624_v12 = vshll.u32 %v14053_v34, 16  ;;  %13206 = vmatprep.subr.bf16.mxu1 %v13937_v20  ;;  %13016 = vmatprep.subr.bf16.mxu0 %v13940_v2  ;;  %v14054_v27 = vld [vmem:[%s14341_s26 + $0x7c] sm:$0xf]  ;;  %v4384_v8 = vld [vmem:[%s14341_s26 + $0x90] sm:$0xf] }
 0x171   : > { %v11026_v24 = vcombine.low %v4569_v21, %v4579_v58  ;;  %v4593_v62 = vsel %vm14372_vm2, %v4588_v4, %v4592_v22  ;;  %v4611_v50 = vor.u32 %v4610_v15, %v4607_v40  ;;  %v4620_v5 = vrot.slane %v4618_v54, 4  ;;  %v15385_v22 = vld [vmem:[#allocation2 + $0x300] sm:$0xff]  }
 0x172   : > { %v4598_v28 = vrot.slane %v4597_v37, 4  ;;  %v4626_v52 = vrot.slane %v4624_v12, 5  ;;  %v4629_v16 = vshrl.u32 %v4382_v51, 16  ;;  %v4632_v18 = vshll.u32 %v4382_v51, 16 }
 0x173   : > { %12983 = vmatmul.mubr.bf16.gmra.mrb[12].mxu1 %v11026_v24  ;;  %v4612_v60 = vrot.slane %v4611_v50, 4  ;;  %v4621_v1 = vor.u32 %v4620_v5, %v4616_v49  ;;  %v4638_v63 = vshll.u32 %v15168_v33, 16  ;;  %v4642_v35 = vshrl.u32 %v14054_v27, 16  ;;  %13017 = vmatpush3.bf16.msra.mxu0 %v13940_v2  ;;  %v4385_v24 = vld [vmem:[%s14341_s26 + $0x9c] sm:$0xf] }
 0x174   : > { %v4603_v42 = vsel %vm14372_vm2, %v4598_v28, %v4602_v11  ;;  %v4631_v39 = vrot.slane %v4629_v16, 4  ;;  %v4634_v29 = vrot.slane %v4632_v18, 5  ;;  %v4648_v61 = vshll.u32 %v15171_v7, 16  ;;  %13207 = vmatpush3.bf16.msra.mxu1 %v13937_v20  ;;  %13050 = vmatprep.subr.bf16.mxu0 %v15371_v59  ;;  %v13931_v11 = vld [vmem:[%s14341_s26 + $0x84] sm:$0xff]  }
 0x175   : > { %v11027_v55 = vcombine.low %v4593_v62, %v4603_v42  ;;  %12795 = vmatmul.mubr.bf16.gmra.mrb[16].mxu0 %v13927_v57  ;;  %v4617_v32 = vsel %vm14372_vm2, %v4612_v60, %v4616_v49  ;;  %v4622_v33 = vrot.slane %v4621_v1, 4  ;;  %v4640_v3 = vrot.slane %v4638_v63, 5  ;;  %13208 = vmatprep.subr.bf16.mxu1 %v13941_v41 }
 0x176   : > { %12798 = vmatprep.mubr.bf16.mxu0 %v13930_v19  ;;  %v4635_v26 = vor.u32 %v4634_v29, %v4631_v39  ;;  %v4644_v56 = vrot.slane %v4642_v35, 4  ;;  %v4650_v0 = vrot.slane %v4648_v61, 5  ;;  %v4653_v7 = vshrl.u32 %v4383_v13, 16  ;;  %v4386_v35 = vld [vmem:[%s14341_s26 + $0xa8] sm:$0xf] }
 0x177   : > { %12986 = vmatprep.mubr.bf16.mxu1 %v11027_v55  ;;  %v4627_v20 = vsel %vm14372_vm2, %v4622_v33, %v4626_v52  ;;  %v4656_v2 = vshll.u32 %v4383_v13, 16  ;;  %v4662_v21 = vshll.u32 %v15190_v36, 16  ;;  %v4666_v23 = vshrl.u32 %v15190_v36, 16  ;;  %v13934_v36 = vld [vmem:[%s14341_s26 + $0x90] sm:$0xff]   ;;  %v13935_v55 = vld [vmem:[%s14341_s26 + $0x9c] sm:$0xff]  }
 0x178   : > { %v11028_v14 = vcombine.low %v4617_v32, %v4627_v20  ;;  %v4636_v30 = vrot.slane %v4635_v26, 4  ;;  %v4645_v31 = vor.u32 %v4644_v56, %v4640_v3  ;;  %v4655_v38 = vrot.slane %v4653_v7, 4  ;;  %13209 = vmatpush3.bf16.msra.mxu1 %v13941_v41  ;;  %v13938_v7 = vld [vmem:[%s14341_s26 + $0xa8] sm:$0xff]  }
 0x179   : > { %v4658_v51 = vrot.slane %v4656_v2, 5  ;;  %v4664_v4 = vrot.slane %v4662_v21, 5  ;;  %v4668_v40 = vrot.slane %v4666_v23, 4  ;;  %v4672_v15 = vshll.u32 %v15193_v53, 16  ;;  %13242 = vmatprep.subr.bf16.mxu1 %v15385_v22 }
 0x17a   : > { %v4641_v10 = vsel %vm14372_vm2, %v4636_v30, %v4640_v3  ;;  %v4646_v54 = vrot.slane %v4645_v31, 4  ;;  %v4677_v58 = vshrl.u32 %v4384_v8, 16  ;;  %v4680_v37 = vshll.u32 %v4384_v8, 16 }
 0x17b   : > { %12987 = vmatmul.mubr.bf16.gmra.mrb[16].mxu1 %v11028_v14  ;;  %v4659_v57 = vor.u32 %v4658_v51, %v4655_v38  ;;  %v4669_v49 = vor.u32 %v4668_v40, %v4664_v4  ;;  %v4674_v34 = vrot.slane %v4672_v15, 5  ;;  %v4686_v12 = vshll.u32 %v15208_v9, 16  ;;  %v4387_v14 = vld [vmem:[%s14341_s26 + $0xb4] sm:$0xf] }
 0x17c   : > { %v4651_v62 = vsel %vm14372_vm2, %v4646_v54, %v4650_v0  ;;  %v4679_v53 = vrot.slane %v4677_v58, 4  ;;  %v4682_v50 = vrot.slane %v4680_v37, 5  ;;  %v4690_v5 = vshrl.u32 %v15208_v9, 16 }
 0x17d   : > { %v11029_v19 = vcombine.low %v4641_v10, %v4651_v62  ;;  %12799 = vmatmul.mubr.bf16.gmra.mrb[20].mxu0 %v13931_v11  ;;  %v4660_v13 = vrot.slane %v4659_v57, 4  ;;  %v4670_v41 = vrot.slane %v4669_v49, 4  ;;  %v4688_v28 = vrot.slane %v4686_v12, 5 }
 0x17e   : > { %12802 = vmatprep.mubr.bf16.mxu0 %v13934_v36  ;;  %v4683_v52 = vor.u32 %v4682_v50, %v4679_v53  ;;  %v4692_v16 = vrot.slane %v4690_v5, 4  ;;  %v4696_v18 = vshll.u32 %v15211_v43, 16  ;;  %v4701_v60 = vshrl.u32 %v4385_v24, 16 }
 0x17f   : > { %12990 = vmatprep.mubr.bf16.mxu1 %v11029_v19  ;;  %v4665_v1 = vsel %vm14372_vm2, %v4660_v13, %v4664_v4  ;;  %v4675_v9 = vsel %vm14372_vm2, %v4670_v41, %v4674_v34  ;;  %v4704_v63 = vshll.u32 %v4385_v24, 16  ;;  %v4710_v27 = vshll.u32 %v15228_v25, 16 }
 0x180   : > { %v11030_v42 = vcombine.low %v4665_v1, %v4675_v9  ;;  %v4684_v39 = vrot.slane %v4683_v52, 4  ;;  %v4693_v29 = vor.u32 %v4692_v16, %v4688_v28  ;;  %v4698_v61 = vrot.slane %v4696_v18, 5 }
 0x181   : > { %v4703_v43 = vrot.slane %v4701_v60, 4  ;;  %v4706_v32 = vrot.slane %v4704_v63, 5  ;;  %v4712_v33 = vrot.slane %v4710_v27, 5  ;;  %v4714_v3 = vshrl.u32 %v15228_v25, 16  ;;  %v11108_v60 = vld [vmem:[%s14341_s26 + $0x1c] sm:$0xf] }
 0x182   : > { %v4689_v26 = vsel %vm14372_vm2, %v4684_v39, %v4688_v28  ;;  %v4694_v56 = vrot.slane %v4693_v29, 4  ;;  %v4720_v0 = vshll.u32 %v15231_v45, 16  ;;  %v4725_v20 = vshrl.u32 %v4386_v35, 16  ;;  %v11107_v28 = vld [vmem:[%s14341_s26 + $0x18] sm:$0xf] }
 0x183   : > { %12991 = vmatmul.mubr.bf16.gmra.mrb[20].mxu1 %v11030_v42  ;;  %v4707_v2 = vor.u32 %v4706_v32, %v4703_v43  ;;  %v4716_v21 = vrot.slane %v4714_v3, 4  ;;  %v4728_v23 = vshll.u32 %v4386_v35, 16  ;;  %v4734_v8 = vshll.u32 %v15250_v6, 16  ;;  %v11459_v35 = vld [vmem:[%s14341_s26 + $0x18] sm:$0xf] }
 0x184   : > { %v4699_v30 = vsel %vm14372_vm2, %v4694_v56, %v4698_v61  ;;  %v4722_v31 = vrot.slane %v4720_v0, 5  ;;  %v4727_v25 = vrot.slane %v4725_v20, 4  ;;  %v4738_v11 = vshrl.u32 %v15250_v6, 16  ;;  %v11396_v61 = vld [vmem:[%s14341_s26 + $0x1c] sm:$0xf] }
 0x185   : > { %v11031_v38 = vcombine.low %v4689_v26, %v4699_v30  ;;  %12803 = vmatmul.mubr.bf16.gmra.mrb[24].mxu0 %v13935_v55  ;;  %v4708_v51 = vrot.slane %v4707_v2, 4  ;;  %v4717_v45 = vor.u32 %v4716_v21, %v4712_v33  ;;  %v4730_v4 = vrot.slane %v4728_v23, 5  ;;  %v11397_v55 = vld [vmem:[%s14341_s26 + $0x20] sm:$0x1]  ;;  %v11110_v26 = vld [vmem:[%s14341_s26 + $0x24] sm:$0xf] }
 0x186   : > { %12806 = vmatprep.mubr.bf16.mxu0 %v13938_v7  ;;  %v4736_v40 = vrot.slane %v4734_v8, 5  ;;  %v4740_v15 = vrot.slane %v4738_v11, 4  ;;  %v4744_v10 = vshll.u32 %v15253_v47, 16  ;;  %v4749_v54 = vshrl.u32 %v4387_v14, 16  ;;  %v13939_v47 = vld [vmem:[%s14341_s26 + $0xb4] sm:$0xff]  }
 0x187   : > { %12994 = vmatprep.mubr.bf16.mxu1 %v11031_v38  ;;  %v4713_v36 = vsel %vm14372_vm2, %v4708_v51, %v4712_v33  ;;  %v4718_v58 = vrot.slane %v4717_v45, 4  ;;  %v4731_v37 = vor.u32 %v4730_v4, %v4727_v25  ;;  %v4752_v6 = vshll.u32 %v4387_v14, 16  ;;  %v11111_v14 = vld [vmem:[%s14341_s26 + $0x28] sm:$0xf]  ;;  %v11460_v38 = vld [vmem:[%s14341_s26 + $0x24] sm:$0xf] }
 0x188   : > { %v4741_v57 = vor.u32 %v4740_v15, %v4736_v40  ;;  %v4746_v49 = vrot.slane %v4744_v10, 5  ;;  %v4751_v34 = vrot.slane %v4749_v54, 4  ;;  %v4758_v12 = vshll.u32 %v15268_v44, 16  ;;  %v11399_v15 = vld [vmem:[%s14341_s26 + $0x28] sm:$0xf] }
 0x189   : > { %v4723_v24 = vsel %vm14372_vm2, %v4718_v58, %v4722_v31  ;;  %v4732_v62 = vrot.slane %v4731_v37, 4  ;;  %v4754_v53 = vrot.slane %v4752_v6, 5  ;;  %v4762_v50 = vshrl.u32 %v15268_v44, 16  ;;  %v13948_v37 = vld [vmem:[#allocation2 + $0x208] sm:$0xff]  }
 0x18a   : > { %v11032_v5 = vcombine.low %v4713_v36, %v4723_v24  ;;  %v4742_v19 = vrot.slane %v4741_v57, 4  ;;  %v4760_v13 = vrot.slane %v4758_v12, 5  ;;  %v4768_v41 = vshll.u32 %v15271_v46, 16 }
 0x18b   : > { %v4737_v52 = vsel %vm14372_vm2, %v4732_v62, %v4736_v40  ;;  %v4755_v16 = vor.u32 %v4754_v53, %v4751_v34  ;;  %v4764_v18 = vrot.slane %v4762_v50, 4  ;;  %v5413_v1 = vshrl.u32 %v11107_v28, 16  ;;  %v11400_v34 = vld [vmem:[%s14341_s26 + $0x2c] sm:$0x1] }
 0x18c   : > { %12995 = vmatmul.mubr.bf16.gmra.mrb[24].mxu1 %v11032_v5  ;;  %v4747_v44 = vsel %vm14372_vm2, %v4742_v19, %v4746_v49  ;;  %v4770_v9 = vrot.slane %v4768_v41, 5  ;;  %v5416_v63 = vshll.u32 %v11107_v28, 16  ;;  %v5422_v27 = vshll.u32 %v11108_v60, 16  ;;  %v11113_v41 = vld [vmem:[%s14341_s26 + $0x30] sm:$0xf] }
 0x18d   : > { %v11033_v46 = vcombine.low %v4737_v52, %v4747_v44  ;;  %12807 = vmatmul.mubr.bf16.gmra.mrb[28].mxu0 %v13939_v47  ;;  %v4756_v42 = vrot.slane %v4755_v16, 4  ;;  %v4765_v39 = vor.u32 %v4764_v18, %v4760_v13  ;;  %v15437_v29 = vrot.slane %v5413_v1, 4 }
 0x18e   : > { %v15441_v43 = vrot.slane %v5416_v63, 5  ;;  %v15443_v32 = vrot.slane %v5422_v27, 5  ;;  %v5426_v33 = vshrl.u32 %v11108_v60, 16  ;;  %v11155_v3 = vcombine.low %v11107_v28, %v11108_v60  ;;  %v11114_v60 = vld [vmem:[%s14341_s26 + $0x34] sm:$0xf] }
 0x18f   : > { %12998 = vmatprep.mubr.bf16.mxu1 %v11033_v46  ;;  %v4761_v56 = vsel %vm14372_vm2, %v4756_v42, %v4760_v13  ;;  %v4766_v0 = vrot.slane %v4765_v39, 4  ;;  %v8059_v7 = vshrl.u32 %v11459_v35, 16  ;;  %v8062_v20 = vshll.u32 %v11459_v35, 16  ;;  %v11461_v27 = vld [vmem:[%s14341_s26 + $0x30] sm:$0xf] }
 0x190   : > { %v15448_v2 = vrot.slane %v5426_v33, 4  ;;  %13018 = vmatprep.mubr.bf16.mxu0 %v11155_v3  ;;  %v8068_v21 = vshll.u32 %v11396_v61, 16  ;;  %v8072_v23 = vshrl.u32 %v11396_v61, 16  ;;  %v8078_v8 = vshll.u32 %v11397_v55, 16  ;;  %v13952_v35 = vld [vmem:[#allocation2 + $0x210] sm:$0xff]  }
 0x191   : > { %v4771_v30 = vsel %vm14372_vm2, %v4766_v0, %v4770_v9  ;;  %v8061_v31 = vrot.slane %v8059_v7, 4  ;;  %v8064_v25 = vrot.slane %v8062_v20, 5  ;;  %v5437_v11 = vshrl.u32 %v11110_v26, 16  ;;  %v11402_v55 = vld [vmem:[%s14341_s26 + $0x34] sm:$0xf]  ;;  %v13956_v0 = vld [vmem:[#allocation2 + $0x218] sm:$0xff]  }
 0x192   : > { %v11034_v51 = vcombine.low %v4761_v56, %v4771_v30  ;;  %v8070_v45 = vrot.slane %v8068_v21, 5  ;;  %v8074_v4 = vrot.slane %v8072_v23, 4  ;;  %v8080_v40 = vrot.slane %v8078_v8, 5  ;;  %v11403_v33 = vld [vmem:[%s14341_s26 + $0x38] sm:$0x1] }
 0x193   : > { %v8065_v10 = vor.u32 %v8064_v25, %v8061_v31  ;;  %v15455_v54 = vrot.slane %v5437_v11, 4  ;;  %v5440_v36 = vshll.u32 %v11110_v26, 16  ;;  %v5446_v58 = vshll.u32 %v11111_v14, 16  ;;  %v11116_v8 = vld [vmem:[%s14341_s26 + $0x3c] sm:$0xf] }
 0x194   : > { %12999 = vmatmul.mubr.bf16.gmra.mrb[28].mxu1 %v11034_v51  ;;  %v8075_v6 = vor.u32 %v8074_v4, %v8070_v45  ;;  %v5450_v57 = vshrl.u32 %v11111_v14, 16  ;;  %v11156_v49 = vcombine.low %v11110_v26, %v11111_v14  ;;  %v8083_v12 = vshrl.u32 %v11460_v38, 16  ;;  %v11117_v11 = vld [vmem:[%s14341_s26 + $0x40] sm:$0xf] }
 0x195   : > { %v8066_v24 = vrot.slane %v8065_v10, 4  ;;  %v15458_v62 = vrot.slane %v5440_v36, 5  ;;  %v15460_v47 = vrot.slane %v5446_v58, 5  ;;  %v8086_v53 = vshll.u32 %v11460_v38, 16 }
 0x196   : > { %v8076_v50 = vrot.slane %v8075_v6, 4  ;;  %v15462_v5 = vrot.slane %v5450_v57, 4  ;;  %13019 = vmatmul.mubr.bf16.vlgmr.msra.gmra.mrb[32].mxu0 %v11156_v49  ;;  %v8085_v19 = vrot.slane %v8083_v12, 4  ;;  %v8092_v13 = vshll.u32 %v11399_v15, 16 }
 0x197   : > { %v8071_v28 = vsel %vm14372_vm2, %v8066_v24, %v8070_v45  ;;  %v8088_v52 = vrot.slane %v8086_v53, 5  ;;  %v8096_v16 = vshrl.u32 %v11399_v15, 16  ;;  %v8102_v18 = vshll.u32 %v11400_v34, 16  ;;  %13051 = vmatpush3.bf16.msra.mxu0 %v15371_v59 }
 0x198   : > { %v8081_v1 = vsel %vm14372_vm2, %v8076_v50, %v8080_v40  ;;  %v8094_v44 = vrot.slane %v8092_v13, 5  ;;  %v5461_v9 = vshrl.u32 %v11113_v41, 16  ;;  %v5464_v63 = vshll.u32 %v11113_v41, 16  ;;  %13052 = vmatprep.subr.bf16.mxu0 %v13948_v37  ;;  %v11462_v40 = vld [vmem:[%s14341_s26 + $0x3c] sm:$0xf] }
 0x199   : > { %v11475_v46 = vcombine.low %v8071_v28, %v8081_v1  ;;  %v8089_v42 = vor.u32 %v8088_v52, %v8085_v19  ;;  %v8098_v39 = vrot.slane %v8096_v16, 4  ;;  %v8104_v61 = vrot.slane %v8102_v18, 5  ;;  %v11405_v50 = vld [vmem:[%s14341_s26 + $0x40] sm:$0xf]  ;;  %v13949_v19 = vld [vmem:[#allocation2 + $0x308] sm:$0xff]  }
 0x19a   : > { %v15474_v3 = vrot.slane %v5461_v9, 4  ;;  %v15476_v59 = vrot.slane %v5464_v63, 5  ;;  %v5470_v26 = vshll.u32 %v11114_v60, 16  ;;  %v5474_v56 = vshrl.u32 %v11114_v60, 16  ;;  %v11406_v16 = vld [vmem:[%s14341_s26 + $0x44] sm:$0x1] }
 0x19b   : > { %13210 = vmatprep.mubr.bf16.mxu1 %v11475_v46  ;;  %v8090_v7 = vrot.slane %v8089_v42, 4  ;;  %v8099_v20 = vor.u32 %v8098_v39, %v8094_v44  ;;  %v11157_v21 = vcombine.low %v11113_v41, %v11114_v60  ;;  %v8107_v23 = vshrl.u32 %v11461_v27, 16  ;;  %13053 = vmatpush3.bf16.msra.mxu0 %v13948_v37  ;;  %v13960_v18 = vld [vmem:[#allocation2 + $0x220] sm:$0xff]   ;;  %v11119_v63 = vld [vmem:[%s14341_s26 + $0x48] sm:$0xf] }
 0x19c   : > { %v15479_v14 = vrot.slane %v5470_v26, 5  ;;  %v15481_v30 = vrot.slane %v5474_v56, 4  ;;  %v8110_v31 = vshll.u32 %v11461_v27, 16  ;;  %v8116_v25 = vshll.u32 %v11402_v55, 16  ;;  %13054 = vmatprep.subr.bf16.mxu0 %v13952_v35  ;;  %v11120_v39 = vld [vmem:[%s14341_s26 + $0x4c] sm:$0xf] }
 0x19d   : > { %v8095_v38 = vsel %vm14372_vm2, %v8090_v7, %v8094_v44  ;;  %v8100_v51 = vrot.slane %v8099_v20, 4  ;;  %13022 = vmatprep.mubr.bf16.mxu0 %v11157_v21  ;;  %v8109_v45 = vrot.slane %v8107_v23, 4  ;;  %v8120_v4 = vshrl.u32 %v11402_v55, 16  ;;  %v11463_v56 = vld [vmem:[%s14341_s26 + $0x48] sm:$0xf]  ;;  %v13953_v7 = vld [vmem:[#allocation2 + $0x310] sm:$0xff]  }
 0x19e   : > { %v8112_v15 = vrot.slane %v8110_v31, 5  ;;  %v8118_v10 = vrot.slane %v8116_v25, 5  ;;  %v8126_v36 = vshll.u32 %v11403_v33, 16  ;;  %v5485_v58 = vshrl.u32 %v11116_v8, 16 }
 0x19f   : > { %v8105_v37 = vsel %vm14372_vm2, %v8100_v51, %v8104_v61  ;;  %v8122_v6 = vrot.slane %v8120_v4, 4  ;;  %v5488_v57 = vshll.u32 %v11116_v8, 16  ;;  %v5494_v49 = vshll.u32 %v11117_v11, 16  ;;  %13055 = vmatpush3.bf16.msra.mxu0 %v13952_v35 }
 0x1a0   : > { %v11476_v34 = vcombine.low %v8095_v38, %v8105_v37  ;;  %v8113_v12 = vor.u32 %v8112_v15, %v8109_v45  ;;  %v8128_v24 = vrot.slane %v8126_v36, 5  ;;  %v15489_v53 = vrot.slane %v5485_v58, 4  ;;  %13056 = vmatprep.subr.bf16.mxu0 %v13956_v0  ;;  %v11408_v38 = vld [vmem:[%s14341_s26 + $0x4c] sm:$0xf]  ;;  %v11409_v15 = vld [vmem:[%s14341_s26 + $0x50] sm:$0x1] }
 0x1a1   : > { %v8123_v13 = vor.u32 %v8122_v6, %v8118_v10  ;;  %v15492_v41 = vrot.slane %v5488_v57, 5  ;;  %v15494_v28 = vrot.slane %v5494_v49, 5  ;;  %v5498_v52 = vshrl.u32 %v11117_v11, 16  ;;  %v11122_v57 = vld [vmem:[%s14341_s26 + $0x54] sm:$0xf] }
 0x1a2   : > { %13211 = vmatmul.mubr.bf16.vlgmr.msra.gmra.mrb[32].mxu1 %v11476_v34  ;;  %v8114_v60 = vrot.slane %v8113_v12, 4  ;;  %v11158_v1 = vcombine.low %v11116_v8, %v11117_v11  ;;  %v8131_v44 = vshrl.u32 %v11462_v40, 16  ;;  %v8134_v9 = vshll.u32 %v11462_v40, 16  ;;  %v13968_v49 = vld [vmem:[#allocation2 + $0x230] sm:$0xff]  }
 0x1a3   : > { %13243 = vmatpush3.bf16.msra.mxu1 %v15385_v22  ;;  %v8124_v27 = vrot.slane %v8123_v13, 4  ;;  %v15499_v35 = vrot.slane %v5498_v52, 4  ;;  %v8140_v46 = vshll.u32 %v11405_v50, 16  ;;  %v8144_v42 = vshrl.u32 %v11405_v50, 16  ;;  %13057 = vmatpush3.bf16.msra.mxu0 %v13956_v0  ;;  %v13964_v0 = vld [vmem:[#allocation2 + $0x228] sm:$0xff]  }
 0x1a4   : > { %v8119_v61 = vsel %vm14372_vm2, %v8114_v60, %v8118_v10  ;;  %13023 = vmatmul.mubr.bf16.gmra.mrb[36].mxu0 %v11158_v1  ;;  %v8133_v55 = vrot.slane %v8131_v44, 4  ;;  %v8136_v33 = vrot.slane %v8134_v9, 5  ;;  %v8150_v26 = vshll.u32 %v11406_v16, 16  ;;  %13244 = vmatprep.subr.bf16.mxu1 %v13949_v19  ;;  %v13957_v10 = vld [vmem:[#allocation2 + $0x318] sm:$0xff]  }
 0x1a5   : > { %v8129_v22 = vsel %vm14372_vm2, %v8124_v27, %v8128_v24  ;;  %v8142_v20 = vrot.slane %v8140_v46, 5  ;;  %v8146_v21 = vrot.slane %v8144_v42, 4  ;;  %v5509_v23 = vshrl.u32 %v11119_v63, 16  ;;  %13058 = vmatprep.subr.bf16.mxu0 %v13960_v18  ;;  %v11464_v27 = vld [vmem:[%s14341_s26 + $0x54] sm:$0xf] }
 0x1a6   : > { %v11477_v8 = vcombine.low %v8119_v61, %v8129_v22  ;;  %v8137_v31 = vor.u32 %v8136_v33, %v8133_v55  ;;  %v8152_v25 = vrot.slane %v8150_v26, 5  ;;  %v5512_v11 = vshll.u32 %v11119_v63, 16  ;;  %v13961_v55 = vld [vmem:[#allocation2 + $0x320] sm:$0xff]  }
 0x1a7   : > { %v8147_v51 = vor.u32 %v8146_v21, %v8142_v20  ;;  %13245 = vmatpush3.bf16.msra.mxu1 %v13949_v19  ;;  %v15508_v45 = vrot.slane %v5509_v23, 4  ;;  %v5518_v4 = vshll.u32 %v11120_v39, 16  ;;  %v5522_v40 = vshrl.u32 %v11120_v39, 16  ;;  %13059 = vmatpush3.bf16.msra.mxu0 %v13960_v18  ;;  %v11123_v19 = vld [vmem:[%s14341_s26 + $0x58] sm:$0xf] }
 0x1a8   : > { %13214 = vmatprep.mubr.bf16.mxu1 %v11477_v8  ;;  %v8138_v36 = vrot.slane %v8137_v31, 4  ;;  %v15511_v58 = vrot.slane %v5512_v11, 5  ;;  %v11159_v37 = vcombine.low %v11119_v63, %v11120_v39  ;;  %v8155_v6 = vshrl.u32 %v11463_v56, 16  ;;  %13246 = vmatprep.subr.bf16.mxu1 %v13953_v7  ;;  %v11411_v63 = vld [vmem:[%s14341_s26 + $0x58] sm:$0xf] }
 0x1a9   : > { %v8148_v34 = vrot.slane %v8147_v51, 4  ;;  %v15514_v12 = vrot.slane %v5518_v4, 5  ;;  %v15516_v24 = vrot.slane %v5522_v40, 4  ;;  %v8158_v50 = vshll.u32 %v11463_v56, 16  ;;  %13060 = vmatprep.subr.bf16.mxu0 %v13964_v0  ;;  %v11412_v8 = vld [vmem:[%s14341_s26 + $0x5c] sm:$0x1] }
 0x1aa   : > { %v8143_v13 = vsel %vm14372_vm2, %v8138_v36, %v8142_v20  ;;  %13026 = vmatprep.mubr.bf16.mxu0 %v11159_v37  ;;  %v8157_v52 = vrot.slane %v8155_v6, 4  ;;  %v8164_v16 = vshll.u32 %v11408_v38, 16  ;;  %v8168_v18 = vshrl.u32 %v11408_v38, 16  ;;  %v13972_v20 = vld [vmem:[#allocation2 + $0x238] sm:$0xff]   ;;  %v11125_v51 = vld [vmem:[%s14341_s26 + $0x60] sm:$0xf] }
 0x1ab   : > { %v8153_v60 = vsel %vm14372_vm2, %v8148_v34, %v8152_v25  ;;  %v8160_v1 = vrot.slane %v8158_v50, 5  ;;  %v8174_v44 = vshll.u32 %v11409_v15, 16  ;;  %v5533_v9 = vshrl.u32 %v11122_v57, 16  ;;  %13247 = vmatpush3.bf16.msra.mxu1 %v13953_v7  ;;  %13061 = vmatpush3.bf16.msra.mxu0 %v13964_v0  ;;  %v13965_v4 = vld [vmem:[#allocation2 + $0x328] sm:$0xff]   ;;  %v15533_v40 = vld [vmem:[#allocation2 + $0x280] sm:$0xff]  }
 0x1ac   : > { %v11478_v46 = vcombine.low %v8143_v13, %v8153_v60  ;;  %v8166_v42 = vrot.slane %v8164_v16, 5  ;;  %v8170_v39 = vrot.slane %v8168_v18, 4  ;;  %v5536_v61 = vshll.u32 %v11122_v57, 16  ;;  %13248 = vmatprep.subr.bf16.mxu1 %v13957_v10  ;;  %13062 = vmatprep.subr.bf16.mxu0 %v13968_v49  ;;  %v11414_v18 = vld [vmem:[%s14341_s26 + $0x64] sm:$0xf] }
 0x1ad   : > { %v8161_v33 = vor.u32 %v8160_v1, %v8157_v52  ;;  %v8176_v26 = vrot.slane %v8174_v44, 5  ;;  %v15525_v56 = vrot.slane %v5533_v9, 4  ;;  %v5542_v22 = vshll.u32 %v11123_v19, 16  ;;  %v11465_v60 = vld [vmem:[%s14341_s26 + $0x60] sm:$0xf] }
 0x1ae   : > { %13215 = vmatmul.mubr.bf16.gmra.mrb[36].mxu1 %v11478_v46  ;;  %v8171_v21 = vor.u32 %v8170_v39, %v8166_v42  ;;  %v15527_v23 = vrot.slane %v5536_v61, 5  ;;  %v5546_v7 = vshrl.u32 %v11123_v19, 16  ;;  %v11160_v0 = vcombine.low %v11122_v57, %v11123_v19  ;;  %v11126_v57 = vld [vmem:[%s14341_s26 + $0x64] sm:$0xf]  ;;  %v11415_v61 = vld [vmem:[%s14341_s26 + $0x68] sm:$0x1] }
 0x1af   : > { %v8162_v31 = vrot.slane %v8161_v33, 4  ;;  %v15530_v25 = vrot.slane %v5542_v22, 5  ;;  %v8179_v11 = vshrl.u32 %v11464_v27, 16  ;;  %v8182_v38 = vshll.u32 %v11464_v27, 16  ;;  %13249 = vmatpush3.bf16.msra.mxu1 %v13957_v10  ;;  %13063 = vmatpush3.bf16.msra.mxu0 %v13968_v49  ;;  %v13969_v33 = vld [vmem:[#allocation2 + $0x330] sm:$0xff]  }
 0x1b0   : > { %v8172_v15 = vrot.slane %v8171_v21, 4  ;;  %v15535_v36 = vrot.slane %v5546_v7, 4  ;;  %13027 = vmatmul.mubr.bf16.gmra.mrb[40].mxu0 %v11160_v0  ;;  %v8188_v37 = vshll.u32 %v11411_v63, 16  ;;  %v8192_v6 = vshrl.u32 %v11411_v63, 16  ;;  %13250 = vmatprep.subr.bf16.mxu1 %v13961_v55  ;;  %v11128_v0 = vld [vmem:[%s14341_s26 + $0x6c] sm:$0xf] }
 0x1b1   : > { %v8167_v34 = vsel %vm14372_vm2, %v8162_v31, %v8166_v42  ;;  %v8181_v50 = vrot.slane %v8179_v11, 4  ;;  %v8184_v19 = vrot.slane %v8182_v38, 5  ;;  %v8198_v10 = vshll.u32 %v11412_v8, 16  ;;  %13064 = vmatprep.subr.bf16.mxu0 %v13972_v20  ;;  %v11129_v11 = vld [vmem:[%s14341_s26 + $0x70] sm:$0xf] }
 0x1b2   : > { %v8177_v49 = vsel %vm14372_vm2, %v8172_v15, %v8176_v26  ;;  %v8190_v13 = vrot.slane %v8188_v37, 5  ;;  %v8194_v52 = vrot.slane %v8192_v6, 4  ;;  %v5557_v16 = vshrl.u32 %v11125_v51, 16 }
 0x1b3   : > { %v11479_v1 = vcombine.low %v8167_v34, %v8177_v49  ;;  %v8185_v44 = vor.u32 %v8184_v19, %v8181_v50  ;;  %v8200_v9 = vrot.slane %v8198_v10, 5  ;;  %v5560_v63 = vshll.u32 %v11125_v51, 16  ;;  %13251 = vmatpush3.bf16.msra.mxu1 %v13961_v55  ;;  %13065 = vmatpush3.bf16.msra.mxu0 %v13972_v20  ;;  %v11417_v19 = vld [vmem:[%s14341_s26 + $0x70] sm:$0xf] }
 0x1b4   : > { %v8195_v27 = vor.u32 %v8194_v52, %v8190_v13  ;;  %v15544_v46 = vrot.slane %v5557_v16, 4  ;;  %v5566_v42 = vshll.u32 %v11126_v57, 16  ;;  %v5570_v39 = vshrl.u32 %v11126_v57, 16  ;;  %13252 = vmatprep.subr.bf16.mxu1 %v13965_v4  ;;  %13098 = vmatprep.subr.bf16.mxu0 %v15533_v40 }
 0x1b5   : > { %13218 = vmatprep.mubr.bf16.mxu1 %v11479_v1  ;;  %v8186_v26 = vrot.slane %v8185_v44, 4  ;;  %v15548_v22 = vrot.slane %v5560_v63, 5  ;;  %v11161_v21 = vcombine.low %v11125_v51, %v11126_v57  ;;  %v8203_v7 = vshrl.u32 %v11465_v60, 16 }
 0x1b6   : > { %v8196_v55 = vrot.slane %v8195_v27, 4  ;;  %v15551_v20 = vrot.slane %v5566_v42, 5  ;;  %v15553_v8 = vrot.slane %v5570_v39, 4  ;;  %v8206_v31 = vshll.u32 %v11465_v60, 16  ;;  %v13973_v60 = vld [vmem:[#allocation2 + $0x338] sm:$0xff]  }
 0x1b7   : > { %v8191_v38 = vsel %vm14372_vm2, %v8186_v26, %v8190_v13  ;;  %13030 = vmatprep.mubr.bf16.mxu0 %v11161_v21  ;;  %v8205_v15 = vrot.slane %v8203_v7, 4  ;;  %v8212_v37 = vshll.u32 %v11414_v18, 16  ;;  %v8216_v6 = vshrl.u32 %v11414_v18, 16  ;;  %13253 = vmatpush3.bf16.msra.mxu1 %v13965_v4  ;;  %v11466_v13 = vld [vmem:[%s14341_s26 + $0x6c] sm:$0xf] }
 0x1b8   : > { %v8201_v51 = vsel %vm14372_vm2, %v8196_v55, %v8200_v9  ;;  %v8208_v57 = vrot.slane %v8206_v31, 5  ;;  %v8222_v34 = vshll.u32 %v11415_v61, 16  ;;  %v5581_v50 = vshrl.u32 %v11128_v0, 16  ;;  %13254 = vmatprep.subr.bf16.mxu1 %v13969_v33  ;;  %v15567_v39 = vld [vmem:[%s14341_s26 + $0x74] sm:$0x1] }
 0x1b9   : > { %v11480_v10 = vcombine.low %v8191_v38, %v8201_v51  ;;  %v8214_v49 = vrot.slane %v8212_v37, 5  ;;  %v8218_v52 = vrot.slane %v8216_v6, 4  ;;  %v5584_v16 = vshll.u32 %v11128_v0, 16  ;;  %v11131_v55 = vld [vmem:[%s14341_s26 + $0x78] sm:$0xf] }
 0x1ba   : > { %v8209_v1 = vor.u32 %v8208_v57, %v8205_v15  ;;  %v8224_v44 = vrot.slane %v8222_v34, 5  ;;  %v15562_v18 = vrot.slane %v5581_v50, 4  ;;  %v5590_v4 = vshll.u32 %v11129_v11, 16  ;;  %v11132_v6 = vld [vmem:[%s14341_s26 + $0x7c] sm:$0xf] }
 0x1bb   : > { %13219 = vmatmul.mubr.bf16.gmra.mrb[40].mxu1 %v11480_v10  ;;  %v8219_v9 = vor.u32 %v8218_v52, %v8214_v49  ;;  %v15564_v63 = vrot.slane %v5584_v16, 5  ;;  %v5594_v27 = vshrl.u32 %v11129_v11, 16  ;;  %v11162_v42 = vcombine.low %v11128_v0, %v11129_v11  ;;  %v11467_v51 = vld [vmem:[%s14341_s26 + $0x78] sm:$0xf]  ;;  %v15576_v0 = vld [vmem:[#allocation2 + $0x380] sm:$0xff]  }
 0x1bc   : > { %v8210_v61 = vrot.slane %v8209_v1, 4  ;;  %v15569_v26 = vrot.slane %v5590_v4, 5  ;;  %v8227_v21 = vshrl.u32 %v11466_v13, 16  ;;  %v8230_v7 = vshll.u32 %v11466_v13, 16  ;;  %13255 = vmatpush3.bf16.msra.mxu1 %v13969_v33 }
 0x1bd   : > { %v8220_v31 = vrot.slane %v8219_v9, 4  ;;  %v15572_v38 = vrot.slane %v5594_v27, 4  ;;  %13031 = vmatmul.mubr.bf16.gmra.mrb[44].mxu0 %v11162_v42  ;;  %v8236_v15 = vshll.u32 %v11417_v19, 16  ;;  %v8240_v37 = vshrl.u32 %v11417_v19, 16  ;;  %13256 = vmatprep.subr.bf16.mxu1 %v13973_v60  ;;  %v15584_v19 = vld [vmem:[%s14341_s26 + $0x7c] sm:$0xf] }
 0x1be   : > { %v8215_v11 = vsel %vm14372_vm2, %v8210_v61, %v8214_v49  ;;  %v8229_v57 = vrot.slane %v8227_v21, 4  ;;  %v8232_v34 = vrot.slane %v8230_v7, 5  ;;  %v8246_v33 = vshll.u32 %v15567_v39, 16  ;;  %17240 = vst [vmem:[#allocation11_spill] sm:$0xff] %v15584_v19  ;;  %v15587_v27 = vld [vmem:[%s14341_s26 + $0x80] sm:$0x1] }
 0x1bf   : > { %v8225_v50 = vsel %vm14372_vm2, %v8220_v31, %v8224_v44  ;;  %v8238_v10 = vrot.slane %v8236_v15, 5  ;;  %v8242_v52 = vrot.slane %v8240_v37, 4  ;;  %v5605_v16 = vshrl.u32 %v11131_v55, 16  ;;  %17241 = vst [vmem:[#allocation13_spill] sm:$0xff] %v15587_v27  ;;  %v11134_v37 = vld [vmem:[%s14341_s26 + $0x84] sm:$0xf] }
 0x1c0   : > { %v11481_v13 = vcombine.low %v8215_v11, %v8225_v50  ;;  %v8233_v1 = vor.u32 %v8232_v34, %v8229_v57  ;;  %v8248_v4 = vrot.slane %v8246_v33, 5  ;;  %v5608_v9 = vshll.u32 %v11131_v55, 16  ;;  %13257 = vmatpush3.bf16.msra.mxu1 %v13973_v60  ;;  %v11135_v33 = vld [vmem:[%s14341_s26 + $0x88] sm:$0xf] }
 0x1c1   : > { %v8243_v49 = vor.u32 %v8242_v52, %v8238_v10  ;;  %v15589_v42 = vrot.slane %v5605_v16, 4  ;;  %v5614_v61 = vshll.u32 %v11132_v6, 16  ;;  %v5618_v21 = vshrl.u32 %v11132_v6, 16  ;;  %13290 = vmatprep.subr.bf16.mxu1 %v15576_v0 }
 0x1c2   : > { %13222 = vmatprep.mubr.bf16.mxu1 %v11481_v13  ;;  %v8234_v44 = vrot.slane %v8233_v1, 4  ;;  %v15592_v7 = vrot.slane %v5608_v9, 5  ;;  %v11163_v31 = vcombine.low %v11131_v55, %v11132_v6  ;;  %v8251_v15 = vshrl.u32 %v11467_v51, 16  ;;  %v11468_v6 = vld [vmem:[%s14341_s26 + $0x84] sm:$0xf] }
 0x1c3   : > { %17242 = vst [vmem:[#allocation15_spill] sm:$0xff] %v15589_v42  ;;  %v8244_v11 = vrot.slane %v8243_v49, 4  ;;  %v15595_v57 = vrot.slane %v5614_v61, 5  ;;  %v15597_v60 = vrot.slane %v5618_v21, 4  ;;  %v8254_v34 = vshll.u32 %v11467_v51, 16 }
 0x1c4   : > { %17243 = vst [vmem:[#allocation16_spill] sm:$0xff] %v15592_v7  ;;  %v8239_v50 = vsel %vm14372_vm2, %v8234_v44, %v8238_v10  ;;  %13034 = vmatprep.mubr.bf16.mxu0 %v11163_v31  ;;  %v8253_v52 = vrot.slane %v8251_v15, 4  ;;  %v8260_v16 = vshll.u32 %v15584_v19, 16  ;;  %v8264_v55 = vshrl.u32 %v15584_v19, 16  ;;  %v15609_v51 = vld [vmem:[%s14341_s26 + $0x88] sm:$0xf] }
 0x1c5   : > { %17244 = vst [vmem:[#allocation17_spill] sm:$0xff] %v15595_v57  ;;  %17245 = vst [vmem:[#allocation12_spill] sm:$0xff] %v15597_v60  ;;  %v8249_v13 = vsel %vm14372_vm2, %v8244_v11, %v8248_v4  ;;  %v8256_v1 = vrot.slane %v8254_v34, 5  ;;  %v8270_v9 = vshll.u32 %v15587_v27, 16  ;;  %v5629_v49 = vshrl.u32 %v11134_v37, 16 }
 0x1c6   : > { %17246 = vst [vmem:[#allocation14_spill] sm:$0xff] %v15609_v51  ;;  %v11482_v61 = vcombine.low %v8239_v50, %v8249_v13  ;;  %v8262_v21 = vrot.slane %v8260_v16, 5  ;;  %v8266_v10 = vrot.slane %v8264_v55, 4  ;;  %v5632_v44 = vshll.u32 %v11134_v37, 16  ;;  %v15614_v57 = vld [vmem:[%s14341_s26 + $0x8c] sm:$0x1] }
 0x1c7   : > { %v8257_v31 = vor.u32 %v8256_v1, %v8253_v52  ;;  %v8272_v15 = vrot.slane %v8270_v9, 5  ;;  %v15611_v60 = vrot.slane %v5629_v49, 4  ;;  %v5638_v19 = vshll.u32 %v11135_v33, 16  ;;  %17248 = vst [vmem:[#allocation20_spill] sm:$0xff] %v15614_v57  ;;  %v11137_v52 = vld [vmem:[%s14341_s26 + $0x90] sm:$0xf] }
 0x1c8   : > { %13223 = vmatmul.mubr.bf16.gmra.mrb[44].mxu1 %v11482_v61  ;;  %v8267_v4 = vor.u32 %v8266_v10, %v8262_v21  ;;  %v15616_v11 = vrot.slane %v5632_v44, 5  ;;  %v5642_v34 = vshrl.u32 %v11135_v33, 16  ;;  %v11164_v27 = vcombine.low %v11134_v37, %v11135_v33  ;;  %v11138_v10 = vld [vmem:[%s14341_s26 + $0x94] sm:$0xf]  ;;  %v15636_v7 = vld [vmem:[%s14341_s26 + $0x98] sm:$0x1] }
 0x1c9   : > { %17247 = vst [vmem:[#allocation18_spill] sm:$0xff] %v15611_v60  ;;  %v8258_v50 = vrot.slane %v8257_v31, 4  ;;  %v15618_v16 = vrot.slane %v5638_v19, 5  ;;  %v8275_v55 = vshrl.u32 %v11468_v6, 16  ;;  %v8278_v13 = vshll.u32 %v11468_v6, 16  ;;  %17253 = vst [vmem:[#allocation26_spill] sm:$0xff] %v15636_v7 }
 0x1ca   : > { %17249 = vst [vmem:[#allocation22_spill] sm:$0xff] %v15616_v11  ;;  %v8268_v1 = vrot.slane %v8267_v4, 4  ;;  %v15621_v9 = vrot.slane %v5642_v34, 4  ;;  %13035 = vmatmul.mubr.bf16.gmra.mrb[48].mxu0 %v11164_v27  ;;  %v8284_v49 = vshll.u32 %v15609_v51, 16  ;;  %v8288_v61 = vshrl.u32 %v15609_v51, 16 }
 0x1cb   : > { %17250 = vst [vmem:[#allocation23_spill] sm:$0xff] %v15618_v16  ;;  %v8263_v37 = vsel %vm14372_vm2, %v8258_v50, %v8262_v21  ;;  %v8277_v33 = vrot.slane %v8275_v55, 4  ;;  %v8280_v19 = vrot.slane %v8278_v13, 5  ;;  %v8294_v44 = vshll.u32 %v15614_v57, 16  ;;  %v11469_v6 = vld [vmem:[%s14341_s26 + $0x90] sm:$0xf] }
 0x1cc   : > { %17251 = vst [vmem:[#allocation19_spill] sm:$0xff] %v15621_v9  ;;  %v8273_v31 = vsel %vm14372_vm2, %v8268_v1, %v8272_v15  ;;  %v8286_v4 = vrot.slane %v8284_v49, 5  ;;  %v8290_v34 = vrot.slane %v8288_v61, 4  ;;  %v5653_v27 = vshrl.u32 %v11137_v52, 16  ;;  %v15633_v9 = vld [vmem:[%s14341_s26 + $0x94] sm:$0xf] }
 0x1cd   : > { %17252 = vst [vmem:[#allocation21_spill] sm:$0xff] %v15633_v9  ;;  %v11483_v16 = vcombine.low %v8263_v37, %v8273_v31  ;;  %v8281_v51 = vor.u32 %v8280_v19, %v8277_v33  ;;  %v8296_v11 = vrot.slane %v8294_v44, 5  ;;  %v5656_v60 = vshll.u32 %v11137_v52, 16  ;;  %v11140_v31 = vld [vmem:[%s14341_s26 + $0x9c] sm:$0xf] }
 0x1ce   : > { %v8291_v21 = vor.u32 %v8290_v34, %v8286_v4  ;;  %v15638_v50 = vrot.slane %v5653_v27, 4  ;;  %v5662_v55 = vshll.u32 %v11138_v10, 16  ;;  %v5666_v13 = vshrl.u32 %v11138_v10, 16  ;;  %v11395_v42 = vld [vmem:[%s14341_s26 + $0x18] sm:$0xe] }
 0x1cf   : > { %13226 = vmatprep.mubr.bf16.mxu1 %v11483_v16  ;;  %v8282_v15 = vrot.slane %v8281_v51, 4  ;;  %v15640_v1 = vrot.slane %v5656_v60, 5  ;;  %v11165_v49 = vcombine.low %v11137_v52, %v11138_v10  ;;  %v8299_v61 = vshrl.u32 %v11469_v6, 16  ;;  %v11141_v16 = vld [vmem:[%s14341_s26 + $0xa0] sm:$0xf] }
 0x1d0   : > { %17254 = vst [vmem:[#allocation27_spill] sm:$0xff] %v15638_v50  ;;  %v8292_v37 = vrot.slane %v8291_v21, 4  ;;  %v15642_v33 = vrot.slane %v5662_v55, 5  ;;  %v15644_v19 = vrot.slane %v5666_v13, 4  ;;  %v8302_v44 = vshll.u32 %v11469_v6, 16 }
 0x1d1   : > { %17255 = vst [vmem:[#allocation28_spill] sm:$0xff] %v15640_v1  ;;  %v8287_v34 = vsel %vm14372_vm2, %v8282_v15, %v8286_v4  ;;  %13038 = vmatprep.mubr.bf16.mxu0 %v11165_v49  ;;  %v8301_v27 = vrot.slane %v8299_v61, 4  ;;  %v8308_v51 = vshll.u32 %v15633_v9, 16  ;;  %v8312_v60 = vshrl.u32 %v15633_v9, 16  ;;  %v15656_v6 = vld [vmem:[%s14341_s26 + $0xa0] sm:$0xf] }
 0x1d2   : > { %17256 = vst [vmem:[#allocation29_spill] sm:$0xff] %v15642_v33  ;;  %17257 = vst [vmem:[#allocation24_spill] sm:$0xff] %v15644_v19  ;;  %v8297_v52 = vsel %vm14372_vm2, %v8292_v37, %v8296_v11  ;;  %v8304_v10 = vrot.slane %v8302_v44, 5  ;;  %v8318_v21 = vshll.u32 %v15636_v7, 16  ;;  %v5677_v55 = vshrl.u32 %v11140_v31, 16 }
 0x1d3   : > { %17258 = vst [vmem:[#allocation25_spill] sm:$0xff] %v15656_v6  ;;  %v11470_v13 = vld [vmem:[%s14341_s26 + $0x9c] sm:$0xf]  ;;  %v11484_v19 = vcombine.low %v8287_v34, %v8297_v52  ;;  %v8310_v4 = vrot.slane %v8308_v51, 5  ;;  %v8314_v15 = vrot.slane %v8312_v60, 4  ;;  %v5680_v49 = vshll.u32 %v11140_v31, 16 }
 0x1d4   : > { %v8305_v61 = vor.u32 %v8304_v10, %v8301_v27  ;;  %v8320_v33 = vrot.slane %v8318_v21, 5  ;;  %v15659_v1 = vrot.slane %v5677_v55, 4  ;;  %v5686_v9 = vshll.u32 %v11141_v16, 16  ;;  %v15664_v50 = vld [vmem:[%s14341_s26 + $0xa4] sm:$0x1] }
 0x1d5   : > { %13227 = vmatmul.mubr.bf16.gmra.mrb[48].mxu1 %v11484_v19  ;;  %v8315_v11 = vor.u32 %v8314_v15, %v8310_v4  ;;  %v15661_v37 = vrot.slane %v5680_v49, 5  ;;  %v5690_v44 = vshrl.u32 %v11141_v16, 16  ;;  %v11166_v7 = vcombine.low %v11140_v31, %v11141_v16  ;;  %17261 = vst [vmem:[#allocation34_spill] sm:$0xff] %v15664_v50  ;;  %v11143_v21 = vld [vmem:[%s14341_s26 + $0xa8] sm:$0xf] }
 0x1d6   : > { %17259 = vst [vmem:[#allocation30_spill] sm:$0xff] %v15659_v1  ;;  %v8306_v57 = vrot.slane %v8305_v61, 4  ;;  %v15666_v34 = vrot.slane %v5686_v9, 5  ;;  %v8323_v51 = vshrl.u32 %v11470_v13, 16  ;;  %v8326_v60 = vshll.u32 %v11470_v13, 16 }
 0x1d7   : > { %17260 = vst [vmem:[#allocation32_spill] sm:$0xff] %v15661_v37  ;;  %v8316_v27 = vrot.slane %v8315_v11, 4  ;;  %v15668_v52 = vrot.slane %v5690_v44, 4  ;;  %13039 = vmatmul.mubr.bf16.gmra.mrb[52].mxu0 %v11166_v7  ;;  %v8332_v19 = vshll.u32 %v15656_v6, 16  ;;  %v8336_v10 = vshrl.u32 %v15656_v6, 16 }
 0x1d8   : > { %17262 = vst [vmem:[#allocation35_spill] sm:$0xff] %v15666_v34  ;;  %v8311_v31 = vsel %vm14372_vm2, %v8306_v57, %v8310_v4  ;;  %v8325_v16 = vrot.slane %v8323_v51, 4  ;;  %v8328_v55 = vrot.slane %v8326_v60, 5  ;;  %v8342_v9 = vshll.u32 %v15664_v50, 16  ;;  %v11144_v13 = vld [vmem:[%s14341_s26 + $0xac] sm:$0xf] }
 0x1d9   : > { %17263 = vst [vmem:[#allocation31_spill] sm:$0xff] %v15668_v52  ;;  %v8321_v15 = vsel %vm14372_vm2, %v8316_v27, %v8320_v33  ;;  %v8334_v49 = vrot.slane %v8332_v19, 5  ;;  %v8338_v7 = vrot.slane %v8336_v10, 4  ;;  %v5701_v61 = vshrl.u32 %v11143_v21, 16  ;;  %v11471_v11 = vld [vmem:[%s14341_s26 + $0xa8] sm:$0xf] }
 0x1da   : > { %v11485_v44 = vcombine.low %v8311_v31, %v8321_v15  ;;  %v8329_v6 = vor.u32 %v8328_v55, %v8325_v16  ;;  %v8344_v52 = vrot.slane %v8342_v9, 5  ;;  %v5704_v34 = vshll.u32 %v11143_v21, 16  ;;  %v15681_v37 = vld [vmem:[%s14341_s26 + $0xac] sm:$0xf]  ;;  %v15686_v50 = vld [vmem:[%s14341_s26 + $0xb0] sm:$0x1] }
 0x1db   : > { %17264 = vst [vmem:[#allocation33_spill] sm:$0xff] %v15681_v37  ;;  %v8339_v57 = vor.u32 %v8338_v7, %v8334_v49  ;;  %v15683_v4 = vrot.slane %v5701_v61, 4  ;;  %v5710_v51 = vshll.u32 %v11144_v13, 16  ;;  %v5714_v60 = vshrl.u32 %v11144_v13, 16  ;;  %17266 = vst [vmem:[#allocation38_spill] sm:$0xff] %v15686_v50 }
 0x1dc   : > { %13230 = vmatprep.mubr.bf16.mxu1 %v11485_v44  ;;  %v8330_v33 = vrot.slane %v8329_v6, 4  ;;  %v15688_v27 = vrot.slane %v5704_v34, 5  ;;  %v11167_v19 = vcombine.low %v11143_v21, %v11144_v13  ;;  %v8347_v10 = vshrl.u32 %v11471_v11, 16  ;;  %v11146_v31 = vld [vmem:[%s14341_s26 + $0xb4] sm:$0xf] }
 0x1dd   : > { %17265 = vst [vmem:[#allocation37_spill] sm:$0xff] %v15683_v4  ;;  %v8340_v16 = vrot.slane %v8339_v57, 4  ;;  %v15691_v55 = vrot.slane %v5710_v51, 5  ;;  %v15693_v9 = vrot.slane %v5714_v60, 4  ;;  %v8350_v15 = vshll.u32 %v11471_v11, 16 }
 0x1de   : > { %17267 = vst [vmem:[#allocation40_spill] sm:$0xff] %v15688_v27  ;;  %v11147_v7 = vld [vmem:[%s14341_s26 + $0xb8] sm:$0xf]  ;;  %v8335_v61 = vsel %vm14372_vm2, %v8330_v33, %v8334_v49  ;;  %13042 = vmatprep.mubr.bf16.mxu0 %v11167_v19  ;;  %v8349_v4 = vrot.slane %v8347_v10, 4  ;;  %v8356_v6 = vshll.u32 %v15681_v37, 16  ;;  %v8360_v34 = vshrl.u32 %v15681_v37, 16 }
 0x1df   : > { %17268 = vst [vmem:[#allocation41_spill] sm:$0xff] %v15691_v55  ;;  %17269 = vst [vmem:[#allocation36_spill] sm:$0xff] %v15693_v9  ;;  %v11472_v21 = vld [vmem:[%s14341_s26 + $0xb4] sm:$0xf]  ;;  %v8345_v13 = vsel %vm14372_vm2, %v8340_v16, %v8344_v52  ;;  %v8352_v44 = vrot.slane %v8350_v15, 5  ;;  %v8366_v57 = vshll.u32 %v15686_v50, 16  ;;  %v11168_v15 = vcombine.low %v11146_v31, %v11147_v7 }
 0x1e0   : > { %v5725_v11 = vshrl.u32 %v11146_v31, 16  ;;  %v11486_v51 = vcombine.low %v8335_v61, %v8345_v13  ;;  %v8358_v60 = vrot.slane %v8356_v6, 5  ;;  %v8362_v9 = vrot.slane %v8360_v34, 4  ;;  %v15707_v37 = vld [vmem:[%s14341_s26 + $0xb8] sm:$0xf] }
 0x1e1   : > { %v5728_v49 = vshll.u32 %v11146_v31, 16  ;;  %v8353_v33 = vor.u32 %v8352_v44, %v8349_v4  ;;  %v8368_v19 = vrot.slane %v8366_v57, 5  ;;  %v5734_v55 = vshll.u32 %v11147_v7, 16  ;;  %17271 = vst [vmem:[#allocation42_spill] sm:$0xff] %v15707_v37  ;;  %v15712_v50 = vld [vmem:[%s14341_s26 + $0xbc] sm:$0x1]  ;;  %13043 = vmatmul.mubr.bf16.gmra.mrb[56].mxu0 %v11168_v15 }
 0x1e2   : > { %v15704_v10 = vrot.slane %v5725_v11, 4  ;;  %13231 = vmatmul.mubr.bf16.gmra.mrb[52].mxu1 %v11486_v51  ;;  %v8363_v27 = vor.u32 %v8362_v9, %v8358_v60  ;;  %v5738_v16 = vshrl.u32 %v11147_v7, 16  ;;  %17273 = vst [vmem:[#allocation46_spill] sm:$0xff] %v15712_v50  ;;  %v8371_v34 = vshrl.u32 %v11472_v21, 16  ;;  %v11149_v13 = vld [vmem:[%s14341_s26 + $0xc0] sm:$0xf] }
 0x1e3   : > { %v15709_v52 = vrot.slane %v5728_v49, 5  ;;  %v8354_v61 = vrot.slane %v8353_v33, 4  ;;  %v15714_v6 = vrot.slane %v5734_v55, 5  ;;  %v8374_v4 = vshll.u32 %v11472_v21, 16  ;;  %v11150_v49 = vld [vmem:[%s14341_s26 + $0xc4] sm:$0xf] }
 0x1e4   : > { %17270 = vst [vmem:[#allocation39_spill] sm:$0xff] %v15704_v10  ;;  %v8364_v44 = vrot.slane %v8363_v27, 4  ;;  %v15717_v57 = vrot.slane %v5738_v16, 4  ;;  %v8380_v9 = vshll.u32 %v15707_v37, 16  ;;  %v8384_v11 = vshrl.u32 %v15707_v37, 16 }
 0x1e5   : > { %17272 = vst [vmem:[#allocation44_spill] sm:$0xff] %v15709_v52  ;;  %17274 = vst [vmem:[#allocation47_spill] sm:$0xff] %v15714_v6  ;;  %v8359_v31 = vsel %vm14372_vm2, %v8354_v61, %v8358_v60  ;;  %v8373_v7 = vrot.slane %v8371_v34, 4  ;;  %v8376_v51 = vrot.slane %v8374_v4, 5  ;;  %v8390_v55 = vshll.u32 %v15712_v50, 16 }
 0x1e6   : > { %17275 = vst [vmem:[#allocation43_spill] sm:$0xff] %v15717_v57  ;;  %v8369_v21 = vsel %vm14372_vm2, %v8364_v44, %v8368_v19  ;;  %v8382_v27 = vrot.slane %v8380_v9, 5  ;;  %v8386_v33 = vrot.slane %v8384_v11, 4  ;;  %v5749_v16 = vshrl.u32 %v11149_v13, 16  ;;  %v11473_v15 = vld [vmem:[%s14341_s26 + $0xc0] sm:$0xf] }
 0x1e7   : > { %v11487_v57 = vcombine.low %v8359_v31, %v8369_v21  ;;  %v8377_v6 = vor.u32 %v8376_v51, %v8373_v7  ;;  %v8392_v37 = vrot.slane %v8390_v55, 5  ;;  %v5752_v52 = vshll.u32 %v11149_v13, 16  ;;  %v15731_v50 = vld [vmem:[%s14341_s26 + $0xc4] sm:$0xf]  ;;  %v15736_v11 = vld [vmem:[%s14341_s26 + $0xc8] sm:$0x1] }
 0x1e8   : > { %v8387_v60 = vor.u32 %v8386_v33, %v8382_v27  ;;  %v15728_v61 = vrot.slane %v5749_v16, 4  ;;  %v5758_v34 = vshll.u32 %v11150_v49, 16  ;;  %v5762_v4 = vshrl.u32 %v11150_v49, 16  ;;  %17277 = vst [vmem:[#allocation49_spill] sm:$0xff] %v15731_v50  ;;  %17279 = vst [vmem:[#allocation52_spill] sm:$0xff] %v15736_v11 }
 0x1e9   : > { %13234 = vmatprep.mubr.bf16.mxu1 %v11487_v57  ;;  %v8378_v19 = vrot.slane %v8377_v6, 4  ;;  %v15733_v44 = vrot.slane %v5752_v52, 5  ;;  %v11169_v9 = vcombine.low %v11149_v13, %v11150_v49  ;;  %v8395_v31 = vshrl.u32 %v11473_v15, 16  ;;  %v11152_v33 = vld [vmem:[%s14341_s26 + $0xcc] sm:$0xf] }
 0x1ea   : > { %17276 = vst [vmem:[#allocation45_spill] sm:$0xff] %v15728_v61  ;;  %v8388_v7 = vrot.slane %v8387_v60, 4  ;;  %v15738_v51 = vrot.slane %v5758_v34, 5  ;;  %v15740_v55 = vrot.slane %v5762_v4, 4  ;;  %v8398_v21 = vshll.u32 %v11473_v15, 16 }
 0x1eb   : > { %17278 = vst [vmem:[#allocation51_spill] sm:$0xff] %v15733_v44  ;;  %v8383_v57 = vsel %vm14372_vm2, %v8378_v19, %v8382_v27  ;;  %13046 = vmatprep.mubr.bf16.mxu0 %v11169_v9  ;;  %v8397_v6 = vrot.slane %v8395_v31, 4  ;;  %v8404_v52 = vshll.u32 %v15731_v50, 16  ;;  %v8408_v13 = vshrl.u32 %v15731_v50, 16  ;;  %v11153_v49 = vld [vmem:[%s14341_s26 + $0xd0] sm:$0xf] }
 0x1ec   : > { %17280 = vst [vmem:[#allocation53_spill] sm:$0xff] %v15738_v51  ;;  %17281 = vst [vmem:[#allocation48_spill] sm:$0xff] %v15740_v55  ;;  %v8393_v16 = vsel %vm14372_vm2, %v8388_v7, %v8392_v37  ;;  %v8400_v60 = vrot.slane %v8398_v21, 5  ;;  %v8414_v34 = vshll.u32 %v15736_v11, 16  ;;  %v5773_v4 = vshrl.u32 %v11152_v33, 16 }
 0x1ed   : > { %v15752_v15 = vld [vmem:[%s14341_s26 + $0xd0] sm:$0xf]  ;;  %v11474_v55 = vld [vmem:[%s14341_s26 + $0xcc] sm:$0xf]  ;;  %v11488_v51 = vcombine.low %v8383_v57, %v8393_v16  ;;  %v8406_v27 = vrot.slane %v8404_v52, 5  ;;  %v8410_v19 = vrot.slane %v8408_v13, 4  ;;  %v11170_v11 = vcombine.low %v11152_v33, %v11153_v49 }
 0x1ee   : > { %17282 = vst [vmem:[#allocation50_spill] sm:$0xff] %v15752_v15  ;;  %v5776_v9 = vshll.u32 %v11152_v33, 16  ;;  %v8401_v31 = vor.u32 %v8400_v60, %v8397_v6  ;;  %v8416_v50 = vrot.slane %v8414_v34, 5  ;;  %v15755_v44 = vrot.slane %v5773_v4, 4  ;;  %v15760_v10 = vld [vmem:[%s14341_s26 + $0xd4] sm:$0x1] }
 0x1ef   : > { %v5782_v61 = vshll.u32 %v11153_v49, 16  ;;  %13235 = vmatmul.mubr.bf16.gmra.mrb[56].mxu1 %v11488_v51  ;;  %v8411_v37 = vor.u32 %v8410_v19, %v8406_v27  ;;  %v5786_v21 = vshrl.u32 %v11153_v49, 16  ;;  %17283 = vst [vmem:[#allocation54_spill] sm:$0xff] %v15760_v10  ;;  %v8419_v52 = vshrl.u32 %v11474_v55, 16  ;;  %v11109_v16 = vld [vmem:[%s14341_s26 + $0x20] sm:$0x1]  ;;  %13047 = vmatmul.mubr.bf16.gmra.mrb[60].mxu0 %v11170_v11 }
 0x1f0   : > { %v15757_v7 = vrot.slane %v5776_v9, 5  ;;  %v8402_v1 = vrot.slane %v8401_v31, 4  ;;  %v8422_v13 = vshll.u32 %v11474_v55, 16  ;;  %v8428_v51 = vshll.u32 %v15752_v15, 16 }
 0x1f1   : > { %v15762_v57 = vrot.slane %v5782_v61, 5  ;;  %v8412_v6 = vrot.slane %v8411_v37, 4  ;;  %v15766_v60 = vrot.slane %v5786_v21, 4  ;;  %v8432_v34 = vshrl.u32 %v15752_v15, 16  ;;  %v14056_v15 = vld [vmem:[%s14341_s26 + $0x20] sm:$0x1] }
 0x1f2   : > { %v8407_v33 = vsel %vm14372_vm2, %v8402_v1, %v8406_v27  ;;  %v8421_v49 = vrot.slane %v8419_v52, 4  ;;  %v8424_v4 = vrot.slane %v8422_v13, 5  ;;  %v8438_v61 = vshll.u32 %v15760_v10, 16 }
 0x1f3   : > { %17284 = vst [vmem:[#allocation55_spill] sm:$0xff] %v15766_v60  ;;  %v8417_v55 = vsel %vm14372_vm2, %v8412_v6, %v8416_v50  ;;  %v8430_v19 = vrot.slane %v8428_v51, 5  ;;  %v8434_v9 = vrot.slane %v8432_v34, 4  ;;  %v5419_v11 = vor.u32 %v15441_v43, %v15437_v29  ;;  %v14055_v51 = vld [vmem:[%s14341_s26 + $0x1c] sm:$0xf] }
 0x1f4   : > { %v11489_v31 = vcombine.low %v8407_v33, %v8417_v55  ;;  %v8425_v37 = vor.u32 %v8424_v4, %v8421_v49  ;;  %v8440_v21 = vrot.slane %v8438_v61, 5  ;;  %v5429_v1 = vor.u32 %v15448_v2, %v15443_v32  ;;  %v11112_v29 = vld [vmem:[%s14341_s26 + $0x2c] sm:$0x1]  ;;  %v11398_v61 = vld [vmem:[%s14341_s26 + $0x24] sm:$0xe] }
 0x1f5   : > { %v8435_v27 = vor.u32 %v8434_v9, %v8430_v19  ;;  %v5420_v52 = vrot.slane %v5419_v11, 4  ;;  %v5432_v13 = vshll.u32 %v11109_v16, 16  ;;  %v11443_v10 = vrot.slane %v11395_v42, 9 }
 0x1f6   : > { %13238 = vmatprep.mubr.bf16.mxu1 %v11489_v31  ;;  %v8426_v50 = vrot.slane %v8425_v37, 4  ;;  %v5430_v6 = vrot.slane %v5429_v1, 4  ;;  %v7915_v34 = vrot.slane %v14055_v51, 5  ;;  %v7918_v60 = vrot.slane %v14056_v15, 5  ;;  %v11115_v31 = vld [vmem:[%s14341_s26 + $0x38] sm:$0x1] }
 0x1f7   : > { %v8436_v43 = vrot.slane %v8435_v27, 4  ;;  %v5425_v33 = vsel %vm14372_vm2, %v5420_v52, %v15443_v32  ;;  %v5434_v2 = vrot.slane %v5432_v13, 5  ;;  %v5443_v42 = vor.u32 %v15458_v62, %v15455_v54  ;;  %v11401_v37 = vld [vmem:[%s14341_s26 + $0x30] sm:$0xe]  ;;  %v14057_v52 = vld [vmem:[%s14341_s26 + $0x28] sm:$0xf] }
 0x1f8   : > { %v8431_v16 = vsel %vm14372_vm2, %v8426_v50, %v8430_v19  ;;  %v7916_v49 = vsel %vm14722_vm5, %v11443_v10, %v7915_v34  ;;  %v7917_v4 = vrot.slane %v7915_v34, 4  ;;  %v5453_v15 = vor.u32 %v15462_v5, %v15460_v47  ;;  %v14058_v50 = vld [vmem:[%s14341_s26 + $0x2c] sm:$0x1] }
 0x1f9   : > { %v8441_v32 = vsel %vm14372_vm2, %v8436_v43, %v8440_v21  ;;  %v5435_v55 = vsel %vm14372_vm2, %v5430_v6, %v5434_v2  ;;  %v5444_v9 = vrot.slane %v5443_v42, 4  ;;  %v5456_v54 = vshll.u32 %v11112_v29, 16  ;;  %v14059_v43 = vld [vmem:[%s14341_s26 + $0x34] sm:$0xf] }
 0x1fa   : > { %v11490_v62 = vcombine.low %v8431_v16, %v8441_v32  ;;  %v11179_v19 = vcombine.low %v5425_v33, %v5435_v55  ;;  %v7919_v10 = vsel %vm14722_vm5, %v7917_v4, %v7918_v60  ;;  %v5454_v11 = vrot.slane %v5453_v15, 4  ;;  %v11404_v32 = vld [vmem:[%s14341_s26 + $0x3c] sm:$0xe] }
 0x1fb   : > { %v11499_v5 = vcombine.low %v7916_v49, %v7919_v10  ;;  %v5449_v21 = vsel %vm14372_vm2, %v5444_v9, %v15460_v47  ;;  %v5458_v1 = vrot.slane %v5456_v54, 5  ;;  %v11444_v27 = vrot.slane %v11398_v61, 9  ;;  %v14060_v54 = vld [vmem:[%s14341_s26 + $0x38] sm:$0x1] }
 0x1fc   : > { %13239 = vmatmul.mubr.bf16.gmra.mrb[60].mxu1 %v11490_v62  ;;  %13066 = vmatprep.mubr.bf16.mxu0 %v11179_v19  ;;  %v7922_v13 = vrot.slane %v14057_v52, 5  ;;  %v7925_v6 = vrot.slane %v14058_v50, 5  ;;  %v5467_v60 = vor.u32 %v15476_v59, %v15474_v3  ;;  %v5477_v51 = vor.u32 %v15481_v30, %v15479_v14  ;;  %v11118_v3 = vld [vmem:[%s14341_s26 + $0x44] sm:$0x1]  ;;  %v13976_v59 = vld [vmem:[#allocation2 + $0x288] sm:$0xff]  }
 0x1fd   : > { %13258 = vmatprep.mubr.bf16.mxu1 %v11499_v5  ;;  %v5459_v47 = vsel %vm14372_vm2, %v5454_v11, %v5458_v1  ;;  %v5480_v34 = vshll.u32 %v11115_v31, 16  ;;  %v11445_v29 = vrot.slane %v11401_v37, 9  ;;  %v7929_v33 = vrot.slane %v14059_v43, 5  ;;  %v13977_v5 = vld [vmem:[#allocation2 + $0x388] sm:$0xff]  }
 0x1fe   : > { %v11180_v2 = vcombine.low %v5449_v21, %v5459_v47  ;;  %v7923_v42 = vsel %vm14722_vm5, %v11444_v27, %v7922_v13  ;;  %v7924_v16 = vrot.slane %v7922_v13, 4  ;;  %v5468_v49 = vrot.slane %v5467_v60, 4  ;;  %v14061_v13 = vld [vmem:[%s14341_s26 + $0x40] sm:$0xf]  ;;  %v13978_v60 = vld [vmem:[#allocation2 + $0x290] sm:$0xff]  }
 0x1ff   : > { %v5478_v4 = vrot.slane %v5477_v51, 4  ;;  %v5482_v30 = vrot.slane %v5480_v34, 5  ;;  %v7930_v15 = vsel %vm14722_vm5, %v11445_v29, %v7929_v33  ;;  %v7931_v61 = vrot.slane %v7929_v33, 4  ;;  %v14062_v51 = vld [vmem:[%s14341_s26 + $0x44] sm:$0x1] }
 0x200   : > { %13067 = vmatmul.mubr.bf16.vlgmr.msra.gmra.mrb[32].mxu0 %v11180_v2  ;;  %v7926_v55 = vsel %vm14722_vm5, %v7924_v16, %v7925_v6  ;;  %v5473_v9 = vsel %vm14372_vm2, %v5468_v49, %v15479_v14  ;;  %v7932_v62 = vrot.slane %v14060_v54, 5  ;;  %v5491_v19 = vor.u32 %v15492_v41, %v15489_v53  ;;  %v11121_v41 = vld [vmem:[%s14341_s26 + $0x50] sm:$0x1]  ;;  %v11407_v6 = vld [vmem:[%s14341_s26 + $0x48] sm:$0xe] }
 0x201   : > { %v11500_v10 = vcombine.low %v7923_v42, %v7926_v55  ;;  %13099 = vmatpush3.bf16.msra.mxu0 %v15533_v40  ;;  %v5483_v11 = vsel %vm14372_vm2, %v5478_v4, %v5482_v30  ;;  %v5501_v31 = vor.u32 %v15499_v35, %v15494_v28  ;;  %v5504_v37 = vshll.u32 %v11118_v3, 16  ;;  %v11124_v16 = vld [vmem:[%s14341_s26 + $0x5c] sm:$0x1]  ;;  %v14063_v4 = vld [vmem:[%s14341_s26 + $0x4c] sm:$0xf] }
 0x202   : > { %v11181_v21 = vcombine.low %v5473_v9, %v5483_v11  ;;  %v7933_v14 = vsel %vm14722_vm5, %v7931_v61, %v7932_v62  ;;  %v5492_v1 = vrot.slane %v5491_v19, 4  ;;  %13100 = vmatprep.subr.bf16.mxu0 %v13976_v59  ;;  %v11446_v53 = vrot.slane %v11404_v32, 9  ;;  %v11410_v32 = vld [vmem:[%s14341_s26 + $0x54] sm:$0xe]  ;;  %v13980_v55 = vld [vmem:[#allocation2 + $0x298] sm:$0xff]  }
 0x203   : > { %v11501_v27 = vcombine.low %v7930_v15, %v7933_v14  ;;  %v5502_v40 = vrot.slane %v5501_v31, 4  ;;  %v5506_v52 = vrot.slane %v5504_v37, 5  ;;  %v7936_v50 = vrot.slane %v14061_v13, 5  ;;  %v14064_v15 = vld [vmem:[%s14341_s26 + $0x50] sm:$0x1] }
 0x204   : > { %13259 = vmatmul.mubr.bf16.vlgmr.msra.gmra.mrb[32].mxu1 %v11500_v10  ;;  %13070 = vmatprep.mubr.bf16.mxu0 %v11181_v21  ;;  %v5497_v35 = vsel %vm14372_vm2, %v5492_v1, %v15494_v28  ;;  %v7939_v47 = vrot.slane %v14062_v51, 5  ;;  %v5515_v34 = vor.u32 %v15511_v58, %v15508_v45  ;;  %v5525_v29 = vor.u32 %v15516_v24, %v15514_v12  ;;  %v11127_v37 = vld [vmem:[%s14341_s26 + $0x68] sm:$0x1] }
 0x205   : > { %13291 = vmatpush3.bf16.msra.mxu1 %v15576_v0  ;;  %13262 = vmatprep.mubr.bf16.mxu1 %v11501_v27  ;;  %v5507_v43 = vsel %vm14372_vm2, %v5502_v40, %v5506_v52  ;;  %v7937_v28 = vsel %vm14722_vm5, %v11446_v53, %v7936_v50  ;;  %v7938_v33 = vrot.slane %v7936_v50, 4  ;;  %v5528_v2 = vshll.u32 %v11121_v41, 16  ;;  %v13979_v0 = vld [vmem:[#allocation2 + $0x390] sm:$0xff]   ;;  %v14065_v53 = vld [vmem:[%s14341_s26 + $0x58] sm:$0xf]  ;;  %v13982_v52 = vld [vmem:[#allocation2 + $0x2a0] sm:$0xff]  }
 0x206   : > { %v11182_v42 = vcombine.low %v5497_v35, %v5507_v43  ;;  %13101 = vmatpush3.bf16.msra.mxu0 %v13976_v59  ;;  %13292 = vmatprep.subr.bf16.mxu1 %v13977_v5  ;;  %v5516_v45 = vrot.slane %v5515_v34, 4  ;;  %v5526_v58 = vrot.slane %v5525_v29, 4  ;;  %v11447_v24 = vrot.slane %v11407_v6, 9  ;;  %v14066_v27 = vld [vmem:[%s14341_s26 + $0x5c] sm:$0x1] }
 0x207   : > { %v7940_v49 = vsel %vm14722_vm5, %v7938_v33, %v7939_v47  ;;  %v5530_v3 = vrot.slane %v5528_v2, 5  ;;  %v7943_v30 = vrot.slane %v14063_v4, 5  ;;  %v7946_v61 = vrot.slane %v14064_v15, 5  ;;  %13102 = vmatprep.subr.bf16.mxu0 %v13978_v60  ;;  %v11130_v29 = vld [vmem:[%s14341_s26 + $0x74] sm:$0x1]  ;;  %v13983_v33 = vld [vmem:[#allocation2 + $0x3a0] sm:$0xff]  }
 0x208   : > { %13071 = vmatmul.mubr.bf16.gmra.mrb[36].mxu0 %v11182_v42  ;;  %v11502_v59 = vcombine.low %v7937_v28, %v7940_v49  ;;  %v5521_v9 = vsel %vm14372_vm2, %v5516_v45, %v15514_v12  ;;  %v5539_v54 = vor.u32 %v15527_v23, %v15525_v56  ;;  %v5549_v62 = vor.u32 %v15535_v36, %v15530_v25  ;;  %v11413_v56 = vld [vmem:[%s14341_s26 + $0x60] sm:$0xe]  ;;  %v13981_v23 = vld [vmem:[#allocation2 + $0x398] sm:$0xff]   ;;  %v11416_v43 = vld [vmem:[%s14341_s26 + $0x6c] sm:$0xe] }
 0x209   : > { %13293 = vmatpush3.bf16.msra.mxu1 %v13977_v5  ;;  %v5531_v19 = vsel %vm14372_vm2, %v5526_v58, %v5530_v3  ;;  %v7944_v10 = vsel %vm14722_vm5, %v11447_v24, %v7943_v30  ;;  %v7945_v11 = vrot.slane %v7943_v30, 4  ;;  %v5552_v31 = vshll.u32 %v11124_v16, 16  ;;  %v14067_v45 = vld [vmem:[%s14341_s26 + $0x64] sm:$0xf]  ;;  %v14068_v24 = vld [vmem:[%s14341_s26 + $0x68] sm:$0x1] }
 0x20a   : > { %v11183_v21 = vcombine.low %v5521_v9, %v5531_v19  ;;  %v5540_v12 = vrot.slane %v5539_v54, 4  ;;  %v5550_v14 = vrot.slane %v5549_v62, 4  ;;  %v11448_v1 = vrot.slane %v11410_v32, 9  ;;  %13103 = vmatpush3.bf16.msra.mxu0 %v13978_v60  ;;  %13294 = vmatprep.subr.bf16.mxu1 %v13979_v0  ;;  %v14069_v62 = vld [vmem:[%s14341_s26 + $0x70] sm:$0xf] }
 0x20b   : > { %v7947_v36 = vsel %vm14722_vm5, %v7945_v11, %v7946_v61  ;;  %v5554_v5 = vrot.slane %v5552_v31, 5  ;;  %v7950_v41 = vrot.slane %v14065_v53, 5  ;;  %v7953_v40 = vrot.slane %v14066_v27, 5  ;;  %13104 = vmatprep.subr.bf16.mxu0 %v13980_v55  ;;  %v11419_v11 = vld [vmem:[%s14341_s26 + $0x78] sm:$0xe]  ;;  %v13986_v31 = vld [vmem:[#allocation2 + $0x2b0] sm:$0xff]  }
 0x20c   : > { %13263 = vmatmul.mubr.bf16.gmra.mrb[36].mxu1 %v11502_v59  ;;  %13074 = vmatprep.mubr.bf16.mxu0 %v11183_v21  ;;  %v11503_v13 = vcombine.low %v7944_v10, %v7947_v36  ;;  %v5545_v50 = vsel %vm14372_vm2, %v5540_v12, %v15530_v25  ;;  %v5563_v6 = vor.u32 %v15548_v22, %v15544_v46  ;;  %v5576_v60 = vshll.u32 %v11127_v37, 16  ;;  %v17285_v12 = vld [vmem:[#allocation15_spill] sm:$0xff]  ;;  %v17288_v53 = vld [vmem:[#allocation12_spill] sm:$0xff] }
 0x20d   : > { %v5555_v35 = vsel %vm14372_vm2, %v5550_v14, %v5554_v5  ;;  %v7951_v51 = vsel %vm14722_vm5, %v11448_v1, %v7950_v41  ;;  %v7952_v47 = vrot.slane %v7950_v41, 4  ;;  %13295 = vmatpush3.bf16.msra.mxu1 %v13979_v0  ;;  %v5573_v34 = vor.u32 %v15553_v8, %v15551_v20  ;;  %v13984_v8 = vld [vmem:[#allocation2 + $0x2a8] sm:$0xff]   ;;  %v17287_v5 = vld [vmem:[#allocation17_spill] sm:$0xff] }
 0x20e   : > { %13266 = vmatprep.mubr.bf16.mxu1 %v11503_v13  ;;  %v11184_v25 = vcombine.low %v5545_v50, %v5555_v35  ;;  %v5564_v28 = vrot.slane %v5563_v6, 4  ;;  %v5578_v46 = vrot.slane %v5576_v60, 5  ;;  %v11449_v22 = vrot.slane %v11413_v56, 9  ;;  %13105 = vmatpush3.bf16.msra.mxu0 %v13980_v55  ;;  %v11133_v55 = vld [vmem:[%s14341_s26 + $0x80] sm:$0x1]  ;;  %v17286_v14 = vld [vmem:[#allocation16_spill] sm:$0xff] }
 0x20f   : > { %v7954_v2 = vsel %vm14722_vm5, %v7952_v47, %v7953_v40  ;;  %v5574_v42 = vrot.slane %v5573_v34, 4  ;;  %v7957_v58 = vrot.slane %v14067_v45, 5  ;;  %v7960_v16 = vrot.slane %v14068_v24, 5  ;;  %13296 = vmatprep.subr.bf16.mxu1 %v13981_v23  ;;  %13106 = vmatprep.subr.bf16.mxu0 %v13982_v52  ;;  %v11136_v13 = vld [vmem:[%s14341_s26 + $0x8c] sm:$0x1]  ;;  %v13987_v50 = vld [vmem:[#allocation2 + $0x3b0] sm:$0xff]  }
 0x210   : > { %13075 = vmatmul.mubr.bf16.gmra.mrb[40].mxu0 %v11184_v25  ;;  %v11504_v0 = vcombine.low %v7951_v51, %v7954_v2  ;;  %v5569_v49 = vsel %vm14372_vm2, %v5564_v28, %v15551_v20  ;;  %v5587_v3 = vor.u32 %v15564_v63, %v15562_v18  ;;  %v5597_v4 = vor.u32 %v15572_v38, %v15569_v26  ;;  %v13985_v18 = vld [vmem:[#allocation2 + $0x3a8] sm:$0xff]   ;;  %v17290_v47 = vld [vmem:[#allocation13_spill] sm:$0xff] }
 0x211   : > { %v5579_v30 = vsel %vm14372_vm2, %v5574_v42, %v5578_v46  ;;  %v7958_v15 = vsel %vm14722_vm5, %v11449_v22, %v7957_v58  ;;  %v7959_v61 = vrot.slane %v7957_v58, 4  ;;  %v5600_v32 = vshll.u32 %v11130_v29, 16  ;;  %13297 = vmatpush3.bf16.msra.mxu1 %v13981_v23  ;;  %v17289_v35 = vld [vmem:[#allocation11_spill] sm:$0xff]  ;;  %v17291_v46 = vld [vmem:[#allocation18_spill] sm:$0xff] }
 0x212   : > { %v11185_v59 = vcombine.low %v5569_v49, %v5579_v30  ;;  %v5588_v20 = vrot.slane %v5587_v3, 4  ;;  %v5598_v9 = vrot.slane %v5597_v4, 4  ;;  %v11450_v54 = vrot.slane %v11416_v43, 9  ;;  %13107 = vmatpush3.bf16.msra.mxu0 %v13982_v52  ;;  %13298 = vmatprep.subr.bf16.mxu1 %v13983_v33  ;;  %v11422_v29 = vld [vmem:[%s14341_s26 + $0x84] sm:$0xe]  ;;  %v13988_v43 = vld [vmem:[#allocation2 + $0x2b8] sm:$0xff]  }
 0x213   : > { %v7961_v63 = vsel %vm14722_vm5, %v7959_v61, %v7960_v16  ;;  %v5602_v38 = vrot.slane %v5600_v32, 5  ;;  %v7964_v19 = vrot.slane %v14069_v62, 5  ;;  %v7967_v10 = vrot.slane %v15567_v39, 5  ;;  %13108 = vmatprep.subr.bf16.mxu0 %v13984_v8  ;;  %v17292_v22 = vld [vmem:[#allocation22_spill] sm:$0xff]  ;;  %v17293_v2 = vld [vmem:[#allocation23_spill] sm:$0xff] }
 0x214   : > { %13267 = vmatmul.mubr.bf16.gmra.mrb[40].mxu1 %v11504_v0  ;;  %13078 = vmatprep.mubr.bf16.mxu0 %v11185_v59  ;;  %v11505_v37 = vcombine.low %v7958_v15, %v7961_v63  ;;  %v5593_v21 = vsel %vm14372_vm2, %v5588_v20, %v15569_v26  ;;  %v5611_v1 = vor.u32 %v17286_v14, %v17285_v12  ;;  %v5624_v56 = vshll.u32 %v11133_v55, 16  ;;  %v17294_v42 = vld [vmem:[#allocation19_spill] sm:$0xff]  ;;  %v11139_v0 = vld [vmem:[%s14341_s26 + $0x98] sm:$0x1]  ;;  %v17295_v55 = vld [vmem:[#allocation14_spill] sm:$0xff] }
 0x215   : > { %v5603_v23 = vsel %vm14372_vm2, %v5598_v9, %v5602_v38  ;;  %v7965_v39 = vsel %vm14722_vm5, %v11450_v54, %v7964_v19  ;;  %v7966_v36 = vrot.slane %v7964_v19, 4  ;;  %v5621_v41 = vor.u32 %v17288_v53, %v17287_v5  ;;  %13299 = vmatpush3.bf16.msra.mxu1 %v13983_v33  ;;  %v13989_v15 = vld [vmem:[#allocation2 + $0x3b8] sm:$0xff]   ;;  %v17296_v20 = vld [vmem:[#allocation20_spill] sm:$0xff]  ;;  %v15942_v63 = vld [vmem:[#allocation2 + $0x2c0] sm:$0xff]  }
 0x216   : > { %13270 = vmatprep.mubr.bf16.mxu1 %v11505_v37  ;;  %v11186_v27 = vcombine.low %v5593_v21, %v5603_v23  ;;  %v5612_v40 = vrot.slane %v5611_v1, 4  ;;  %v5626_v26 = vrot.slane %v5624_v56, 5  ;;  %v11451_v52 = vrot.slane %v11419_v11, 9  ;;  %13109 = vmatpush3.bf16.msra.mxu0 %v13984_v8  ;;  %v11425_v54 = vld [vmem:[%s14341_s26 + $0x90] sm:$0xe]  ;;  %v17297_v62 = vld [vmem:[#allocation27_spill] sm:$0xff] }
 0x217   : > { %v7968_v6 = vsel %vm14722_vm5, %v7966_v36, %v7967_v10  ;;  %v5622_v60 = vrot.slane %v5621_v41, 4  ;;  %v7971_v51 = vrot.slane %v17289_v35, 5  ;;  %v7974_v34 = vrot.slane %v17290_v47, 5  ;;  %13300 = vmatprep.subr.bf16.mxu1 %v13985_v18  ;;  %13110 = vmatprep.subr.bf16.mxu0 %v13986_v31  ;;  %v17298_v19 = vld [vmem:[#allocation28_spill] sm:$0xff]  ;;  %v17299_v12 = vld [vmem:[#allocation29_spill] sm:$0xff]  ;;  %v15957_v41 = vld [vmem:[#allocation2 + $0x3c0] sm:$0xff]  }
 0x218   : > { %13079 = vmatmul.mubr.bf16.gmra.mrb[44].mxu0 %v11186_v27  ;;  %v11506_v25 = vcombine.low %v7965_v39, %v7968_v6  ;;  %v5617_v28 = vsel %vm14372_vm2, %v5612_v40, %v17287_v5  ;;  %v5635_v33 = vor.u32 %v17292_v22, %v17291_v46  ;;  %v5645_v45 = vor.u32 %v17294_v42, %v17293_v2  ;;  %v17300_v14 = vld [vmem:[#allocation24_spill] sm:$0xff]  ;;  %v11142_v56 = vld [vmem:[%s14341_s26 + $0xa4] sm:$0x1]  ;;  %v11428_v53 = vld [vmem:[%s14341_s26 + $0x9c] sm:$0xe] }
 0x219   : > { %v5627_v58 = vsel %vm14372_vm2, %v5622_v60, %v5626_v26  ;;  %v7972_v24 = vsel %vm14722_vm5, %v11451_v52, %v7971_v51  ;;  %v7973_v16 = vrot.slane %v7971_v51, 4  ;;  %v5648_v8 = vshll.u32 %v11136_v13, 16  ;;  %13301 = vmatpush3.bf16.msra.mxu1 %v13985_v18  ;;  %v17301_v26 = vld [vmem:[#allocation21_spill] sm:$0xff]  ;;  %v17302_v13 = vld [vmem:[#allocation26_spill] sm:$0xff]  ;;  %v17304_v51 = vld [vmem:[#allocation32_spill] sm:$0xff] }
 0x21a   : > { %v11187_v49 = vcombine.low %v5617_v28, %v5627_v58  ;;  %v5636_v3 = vrot.slane %v5635_v33, 4  ;;  %v5646_v4 = vrot.slane %v5645_v45, 4  ;;  %v11452_v30 = vrot.slane %v11422_v29, 9  ;;  %13111 = vmatpush3.bf16.msra.mxu0 %v13986_v31  ;;  %13302 = vmatprep.subr.bf16.mxu1 %v13987_v50  ;;  %v17303_v35 = vld [vmem:[#allocation30_spill] sm:$0xff]  ;;  %v17306_v29 = vld [vmem:[#allocation31_spill] sm:$0xff] }
 0x21b   : > { %v7975_v61 = vsel %vm14722_vm5, %v7973_v16, %v7974_v34  ;;  %v5650_v32 = vrot.slane %v5648_v8, 5  ;;  %v7978_v59 = vrot.slane %v17295_v55, 5  ;;  %v7981_v9 = vrot.slane %v17296_v20, 5  ;;  %13112 = vmatprep.subr.bf16.mxu0 %v13988_v43  ;;  %v17305_v34 = vld [vmem:[#allocation35_spill] sm:$0xff]  ;;  %v17307_v8 = vld [vmem:[#allocation25_spill] sm:$0xff] }
 0x21c   : > { %13271 = vmatmul.mubr.bf16.gmra.mrb[44].mxu1 %v11506_v25  ;;  %13082 = vmatprep.mubr.bf16.mxu0 %v11187_v49  ;;  %v11507_v18 = vcombine.low %v7972_v24, %v7975_v61  ;;  %v5641_v38 = vsel %vm14372_vm2, %v5636_v3, %v17293_v2  ;;  %v5659_v10 = vor.u32 %v17298_v19, %v17297_v62  ;;  %v5672_v11 = vshll.u32 %v11139_v0, 16  ;;  %v11145_v25 = vld [vmem:[%s14341_s26 + $0xb0] sm:$0x1]  ;;  %v17308_v49 = vld [vmem:[#allocation34_spill] sm:$0xff]  ;;  %v17309_v61 = vld [vmem:[#allocation37_spill] sm:$0xff] }
 0x21d   : > { %v5651_v31 = vsel %vm14372_vm2, %v5646_v4, %v5650_v32  ;;  %v7979_v37 = vsel %vm14722_vm5, %v11452_v30, %v7978_v59  ;;  %v7980_v21 = vrot.slane %v7978_v59, 4  ;;  %v5669_v1 = vor.u32 %v17300_v14, %v17299_v12  ;;  %13303 = vmatpush3.bf16.msra.mxu1 %v13987_v50  ;;  %v11431_v4 = vld [vmem:[%s14341_s26 + $0xa8] sm:$0xe]  ;;  %v17310_v32 = vld [vmem:[#allocation40_spill] sm:$0xff]  ;;  %v11148_v20 = vld [vmem:[%s14341_s26 + $0xbc] sm:$0x1] }
 0x21e   : > { %13274 = vmatprep.mubr.bf16.mxu1 %v11507_v18  ;;  %v11188_v23 = vcombine.low %v5641_v38, %v5651_v31  ;;  %v5660_v39 = vrot.slane %v5659_v10, 4  ;;  %v5674_v36 = vrot.slane %v5672_v11, 5  ;;  %v11453_v5 = vrot.slane %v11425_v54, 9  ;;  %13113 = vmatpush3.bf16.msra.mxu0 %v13988_v43  ;;  %v17311_v38 = vld [vmem:[#allocation41_spill] sm:$0xff]  ;;  %v17312_v62 = vld [vmem:[#allocation36_spill] sm:$0xff] }
 0x21f   : > { %v7982_v27 = vsel %vm14722_vm5, %v7980_v21, %v7981_v9  ;;  %v5670_v40 = vrot.slane %v5669_v1, 4  ;;  %v7985_v52 = vrot.slane %v17301_v26, 5  ;;  %v7988_v6 = vrot.slane %v17302_v13, 5  ;;  %13304 = vmatprep.subr.bf16.mxu1 %v13989_v15  ;;  %13146 = vmatprep.subr.bf16.mxu0 %v15942_v63  ;;  %v17313_v14 = vld [vmem:[#allocation33_spill] sm:$0xff]  ;;  %v17317_v26 = vld [vmem:[#allocation47_spill] sm:$0xff] }
 0x220   : > { %13083 = vmatmul.mubr.bf16.gmra.mrb[48].mxu0 %v11188_v23  ;;  %v11508_v50 = vcombine.low %v7979_v37, %v7982_v27  ;;  %v5665_v60 = vsel %vm14372_vm2, %v5660_v39, %v17299_v12  ;;  %v5683_v47 = vor.u32 %v17304_v51, %v17303_v35  ;;  %v5693_v43 = vor.u32 %v17306_v29, %v17305_v34  ;;  %v11434_v39 = vld [vmem:[%s14341_s26 + $0xb4] sm:$0xe]  ;;  %v17316_v27 = vld [vmem:[#allocation44_spill] sm:$0xff] }
 0x221   : > { %v5675_v28 = vsel %vm14372_vm2, %v5670_v40, %v5674_v36  ;;  %v7986_v46 = vsel %vm14722_vm5, %v11453_v5, %v7985_v52  ;;  %v7987_v22 = vrot.slane %v7985_v52, 4  ;;  %v5696_v33 = vshll.u32 %v11142_v56, 16  ;;  %13305 = vmatpush3.bf16.msra.mxu1 %v13989_v15  ;;  %v17314_v56 = vld [vmem:[#allocation38_spill] sm:$0xff]  ;;  %v17318_v52 = vld [vmem:[#allocation43_spill] sm:$0xff] }
 0x222   : > { %v11189_v2 = vcombine.low %v5665_v60, %v5675_v28  ;;  %v5684_v42 = vrot.slane %v5683_v47, 4  ;;  %v5694_v45 = vrot.slane %v5693_v43, 4  ;;  %v11454_v58 = vrot.slane %v11428_v53, 9  ;;  %13338 = vmatprep.subr.bf16.mxu1 %v15957_v41  ;;  %v17315_v53 = vld [vmem:[#allocation39_spill] sm:$0xff] }
 0x223   : > { %v7989_v24 = vsel %vm14722_vm5, %v7987_v22, %v7988_v6  ;;  %v5698_v16 = vrot.slane %v5696_v33, 5  ;;  %v7992_v0 = vrot.slane %v17307_v8, 5  ;;  %v7995_v3 = vrot.slane %v17308_v49, 5  ;;  %v11151_v6 = vld [vmem:[%s14341_s26 + $0xc8] sm:$0x1] }
 0x224   : > { %13275 = vmatmul.mubr.bf16.gmra.mrb[48].mxu1 %v11508_v50  ;;  %13086 = vmatprep.mubr.bf16.mxu0 %v11189_v2  ;;  %v11509_v30 = vcombine.low %v7986_v46, %v7989_v24  ;;  %v5689_v15 = vsel %vm14372_vm2, %v5684_v42, %v17305_v34  ;;  %v5707_v55 = vor.u32 %v17310_v32, %v17309_v61  ;;  %v5720_v59 = vshll.u32 %v11145_v25, 16  ;;  %v11437_v46 = vld [vmem:[%s14341_s26 + $0xc0] sm:$0xe] }
 0x225   : > { %v5699_v9 = vsel %vm14372_vm2, %v5694_v45, %v5698_v16  ;;  %v7993_v54 = vsel %vm14722_vm5, %v11454_v58, %v7992_v0  ;;  %v7994_v18 = vrot.slane %v7992_v0, 4  ;;  %v5717_v19 = vor.u32 %v17312_v62, %v17311_v38  ;;  %v17319_v42 = vld [vmem:[#allocation42_spill] sm:$0xff] }
 0x226   : > { %13278 = vmatprep.mubr.bf16.mxu1 %v11509_v30  ;;  %v11190_v10 = vcombine.low %v5689_v15, %v5699_v9  ;;  %v5708_v11 = vrot.slane %v5707_v55, 4  ;;  %v5722_v31 = vrot.slane %v5720_v59, 5  ;;  %v11455_v37 = vrot.slane %v11431_v4, 9  ;;  %v17320_v58 = vld [vmem:[#allocation46_spill] sm:$0xff]  ;;  %v17322_v4 = vld [vmem:[#allocation51_spill] sm:$0xff]  ;;  %v17324_v9 = vld [vmem:[#allocation48_spill] sm:$0xff] }
 0x227   : > { %v7996_v21 = vsel %vm14722_vm5, %v7994_v18, %v7995_v3  ;;  %v5718_v12 = vrot.slane %v5717_v19, 4  ;;  %v7999_v1 = vrot.slane %v17313_v14, 5  ;;  %v8002_v23 = vrot.slane %v17314_v56, 5  ;;  %v17321_v3 = vld [vmem:[#allocation45_spill] sm:$0xff]  ;;  %v17326_v56 = vld [vmem:[#allocation52_spill] sm:$0xff] }
 0x228   : > { %13087 = vmatmul.mubr.bf16.gmra.mrb[52].mxu0 %v11190_v10  ;;  %v11510_v36 = vcombine.low %v7993_v54, %v7996_v21  ;;  %v5713_v5 = vsel %vm14372_vm2, %v5708_v11, %v17311_v38  ;;  %v5731_v40 = vor.u32 %v17316_v27, %v17315_v53  ;;  %v5741_v13 = vor.u32 %v17318_v52, %v17317_v26  ;;  %v16007_v50 = vpop.f32.mrb[0].mxu0  ;;  %v11154_v18 = vld [vmem:[%s14341_s26 + $0xd4] sm:$0x1]  ;;  %v17327_v27 = vld [vmem:[#allocation55_spill] sm:$0xff] }
 0x229   : > { %v5723_v60 = vsel %vm14372_vm2, %v5718_v12, %v5722_v31  ;;  %v8000_v35 = vsel %vm14722_vm5, %v11455_v37, %v7999_v1  ;;  %v8001_v51 = vrot.slane %v7999_v1, 4  ;;  %v5744_v47 = vshll.u32 %v11148_v20, 16  ;;  %v16013_v34 = vpop.f32.mrb[1].mxu0  ;;  %v17323_v20 = vld [vmem:[#allocation53_spill] sm:$0xff]  ;;  %v11440_v31 = vld [vmem:[%s14341_s26 + $0xcc] sm:$0xe] }
 0x22a   : > { %v11191_v29 = vcombine.low %v5713_v5, %v5723_v60  ;;  %v5732_v43 = vrot.slane %v5731_v40, 4  ;;  %v5742_v25 = vrot.slane %v5741_v13, 4  ;;  %v11456_v28 = vrot.slane %v11434_v39, 9  ;;  %v16016_v22 = vpop.f32.mrb[2].mxu0  ;;  %v17325_v14 = vld [vmem:[#allocation49_spill] sm:$0xff] }
 0x22b   : > { %v8003_v33 = vsel %vm14722_vm5, %v8001_v51, %v8002_v23  ;;  %v5746_v2 = vrot.slane %v5744_v47, 5  ;;  %v8006_v45 = vrot.slane %v17319_v42, 5  ;;  %v8009_v24 = vrot.slane %v17320_v58, 5  ;;  %v16022_v16 = vpop.f32.mrb[0].mxu1  ;;  %v16024_v8 = vpop.f32.mrb[3].mxu0 }
 0x22c   : > { %13279 = vmatmul.mubr.bf16.gmra.mrb[52].mxu1 %v11510_v36  ;;  %13090 = vmatprep.mubr.bf16.mxu0 %v11191_v29  ;;  %v11511_v0 = vcombine.low %v8000_v35, %v8003_v33  ;;  %v5737_v49 = vsel %vm14372_vm2, %v5732_v43, %v17317_v26  ;;  %v5755_v30 = vor.u32 %v17322_v4, %v17321_v3  ;;  %v5768_v15 = vshll.u32 %v11151_v6, 16  ;;  %v16031_v61 = vpop.f32.mrb[1].mxu1  ;;  %v11203_v39 = vld [vmem:[%s14341_s26 + $0xc] sm:$0xf]  ;;  %v11204_v26 = vld [vmem:[%s14341_s26 + $0x10] sm:$0xf] }
 0x22d   : > { %v5747_v32 = vsel %vm14372_vm2, %v5742_v25, %v5746_v2  ;;  %v8007_v55 = vsel %vm14722_vm5, %v11456_v28, %v8006_v45  ;;  %v8008_v59 = vrot.slane %v8006_v45, 4  ;;  %v5765_v54 = vor.u32 %v17324_v9, %v17323_v20  ;;  %v16040_v38 = vpop.f32.mrb[2].mxu1  ;;  %v11205_v43 = vld [vmem:[%s14341_s26 + $0x14] sm:$0x1]  ;;  %v11523_v25 = vld [vmem:[%s14341_s26 + $0xc] sm:$0xe] }
 0x22e   : > { %13282 = vmatprep.mubr.bf16.mxu1 %v11511_v0  ;;  %v11192_v62 = vcombine.low %v5737_v49, %v5747_v32  ;;  %v5756_v19 = vrot.slane %v5755_v30, 4  ;;  %v5770_v10 = vrot.slane %v5768_v15, 5  ;;  %v11457_v11 = vrot.slane %v11437_v46, 9  ;;  %v16043_v37 = vpop.f32.mrb[3].mxu1  ;;  %v17328_v2 = vld [vmem:[#allocation50_spill] sm:$0xff] }
 0x22f   : > { %v8010_v21 = vsel %vm14722_vm5, %v8008_v59, %v8009_v24  ;;  %v5766_v12 = vrot.slane %v5765_v54, 4  ;;  %v8013_v1 = vrot.slane %v17325_v14, 5  ;;  %v8016_v23 = vrot.slane %v17326_v56, 5  ;;  %v17329_v45 = vld [vmem:[#allocation54_spill] sm:$0xff]  ;;  %v11524_v24 = vld [vmem:[%s14341_s26 + $0x10] sm:$0xf] }
 0x230   : > { %13091 = vmatmul.mubr.bf16.gmra.mrb[56].mxu0 %v11192_v62  ;;  %v11512_v36 = vcombine.low %v8007_v55, %v8010_v21  ;;  %v5761_v5 = vsel %vm14372_vm2, %v5756_v19, %v17323_v20  ;;  %v5779_v53 = vor.u32 %v15757_v7, %v15755_v44  ;;  %v5789_v40 = vor.u32 %v17327_v27, %v15762_v57  ;;  %v16058_v52 = vpop.f32.mrb[4].mxu0  ;;  %v11525_v15 = vld [vmem:[%s14341_s26 + $0x14] sm:$0x1]  ;;  %v11206_v9 = vld [vmem:[%s14341_s26 + $0x18] sm:$0xf] }
 0x231   : > { %v5771_v13 = vsel %vm14372_vm2, %v5766_v12, %v5770_v10  ;;  %v8014_v6 = vsel %vm14722_vm5, %v11457_v11, %v8013_v1  ;;  %v8015_v60 = vrot.slane %v8013_v1, 4  ;;  %v5792_v35 = vshll.u32 %v11154_v18, 16  ;;  %v16064_v51 = vpop.f32.mrb[5].mxu0  ;;  %v11207_v10 = vld [vmem:[%s14341_s26 + $0x1c] sm:$0xf] }
 0x232   : > { %v11193_v47 = vcombine.low %v5761_v5, %v5771_v13  ;;  %v5780_v29 = vrot.slane %v5779_v53, 4  ;;  %v5790_v44 = vrot.slane %v5789_v40, 4  ;;  %v11458_v7 = vrot.slane %v11440_v31, 9  ;;  %v16068_v28 = vpop.f32.mrb[6].mxu0  ;;  %v11208_v1 = vld [vmem:[%s14341_s26 + $0x20] sm:$0x1] }
 0x233   : > { %v8017_v46 = vsel %vm14722_vm5, %v8015_v60, %v8016_v23  ;;  %v5794_v33 = vrot.slane %v5792_v35, 5  ;;  %v8020_v42 = vrot.slane %v17328_v2, 5  ;;  %v8023_v58 = vrot.slane %v17329_v45, 5  ;;  %v16075_v0 = vpop.f32.mrb[7].mxu0  ;;  %v11526_v60 = vld [vmem:[%s14341_s26 + $0x18] sm:$0xe] }
 0x234   : > { %13283 = vmatmul.mubr.bf16.gmra.mrb[56].mxu1 %v11512_v36  ;;  %13094 = vmatprep.mubr.bf16.mxu0 %v11193_v47  ;;  %v11513_v49 = vcombine.low %v8014_v6, %v8017_v46  ;;  %v5785_v3 = vsel %vm14372_vm2, %v5780_v29, %v15762_v57  ;;  %v6457_v4 = vshrl.u32 %v11203_v39, 16  ;;  %v6460_v30 = vshll.u32 %v11203_v39, 16  ;;  %v11527_v35 = vld [vmem:[%s14341_s26 + $0x1c] sm:$0xf] }
 0x235   : > { %v5795_v32 = vsel %vm14372_vm2, %v5790_v44, %v5794_v33  ;;  %v8021_v55 = vsel %vm14722_vm5, %v11458_v7, %v8020_v42  ;;  %v8022_v59 = vrot.slane %v8020_v42, 4  ;;  %v6466_v20 = vshll.u32 %v11204_v26, 16  ;;  %v16086_v54 = vpop.f32.mrb[4].mxu1 }
 0x236   : > { %13286 = vmatprep.mubr.bf16.mxu1 %v11513_v49  ;;  %v11194_v18 = vcombine.low %v5785_v3, %v5795_v32  ;;  %v6459_v62 = vrot.slane %v6457_v4, 4  ;;  %v6462_v19 = vrot.slane %v6460_v30, 5  ;;  %v6470_v57 = vshrl.u32 %v11204_v26, 16  ;;  %v16089_v11 = vpop.f32.mrb[5].mxu1 }
 0x237   : > { %v8024_v31 = vsel %vm14722_vm5, %v8022_v59, %v8023_v58  ;;  %v6468_v21 = vrot.slane %v6466_v20, 5  ;;  %v6476_v12 = vshll.u32 %v11205_v43, 16  ;;  %v11571_v14 = vrot.slane %v11523_v25, 9  ;;  %v16094_v56 = vpop.f32.mrb[6].mxu1  ;;  %v11528_v25 = vld [vmem:[%s14341_s26 + $0x20] sm:$0x1] }
 0x238   : > { %13095 = vmatmul.mubr.bf16.gmra.mrb[60].mxu0 %v11194_v18  ;;  %v11514_v23 = vcombine.low %v8021_v55, %v8024_v31  ;;  %v6463_v39 = vor.u32 %v6462_v19, %v6459_v62  ;;  %v6472_v36 = vrot.slane %v6470_v57, 4  ;;  %v9103_v5 = vrot.slane %v11524_v24, 5  ;;  %v16096_v53 = vpop.f32.mrb[7].mxu1  ;;  %v16098_v27 = vpop.f32.mrb[8].mxu0  ;;  %v11209_v58 = vld [vmem:[%s14341_s26 + $0x24] sm:$0xf] }
 0x239   : > { %v6478_v40 = vrot.slane %v6476_v12, 5  ;;  %v9106_v26 = vrot.slane %v11525_v15, 5  ;;  %v6481_v13 = vshrl.u32 %v11206_v9, 16  ;;  %v6484_v6 = vshll.u32 %v11206_v9, 16  ;;  %v16102_v47 = vpop.f32.mrb[9].mxu0 }
 0x23a   : > { %v6464_v29 = vrot.slane %v6463_v39, 4  ;;  %v6473_v44 = vor.u32 %v6472_v36, %v6468_v21  ;;  %v9104_v7 = vsel %vm14722_vm5, %v11571_v14, %v9103_v5  ;;  %v9105_v43 = vrot.slane %v9103_v5, 4  ;;  %v16107_v46 = vpop.f32.mrb[10].mxu0  ;;  %v11210_v15 = vld [vmem:[%s14341_s26 + $0x28] sm:$0xf] }
 0x23b   : > { %v6483_v33 = vrot.slane %v6481_v13, 4  ;;  %v6486_v2 = vrot.slane %v6484_v6, 5  ;;  %v6490_v42 = vshll.u32 %v11207_v10, 16  ;;  %v6494_v45 = vshrl.u32 %v11207_v10, 16  ;;  %v16110_v24 = vpop.f32.mrb[11].mxu0 }
 0x23c   : > { %13287 = vmatmul.mubr.bf16.gmra.mrb[60].mxu1 %v11514_v23  ;;  %v6469_v49 = vsel %vm14372_vm2, %v6464_v29, %v6468_v21  ;;  %v6474_v3 = vrot.slane %v6473_v44, 4  ;;  %v9107_v4 = vsel %vm14722_vm5, %v9105_v43, %v9106_v26  ;;  %v6500_v30 = vshll.u32 %v11208_v1, 16  ;;  %v11211_v10 = vld [vmem:[%s14341_s26 + $0x2c] sm:$0x1]  ;;  %v11529_v23 = vld [vmem:[%s14341_s26 + $0x24] sm:$0xe] }
 0x23d   : > { %v11587_v32 = vcombine.low %v9104_v7, %v9107_v4  ;;  %v6487_v55 = vor.u32 %v6486_v2, %v6483_v33  ;;  %v6492_v59 = vrot.slane %v6490_v42, 5  ;;  %v6496_v20 = vrot.slane %v6494_v45, 4  ;;  %v16117_v9 = vpop.f32.mrb[8].mxu1  ;;  %v11530_v13 = vld [vmem:[%s14341_s26 + $0x28] sm:$0xf] }
 0x23e   : > { %v6479_v18 = vsel %vm14372_vm2, %v6474_v3, %v6478_v40  ;;  %v6502_v62 = vrot.slane %v6500_v30, 5  ;;  %v11572_v19 = vrot.slane %v11526_v60, 9  ;;  %v9110_v57 = vrot.slane %v11527_v35, 5  ;;  %v16122_v31 = vpop.f32.mrb[9].mxu1  ;;  %v16131_v6 = vld [vmem:[%s14341_s26 + $0x2c] sm:$0x1] }
 0x23f   : > { %v11251_v21 = vcombine.low %v6469_v49, %v6479_v18  ;;  %13306 = vmatprep.mubr.bf16.mxu1 %v11587_v32  ;;  %v6488_v12 = vrot.slane %v6487_v55, 4  ;;  %v6497_v14 = vor.u32 %v6496_v20, %v6492_v59  ;;  %v9113_v1 = vrot.slane %v11528_v25, 5  ;;  %v16125_v39 = vpop.f32.mrb[10].mxu1  ;;  %v11212_v60 = vld [vmem:[%s14341_s26 + $0x30] sm:$0xf]  ;;  %v13992_v3 = vld [vmem:[#allocation2 + $0x2c8] sm:$0xff]  }
 0x240   : > { %v9111_v36 = vsel %vm14722_vm5, %v11572_v19, %v9110_v57  ;;  %v9112_v5 = vrot.slane %v9110_v57, 4  ;;  %v6505_v40 = vshrl.u32 %v11209_v58, 16  ;;  %v6508_v26 = vshll.u32 %v11209_v58, 16  ;;  %v16134_v35 = vpop.f32.mrb[11].mxu1  ;;  %v16136_v29 = vpop.f32.mrb[12].mxu0 }
 0x241   : > { %13114 = vmatprep.mubr.bf16.mxu0 %v11251_v21  ;;  %v6493_v44 = vsel %vm14372_vm2, %v6488_v12, %v6492_v59  ;;  %v6498_v7 = vrot.slane %v6497_v14, 4  ;;  %v6514_v43 = vshll.u32 %v11210_v15, 16  ;;  %v6518_v25 = vshrl.u32 %v11210_v15, 16  ;;  %v11213_v33 = vld [vmem:[%s14341_s26 + $0x34] sm:$0xf]  ;;  %v16141_v2 = vpop.f32.mrb[13].mxu0 }
 0x242   : > { %v9114_v42 = vsel %vm14722_vm5, %v9112_v5, %v9113_v1  ;;  %v6507_v45 = vrot.slane %v6505_v40, 4  ;;  %v6510_v58 = vrot.slane %v6508_v26, 5  ;;  %v6524_v49 = vshll.u32 %v11211_v10, 16  ;;  %v16145_v4 = vpop.f32.mrb[14].mxu0  ;;  %v13993_v59 = vld [vmem:[#allocation2 + $0x3c8] sm:$0xff]  }
 0x243   : > { %v6503_v30 = vsel %vm14372_vm2, %v6498_v7, %v6502_v62  ;;  %v11588_v32 = vcombine.low %v9111_v36, %v9114_v42  ;;  %v6516_v55 = vrot.slane %v6514_v43, 5  ;;  %v6520_v15 = vrot.slane %v6518_v25, 4  ;;  %v16149_v20 = vpop.f32.mrb[15].mxu0  ;;  %v11214_v10 = vld [vmem:[%s14341_s26 + $0x38] sm:$0x1]  ;;  %v13995_v25 = vld [vmem:[#allocation2 + $0x3d0] sm:$0xff]  }
 0x244   : > { %17330 = vst [vmem:[#allocation15_spill] sm:$0xff] %v16149_v20  ;;  %v11252_v18 = vcombine.low %v6493_v44, %v6503_v30  ;;  %v6511_v19 = vor.u32 %v6510_v58, %v6507_v45  ;;  %v6526_v57 = vrot.slane %v6524_v49, 5  ;;  %v11573_v21 = vrot.slane %v11529_v23, 9  ;;  %v16153_v12 = vld [vmem:[%s14341_s26 + $0x30] sm:$0xe]  ;;  %v16186_v20 = vld [vmem:[#allocation2 + $0x2d8] sm:$0xff]  }
 0x245   : > { %13307 = vmatmul.mubr.bf16.vlgmr.msra.gmra.mrb[32].mxu1 %v11588_v32  ;;  %v6521_v14 = vor.u32 %v6520_v15, %v6516_v55  ;;  %v9117_v1 = vrot.slane %v11530_v13, 5  ;;  %v9120_v62 = vrot.slane %v16131_v6, 5  ;;  %v6529_v36 = vshrl.u32 %v11212_v60, 16  ;;  %v11533_v7 = vld [vmem:[%s14341_s26 + $0x34] sm:$0xf] }
 0x246   : > { %13115 = vmatmul.mubr.bf16.vlgmr.msra.gmra.mrb[32].mxu0 %v11252_v18  ;;  %13339 = vmatpush3.bf16.msra.mxu1 %v15957_v41  ;;  %v6512_v5 = vrot.slane %v6511_v19, 4  ;;  %v6532_v40 = vshll.u32 %v11212_v60, 16  ;;  %v6538_v26 = vshll.u32 %v11213_v33, 16  ;;  %v6542_v44 = vshrl.u32 %v11213_v33, 16  ;;  %v16159_v23 = vld [vmem:[%s14341_s26 + $0x38] sm:$0x1] }
 0x247   : > { %v11215_v43 = vld [vmem:[%s14341_s26 + $0x3c] sm:$0xf]  ;;  %v16162_v42 = vpop.f32.mrb[12].mxu1  ;;  %13147 = vmatpush3.bf16.msra.mxu0 %v15942_v63  ;;  %v6522_v13 = vrot.slane %v6521_v14, 4  ;;  %v9118_v6 = vsel %vm14722_vm5, %v11573_v21, %v9117_v1  ;;  %v9119_v45 = vrot.slane %v9117_v1, 4  ;;  %v6531_v41 = vrot.slane %v6529_v36, 4  ;;  %13340 = vmatprep.subr.bf16.mxu1 %v13993_v59 }
 0x248   : > { %v11216_v58 = vld [vmem:[%s14341_s26 + $0x40] sm:$0xf]  ;;  %v16168_v60 = vpop.f32.mrb[13].mxu1  ;;  %v6517_v33 = vsel %vm14372_vm2, %v6512_v5, %v6516_v55  ;;  %v6534_v49 = vrot.slane %v6532_v40, 5  ;;  %v6540_v30 = vrot.slane %v6538_v26, 5  ;;  %v6544_v32 = vrot.slane %v6542_v44, 4  ;;  %13148 = vmatprep.subr.bf16.mxu0 %v13992_v3 }
 0x249   : > { %v13994_v15 = vld [vmem:[#allocation2 + $0x2d0] sm:$0xff]   ;;  %v16172_v63 = vpop.f32.mrb[14].mxu1  ;;  %v16174_v18 = vpop.f32.mrb[16].mxu0  ;;  %v6527_v19 = vsel %vm14372_vm2, %v6522_v13, %v6526_v57  ;;  %v9121_v21 = vsel %vm14722_vm5, %v9119_v45, %v9120_v62  ;;  %v6548_v14 = vshll.u32 %v11214_v10, 16  ;;  %v11574_v1 = vrot.slane %v16153_v12, 9 }
 0x24a   : > { %17331 = vst [vmem:[#allocation16_spill] sm:$0xff] %v16174_v18  ;;  %v16181_v55 = vpop.f32.mrb[15].mxu1  ;;  %v16183_v36 = vpop.f32.mrb[17].mxu0  ;;  %v11253_v5 = vcombine.low %v6517_v33, %v6527_v19  ;;  %v11589_v40 = vcombine.low %v9118_v6, %v9121_v21  ;;  %v6535_v26 = vor.u32 %v6534_v49, %v6531_v41  ;;  %v6545_v44 = vor.u32 %v6544_v32, %v6540_v30  ;;  %v11217_v18 = vld [vmem:[%s14341_s26 + $0x44] sm:$0x1]  ;;  %v13997_v6 = vld [vmem:[#allocation2 + $0x3d8] sm:$0xff]  }
 0x24b   : > { %17332 = vst [vmem:[#allocation17_spill] sm:$0xff] %v16181_v55  ;;  %17333 = vst [vmem:[#allocation12_spill] sm:$0xff] %v16183_v36  ;;  %13341 = vmatpush3.bf16.msra.mxu1 %v13993_v59  ;;  %v16188_v57 = vpop.f32.mrb[18].mxu0  ;;  %v6550_v62 = vrot.slane %v6548_v14, 5  ;;  %v9124_v10 = vrot.slane %v11533_v7, 5  ;;  %v9127_v12 = vrot.slane %v16159_v23, 5  ;;  %13149 = vmatpush3.bf16.msra.mxu0 %v13992_v3 }
 0x24c   : > { %17334 = vst [vmem:[#allocation11_spill] sm:$0xff] %v16188_v57  ;;  %v6553_v13 = vshrl.u32 %v11215_v43, 16  ;;  %v11535_v45 = vld [vmem:[%s14341_s26 + $0x3c] sm:$0xe]  ;;  %v11536_v36 = vld [vmem:[%s14341_s26 + $0x40] sm:$0xf]  ;;  %13342 = vmatprep.subr.bf16.mxu1 %v13995_v25  ;;  %13118 = vmatprep.mubr.bf16.mxu0 %v11253_v5 }
 0x24d   : > { %v16193_v41 = vpop.f32.mrb[19].mxu0  ;;  %13310 = vmatprep.mubr.bf16.mxu1 %v11589_v40  ;;  %v6536_v59 = vrot.slane %v6535_v26, 4  ;;  %v6546_v33 = vrot.slane %v6545_v44, 4  ;;  %v6556_v49 = vshll.u32 %v11215_v43, 16  ;;  %v6562_v32 = vshll.u32 %v11216_v58, 16  ;;  %13150 = vmatprep.subr.bf16.mxu0 %v13994_v15 }
 0x24e   : > { %17335 = vst [vmem:[#allocation13_spill] sm:$0xff] %v16193_v41  ;;  %v11537_v7 = vld [vmem:[%s14341_s26 + $0x44] sm:$0x1]  ;;  %v9125_v3 = vsel %vm14722_vm5, %v11574_v1, %v9124_v10  ;;  %v9126_v23 = vrot.slane %v9124_v10, 4  ;;  %v6555_v19 = vrot.slane %v6553_v13, 4  ;;  %v6566_v21 = vshrl.u32 %v11216_v58, 16 }
 0x24f   : > { %v11218_v14 = vld [vmem:[%s14341_s26 + $0x48] sm:$0xf]  ;;  %v6541_v5 = vsel %vm14372_vm2, %v6536_v59, %v6540_v30  ;;  %v6551_v40 = vsel %vm14372_vm2, %v6546_v33, %v6550_v62  ;;  %v6558_v43 = vrot.slane %v6556_v49, 5  ;;  %v6564_v26 = vrot.slane %v6562_v32, 5  ;;  %v11219_v44 = vld [vmem:[%s14341_s26 + $0x4c] sm:$0xf]  ;;  %13343 = vmatpush3.bf16.msra.mxu1 %v13995_v25  ;;  %13151 = vmatpush3.bf16.msra.mxu0 %v13994_v15 }
 0x250   : > { %v16207_v41 = vld [vmem:[#allocation2 + $0x2e0] sm:$0xff]   ;;  %v16209_v1 = vpop.f32.mrb[16].mxu1  ;;  %v11254_v58 = vcombine.low %v6541_v5, %v6551_v40  ;;  %v9128_v10 = vsel %vm14722_vm5, %v9126_v23, %v9127_v12  ;;  %v6568_v13 = vrot.slane %v6566_v21, 4  ;;  %v6572_v57 = vshll.u32 %v11217_v18, 16  ;;  %v11220_v55 = vld [vmem:[%s14341_s26 + $0x50] sm:$0x1]  ;;  %13344 = vmatprep.subr.bf16.mxu1 %v13997_v6  ;;  %13152 = vmatprep.subr.bf16.mxu0 %v16186_v20 }
 0x251   : > { %17336 = vst [vmem:[#allocation18_spill] sm:$0xff] %v16209_v1  ;;  %v13999_v30 = vld [vmem:[#allocation2 + $0x3e0] sm:$0xff]   ;;  %v16214_v62 = vpop.f32.mrb[17].mxu1  ;;  %v11590_v59 = vcombine.low %v9125_v3, %v9128_v10  ;;  %v6559_v25 = vor.u32 %v6558_v43, %v6555_v19  ;;  %v11575_v33 = vrot.slane %v11535_v45, 9  ;;  %v9131_v49 = vrot.slane %v11536_v36, 5  ;;  %v16219_v12 = vpop.f32.mrb[20].mxu0 }
 0x252   : > { %17337 = vst [vmem:[#allocation22_spill] sm:$0xff] %v16214_v62  ;;  %v16217_v32 = vpop.f32.mrb[18].mxu1  ;;  %17339 = vst [vmem:[#allocation19_spill] sm:$0xff] %v16219_v12  ;;  %13119 = vmatmul.mubr.bf16.gmra.mrb[36].mxu0 %v11254_v58  ;;  %v6569_v15 = vor.u32 %v6568_v13, %v6564_v26  ;;  %v6574_v18 = vrot.slane %v6572_v57, 5  ;;  %v9134_v23 = vrot.slane %v11537_v7, 5  ;;  %v6577_v21 = vshrl.u32 %v11218_v14, 16 }
 0x253   : > { %17338 = vst [vmem:[#allocation23_spill] sm:$0xff] %v16217_v32  ;;  %v11538_v5 = vld [vmem:[%s14341_s26 + $0x48] sm:$0xe]  ;;  %v16223_v40 = vpop.f32.mrb[19].mxu1  ;;  %v16225_v3 = vpop.f32.mrb[21].mxu0  ;;  %13311 = vmatmul.mubr.bf16.gmra.mrb[36].mxu1 %v11590_v59  ;;  %v6560_v36 = vrot.slane %v6559_v25, 4  ;;  %v9132_v45 = vsel %vm14722_vm5, %v11575_v33, %v9131_v49  ;;  %13153 = vmatpush3.bf16.msra.mxu0 %v16186_v20 }
 0x254   : > { %17340 = vst [vmem:[#allocation14_spill] sm:$0xff] %v16223_v40  ;;  %17341 = vst [vmem:[#allocation20_spill] sm:$0xff] %v16225_v3  ;;  %v9133_v19 = vrot.slane %v9131_v49, 4  ;;  %v6580_v43 = vshll.u32 %v11218_v14, 16  ;;  %v11539_v10 = vld [vmem:[%s14341_s26 + $0x4c] sm:$0xf]  ;;  %13345 = vmatpush3.bf16.msra.mxu1 %v13997_v6  ;;  %13154 = vmatprep.subr.bf16.mxu0 %v16207_v41 }
 0x255   : > { %v11540_v12 = vld [vmem:[%s14341_s26 + $0x50] sm:$0x1]  ;;  %v16231_v58 = vpop.f32.mrb[22].mxu0  ;;  %v6570_v57 = vrot.slane %v6569_v15, 4  ;;  %v6579_v7 = vrot.slane %v6577_v21, 4  ;;  %v6586_v13 = vshll.u32 %v11219_v44, 16  ;;  %v6565_v25 = vsel %vm14372_vm2, %v6560_v36, %v6564_v26  ;;  %13346 = vmatprep.subr.bf16.mxu1 %v13999_v30 }
 0x256   : > { %17342 = vst [vmem:[#allocation27_spill] sm:$0xff] %v16231_v58  ;;  %v6590_v32 = vshrl.u32 %v11219_v44, 16  ;;  %v14000_v40 = vld [vmem:[#allocation2 + $0x2e8] sm:$0xff]   ;;  %v16236_v59 = vpop.f32.mrb[23].mxu0  ;;  %v9135_v14 = vsel %vm14722_vm5, %v9133_v19, %v9134_v23  ;;  %v6582_v33 = vrot.slane %v6580_v43, 5  ;;  %v6596_v49 = vshll.u32 %v11220_v55, 16 }
 0x257   : > { %v16234_v3 = vld [vmem:[#allocation2 + $0x3e8] sm:$0xff]   ;;  %17343 = vst [vmem:[#allocation28_spill] sm:$0xff] %v16236_v59  ;;  %v6575_v20 = vsel %vm14372_vm2, %v6570_v57, %v6574_v18  ;;  %v11591_v6 = vcombine.low %v9132_v45, %v9135_v14  ;;  %v6588_v44 = vrot.slane %v6586_v13, 5  ;;  %v11576_v62 = vrot.slane %v11538_v5, 9  ;;  %v16245_v1 = vpop.f32.mrb[20].mxu1  ;;  %13155 = vmatpush3.bf16.msra.mxu0 %v16207_v41 }
 0x258   : > { %v6592_v15 = vrot.slane %v6590_v32, 4  ;;  %v11255_v21 = vcombine.low %v6565_v25, %v6575_v20  ;;  %v6583_v58 = vor.u32 %v6582_v33, %v6579_v7  ;;  %v6598_v59 = vrot.slane %v6596_v49, 5  ;;  %v16252_v18 = vpop.f32.mrb[21].mxu1  ;;  %13347 = vmatpush3.bf16.msra.mxu1 %v13999_v30  ;;  %v16264_v43 = vpop.f32.mrb[24].mxu0  ;;  %13156 = vmatprep.subr.bf16.mxu0 %v14000_v40  ;;  %v14002_v7 = vld [vmem:[#allocation2 + $0x2f0] sm:$0xff]  }
 0x259   : > { %13314 = vmatprep.mubr.bf16.mxu1 %v11591_v6  ;;  %v9138_v23 = vrot.slane %v11539_v10, 5  ;;  %v9141_v36 = vrot.slane %v11540_v12, 5  ;;  %v16249_v55 = vmul.f32 %v16007_v50, %v16007_v50  ;;  %17344 = vst [vmem:[#allocation29_spill] sm:$0xff] %v16252_v18  ;;  %v16256_v45 = vmul.f32 %v16022_v16, %v16022_v16  ;;  %v16262_v19 = vpop.f32.mrb[22].mxu1  ;;  %17346 = vst [vmem:[#allocation21_spill] sm:$0xff] %v16264_v43  ;;  %v14003_v30 = vld [vmem:[#allocation2 + $0x3f0] sm:$0xff]  }
 0x25a   : > { %v6593_v26 = vor.u32 %v6592_v15, %v6588_v44  ;;  %13122 = vmatprep.mubr.bf16.mxu0 %v11255_v21  ;;  %v6584_v32 = vrot.slane %v6583_v58, 4  ;;  %v2581_v5 = vmul.f32 %v16013_v34, %v16013_v34  ;;  %v5293_v12 = vmul.f32 %v16031_v61, %v16031_v61  ;;  %17345 = vst [vmem:[#allocation24_spill] sm:$0xff] %v16262_v19  ;;  %v16271_v13 = vpop.f32.mrb[23].mxu1  ;;  %v16273_v25 = vpop.f32.mrb[25].mxu0  ;;  %v11221_v20 = vld [vmem:[%s14341_s26 + $0x54] sm:$0xf] }
 0x25b   : > { %v9139_v10 = vsel %vm14722_vm5, %v11576_v62, %v9138_v23  ;;  %v9140_v58 = vrot.slane %v9138_v23, 4  ;;  %v11859_v57 = vpack.c.bf16 %v16016_v22, %v16007_v50  ;;  %13348 = vmatprep.subr.bf16.mxu1 %v16234_v3  ;;  %17347 = vst [vmem:[#allocation26_spill] sm:$0xff] %v16271_v13  ;;  %17348 = vst [vmem:[#allocation30_spill] sm:$0xff] %v16273_v25  ;;  %v16288_v6 = vpop.f32.mrb[26].mxu0  ;;  %v11222_v23 = vld [vmem:[%s14341_s26 + $0x58] sm:$0xf]  ;;  %13157 = vmatpush3.bf16.msra.mxu0 %v14000_v40 }
 0x25c   : > { %v6594_v41 = vrot.slane %v6593_v26, 4  ;;  %v6589_v14 = vsel %vm14372_vm2, %v6584_v32, %v6588_v44  ;;  %v16279_v62 = vmul.f32 %v16016_v22, %v16016_v22  ;;  %v11939_v33 = vpack.c.bf16 %v16040_v38, %v16022_v16  ;;  %17349 = vst [vmem:[#allocation32_spill] sm:$0xff] %v16288_v6  ;;  %v11541_v6 = vld [vmem:[%s14341_s26 + $0x54] sm:$0xe]  ;;  %13349 = vmatpush3.bf16.msra.mxu1 %v16234_v3  ;;  %v11225_v13 = vld [vmem:[%s14341_s26 + $0x64] sm:$0xf] }
 0x25d   : > { %v16285_v49 = vmul.f32 %v16040_v38, %v16040_v38  ;;  %v9142_v44 = vsel %vm14722_vm5, %v9140_v58, %v9141_v36  ;;  %12171 = vst [vmem:[%s16296_s29 + $0x8] sm:$0xff] %v11859_v57   ;;  %v11854_v21 = vpack.c.bf16 %v16024_v8, %v16013_v34  ;;  %v2543_v26 = vadd.f32 %v16024_v8, %v16013_v34  ;;  %v11223_v57 = vld [vmem:[%s14341_s26 + $0x5c] sm:$0x1] }
 0x25e   : > { %v6599_v15 = vsel %vm14372_vm2, %v6594_v41, %v6598_v59  ;;  %v16304_v59 = vpop.f32.mrb[27].mxu0  ;;  %v11592_v32 = vcombine.low %v9139_v10, %v9142_v44  ;;  %12187 = vst [vmem:[%s16296_s29 + $0x88] sm:$0xff] %v11939_v33   ;;  %v2582_v41 = vmul.f32 %v16024_v8, %v16024_v8  ;;  %v11934_v58 = vpack.c.bf16 %v16043_v37, %v16031_v61  ;;  %v14004_v34 = vld [vmem:[#allocation2 + $0x2f8] sm:$0xff]  }
 0x25f   : > { %17350 = vst [vmem:[#allocation35_spill] sm:$0xff] %v16304_v59  ;;  %v11256_v36 = vcombine.low %v6589_v14, %v6599_v15  ;;  %11855 = vst [vmem:[%s16296_s29] sm:$0xff] %v11854_v21   ;;  %v16316_v40 = vadd.f32 %v16007_v50, %v2543_v26  ;;  %v5255_v10 = vadd.f32 %v16043_v37, %v16031_v61  ;;  %v6601_v14 = vshrl.u32 %v11221_v20, 16  ;;  %v11542_v33 = vld [vmem:[%s14341_s26 + $0x58] sm:$0xf]  ;;  %v11543_v15 = vld [vmem:[%s14341_s26 + $0x5c] sm:$0x1] }
 0x260   : > { %v5294_v8 = vmul.f32 %v16043_v37, %v16043_v37  ;;  %13158 = vmatprep.subr.bf16.mxu0 %v14002_v7  ;;  %13350 = vmatprep.subr.bf16.mxu1 %v14003_v30  ;;  %v14005_v44 = vld [vmem:[#allocation2 + $0x3f8] sm:$0xff]   ;;  %v2613_v3 = vadd.f32 %v2582_v41, %v2581_v5  ;;  %12186 = vst [vmem:[%s16296_s29 + $0x80] sm:$0xff] %v11934_v58   ;;  %v6604_v50 = vshll.u32 %v11221_v20, 16  ;;  %v6610_v21 = vshll.u32 %v11222_v23, 16  ;;  %v11224_v59 = vld [vmem:[%s14341_s26 + $0x60] sm:$0xf] }
 0x261   : > { %13123 = vmatmul.mubr.bf16.gmra.mrb[40].mxu0 %v11256_v36  ;;  %13315 = vmatmul.mubr.bf16.gmra.mrb[40].mxu1 %v11592_v32  ;;  %v6614_v26 = vshrl.u32 %v11222_v23, 16  ;;  %v16327_v61 = vadd.f32 %v16022_v16, %v5255_v10  ;;  %v6603_v37 = vrot.slane %v6601_v14, 4  ;;  %v6620_v43 = vshll.u32 %v11223_v57, 16  ;;  %v16330_v19 = vpop.f32.mrb[24].mxu1  ;;  %v16337_v16 = vpop.f32.mrb[28].mxu0  ;;  %v17370_v17 = vld [vmem:[#allocation24_spill] sm:$0xff] }
 0x262   : > { %v5325_v25 = vadd.f32 %v5294_v8, %v5293_v12  ;;  %13159 = vmatpush3.bf16.msra.mxu0 %v14002_v7  ;;  %v16333_v18 = vadd.f32 %v2613_v3, %v16249_v55  ;;  %v6606_v36 = vrot.slane %v6604_v50, 5  ;;  %v6612_v5 = vrot.slane %v6610_v21, 5  ;;  %13351 = vmatpush3.bf16.msra.mxu1 %v14003_v30  ;;  %v16335_v23 = vpop.f32.mrb[25].mxu1  ;;  %17351 = vst [vmem:[#allocation31_spill] sm:$0xff] %v16337_v16  ;;  %v16344_v58 = vpop.f32.mrb[29].mxu0 }
 0x263   : > { %v6616_v20 = vrot.slane %v6614_v26, 4  ;;  %13160 = vmatprep.subr.bf16.mxu0 %v14004_v34  ;;  %v6622_v32 = vrot.slane %v6620_v43, 5  ;;  %v11577_v7 = vrot.slane %v11541_v6, 9  ;;  %v9145_v41 = vrot.slane %v11542_v33, 5  ;;  %13352 = vmatprep.subr.bf16.mxu1 %v14005_v44  ;;  %v16342_v55 = vpop.f32.mrb[26].mxu1  ;;  %17352 = vst [vmem:[#allocation25_spill] sm:$0xff] %v16344_v58 }
 0x264   : > { %v16340_v12 = vadd.f32 %v5325_v25, %v16256_v45  ;;  %v6607_v57 = vor.u32 %v6606_v36, %v6603_v37  ;;  %v9148_v30 = vrot.slane %v11543_v15, 5  ;;  %v11226_v8 = vld [vmem:[%s14341_s26 + $0x68] sm:$0x1]  ;;  %v6625_v14 = vshrl.u32 %v11224_v59, 16  ;;  %v16347_v3 = vpop.f32.mrb[27].mxu1  ;;  %v16349_v50 = vpop.f32.mrb[30].mxu0 }
 0x265   : > { %v6617_v10 = vor.u32 %v6616_v20, %v6612_v5  ;;  %17353 = vst [vmem:[#allocation34_spill] sm:$0xff] %v16347_v3  ;;  %17354 = vst [vmem:[#allocation37_spill] sm:$0xff] %v16349_v50  ;;  %v9146_v45 = vsel %vm14722_vm5, %v11577_v7, %v9145_v41  ;;  %v9147_v43 = vrot.slane %v9145_v41, 4  ;;  %v6628_v25 = vshll.u32 %v11224_v59, 16  ;;  %v11544_v33 = vld [vmem:[%s14341_s26 + $0x60] sm:$0xe] }
 0x266   : > { %v6634_v6 = vshll.u32 %v11225_v13, 16  ;;  %13161 = vmatpush3.bf16.msra.mxu0 %v14004_v34  ;;  %v16354_v21 = vpop.f32.mrb[31].mxu0  ;;  %v6608_v26 = vrot.slane %v6607_v57, 4  ;;  %v6627_v37 = vrot.slane %v6625_v14, 4  ;;  %v6638_v36 = vshrl.u32 %v11225_v13, 16  ;;  %13353 = vmatpush3.bf16.msra.mxu1 %v14005_v44 }
 0x267   : > { %17355 = vst [vmem:[#allocation40_spill] sm:$0xff] %v16354_v21  ;;  %v6618_v15 = vrot.slane %v6617_v10, 4  ;;  %v11545_v20 = vld [vmem:[%s14341_s26 + $0x64] sm:$0xf]  ;;  %v9149_v50 = vsel %vm14722_vm5, %v9147_v43, %v9148_v30  ;;  %v6630_v58 = vrot.slane %v6628_v25, 5  ;;  %v6644_v7 = vshll.u32 %v11226_v8, 16 }
 0x268   : > { %v6636_v16 = vrot.slane %v6634_v6, 5  ;;  %v11546_v41 = vld [vmem:[%s14341_s26 + $0x68] sm:$0x1]  ;;  %v6613_v59 = vsel %vm14372_vm2, %v6608_v26, %v6612_v5  ;;  %v11593_v21 = vcombine.low %v9146_v45, %v9149_v50  ;;  %v6640_v57 = vrot.slane %v6638_v36, 4  ;;  %v16364_v44 = vpop.f32.mrb[28].mxu1 }
 0x269   : > { %v6623_v34 = vsel %vm14372_vm2, %v6618_v15, %v6622_v32  ;;  %v6631_v14 = vor.u32 %v6630_v58, %v6627_v37  ;;  %v6646_v13 = vrot.slane %v6644_v7, 5  ;;  %v11578_v3 = vrot.slane %v11544_v33, 9  ;;  %v16368_v6 = vpop.f32.mrb[29].mxu1  ;;  %v11227_v7 = vld [vmem:[%s14341_s26 + $0x6c] sm:$0xf] }
 0x26a   : > { %v11257_v10 = vcombine.low %v6613_v59, %v6623_v34  ;;  %13318 = vmatprep.mubr.bf16.mxu1 %v11593_v21  ;;  %v6641_v30 = vor.u32 %v6640_v57, %v6636_v16  ;;  %v9152_v43 = vrot.slane %v11545_v20, 5  ;;  %v9155_v25 = vrot.slane %v11546_v41, 5  ;;  %v16376_v45 = vpop.f32.mrb[30].mxu1 }
 0x26b   : > { %v2587_v8 = vmul.f32 %v16058_v52, %v16058_v52  ;;  %v6632_v5 = vrot.slane %v6631_v14, 4  ;;  %v5299_v32 = vmul.f32 %v16086_v54, %v16086_v54  ;;  %v2545_v58 = vadd.f32 %v16016_v22, %v16316_v40  ;;  %v16382_v37 = vpop.f32.mrb[31].mxu1 }
 0x26c   : > { %13126 = vmatprep.mubr.bf16.mxu0 %v11257_v10  ;;  %v2585_v50 = vmul.f32 %v16064_v51, %v16064_v51  ;;  %v6642_v33 = vrot.slane %v6641_v30, 4  ;;  %v9153_v21 = vsel %vm14722_vm5, %v11578_v3, %v9152_v43  ;;  %v9154_v26 = vrot.slane %v9152_v43, 4 }
 0x26d   : > { %v2615_v15 = vadd.f32 %v16333_v18, %v16279_v62  ;;  %v6637_v36 = vsel %vm14372_vm2, %v6632_v5, %v6636_v16  ;;  %v2546_v22 = vadd.f32 %v2545_v58, %v16064_v51  ;;  %v5257_v40 = vadd.f32 %v16040_v38, %v16327_v61 }
 0x26e   : > { %v5297_v20 = vmul.f32 %v16089_v11, %v16089_v11  ;;  %v6647_v3 = vsel %vm14372_vm2, %v6642_v33, %v6646_v13  ;;  %v9156_v18 = vsel %vm14722_vm5, %v9154_v26, %v9155_v25  ;;  %v5327_v16 = vadd.f32 %v16340_v12, %v16285_v49  ;;  %v11228_v12 = vld [vmem:[%s14341_s26 + $0x70] sm:$0xf]  ;;  %v11547_v33 = vld [vmem:[%s14341_s26 + $0x6c] sm:$0xe] }
 0x26f   : > { %v2616_v62 = vadd.f32 %v2615_v15, %v2585_v50  ;;  %v11258_v41 = vcombine.low %v6637_v36, %v6647_v3  ;;  %v11594_v59 = vcombine.low %v9153_v21, %v9156_v18  ;;  %v5258_v38 = vadd.f32 %v5257_v40, %v16089_v11  ;;  %v11548_v36 = vld [vmem:[%s14341_s26 + $0x70] sm:$0xf]  ;;  %v11230_v3 = vld [vmem:[%s14341_s26 + $0x78] sm:$0xf] }
 0x270   : > { %v11869_v61 = vpack.c.bf16 %v16068_v28, %v16058_v52  ;;  %v5328_v34 = vadd.f32 %v5327_v16, %v5297_v20  ;;  %v16403_v57 = vmul.f32 %v16068_v28, %v16068_v28  ;;  %v11949_v10 = vpack.c.bf16 %v16094_v56, %v16086_v54 }
 0x271   : > { %v16409_v49 = vmul.f32 %v16094_v56, %v16094_v56  ;;  %13127 = vmatmul.mubr.bf16.gmra.mrb[44].mxu0 %v11258_v41  ;;  %13319 = vmatmul.mubr.bf16.gmra.mrb[44].mxu1 %v11594_v59  ;;  %v11864_v14 = vpack.c.bf16 %v16075_v0, %v16064_v51  ;;  %v2547_v13 = vadd.f32 %v2546_v22, %v16075_v0  ;;  %v6649_v43 = vshrl.u32 %v11227_v7, 16  ;;  %v11229_v51 = vld [vmem:[%s14341_s26 + $0x74] sm:$0x1] }
 0x272   : > { %12173 = vst [vmem:[%s16296_s29 + $0x18] sm:$0xff] %v11869_v61   ;;  %v2586_v30 = vmul.f32 %v16075_v0, %v16075_v0  ;;  %12189 = vst [vmem:[%s16296_s29 + $0x98] sm:$0xff] %v11949_v10   ;;  %v11944_v25 = vpack.c.bf16 %v16096_v53, %v16089_v11  ;;  %v5259_v5 = vadd.f32 %v5258_v38, %v16096_v53  ;;  %v6652_v50 = vshll.u32 %v11227_v7, 16  ;;  %v11231_v61 = vld [vmem:[%s14341_s26 + $0x7c] sm:$0xf] }
 0x273   : > { %v5298_v58 = vmul.f32 %v16096_v53, %v16096_v53  ;;  %12172 = vst [vmem:[%s16296_s29 + $0x10] sm:$0xff] %v11864_v14   ;;  %v2548_v21 = vadd.f32 %v16058_v52, %v2547_v13  ;;  %v6651_v0 = vrot.slane %v6649_v43, 4  ;;  %v6658_v15 = vshll.u32 %v11228_v12, 16  ;;  %v11549_v53 = vld [vmem:[%s14341_s26 + $0x74] sm:$0x1] }
 0x274   : > { %v2617_v26 = vadd.f32 %v2616_v62, %v2586_v30  ;;  %12188 = vst [vmem:[%s16296_s29 + $0x90] sm:$0xff] %v11944_v25   ;;  %v5260_v11 = vadd.f32 %v16086_v54, %v5259_v5  ;;  %v6654_v40 = vrot.slane %v6652_v50, 5  ;;  %v6662_v20 = vshrl.u32 %v11228_v12, 16  ;;  %v11232_v54 = vld [vmem:[%s14341_s26 + $0x80] sm:$0x1] }
 0x275   : > { %v5329_v22 = vadd.f32 %v5328_v34, %v5298_v58  ;;  %v6660_v16 = vrot.slane %v6658_v15, 5  ;;  %v6668_v7 = vshll.u32 %v11229_v51, 16  ;;  %v11579_v41 = vrot.slane %v11547_v33, 9  ;;  %v11550_v25 = vld [vmem:[%s14341_s26 + $0x78] sm:$0xe] }
 0x276   : > { %v2618_v18 = vadd.f32 %v2617_v26, %v2587_v8  ;;  %v6655_v62 = vor.u32 %v6654_v40, %v6651_v0  ;;  %v6664_v59 = vrot.slane %v6662_v20, 4  ;;  %v9159_v38 = vrot.slane %v11548_v36, 5  ;;  %v11551_v50 = vld [vmem:[%s14341_s26 + $0x7c] sm:$0xf]  ;;  %v11552_v36 = vld [vmem:[%s14341_s26 + $0x80] sm:$0x1] }
 0x277   : > { %v5330_v52 = vadd.f32 %v5329_v22, %v5299_v32  ;;  %v6670_v10 = vrot.slane %v6668_v7, 5  ;;  %v9162_v14 = vrot.slane %v11549_v53, 5  ;;  %v6673_v34 = vshrl.u32 %v11230_v3, 16 }
 0x278   : > { %v6676_v13 = vshll.u32 %v11230_v3, 16  ;;  %v6656_v12 = vrot.slane %v6655_v62, 4  ;;  %v6665_v30 = vor.u32 %v6664_v59, %v6660_v16  ;;  %v9160_v8 = vsel %vm14722_vm5, %v11579_v41, %v9159_v38 }
 0x279   : > { %v9161_v43 = vrot.slane %v9159_v38, 4  ;;  %v6675_v5 = vrot.slane %v6673_v34, 4  ;;  %v6682_v58 = vshll.u32 %v11231_v61, 16  ;;  %v6686_v51 = vshrl.u32 %v11231_v61, 16 }
 0x27a   : > { %v6678_v32 = vrot.slane %v6676_v13, 5  ;;  %v6661_v33 = vsel %vm14372_vm2, %v6656_v12, %v6660_v16  ;;  %v6666_v26 = vrot.slane %v6665_v30, 4  ;;  %v6692_v15 = vshll.u32 %v11232_v54, 16 }
 0x27b   : > { %v9163_v0 = vsel %vm14722_vm5, %v9161_v43, %v9162_v14  ;;  %v6684_v20 = vrot.slane %v6682_v58, 5  ;;  %v6688_v53 = vrot.slane %v6686_v51, 4  ;;  %v11580_v41 = vrot.slane %v11550_v25, 9 }
 0x27c   : > { %v11595_v22 = vcombine.low %v9160_v8, %v9163_v0  ;;  %v6679_v40 = vor.u32 %v6678_v32, %v6675_v5  ;;  %v6671_v3 = vsel %vm14372_vm2, %v6666_v26, %v6670_v10  ;;  %v6694_v7 = vrot.slane %v6692_v15, 5  ;;  %v11234_v0 = vld [vmem:[%s14341_s26 + $0x88] sm:$0xf] }
 0x27d   : > { %v9166_v62 = vrot.slane %v11551_v50, 5  ;;  %v11259_v59 = vcombine.low %v6661_v33, %v6671_v3  ;;  %v6689_v16 = vor.u32 %v6688_v53, %v6684_v20  ;;  %v9169_v61 = vrot.slane %v11552_v36, 5  ;;  %v11235_v3 = vld [vmem:[%s14341_s26 + $0x8c] sm:$0x1] }
 0x27e   : > { %13322 = vmatprep.mubr.bf16.mxu1 %v11595_v22  ;;  %v6680_v38 = vrot.slane %v6679_v40, 4  ;;  %v2591_v34 = vmul.f32 %v16098_v27, %v16098_v27  ;;  %v5303_v13 = vmul.f32 %v16117_v9, %v16117_v9  ;;  %v2549_v30 = vadd.f32 %v16068_v28, %v2548_v21 }
 0x27f   : > { %v9167_v14 = vsel %vm14722_vm5, %v11580_v41, %v9166_v62  ;;  %v9168_v54 = vrot.slane %v9166_v62, 4  ;;  %13130 = vmatprep.mubr.bf16.mxu0 %v11259_v59  ;;  %v6690_v12 = vrot.slane %v6689_v16, 4  ;;  %v2589_v8 = vmul.f32 %v16102_v47, %v16102_v47 }
 0x280   : > { %v6685_v10 = vsel %vm14372_vm2, %v6680_v38, %v6684_v20  ;;  %v2619_v25 = vadd.f32 %v2618_v18, %v16403_v57  ;;  %v5261_v5 = vadd.f32 %v16094_v56, %v5260_v11  ;;  %v5301_v32 = vmul.f32 %v16122_v31, %v16122_v31  ;;  %v11233_v11 = vld [vmem:[%s14341_s26 + $0x84] sm:$0xf] }
 0x281   : > { %v9170_v43 = vsel %vm14722_vm5, %v9168_v54, %v9169_v61  ;;  %v6695_v58 = vsel %vm14372_vm2, %v6690_v12, %v6694_v7  ;;  %v2550_v28 = vadd.f32 %v2549_v30, %v16102_v47  ;;  %v5331_v21 = vadd.f32 %v5330_v52, %v16409_v49  ;;  %v11553_v38 = vld [vmem:[%s14341_s26 + $0x84] sm:$0xe]  ;;  %v11555_v54 = vld [vmem:[%s14341_s26 + $0x8c] sm:$0x1] }
 0x282   : > { %v11596_v51 = vcombine.low %v9167_v14, %v9170_v43  ;;  %v11260_v50 = vcombine.low %v6685_v10, %v6695_v58  ;;  %v2620_v33 = vadd.f32 %v2619_v25, %v2589_v8  ;;  %v5262_v57 = vadd.f32 %v5261_v5, %v16122_v31  ;;  %v11236_v10 = vld [vmem:[%s14341_s26 + $0x90] sm:$0xf]  ;;  %v11237_v58 = vld [vmem:[%s14341_s26 + $0x94] sm:$0xf] }
 0x283   : > { %v11879_v56 = vpack.c.bf16 %v16107_v46, %v16098_v27  ;;  %v5332_v18 = vadd.f32 %v5331_v21, %v5301_v32  ;;  %v16473_v26 = vmul.f32 %v16107_v46, %v16107_v46  ;;  %v11959_v49 = vpack.c.bf16 %v16125_v39, %v16117_v9 }
 0x284   : > { %13323 = vmatmul.mubr.bf16.gmra.mrb[48].mxu1 %v11596_v51  ;;  %v16479_v52 = vmul.f32 %v16125_v39, %v16125_v39  ;;  %13131 = vmatmul.mubr.bf16.gmra.mrb[48].mxu0 %v11260_v50  ;;  %v11874_v15 = vpack.c.bf16 %v16110_v24, %v16102_v47  ;;  %v2551_v36 = vadd.f32 %v2550_v28, %v16110_v24  ;;  %v6697_v47 = vshrl.u32 %v11233_v11, 16 }
 0x285   : > { %12175 = vst [vmem:[%s16296_s29 + $0x28] sm:$0xff] %v11879_v56   ;;  %v2590_v22 = vmul.f32 %v16110_v24, %v16110_v24  ;;  %v11954_v40 = vpack.c.bf16 %v16134_v35, %v16122_v31  ;;  %12191 = vst [vmem:[%s16296_s29 + $0xa8] sm:$0xff] %v11959_v49   ;;  %v5263_v20 = vadd.f32 %v5262_v57, %v16134_v35  ;;  %v6700_v7 = vshll.u32 %v11233_v11, 16  ;;  %v11554_v31 = vld [vmem:[%s14341_s26 + $0x88] sm:$0xf] }
 0x286   : > { %v5302_v53 = vmul.f32 %v16134_v35, %v16134_v35  ;;  %12174 = vst [vmem:[%s16296_s29 + $0x20] sm:$0xff] %v11874_v15   ;;  %v2552_v41 = vadd.f32 %v16098_v27, %v2551_v36  ;;  %v6706_v24 = vshll.u32 %v11234_v0, 16  ;;  %v6710_v59 = vshrl.u32 %v11234_v0, 16  ;;  %v11556_v0 = vld [vmem:[%s14341_s26 + $0x90] sm:$0xe] }
 0x287   : > { %v2621_v62 = vadd.f32 %v2620_v33, %v2590_v22  ;;  %12190 = vst [vmem:[%s16296_s29 + $0xa0] sm:$0xff] %v11954_v40   ;;  %v5264_v16 = vadd.f32 %v16117_v9, %v5263_v20  ;;  %v6699_v14 = vrot.slane %v6697_v47, 4  ;;  %v6702_v35 = vrot.slane %v6700_v7, 5  ;;  %v11238_v9 = vld [vmem:[%s14341_s26 + $0x98] sm:$0x1] }
 0x288   : > { %v5333_v61 = vadd.f32 %v5332_v18, %v5302_v53  ;;  %v6708_v30 = vrot.slane %v6706_v24, 5  ;;  %v6712_v8 = vrot.slane %v6710_v59, 4  ;;  %v6716_v43 = vshll.u32 %v11235_v3, 16  ;;  %v11557_v20 = vld [vmem:[%s14341_s26 + $0x94] sm:$0xf] }
 0x289   : > { %v2622_v12 = vadd.f32 %v2621_v62, %v2591_v34  ;;  %v6703_v25 = vor.u32 %v6702_v35, %v6699_v14  ;;  %v11581_v5 = vrot.slane %v11553_v38, 9  ;;  %v9173_v32 = vrot.slane %v11554_v31, 5  ;;  %v11558_v53 = vld [vmem:[%s14341_s26 + $0x98] sm:$0x1] }
 0x28a   : > { %v5334_v27 = vadd.f32 %v5333_v61, %v5303_v13  ;;  %v6713_v51 = vor.u32 %v6712_v8, %v6708_v30  ;;  %v6718_v28 = vrot.slane %v6716_v43, 5  ;;  %v9176_v21 = vrot.slane %v11555_v54, 5 }
 0x28b   : > { %v6721_v50 = vshrl.u32 %v11236_v10, 16  ;;  %v6704_v33 = vrot.slane %v6703_v25, 4  ;;  %v9174_v34 = vsel %vm14722_vm5, %v11581_v5, %v9173_v32  ;;  %v9175_v57 = vrot.slane %v9173_v32, 4 }
 0x28c   : > { %v6724_v56 = vshll.u32 %v11236_v10, 16  ;;  %v6714_v11 = vrot.slane %v6713_v51, 4  ;;  %v6730_v18 = vshll.u32 %v11237_v58, 16  ;;  %v6734_v49 = vshrl.u32 %v11237_v58, 16 }
 0x28d   : > { %v6723_v13 = vrot.slane %v6721_v50, 4  ;;  %v6709_v15 = vsel %vm14372_vm2, %v6704_v33, %v6708_v30  ;;  %v9177_v36 = vsel %vm14722_vm5, %v9175_v57, %v9176_v21  ;;  %v6740_v40 = vshll.u32 %v11238_v9, 16 }
 0x28e   : > { %v6726_v22 = vrot.slane %v6724_v56, 5  ;;  %v6719_v3 = vsel %vm14372_vm2, %v6714_v11, %v6718_v28  ;;  %v11597_v47 = vcombine.low %v9174_v34, %v9177_v36  ;;  %v6732_v7 = vrot.slane %v6730_v18, 5  ;;  %v17357_v36 = vld [vmem:[#allocation17_spill] sm:$0xff] }
 0x28f   : > { %v6736_v62 = vrot.slane %v6734_v49, 4  ;;  %v11261_v24 = vcombine.low %v6709_v15, %v6719_v3  ;;  %v6742_v38 = vrot.slane %v6740_v40, 5  ;;  %v11582_v31 = vrot.slane %v11556_v0, 9  ;;  %v11559_v3 = vld [vmem:[%s14341_s26 + $0x9c] sm:$0xe] }
 0x290   : > { %v6727_v59 = vor.u32 %v6726_v22, %v6723_v13  ;;  %13326 = vmatprep.mubr.bf16.mxu1 %v11597_v47  ;;  %v9180_v14 = vrot.slane %v11557_v20, 5  ;;  %v9183_v35 = vrot.slane %v11558_v53, 5  ;;  %v2595_v54 = vmul.f32 %v16136_v29, %v16136_v29  ;;  %v17356_v13 = vld [vmem:[#allocation15_spill] sm:$0xff] }
 0x291   : > { %v6737_v61 = vor.u32 %v6736_v62, %v6732_v7  ;;  %13134 = vmatprep.mubr.bf16.mxu0 %v11261_v24  ;;  %v5307_v30 = vmul.f32 %v16162_v42, %v16162_v42  ;;  %v2553_v8 = vadd.f32 %v16107_v46, %v2552_v41  ;;  %v2593_v43 = vmul.f32 %v16141_v2, %v16141_v2 }
 0x292   : > { %v6728_v10 = vrot.slane %v6727_v59, 4  ;;  %v9181_v5 = vsel %vm14722_vm5, %v11582_v31, %v9180_v14  ;;  %v9182_v32 = vrot.slane %v9180_v14, 4  ;;  %v2623_v58 = vadd.f32 %v2622_v12, %v16473_v26  ;;  %v11239_v12 = vld [vmem:[%s14341_s26 + $0x9c] sm:$0xf]  ;;  %v11560_v59 = vld [vmem:[%s14341_s26 + $0xa0] sm:$0xf] }
 0x293   : > { %v6738_v25 = vrot.slane %v6737_v61, 4  ;;  %v2554_v28 = vadd.f32 %v2553_v8, %v16141_v2  ;;  %v5265_v21 = vadd.f32 %v16125_v39, %v5264_v16  ;;  %v5305_v46 = vmul.f32 %v16168_v60, %v16168_v60  ;;  %v11561_v14 = vld [vmem:[%s14341_s26 + $0xa4] sm:$0x1] }
 0x294   : > { %v6733_v51 = vsel %vm14372_vm2, %v6728_v10, %v6732_v7  ;;  %v9184_v9 = vsel %vm14722_vm5, %v9182_v32, %v9183_v35  ;;  %v2624_v50 = vadd.f32 %v2623_v58, %v2593_v43  ;;  %v5335_v26 = vadd.f32 %v5334_v27, %v16479_v52  ;;  %v11240_v27 = vld [vmem:[%s14341_s26 + $0xa0] sm:$0xf]  ;;  %v11242_v35 = vld [vmem:[%s14341_s26 + $0xa8] sm:$0xf] }
 0x295   : > { %v6743_v41 = vsel %vm14372_vm2, %v6738_v25, %v6742_v38  ;;  %v11598_v34 = vcombine.low %v9181_v5, %v9184_v9  ;;  %v5266_v57 = vadd.f32 %v5265_v21, %v16168_v60  ;;  %v11889_v39 = vpack.c.bf16 %v16145_v4, %v16136_v29 }
 0x296   : > { %v11262_v33 = vcombine.low %v6733_v51, %v6743_v41  ;;  %v5336_v16 = vadd.f32 %v5335_v26, %v5305_v46  ;;  %v16543_v56 = vmul.f32 %v16145_v4, %v16145_v4  ;;  %v11969_v11 = vpack.c.bf16 %v16172_v63, %v16162_v42  ;;  %v11243_v51 = vld [vmem:[%s14341_s26 + $0xac] sm:$0xf] }
 0x297   : > { %v16549_v52 = vmul.f32 %v16172_v63, %v16172_v63  ;;  %13327 = vmatmul.mubr.bf16.gmra.mrb[52].mxu1 %v11598_v34  ;;  %12177 = vst [vmem:[%s16296_s29 + $0x38] sm:$0xff] %v11889_v39   ;;  %v11884_v18 = vpack.c.bf16 %v17356_v13, %v16141_v2  ;;  %v2555_v49 = vadd.f32 %v2554_v28, %v17356_v13  ;;  %v6745_v15 = vshrl.u32 %v11239_v12, 16  ;;  %v11241_v2 = vld [vmem:[%s14341_s26 + $0xa4] sm:$0x1]  ;;  %v11562_v39 = vld [vmem:[%s14341_s26 + $0xa8] sm:$0xe] }
 0x298   : > { %13135 = vmatmul.mubr.bf16.gmra.mrb[52].mxu0 %v11262_v33  ;;  %v2594_v0 = vmul.f32 %v17356_v13, %v17356_v13  ;;  %12193 = vst [vmem:[%s16296_s29 + $0xb8] sm:$0xff] %v11969_v11   ;;  %v11964_v22 = vpack.c.bf16 %v17357_v36, %v16168_v60  ;;  %v5267_v40 = vadd.f32 %v5266_v57, %v17357_v36  ;;  %v6748_v53 = vshll.u32 %v11239_v12, 16  ;;  %v11563_v12 = vld [vmem:[%s14341_s26 + $0xac] sm:$0xf] }
 0x299   : > { %v5306_v20 = vmul.f32 %v17357_v36, %v17357_v36  ;;  %12176 = vst [vmem:[%s16296_s29 + $0x30] sm:$0xff] %v11884_v18   ;;  %v2556_v47 = vadd.f32 %v16136_v29, %v2555_v49  ;;  %v6747_v62 = vrot.slane %v6745_v15, 4  ;;  %v6754_v24 = vshll.u32 %v11240_v27, 16  ;;  %v11564_v18 = vld [vmem:[%s14341_s26 + $0xb0] sm:$0x1] }
 0x29a   : > { %v2625_v7 = vadd.f32 %v2624_v50, %v2594_v0  ;;  %12192 = vst [vmem:[%s16296_s29 + $0xb0] sm:$0xff] %v11964_v22   ;;  %v5268_v60 = vadd.f32 %v16162_v42, %v5267_v40  ;;  %v6750_v31 = vrot.slane %v6748_v53, 5  ;;  %v6758_v61 = vshrl.u32 %v11240_v27, 16  ;;  %v11244_v42 = vld [vmem:[%s14341_s26 + $0xb0] sm:$0x1] }
 0x29b   : > { %v5337_v38 = vadd.f32 %v5336_v16, %v5306_v20  ;;  %v6756_v8 = vrot.slane %v6754_v24, 5  ;;  %v6764_v43 = vshll.u32 %v11241_v2, 16  ;;  %v11583_v25 = vrot.slane %v11559_v3, 9 }
 0x29c   : > { %v2626_v10 = vadd.f32 %v2625_v7, %v2595_v54  ;;  %v6751_v5 = vor.u32 %v6750_v31, %v6747_v62  ;;  %v6760_v32 = vrot.slane %v6758_v61, 4  ;;  %v9187_v58 = vrot.slane %v11560_v59, 5  ;;  %v17359_v61 = vld [vmem:[#allocation18_spill] sm:$0xff] }
 0x29d   : > { %v5338_v29 = vadd.f32 %v5337_v38, %v5307_v30  ;;  %v6766_v28 = vrot.slane %v6764_v43, 5  ;;  %v9190_v21 = vrot.slane %v11561_v14, 5  ;;  %v6769_v46 = vshrl.u32 %v11242_v35, 16  ;;  %v17358_v38 = vld [vmem:[#allocation16_spill] sm:$0xff] }
 0x29e   : > { %v6772_v41 = vshll.u32 %v11242_v35, 16  ;;  %v6752_v9 = vrot.slane %v6751_v5, 4  ;;  %v6761_v50 = vor.u32 %v6760_v32, %v6756_v8  ;;  %v9188_v54 = vsel %vm14722_vm5, %v11583_v25, %v9187_v58  ;;  %v17360_v25 = vld [vmem:[#allocation12_spill] sm:$0xff] }
 0x29f   : > { %v9189_v26 = vrot.slane %v9187_v58, 4  ;;  %v6771_v33 = vrot.slane %v6769_v46, 4  ;;  %v6778_v34 = vshll.u32 %v11243_v51, 16  ;;  %v6782_v57 = vshrl.u32 %v11243_v51, 16 }
 0x2a0   : > { %v6774_v30 = vrot.slane %v6772_v41, 5  ;;  %v6757_v16 = vsel %vm14372_vm2, %v6752_v9, %v6756_v8  ;;  %v6762_v11 = vrot.slane %v6761_v50, 4  ;;  %v6788_v13 = vshll.u32 %v11244_v42, 16 }
 0x2a1   : > { %v9191_v27 = vsel %vm14722_vm5, %v9189_v26, %v9190_v21  ;;  %v6780_v15 = vrot.slane %v6778_v34, 5  ;;  %v6784_v36 = vrot.slane %v6782_v57, 4  ;;  %v11584_v20 = vrot.slane %v11562_v39, 9  ;;  %v17363_v26 = vld [vmem:[#allocation23_spill] sm:$0xff]  ;;  %v17365_v39 = vld [vmem:[#allocation14_spill] sm:$0xff] }
 0x2a2   : > { %v11599_v49 = vcombine.low %v9188_v54, %v9191_v27  ;;  %v6775_v0 = vor.u32 %v6774_v30, %v6771_v33  ;;  %v6767_v22 = vsel %vm14372_vm2, %v6762_v11, %v6766_v28  ;;  %v6790_v40 = vrot.slane %v6788_v13, 5  ;;  %v17361_v28 = vld [vmem:[#allocation22_spill] sm:$0xff]  ;;  %v17364_v33 = vld [vmem:[#allocation13_spill] sm:$0xff] }
 0x2a3   : > { %v9194_v2 = vrot.slane %v11563_v12, 5  ;;  %v11263_v53 = vcombine.low %v6757_v16, %v6767_v22  ;;  %v6785_v7 = vor.u32 %v6784_v36, %v6780_v15  ;;  %v9197_v62 = vrot.slane %v11564_v18, 5  ;;  %v11246_v12 = vld [vmem:[%s14341_s26 + $0xb8] sm:$0xf]  ;;  %v11247_v13 = vld [vmem:[%s14341_s26 + $0xbc] sm:$0x1] }
 0x2a4   : > { %13330 = vmatprep.mubr.bf16.mxu1 %v11599_v49  ;;  %v6776_v3 = vrot.slane %v6775_v0, 4  ;;  %v2599_v31 = vmul.f32 %v17358_v38, %v17358_v38  ;;  %v5311_v14 = vmul.f32 %v17359_v61, %v17359_v61  ;;  %v2557_v43 = vadd.f32 %v16145_v4, %v2556_v47 }
 0x2a5   : > { %v9195_v24 = vsel %vm14722_vm5, %v11584_v20, %v9194_v2  ;;  %v9196_v59 = vrot.slane %v9194_v2, 4  ;;  %13138 = vmatprep.mubr.bf16.mxu0 %v11263_v53  ;;  %v6786_v8 = vrot.slane %v6785_v7, 4  ;;  %v2597_v5 = vmul.f32 %v17360_v25, %v17360_v25  ;;  %v16640_v20 = vld [vmem:[%s14341_s26 + $0xb8] sm:$0xf] }
 0x2a6   : > { %v6781_v35 = vsel %vm14372_vm2, %v6776_v3, %v6780_v15  ;;  %v2627_v58 = vadd.f32 %v2626_v10, %v16543_v56  ;;  %v5269_v51 = vadd.f32 %v16172_v63, %v5268_v60  ;;  %v5309_v21 = vmul.f32 %v17361_v28, %v17361_v28  ;;  %v17362_v63 = vld [vmem:[#allocation11_spill] sm:$0xff]  ;;  %v11245_v10 = vld [vmem:[%s14341_s26 + $0xb4] sm:$0xf] }
 0x2a7   : > { %v9198_v32 = vsel %vm14722_vm5, %v9196_v59, %v9197_v62  ;;  %v6791_v42 = vsel %vm14372_vm2, %v6786_v8, %v6790_v40  ;;  %v2558_v4 = vadd.f32 %v2557_v43, %v17360_v25  ;;  %v5339_v47 = vadd.f32 %v5338_v29, %v16549_v52  ;;  %v11565_v40 = vld [vmem:[%s14341_s26 + $0xb4] sm:$0xe]  ;;  %v16644_v62 = vld [vmem:[%s14341_s26 + $0xbc] sm:$0x1] }
 0x2a8   : > { %v11600_v46 = vcombine.low %v9195_v24, %v9198_v32  ;;  %v11264_v41 = vcombine.low %v6781_v35, %v6791_v42  ;;  %v2628_v9 = vadd.f32 %v2627_v58, %v2597_v5  ;;  %v5270_v56 = vadd.f32 %v5269_v51, %v17361_v28  ;;  %v11248_v24 = vld [vmem:[%s14341_s26 + $0xc0] sm:$0xf]  ;;  %v11249_v58 = vld [vmem:[%s14341_s26 + $0xc4] sm:$0xf] }
 0x2a9   : > { %v11899_v60 = vpack.c.bf16 %v17362_v63, %v17358_v38  ;;  %v5340_v50 = vadd.f32 %v5339_v47, %v5309_v21  ;;  %v16613_v54 = vmul.f32 %v17362_v63, %v17362_v63  ;;  %v11979_v52 = vpack.c.bf16 %v17363_v26, %v17359_v61  ;;  %v11250_v21 = vld [vmem:[%s14341_s26 + $0xc8] sm:$0x1] }
 0x2aa   : > { %13331 = vmatmul.mubr.bf16.gmra.mrb[56].mxu1 %v11600_v46  ;;  %v16619_v29 = vmul.f32 %v17363_v26, %v17363_v26  ;;  %13139 = vmatmul.mubr.bf16.gmra.mrb[56].mxu0 %v11264_v41  ;;  %v11894_v30 = vpack.c.bf16 %v17364_v33, %v17360_v25  ;;  %v2559_v34 = vadd.f32 %v2558_v4, %v17364_v33  ;;  %v6793_v18 = vshrl.u32 %v11245_v10, 16 }
 0x2ab   : > { %12179 = vst [vmem:[%s16296_s29 + $0x48] sm:$0xff] %v11899_v60   ;;  %v2598_v57 = vmul.f32 %v17364_v33, %v17364_v33  ;;  %v11974_v16 = vpack.c.bf16 %v17365_v39, %v17361_v28  ;;  %12195 = vst [vmem:[%s16296_s29 + $0xc8] sm:$0xff] %v11979_v52   ;;  %v5271_v11 = vadd.f32 %v5270_v56, %v17365_v39  ;;  %v6796_v49 = vshll.u32 %v11245_v10, 16  ;;  %v11568_v60 = vld [vmem:[%s14341_s26 + $0xc0] sm:$0xe] }
 0x2ac   : > { %v5310_v27 = vmul.f32 %v17365_v39, %v17365_v39  ;;  %12178 = vst [vmem:[%s16296_s29 + $0x40] sm:$0xff] %v11894_v30   ;;  %v2560_v0 = vadd.f32 %v17358_v38, %v2559_v34  ;;  %v6802_v36 = vshll.u32 %v11246_v12, 16  ;;  %v6806_v22 = vshrl.u32 %v11246_v12, 16  ;;  %v16659_v33 = vld [vmem:[%s14341_s26 + $0xc4] sm:$0xf] }
 0x2ad   : > { %v2629_v15 = vadd.f32 %v2628_v9, %v2598_v57  ;;  %12194 = vst [vmem:[%s16296_s29 + $0xc0] sm:$0xff] %v11974_v16   ;;  %v5272_v2 = vadd.f32 %v17359_v61, %v5271_v11  ;;  %v6795_v3 = vrot.slane %v6793_v18, 4  ;;  %v6798_v7 = vrot.slane %v6796_v49, 5  ;;  %v16662_v30 = vld [vmem:[%s14341_s26 + $0xc8] sm:$0x1] }
 0x2ae   : > { %v5341_v53 = vadd.f32 %v5340_v50, %v5310_v27  ;;  %v6804_v35 = vrot.slane %v6802_v36, 5  ;;  %v6808_v38 = vrot.slane %v6806_v22, 4  ;;  %v6812_v8 = vshll.u32 %v11247_v13, 16  ;;  %v17366_v22 = vld [vmem:[#allocation19_spill] sm:$0xff] }
 0x2af   : > { %v2630_v59 = vadd.f32 %v2629_v15, %v2599_v31  ;;  %v6799_v25 = vor.u32 %v6798_v7, %v6795_v3  ;;  %v11585_v5 = vrot.slane %v11565_v40, 9  ;;  %v9201_v32 = vrot.slane %v16640_v20, 5 }
 0x2b0   : > { %v5342_v43 = vadd.f32 %v5341_v53, %v5311_v14  ;;  %v6809_v51 = vor.u32 %v6808_v38, %v6804_v35  ;;  %v6814_v61 = vrot.slane %v6812_v8, 5  ;;  %v9204_v28 = vrot.slane %v16644_v62, 5 }
 0x2b1   : > { %v6817_v42 = vshrl.u32 %v11248_v24, 16  ;;  %v6800_v46 = vrot.slane %v6799_v25, 4  ;;  %v9202_v31 = vsel %vm14722_vm5, %v11585_v5, %v9201_v32  ;;  %v9203_v4 = vrot.slane %v9201_v32, 4 }
 0x2b2   : > { %v6820_v14 = vshll.u32 %v11248_v24, 16  ;;  %v6810_v47 = vrot.slane %v6809_v51, 4  ;;  %v6826_v9 = vshll.u32 %v11249_v58, 16  ;;  %v6830_v56 = vshrl.u32 %v11249_v58, 16  ;;  %v17367_v24 = vld [vmem:[#allocation20_spill] sm:$0xff] }
 0x2b3   : > { %v6819_v41 = vrot.slane %v6817_v42, 4  ;;  %v6805_v10 = vsel %vm14372_vm2, %v6800_v46, %v6804_v35  ;;  %v9205_v50 = vsel %vm14722_vm5, %v9203_v4, %v9204_v28  ;;  %v6836_v12 = vshll.u32 %v11250_v21, 16  ;;  %v11611_v42 = vld [vmem:[%s14341_s26 + $0xc] sm:$0xf] }
 0x2b4   : > { %v6822_v52 = vrot.slane %v6820_v14, 5  ;;  %v6815_v34 = vsel %vm14372_vm2, %v6810_v47, %v6814_v61  ;;  %v11601_v57 = vcombine.low %v9202_v31, %v9205_v50  ;;  %v6828_v39 = vrot.slane %v6826_v9, 5  ;;  %v17368_v61 = vld [vmem:[#allocation29_spill] sm:$0xff]  ;;  %v17372_v50 = vld [vmem:[#allocation26_spill] sm:$0xff] }
 0x2b5   : > { %v6832_v16 = vrot.slane %v6830_v56, 4  ;;  %v11265_v11 = vcombine.low %v6805_v10, %v6815_v34  ;;  %v6838_v13 = vrot.slane %v6836_v12, 5  ;;  %v11586_v18 = vrot.slane %v11568_v60, 9 }
 0x2b6   : > { %v6823_v27 = vor.u32 %v6822_v52, %v6819_v41  ;;  %13334 = vmatprep.mubr.bf16.mxu1 %v11601_v57  ;;  %v9208_v15 = vrot.slane %v16659_v33, 5  ;;  %v9211_v36 = vrot.slane %v16662_v30, 5  ;;  %v2603_v40 = vmul.f32 %v17366_v22, %v17366_v22 }
 0x2b7   : > { %v6833_v49 = vor.u32 %v6832_v16, %v6828_v39  ;;  %13142 = vmatprep.mubr.bf16.mxu0 %v11265_v11  ;;  %v5315_v3 = vmul.f32 %v16245_v1, %v16245_v1  ;;  %v2561_v7 = vadd.f32 %v17362_v63, %v2560_v0  ;;  %v2601_v35 = vmul.f32 %v17367_v24, %v17367_v24 }
 0x2b8   : > { %v6824_v53 = vrot.slane %v6823_v27, 4  ;;  %v9209_v8 = vsel %vm14722_vm5, %v11586_v18, %v9208_v15  ;;  %v9210_v25 = vrot.slane %v9208_v15, 4  ;;  %v2631_v5 = vadd.f32 %v2630_v59, %v16613_v54  ;;  %v14006_v59 = vld [vmem:[%s14341_s26 + $0xc] sm:$0xff]  }
 0x2b9   : > { %v6834_v38 = vrot.slane %v6833_v49, 4  ;;  %v2562_v58 = vadd.f32 %v2561_v7, %v17367_v24  ;;  %v5273_v51 = vadd.f32 %v17363_v26, %v5272_v2  ;;  %v5313_v63 = vmul.f32 %v17368_v61, %v17368_v61  ;;  %v17369_v2 = vld [vmem:[#allocation27_spill] sm:$0xff] }
 0x2ba   : > { %v6829_v32 = vsel %vm14372_vm2, %v6824_v53, %v6828_v39  ;;  %v9212_v28 = vsel %vm14722_vm5, %v9210_v25, %v9211_v36  ;;  %v2632_v21 = vadd.f32 %v2631_v5, %v2601_v35  ;;  %v5343_v54 = vadd.f32 %v5342_v43, %v16619_v29  ;;  %v17371_v43 = vld [vmem:[#allocation28_spill] sm:$0xff]  ;;  %v11612_v39 = vld [vmem:[%s14341_s26 + $0x18] sm:$0xf]  ;;  %v14071_v35 = vld [vmem:[%s14341_s26 + $0x14] sm:$0x1] }
 0x2bb   : > { %v6839_v0 = vsel %vm14372_vm2, %v6834_v38, %v6838_v13  ;;  %v11602_v31 = vcombine.low %v9209_v8, %v9212_v28  ;;  %v5274_v26 = vadd.f32 %v5273_v51, %v17368_v61  ;;  %v11909_v4 = vpack.c.bf16 %v17369_v2, %v17366_v22  ;;  %v14070_v13 = vld [vmem:[%s14341_s26 + $0x10] sm:$0xf]  ;;  %v14007_v8 = vld [vmem:[%s14341_s26 + $0x18] sm:$0xff]   ;;  %v14008_v51 = vld [vmem:[%s14341_s26 + $0x24] sm:$0xff]  }
 0x2bc   : > { %v11266_v46 = vcombine.low %v6829_v32, %v6839_v0  ;;  %v5344_v14 = vadd.f32 %v5343_v54, %v5313_v63  ;;  %v2604_v47 = vmul.f32 %v17369_v2, %v17369_v2  ;;  %v11989_v41 = vpack.c.bf16 %v17370_v17, %v16245_v1  ;;  %v14072_v0 = vld [vmem:[%s14341_s26 + $0x1c] sm:$0xf] }
 0x2bd   : > { %v16700_v29 = vmul.f32 %v17370_v17, %v17370_v17  ;;  %13335 = vmatmul.mubr.bf16.gmra.mrb[60].mxu1 %v11602_v31  ;;  %12181 = vst [vmem:[%s16296_s29 + $0x58] sm:$0xff] %v11909_v4   ;;  %v11904_v9 = vpack.c.bf16 %v17371_v43, %v17367_v24  ;;  %v2563_v56 = vadd.f32 %v2562_v58, %v17371_v43  ;;  %v9552_v10 = vshrl.u32 %v11611_v42, 16 }
 0x2be   : > { %13143 = vmatmul.mubr.bf16.gmra.mrb[60].mxu0 %v11266_v46  ;;  %v2602_v60 = vmul.f32 %v17371_v43, %v17371_v43  ;;  %12197 = vst [vmem:[%s16296_s29 + $0xd8] sm:$0xff] %v11989_v41   ;;  %v11984_v52 = vpack.c.bf16 %v17372_v50, %v17368_v61  ;;  %v5275_v12 = vadd.f32 %v5274_v26, %v17372_v50  ;;  %v9555_v57 = vshll.u32 %v11611_v42, 16  ;;  %v17373_v26 = vld [vmem:[#allocation21_spill] sm:$0xff] }
 0x2bf   : > { %v5314_v34 = vmul.f32 %v17372_v50, %v17372_v50  ;;  %13162 = vmatprep.mubr.bf16.mxu0 %v14006_v59  ;;  %12180 = vst [vmem:[%s16296_s29 + $0x50] sm:$0xff] %v11904_v9   ;;  %v2564_v16 = vadd.f32 %v17366_v22, %v2563_v56  ;;  %v9554_v27 = vrot.slane %v9552_v10, 4  ;;  %v9561_v18 = vshll.u32 %v14070_v13, 16  ;;  %v17374_v10 = vld [vmem:[#allocation30_spill] sm:$0xff] }
 0x2c0   : > { %v2633_v11 = vadd.f32 %v2632_v21, %v2602_v60  ;;  %12196 = vst [vmem:[%s16296_s29 + $0xd0] sm:$0xff] %v11984_v52   ;;  %v5276_v49 = vadd.f32 %v16245_v1, %v5275_v12  ;;  %v9557_v36 = vrot.slane %v9555_v57, 5  ;;  %v9565_v53 = vshrl.u32 %v14070_v13, 16 }
 0x2c1   : > { %v5345_v15 = vadd.f32 %v5344_v14, %v5314_v34  ;;  %v9563_v24 = vrot.slane %v9561_v18, 5  ;;  %v9571_v38 = vshll.u32 %v14071_v35, 16  ;;  %v9576_v25 = vshrl.u32 %v11612_v39, 16 }
 0x2c2   : > { %v2634_v7 = vadd.f32 %v2633_v11, %v2603_v40  ;;  %v9558_v5 = vor.u32 %v9557_v36, %v9554_v27  ;;  %v9567_v32 = vrot.slane %v9565_v53, 4  ;;  %v9579_v58 = vshll.u32 %v11612_v39, 16  ;;  %v14073_v40 = vld [vmem:[%s14341_s26 + $0x20] sm:$0x1] }
 0x2c3   : > { %v5346_v22 = vadd.f32 %v5345_v15, %v5315_v3  ;;  %v9573_v61 = vrot.slane %v9571_v38, 5  ;;  %v9578_v63 = vrot.slane %v9576_v25, 4  ;;  %v9585_v1 = vshll.u32 %v14072_v0, 16  ;;  %v14010_v36 = vld [vmem:[%s14341_s26 + $0x3c] sm:$0xff]   ;;  %v17376_v25 = vld [vmem:[#allocation35_spill] sm:$0xff] }
 0x2c4   : > { %v9589_v28 = vshrl.u32 %v14072_v0, 16  ;;  %v9559_v21 = vrot.slane %v9558_v5, 4  ;;  %v9568_v54 = vor.u32 %v9567_v32, %v9563_v24  ;;  %v9581_v59 = vrot.slane %v9579_v58, 5  ;;  %v17377_v58 = vld [vmem:[#allocation34_spill] sm:$0xff] }
 0x2c5   : > { %v9595_v42 = vshll.u32 %v14073_v40, 16  ;;  %v9587_v46 = vrot.slane %v9585_v1, 5  ;;  %v2607_v3 = vmul.f32 %v17373_v26, %v17373_v26  ;;  %v5319_v4 = vmul.f32 %v16330_v19, %v16330_v19 }
 0x2c6   : > { %13163 = vmatmul.mubr.bf16.vlgmr.msra.gmra.mrb[32].mxu0 %v14007_v8  ;;  %v9591_v31 = vrot.slane %v9589_v28, 4  ;;  %v9564_v14 = vsel %vm14372_vm2, %v9559_v21, %v9563_v24  ;;  %v9569_v41 = vrot.slane %v9568_v54, 4  ;;  %v9582_v43 = vor.u32 %v9581_v59, %v9578_v63  ;;  %v14074_v21 = vld [vmem:[%s14341_s26 + $0x28] sm:$0xf]  ;;  %v11614_v59 = vld [vmem:[%s14341_s26 + $0x30] sm:$0xf] }
 0x2c7   : > { %v9597_v9 = vrot.slane %v9595_v42, 5  ;;  %13166 = vmatprep.mubr.bf16.mxu0 %v14008_v51  ;;  %v2565_v60 = vadd.f32 %v17369_v2, %v2564_v16  ;;  %v2605_v50 = vmul.f32 %v17374_v10, %v17374_v10  ;;  %v2635_v52 = vadd.f32 %v2634_v7, %v2604_v47  ;;  %v14009_v16 = vld [vmem:[%s14341_s26 + $0x30] sm:$0xff]  }
 0x2c8   : > { %v9592_v56 = vor.u32 %v9591_v31, %v9587_v46  ;;  %v9574_v12 = vsel %vm14372_vm2, %v9569_v41, %v9573_v61  ;;  %v9583_v34 = vrot.slane %v9582_v43, 4  ;;  %v5277_v57 = vadd.f32 %v17370_v17, %v5276_v49  ;;  %v17375_v17 = vld [vmem:[#allocation32_spill] sm:$0xff] }
 0x2c9   : > { %v5317_v39 = vmul.f32 %v16335_v23, %v16335_v23  ;;  %v11627_v11 = vcombine.low %v9564_v14, %v9574_v12  ;;  %v2566_v13 = vadd.f32 %v2565_v60, %v17374_v10  ;;  %v2636_v2 = vadd.f32 %v2635_v52, %v2605_v50  ;;  %v14075_v43 = vld [vmem:[%s14341_s26 + $0x2c] sm:$0x1] }
 0x2ca   : > { %v9593_v27 = vrot.slane %v9592_v56, 4  ;;  %v9588_v47 = vsel %vm14372_vm2, %v9583_v34, %v9587_v46  ;;  %v5278_v18 = vadd.f32 %v5277_v57, %v16335_v23  ;;  %v5347_v15 = vadd.f32 %v5346_v22, %v16700_v29  ;;  %v11613_v29 = vld [vmem:[%s14341_s26 + $0x24] sm:$0xf]  ;;  %v14011_v50 = vld [vmem:[%s14341_s26 + $0x48] sm:$0xff]   ;;  %v14076_v57 = vld [vmem:[%s14341_s26 + $0x34] sm:$0xf] }
 0x2cb   : > { %v11919_v49 = vpack.c.bf16 %v17375_v17, %v17373_v26  ;;  %13354 = vmatprep.mubr.bf16.mxu1 %v11627_v11  ;;  %v16752_v7 = vmul.f32 %v17375_v17, %v17375_v17  ;;  %v11999_v24 = vpack.c.bf16 %v16342_v55, %v16330_v19  ;;  %v16758_v35 = vmul.f32 %v16342_v55, %v16342_v55 }
 0x2cc   : > { %v9598_v53 = vsel %vm14372_vm2, %v9593_v27, %v9597_v9  ;;  %v5348_v8 = vadd.f32 %v5347_v15, %v5317_v39  ;;  %v11914_v22 = vpack.c.bf16 %v17376_v25, %v17374_v10  ;;  %v2567_v5 = vadd.f32 %v2566_v13, %v17376_v25  ;;  %v14012_v39 = vld [vmem:[%s14341_s26 + $0x54] sm:$0xff]  }
 0x2cd   : > { %v11628_v38 = vcombine.low %v9588_v47, %v9598_v53  ;;  %12183 = vst [vmem:[%s16296_s29 + $0x68] sm:$0xff] %v11919_v49   ;;  %12199 = vst [vmem:[%s16296_s29 + $0xe8] sm:$0xff] %v11999_v24   ;;  %v2606_v32 = vmul.f32 %v17376_v25, %v17376_v25  ;;  %v11994_v51 = vpack.c.bf16 %v17377_v58, %v16335_v23  ;;  %v9600_v1 = vshrl.u32 %v11613_v29, 16  ;;  %v17378_v49 = vld [vmem:[#allocation31_spill] sm:$0xff]  ;;  %v17379_v25 = vld [vmem:[#allocation25_spill] sm:$0xff] }
 0x2ce   : > { %v5279_v61 = vadd.f32 %v5278_v18, %v17377_v58  ;;  %v5318_v63 = vmul.f32 %v17377_v58, %v17377_v58  ;;  %13167 = vmatmul.mubr.bf16.gmra.mrb[36].mxu0 %v14009_v16  ;;  %12182 = vst [vmem:[%s16296_s29 + $0x60] sm:$0xff] %v11914_v22   ;;  %v2568_v0 = vadd.f32 %v17373_v26, %v2567_v5  ;;  %v9603_v28 = vshll.u32 %v11613_v29, 16 }
 0x2cf   : > { %13355 = vmatmul.mubr.bf16.vlgmr.msra.gmra.mrb[32].mxu1 %v11628_v38  ;;  %v9609_v54 = vshll.u32 %v14074_v21, 16  ;;  %13170 = vmatprep.mubr.bf16.mxu0 %v14010_v36  ;;  %v2637_v40 = vadd.f32 %v2636_v2, %v2606_v32  ;;  %12198 = vst [vmem:[%s16296_s29 + $0xe0] sm:$0xff] %v11994_v51   ;;  %v9613_v46 = vshrl.u32 %v14074_v21, 16  ;;  %v9602_v31 = vrot.slane %v9600_v1, 4  ;;  %v14077_v2 = vld [vmem:[%s14341_s26 + $0x38] sm:$0x1] }
 0x2d0   : > { %v5280_v23 = vadd.f32 %v16330_v19, %v5279_v61  ;;  %v5349_v42 = vadd.f32 %v5348_v8, %v5318_v63  ;;  %v9605_v14 = vrot.slane %v9603_v28, 5  ;;  %v9619_v26 = vshll.u32 %v14075_v43, 16  ;;  %v17381_v43 = vld [vmem:[#allocation40_spill] sm:$0xff] }
 0x2d1   : > { %v9611_v41 = vrot.slane %v9609_v54, 5  ;;  %v2638_v9 = vadd.f32 %v2637_v40, %v2607_v3  ;;  %v9615_v60 = vrot.slane %v9613_v46, 4  ;;  %v9624_v10 = vshrl.u32 %v11614_v59, 16  ;;  %v11615_v46 = vld [vmem:[%s14341_s26 + $0x3c] sm:$0xf] }
 0x2d2   : > { %v5350_v56 = vadd.f32 %v5349_v42, %v5319_v4  ;;  %v9606_v52 = vor.u32 %v9605_v14, %v9602_v31  ;;  %v9621_v12 = vrot.slane %v9619_v26, 5  ;;  %v9627_v34 = vshll.u32 %v11614_v59, 16  ;;  %v17380_v59 = vld [vmem:[#allocation37_spill] sm:$0xff]  ;;  %v14014_v31 = vld [vmem:[%s14341_s26 + $0x6c] sm:$0xff]  }
 0x2d3   : > { %v9633_v19 = vshll.u32 %v14076_v57, 16  ;;  %v9616_v11 = vor.u32 %v9615_v60, %v9611_v41  ;;  %v9626_v27 = vrot.slane %v9624_v10, 4  ;;  %v9637_v13 = vshrl.u32 %v14076_v57, 16 }
 0x2d4   : > { %v9643_v16 = vshll.u32 %v14077_v2, 16  ;;  %v9607_v47 = vrot.slane %v9606_v52, 4  ;;  %v9629_v18 = vrot.slane %v9627_v34, 5  ;;  %v2611_v3 = vmul.f32 %v17378_v49, %v17378_v49 }
 0x2d5   : > { %v9635_v15 = vrot.slane %v9633_v19, 5  ;;  %v9617_v4 = vrot.slane %v9616_v11, 4  ;;  %v9639_v36 = vrot.slane %v9637_v13, 4  ;;  %v5323_v24 = vmul.f32 %v16364_v44, %v16364_v44 }
 0x2d6   : > { %v9645_v53 = vrot.slane %v9643_v16, 5  ;;  %13171 = vmatmul.mubr.bf16.gmra.mrb[40].mxu0 %v14011_v50  ;;  %v9612_v29 = vsel %vm14372_vm2, %v9607_v47, %v9611_v41  ;;  %v9630_v38 = vor.u32 %v9629_v18, %v9626_v27  ;;  %v2569_v8 = vadd.f32 %v17375_v17, %v2568_v0  ;;  %v11616_v16 = vld [vmem:[%s14341_s26 + $0x48] sm:$0xf] }
 0x2d7   : > { %v2609_v22 = vmul.f32 %v17379_v25, %v17379_v25  ;;  %13174 = vmatprep.mubr.bf16.mxu0 %v14012_v39  ;;  %v9622_v5 = vsel %vm14372_vm2, %v9617_v4, %v9621_v12  ;;  %v9640_v32 = vor.u32 %v9639_v36, %v9635_v15  ;;  %v2639_v58 = vadd.f32 %v2638_v9, %v16752_v7  ;;  %v14013_v7 = vld [vmem:[%s14341_s26 + $0x60] sm:$0xff]  }
 0x2d8   : > { %v5281_v51 = vadd.f32 %v16342_v55, %v5280_v23  ;;  %v11629_v61 = vcombine.low %v9612_v29, %v9622_v5  ;;  %v9631_v63 = vrot.slane %v9630_v38, 4  ;;  %v2570_v1 = vadd.f32 %v2569_v8, %v17379_v25  ;;  %v14078_v39 = vld [vmem:[%s14341_s26 + $0x40] sm:$0xf]  ;;  %v14079_v29 = vld [vmem:[%s14341_s26 + $0x44] sm:$0x1]  ;;  %v14015_v8 = vld [vmem:[%s14341_s26 + $0x78] sm:$0xff]  }
 0x2d9   : > { %v5321_v17 = vmul.f32 %v16368_v6, %v16368_v6  ;;  %v9641_v0 = vrot.slane %v9640_v32, 4  ;;  %v2640_v28 = vadd.f32 %v2639_v58, %v2609_v22  ;;  %v5351_v54 = vadd.f32 %v5350_v56, %v16758_v35  ;;  %v14016_v32 = vld [vmem:[%s14341_s26 + $0x84] sm:$0xff]  }
 0x2da   : > { %v5282_v21 = vadd.f32 %v5281_v51, %v16368_v6  ;;  %13358 = vmatprep.mubr.bf16.mxu1 %v11629_v61  ;;  %v9636_v55 = vsel %vm14372_vm2, %v9631_v63, %v9635_v15  ;;  %v11929_v40 = vpack.c.bf16 %v17380_v59, %v17378_v49  ;;  %v2612_v23 = vmul.f32 %v17380_v59, %v17380_v59 }
 0x2db   : > { %v12009_v42 = vpack.c.bf16 %v16376_v45, %v16364_v44  ;;  %v9646_v35 = vsel %vm14372_vm2, %v9641_v0, %v9645_v53  ;;  %v5352_v14 = vadd.f32 %v5351_v54, %v5321_v17  ;;  %v5324_v41 = vmul.f32 %v16376_v45, %v16376_v45 }
 0x2dc   : > { %v11924_v26 = vpack.c.bf16 %v17381_v43, %v17379_v25  ;;  %v11630_v9 = vcombine.low %v9636_v55, %v9646_v35  ;;  %12185 = vst [vmem:[%s16296_s29 + $0x78] sm:$0xff] %v11929_v40   ;;  %v2571_v56 = vadd.f32 %v2570_v1, %v17381_v43  ;;  %v2610_v60 = vmul.f32 %v17381_v43, %v17381_v43  ;;  %v11617_v35 = vld [vmem:[%s14341_s26 + $0x54] sm:$0xf] }
 0x2dd   : > { %12201 = vst [vmem:[%s16296_s29 + $0xf8] sm:$0xff] %v12009_v42   ;;  %v12004_v10 = vpack.c.bf16 %v16382_v37, %v16368_v6  ;;  %v5283_v50 = vadd.f32 %v5282_v21, %v16382_v37  ;;  %v5322_v52 = vmul.f32 %v16382_v37, %v16382_v37  ;;  %v9648_v12 = vshrl.u32 %v11615_v46, 16 }
 0x2de   : > { %12184 = vst [vmem:[%s16296_s29 + $0x70] sm:$0xff] %v11924_v26   ;;  %v9651_v34 = vshll.u32 %v11615_v46, 16  ;;  %13175 = vmatmul.mubr.bf16.gmra.mrb[44].mxu0 %v14013_v7  ;;  %13359 = vmatmul.mubr.bf16.gmra.mrb[36].mxu1 %v11630_v9  ;;  %v2572_v57 = vadd.f32 %v17378_v49, %v2571_v56  ;;  %v2641_v19 = vadd.f32 %v2640_v28, %v2610_v60  ;;  %v9657_v11 = vshll.u32 %v14078_v39, 16 }
 0x2df   : > { %12200 = vst [vmem:[%s16296_s29 + $0xf0] sm:$0xff] %v12004_v10   ;;  %v9661_v27 = vshrl.u32 %v14078_v39, 16  ;;  %13178 = vmatprep.mubr.bf16.mxu0 %v14014_v31  ;;  %v5284_v6 = vadd.f32 %v16364_v44, %v5283_v50  ;;  %v5353_v13 = vadd.f32 %v5352_v14, %v5322_v52  ;;  %v9650_v2 = vrot.slane %v9648_v12, 4  ;;  %v14081_v10 = vld [vmem:[%s14341_s26 + $0x50] sm:$0x1]  ;;  %v14018_v39 = vld [vmem:[%s14341_s26 + $0x9c] sm:$0xff]  }
 0x2e0   : > { %v9653_v37 = vrot.slane %v9651_v34, 5  ;;  %v2573_v47 = vadd.f32 %v17380_v59, %v2572_v57  ;;  %v2642_v18 = vadd.f32 %v2641_v19, %v2611_v3  ;;  %v9659_v15 = vrot.slane %v9657_v11, 5  ;;  %v14080_v59 = vld [vmem:[%s14341_s26 + $0x4c] sm:$0xf]  ;;  %v14017_v52 = vld [vmem:[%s14341_s26 + $0x90] sm:$0xff]  }
 0x2e1   : > { %v9663_v49 = vrot.slane %v9661_v27, 4  ;;  %v5285_v4 = vadd.f32 %v16376_v45, %v5284_v6  ;;  %v5354_v36 = vadd.f32 %v5353_v13, %v5323_v24  ;;  %v9667_v38 = vshll.u32 %v14079_v29, 16 }
 0x2e2   : > { %v9654_v53 = vor.u32 %v9653_v37, %v9650_v2  ;;  %v2574_v25 = vrot.slane %v2573_v47, 4  ;;  %v2643_v22 = vadd.f32 %v2642_v18, %v2612_v23  ;;  %v9672_v5 = vshrl.u32 %v11616_v16, 16 }
 0x2e3   : > { %v9664_v44 = vor.u32 %v9663_v49, %v9659_v15  ;;  %v5286_v58 = vrot.slane %v5285_v4, 4  ;;  %v5355_v51 = vadd.f32 %v5354_v36, %v5324_v41  ;;  %v9669_v63 = vrot.slane %v9667_v38, 5  ;;  %v11618_v36 = vld [vmem:[%s14341_s26 + $0x60] sm:$0xf]  ;;  %v14082_v38 = vld [vmem:[%s14341_s26 + $0x58] sm:$0xf] }
 0x2e4   : > { %v9655_v61 = vrot.slane %v9654_v53, 4  ;;  %v2575_v3 = vadd.f32 %v2574_v25, %v2573_v47  ;;  %v2644_v1 = vrot.slane %v2643_v22, 4  ;;  %v9674_v0 = vrot.slane %v9672_v5, 4 }
 0x2e5   : > { %v9665_v17 = vrot.slane %v9664_v44, 4  ;;  %v5287_v45 = vadd.f32 %v5286_v58, %v5285_v4  ;;  %v5356_v24 = vrot.slane %v5355_v51, 4  ;;  %v9675_v21 = vshll.u32 %v11616_v16, 16 }
 0x2e6   : > { %v9660_v28 = vsel %vm14372_vm2, %v9655_v61, %v9659_v15  ;;  %13179 = vmatmul.mubr.bf16.gmra.mrb[48].mxu0 %v14015_v8  ;;  %v2576_v54 = vrot.slane %v2575_v3, 2  ;;  %v2645_v7 = vadd.f32 %v2644_v1, %v2643_v22  ;;  %v9681_v40 = vshll.u32 %v14080_v59, 16  ;;  %v11619_v1 = vld [vmem:[%s14341_s26 + $0x6c] sm:$0xf] }
 0x2e7   : > { %v9670_v55 = vsel %vm14372_vm2, %v9665_v17, %v9669_v63  ;;  %13182 = vmatprep.mubr.bf16.mxu0 %v14016_v32  ;;  %v5288_v23 = vrot.slane %v5287_v45, 2  ;;  %v5357_v42 = vadd.f32 %v5356_v24, %v5355_v51  ;;  %v9677_v31 = vrot.slane %v9675_v21, 5  ;;  %v14083_v32 = vld [vmem:[%s14341_s26 + $0x5c] sm:$0x1] }
 0x2e8   : > { %v11631_v46 = vcombine.low %v9660_v28, %v9670_v55  ;;  %v2577_v14 = vadd.f32 %v2576_v54, %v2575_v3  ;;  %v2646_v41 = vrot.slane %v2645_v7, 2  ;;  %v9683_v43 = vrot.slane %v9681_v40, 5  ;;  %v14019_v28 = vld [vmem:[%s14341_s26 + $0xa8] sm:$0xff]   ;;  %v14020_v40 = vld [vmem:[%s14341_s26 + $0xb4] sm:$0xff]  }
 0x2e9   : > { %v9685_v26 = vshrl.u32 %v14080_v59, 16  ;;  %v5289_v9 = vadd.f32 %v5288_v23, %v5287_v45  ;;  %v5358_v56 = vrot.slane %v5357_v42, 2  ;;  %v9678_v60 = vor.u32 %v9677_v31, %v9674_v0 }
 0x2ea   : > { %13362 = vmatprep.mubr.bf16.mxu1 %v11631_v46  ;;  %v9691_v50 = vshll.u32 %v14081_v10, 16  ;;  %v2578_v12 = vrot.slane %v2577_v14, 1  ;;  %v2647_v34 = vadd.f32 %v2646_v41, %v2645_v7  ;;  %v9696_v19 = vshrl.u32 %v11617_v35, 16  ;;  %v14084_v7 = vld [vmem:[%s14341_s26 + $0x64] sm:$0xf] }
 0x2eb   : > { %v9687_v57 = vrot.slane %v9685_v26, 4  ;;  %v5290_v11 = vrot.slane %v5289_v9, 1  ;;  %v5359_v27 = vadd.f32 %v5358_v56, %v5357_v42  ;;  %v9679_v6 = vrot.slane %v9678_v60, 4  ;;  %v14085_v46 = vld [vmem:[%s14341_s26 + $0x68] sm:$0x1] }
 0x2ec   : > { %v9693_v13 = vrot.slane %v9691_v50, 5  ;;  %v2579_v2 = vadd.f32 %v2578_v12, %v2577_v14  ;;  %v2648_v37 = vrot.slane %v2647_v34, 1  ;;  %v9698_v47 = vrot.slane %v9696_v19, 4  ;;  %v11620_v50 = vld [vmem:[%s14341_s26 + $0x78] sm:$0xf] }
 0x2ed   : > { %v9688_v16 = vor.u32 %v9687_v57, %v9683_v43  ;;  %v5291_v18 = vadd.f32 %v5290_v11, %v5289_v9  ;;  %v5360_v15 = vrot.slane %v5359_v27, 1  ;;  %v9684_v49 = vsel %vm14372_vm2, %v9679_v6, %v9683_v43  ;;  %v14086_v57 = vld [vmem:[%s14341_s26 + $0x70] sm:$0xf]  ;;  %v14087_v6 = vld [vmem:[%s14341_s26 + $0x74] sm:$0x1] }
 0x2ee   : > { %v9699_v4 = vshll.u32 %v11617_v35, 16  ;;  %13183 = vmatmul.mubr.bf16.gmra.mrb[52].mxu0 %v14017_v52  ;;  %v16852_v53 = vadd.f32 %v2648_v37, %v2647_v34  ;;  %v9705_v8 = vshll.u32 %v14082_v38, 16  ;;  %v9709_v25 = vshrl.u32 %v14082_v38, 16 }
 0x2ef   : > { %v9689_v29 = vrot.slane %v9688_v16, 4  ;;  %13186 = vmatprep.mubr.bf16.mxu0 %v14018_v39  ;;  %v16855_v22 = vadd.f32 %v5291_v18, %v2579_v2  ;;  %v16857_v44 = vadd.f32 %v5360_v15, %v5359_v27  ;;  %v9715_v58 = vshll.u32 %v14083_v32, 16 }
 0x2f0   : > { %v9701_v5 = vrot.slane %v9699_v4, 5  ;;  %v9707_v61 = vrot.slane %v9705_v8, 5  ;;  %v9711_v63 = vrot.slane %v9709_v25, 4  ;;  %v9720_v3 = vshrl.u32 %v11618_v36, 16 }
 0x2f1   : > { %v9694_v51 = vsel %vm14372_vm2, %v9689_v29, %v9693_v13  ;;  %v9717_v45 = vrot.slane %v9715_v58, 5  ;;  %v9723_v24 = vshll.u32 %v11618_v36, 16  ;;  %v9729_v55 = vshll.u32 %v14084_v7, 16  ;;  %v11621_v36 = vld [vmem:[%s14341_s26 + $0x84] sm:$0xf] }
 0x2f2   : > { %v11632_v17 = vcombine.low %v9684_v49, %v9694_v51  ;;  %v9702_v0 = vor.u32 %v9701_v5, %v9698_v47  ;;  %v9712_v21 = vor.u32 %v9711_v63, %v9707_v61  ;;  %v9722_v54 = vrot.slane %v9720_v3, 4  ;;  %v14021_v29 = vld [vmem:[%s14341_s26 + $0xc0] sm:$0xff]   ;;  %v14088_v5 = vld [vmem:[%s14341_s26 + $0x7c] sm:$0xf] }
 0x2f3   : > { %v9733_v59 = vshrl.u32 %v14084_v7, 16  ;;  %v9725_v42 = vrot.slane %v9723_v24, 5  ;;  %v9739_v31 = vshll.u32 %v14085_v46, 16  ;;  %v9744_v35 = vshrl.u32 %v11619_v1, 16 }
 0x2f4   : > { %13363 = vmatmul.mubr.bf16.gmra.mrb[40].mxu1 %v11632_v17  ;;  %v9703_v23 = vrot.slane %v9702_v0, 4  ;;  %v9713_v14 = vrot.slane %v9712_v21, 4  ;;  %v9731_v41 = vrot.slane %v9729_v55, 5  ;;  %v9747_v26 = vshll.u32 %v11619_v1, 16  ;;  %v14089_v17 = vld [vmem:[%s14341_s26 + $0x80] sm:$0x1] }
 0x2f5   : > { %v9735_v43 = vrot.slane %v9733_v59, 4  ;;  %v9726_v56 = vor.u32 %v9725_v42, %v9722_v54  ;;  %v9741_v60 = vrot.slane %v9739_v31, 5  ;;  %v9746_v10 = vrot.slane %v9744_v35, 4  ;;  %v14090_v59 = vld [vmem:[%s14341_s26 + $0x88] sm:$0xf] }
 0x2f6   : > { %v9708_v9 = vsel %vm14372_vm2, %v9703_v23, %v9707_v61  ;;  %13187 = vmatmul.mubr.bf16.gmra.mrb[56].mxu0 %v14019_v28  ;;  %v9718_v52 = vsel %vm14372_vm2, %v9713_v14, %v9717_v45  ;;  %v9749_v34 = vrot.slane %v9747_v26, 5  ;;  %v9753_v19 = vshll.u32 %v14086_v57, 16  ;;  %v11622_v42 = vld [vmem:[%s14341_s26 + $0x90] sm:$0xf] }
 0x2f7   : > { %v9736_v12 = vor.u32 %v9735_v43, %v9731_v41  ;;  %13190 = vmatprep.mubr.bf16.mxu0 %v14020_v40  ;;  %v11633_v39 = vcombine.low %v9708_v9, %v9718_v52  ;;  %v9727_v11 = vrot.slane %v9726_v56, 4  ;;  %v9757_v27 = vshrl.u32 %v14086_v57, 16  ;;  %v14091_v9 = vld [vmem:[%s14341_s26 + $0x8c] sm:$0x1] }
 0x2f8   : > { %v9763_v13 = vshll.u32 %v14087_v6, 16  ;;  %v9750_v37 = vor.u32 %v9749_v34, %v9746_v10  ;;  %v9755_v16 = vrot.slane %v9753_v19, 5  ;;  %v9768_v47 = vshrl.u32 %v11620_v50, 16  ;;  %v14092_v19 = vld [vmem:[%s14341_s26 + $0x94] sm:$0xf] }
 0x2f9   : > { %v9737_v2 = vrot.slane %v9736_v12, 4  ;;  %13366 = vmatprep.mubr.bf16.mxu1 %v11633_v39  ;;  %v9732_v18 = vsel %vm14372_vm2, %v9727_v11, %v9731_v41  ;;  %v9759_v15 = vrot.slane %v9757_v27, 4  ;;  %v9771_v4 = vshll.u32 %v11620_v50, 16  ;;  %v11623_v11 = vld [vmem:[%s14341_s26 + $0x9c] sm:$0xf] }
 0x2fa   : > { %v9765_v49 = vrot.slane %v9763_v13, 5  ;;  %v9751_v8 = vrot.slane %v9750_v37, 4  ;;  %v9770_v25 = vrot.slane %v9768_v47, 4  ;;  %v9777_v32 = vshll.u32 %v14088_v5, 16 }
 0x2fb   : > { %v9742_v38 = vsel %vm14372_vm2, %v9737_v2, %v9741_v60  ;;  %v9760_v51 = vor.u32 %v9759_v15, %v9755_v16  ;;  %v9773_v61 = vrot.slane %v9771_v4, 5  ;;  %v9781_v63 = vshrl.u32 %v14088_v5, 16  ;;  %v14093_v4 = vld [vmem:[%s14341_s26 + $0x98] sm:$0x1]  ;;  %v14094_v5 = vld [vmem:[%s14341_s26 + $0xa0] sm:$0xf] }
 0x2fc   : > { %v11634_v58 = vcombine.low %v9732_v18, %v9742_v38  ;;  %v9756_v3 = vsel %vm14372_vm2, %v9751_v8, %v9755_v16  ;;  %v9779_v1 = vrot.slane %v9777_v32, 5  ;;  %v9787_v0 = vshll.u32 %v14089_v17, 16 }
 0x2fd   : > { %v9792_v45 = vshrl.u32 %v11621_v36, 16  ;;  %v9761_v24 = vrot.slane %v9760_v51, 4  ;;  %v9774_v28 = vor.u32 %v9773_v61, %v9770_v25  ;;  %v9783_v21 = vrot.slane %v9781_v63, 4 }
 0x2fe   : > { %13367 = vmatmul.mubr.bf16.gmra.mrb[44].mxu1 %v11634_v58  ;;  %v9795_v54 = vshll.u32 %v11621_v36, 16  ;;  %13191 = vmatmul.mubr.bf16.gmra.mrb[60].mxu0 %v14021_v29  ;;  %v9789_v7 = vrot.slane %v9787_v0, 5  ;;  %v9801_v40 = vshll.u32 %v14090_v59, 16  ;;  %v9805_v23 = vshrl.u32 %v14090_v59, 16  ;;  %v11624_v58 = vld [vmem:[%s14341_s26 + $0xa8] sm:$0xf] }
 0x2ff   : > { %v9794_v55 = vrot.slane %v9792_v45, 4  ;;  %v9766_v46 = vsel %vm14372_vm2, %v9761_v24, %v9765_v49  ;;  %v9775_v31 = vrot.slane %v9774_v28, 4  ;;  %v9784_v35 = vor.u32 %v9783_v21, %v9779_v1  ;;  %v14095_v28 = vld [vmem:[%s14341_s26 + $0xa4] sm:$0x1] }
 0x300   : > { %v9797_v14 = vrot.slane %v9795_v54, 5  ;;  %v11635_v41 = vcombine.low %v9756_v3, %v9766_v46  ;;  %v9803_v43 = vrot.slane %v9801_v40, 5  ;;  %v9807_v26 = vrot.slane %v9805_v23, 4  ;;  %v14096_v23 = vld [vmem:[%s14341_s26 + $0xac] sm:$0xf] }
 0x301   : > { %v9811_v56 = vshll.u32 %v14091_v9, 16  ;;  %v9780_v60 = vsel %vm14372_vm2, %v9775_v31, %v9779_v1  ;;  %v9785_v10 = vrot.slane %v9784_v35, 4  ;;  %v9816_v52 = vshrl.u32 %v11622_v42, 16  ;;  %v11625_v46 = vld [vmem:[%s14341_s26 + $0xb4] sm:$0xf] }
 0x302   : > { %v9798_v50 = vor.u32 %v9797_v14, %v9794_v55  ;;  %13370 = vmatprep.mubr.bf16.mxu1 %v11635_v41  ;;  %v9808_v12 = vor.u32 %v9807_v26, %v9803_v43  ;;  %v9819_v57 = vshll.u32 %v11622_v42, 16  ;;  %v9825_v39 = vshll.u32 %v14092_v19, 16 }
 0x303   : > { %v9813_v34 = vrot.slane %v9811_v56, 5  ;;  %v9790_v27 = vsel %vm14372_vm2, %v9785_v10, %v9789_v7  ;;  %v9818_v13 = vrot.slane %v9816_v52, 4  ;;  %v9829_v2 = vshrl.u32 %v14092_v19, 16 }
 0x304   : > { %v9799_v6 = vrot.slane %v9798_v50, 4  ;;  %v11636_v37 = vcombine.low %v9780_v60, %v9790_v27  ;;  %v9809_v16 = vrot.slane %v9808_v12, 4  ;;  %v9821_v47 = vrot.slane %v9819_v57, 5  ;;  %v14097_v50 = vld [vmem:[%s14341_s26 + $0xb0] sm:$0x1] }
 0x305   : > { %v9827_v18 = vrot.slane %v9825_v39, 5  ;;  %v9831_v49 = vrot.slane %v9829_v2, 4  ;;  %v9835_v36 = vshll.u32 %v14093_v4, 16  ;;  %v9840_v29 = vshrl.u32 %v11623_v11, 16  ;;  %v11626_v2 = vld [vmem:[%s14341_s26 + $0xc0] sm:$0xf] }
 0x306   : > { %v9804_v15 = vsel %vm14372_vm2, %v9799_v6, %v9803_v43  ;;  %13371 = vmatmul.mubr.bf16.gmra.mrb[48].mxu1 %v11636_v37  ;;  %v9814_v38 = vsel %vm14372_vm2, %v9809_v16, %v9813_v34  ;;  %v9822_v8 = vor.u32 %v9821_v47, %v9818_v13  ;;  %v9843_v25 = vshll.u32 %v11623_v11, 16 }
 0x307   : > { %v9849_v32 = vshll.u32 %v14094_v5, 16  ;;  %v11637_v51 = vcombine.low %v9804_v15, %v9814_v38  ;;  %v9832_v61 = vor.u32 %v9831_v49, %v9827_v18  ;;  %v9837_v63 = vrot.slane %v9835_v36, 5 }
 0x308   : > { %v9842_v3 = vrot.slane %v9840_v29, 4  ;;  %v9823_v1 = vrot.slane %v9822_v8, 4  ;;  %v9845_v17 = vrot.slane %v9843_v25, 5  ;;  %v9853_v45 = vshrl.u32 %v14094_v5, 16 }
 0x309   : > { %v9851_v0 = vrot.slane %v9849_v32, 5  ;;  %13374 = vmatprep.mubr.bf16.mxu1 %v11637_v51  ;;  %v9833_v24 = vrot.slane %v9832_v61, 4  ;;  %v9859_v21 = vshll.u32 %v14095_v28, 16  ;;  %v9864_v54 = vshrl.u32 %v11624_v58, 16 }
 0x30a   : > { %v9867_v7 = vshll.u32 %v11624_v58, 16  ;;  %v9828_v55 = vsel %vm14372_vm2, %v9823_v1, %v9827_v18  ;;  %v9846_v59 = vor.u32 %v9845_v17, %v9842_v3  ;;  %v9855_v40 = vrot.slane %v9853_v45, 4 }
 0x30b   : > { %v9873_v42 = vshll.u32 %v14096_v23, 16  ;;  %v9838_v31 = vsel %vm14372_vm2, %v9833_v24, %v9837_v63  ;;  %v9861_v35 = vrot.slane %v9859_v21, 5  ;;  %v9866_v14 = vrot.slane %v9864_v54, 4 }
 0x30c   : > { %v9869_v41 = vrot.slane %v9867_v7, 5  ;;  %v11638_v43 = vcombine.low %v9828_v55, %v9838_v31  ;;  %v9847_v26 = vrot.slane %v9846_v59, 4  ;;  %v9856_v9 = vor.u32 %v9855_v40, %v9851_v0 }
 0x30d   : > { %v9875_v56 = vrot.slane %v9873_v42, 5  ;;  %v9877_v10 = vshrl.u32 %v14096_v23, 16  ;;  %v9883_v52 = vshll.u32 %v14097_v50, 16  ;;  %v9888_v12 = vshrl.u32 %v11625_v46, 16 }
 0x30e   : > { %v9870_v60 = vor.u32 %v9869_v41, %v9866_v14  ;;  %13375 = vmatmul.mubr.bf16.gmra.mrb[52].mxu1 %v11638_v43  ;;  %v9852_v34 = vsel %vm14372_vm2, %v9847_v26, %v9851_v0  ;;  %v9857_v57 = vrot.slane %v9856_v9, 4  ;;  %v9891_v19 = vshll.u32 %v11625_v46, 16 }
 0x30f   : > { %v9897_v39 = vshll.u32 %v16640_v20, 16  ;;  %v9879_v27 = vrot.slane %v9877_v10, 4  ;;  %v9885_v6 = vrot.slane %v9883_v52, 5  ;;  %v9890_v13 = vrot.slane %v9888_v12, 4 }
 0x310   : > { %v9871_v11 = vrot.slane %v9870_v60, 4  ;;  %v9862_v37 = vsel %vm14372_vm2, %v9857_v57, %v9861_v35  ;;  %v9893_v16 = vrot.slane %v9891_v19, 5  ;;  %v9901_v18 = vshrl.u32 %v16640_v20, 16 }
 0x311   : > { %v9899_v47 = vrot.slane %v9897_v39, 5  ;;  %v11639_v15 = vcombine.low %v9852_v34, %v9862_v37  ;;  %v9880_v4 = vor.u32 %v9879_v27, %v9875_v56  ;;  %v9907_v36 = vshll.u32 %v16644_v62, 16 }
 0x312   : > { %v9876_v49 = vsel %vm14372_vm2, %v9871_v11, %v9875_v56  ;;  %v9894_v29 = vor.u32 %v9893_v16, %v9890_v13  ;;  %v9903_v38 = vrot.slane %v9901_v18, 4  ;;  %v9912_v8 = vshrl.u32 %v11626_v2, 16 }
 0x313   : > { %v9915_v25 = vshll.u32 %v11626_v2, 16  ;;  %13378 = vmatprep.mubr.bf16.mxu1 %v11639_v15  ;;  %v9881_v5 = vrot.slane %v9880_v4, 4  ;;  %v9909_v32 = vrot.slane %v9907_v36, 5  ;;  %v9921_v58 = vshll.u32 %v16659_v33, 16 }
 0x314   : > { %v9925_v51 = vshrl.u32 %v16659_v33, 16  ;;  %v9895_v61 = vrot.slane %v9894_v29, 4  ;;  %v9904_v20 = vor.u32 %v9903_v38, %v9899_v47  ;;  %v9914_v63 = vrot.slane %v9912_v8, 4 }
 0x315   : > { %v9917_v3 = vrot.slane %v9915_v25, 5  ;;  %v9886_v1 = vsel %vm14372_vm2, %v9881_v5, %v9885_v6  ;;  %v9923_v17 = vrot.slane %v9921_v58, 5  ;;  %v9931_v0 = vshll.u32 %v16662_v30, 16 }
 0x316   : > { %v9927_v62 = vrot.slane %v9925_v51, 4  ;;  %v11640_v45 = vcombine.low %v9876_v49, %v9886_v1  ;;  %v9900_v24 = vsel %vm14372_vm2, %v9895_v61, %v9899_v47  ;;  %v9905_v28 = vrot.slane %v9904_v20, 4 }
 0x317   : > { %v9918_v21 = vor.u32 %v9917_v3, %v9914_v63  ;;  %v9933_v7 = vrot.slane %v9931_v0, 5  ;;  %v16929_v33 = vadd.f32 %v16857_v44, %v16852_v53 }
 0x318   : > { %v9928_v54 = vor.u32 %v9927_v62, %v9923_v17  ;;  %13379 = vmatmul.mubr.bf16.gmra.mrb[56].mxu1 %v11640_v45  ;;  %v9910_v55 = vsel %vm14372_vm2, %v9905_v28, %v9909_v32 }
 0x319   : > { %v9919_v59 = vrot.slane %v9918_v21, 4  ;;  %v11641_v40 = vcombine.low %v9900_v24, %v9910_v55 }
 0x31a   : > { %v9929_v30 = vrot.slane %v9928_v54, 4 }
 0x31b   : > { %v9924_v23 = vsel %vm14372_vm2, %v9919_v59, %v9923_v17  ;;  %13382 = vmatprep.mubr.bf16.mxu1 %v11641_v40 }
 0x31c   : > { %v9934_v42 = vsel %vm14372_vm2, %v9929_v30, %v9933_v7 }
 0x31d   : > { %v11642_v46 = vcombine.low %v9924_v23, %v9934_v42 }
 0x320   : > { %13383 = vmatmul.mubr.bf16.gmra.mrb[60].mxu1 %v11642_v46 }
 0x399   : > { %v13164_v53 = vpop.f32.mrb[32].mxu0 }
 0x39a   : > { %v7389_v44 = vpop.f32.mrb[33].mxu0  ;;  %v7749_v56 = vmul.f32 %v13164_v53, %v13164_v53 }
 0x39b   : > { %v13165_v31 = vpop.f32.mrb[34].mxu0  ;;  %v7747_v41 = vmul.f32 %v7389_v44, %v7389_v44 }
 0x39c   : > { %v12019_v35 = vpack.c.bf16 %v13165_v31, %v13164_v53  ;;  %v7392_v14 = vpop.f32.mrb[35].mxu0  ;;  %v7750_v50 = vmul.f32 %v13165_v31, %v13165_v31 }
 0x39d   : > { %v12014_v43 = vpack.c.bf16 %v7392_v14, %v7389_v44  ;;  %v7709_v26 = vadd.f32 %v7392_v14, %v7389_v44  ;;  %v7748_v9 = vmul.f32 %v7392_v14, %v7392_v14 }
 0x39e   : > { %12203 = vst [vmem:[%s16296_s29 + $0x108] sm:$0xff] %v12019_v35  }
 0x39f   : > { %12202 = vst [vmem:[%s16296_s29 + $0x100] sm:$0xff] %v12014_v43   ;;  %v7710_v60 = vadd.f32 %v13164_v53, %v7709_v26  ;;  %v7779_v10 = vadd.f32 %v7748_v9, %v7747_v41 }
 0x3a1   : > { %v7780_v52 = vadd.f32 %v7779_v10, %v7749_v56  ;;  %v13168_v48 = vpop.f32.mrb[36].mxu0  ;;  %v7711_v12 = vadd.f32 %v13165_v31, %v7710_v60 }
 0x3a2   : > { %v13356_v34 = vpop.f32.mrb[32].mxu1  ;;  %v7405_v57 = vpop.f32.mrb[37].mxu0  ;;  %v7753_v51 = vmul.f32 %v13168_v48, %v13168_v48 }
 0x3a3   : > { %v10098_v19 = vpop.f32.mrb[33].mxu1  ;;  %v7712_v39 = vadd.f32 %v7711_v12, %v7405_v57  ;;  %v7751_v11 = vmul.f32 %v7405_v57, %v7405_v57  ;;  %v7781_v27 = vadd.f32 %v7780_v52, %v7750_v50  ;;  %v13169_v6 = vpop.f32.mrb[38].mxu0  ;;  %v10458_v25 = vmul.f32 %v13356_v34, %v13356_v34 }
 0x3a4   : > { %v13357_v13 = vpop.f32.mrb[34].mxu1  ;;  %v12029_v2 = vpack.c.bf16 %v13169_v6, %v13168_v48  ;;  %v7408_v37 = vpop.f32.mrb[39].mxu0  ;;  %v10456_v16 = vmul.f32 %v10098_v19, %v10098_v19  ;;  %v7754_v0 = vmul.f32 %v13169_v6, %v13169_v6 }
 0x3a5   : > { %v12099_v47 = vpack.c.bf16 %v13357_v13, %v13356_v34  ;;  %v10101_v18 = vpop.f32.mrb[35].mxu1  ;;  %v7782_v15 = vadd.f32 %v7781_v27, %v7751_v11  ;;  %v12024_v49 = vpack.c.bf16 %v7408_v37, %v7405_v57  ;;  %v7713_v38 = vadd.f32 %v7712_v39, %v7408_v37 }
 0x3a6   : > { %v12094_v4 = vpack.c.bf16 %v10101_v18, %v10098_v19  ;;  %v10418_v36 = vadd.f32 %v10101_v18, %v10098_v19  ;;  %v10457_v29 = vmul.f32 %v10101_v18, %v10101_v18  ;;  %12205 = vst [vmem:[%s16296_s29 + $0x118] sm:$0xff] %v12029_v2   ;;  %v7752_v8 = vmul.f32 %v7408_v37, %v7408_v37 }
 0x3a7   : > { %12219 = vst [vmem:[%s16296_s29 + $0x188] sm:$0xff] %v12099_v47   ;;  %12204 = vst [vmem:[%s16296_s29 + $0x110] sm:$0xff] %v12024_v49   ;;  %v7714_v58 = vadd.f32 %v13168_v48, %v7713_v38  ;;  %v10459_v63 = vmul.f32 %v13357_v13, %v13357_v13 }
 0x3a8   : > { %12218 = vst [vmem:[%s16296_s29 + $0x180] sm:$0xff] %v12094_v4   ;;  %v10419_v5 = vadd.f32 %v13356_v34, %v10418_v36  ;;  %v10488_v32 = vadd.f32 %v10457_v29, %v10456_v16  ;;  %v7783_v61 = vadd.f32 %v7782_v15, %v7752_v8 }
 0x3a9   : > { %v13172_v20 = vpop.f32.mrb[40].mxu0  ;;  %v7715_v62 = vadd.f32 %v13169_v6, %v7714_v58 }
 0x3aa   : > { %v10489_v3 = vadd.f32 %v10488_v32, %v10458_v25  ;;  %v10420_v1 = vadd.f32 %v13357_v13, %v10419_v5  ;;  %v7421_v17 = vpop.f32.mrb[41].mxu0  ;;  %v7784_v45 = vadd.f32 %v7783_v61, %v7753_v51  ;;  %v7757_v53 = vmul.f32 %v13172_v20, %v13172_v20 }
 0x3ab   : > { %v7755_v24 = vmul.f32 %v7421_v17, %v7421_v17  ;;  %v13173_v28 = vpop.f32.mrb[42].mxu0  ;;  %v7716_v54 = vadd.f32 %v7715_v62, %v7421_v17 }
 0x3ac   : > { %v10490_v21 = vadd.f32 %v10489_v3, %v10459_v63  ;;  %v12039_v7 = vpack.c.bf16 %v13173_v28, %v13172_v20  ;;  %v7424_v55 = vpop.f32.mrb[43].mxu0  ;;  %v7785_v59 = vadd.f32 %v7784_v45, %v7754_v0  ;;  %v7758_v26 = vmul.f32 %v13173_v28, %v13173_v28 }
 0x3ad   : > { %v12034_v40 = vpack.c.bf16 %v7424_v55, %v7421_v17  ;;  %v7756_v30 = vmul.f32 %v7424_v55, %v7424_v55  ;;  %v7717_v23 = vadd.f32 %v7716_v54, %v7424_v55 }
 0x3ae   : > { %12207 = vst [vmem:[%s16296_s29 + $0x128] sm:$0xff] %v12039_v7   ;;  %v7786_v42 = vadd.f32 %v7785_v59, %v7755_v24 }
 0x3af   : > { %12206 = vst [vmem:[%s16296_s29 + $0x120] sm:$0xff] %v12034_v40   ;;  %v7718_v46 = vadd.f32 %v13172_v20, %v7717_v23 }
 0x3b0   : > { %v7787_v44 = vadd.f32 %v7786_v42, %v7756_v30 }
 0x3b1   : > { %v13176_v31 = vpop.f32.mrb[44].mxu0  ;;  %v13360_v35 = vpop.f32.mrb[36].mxu1  ;;  %v7719_v41 = vadd.f32 %v13173_v28, %v7718_v46 }
 0x3b2   : > { %v7437_v14 = vpop.f32.mrb[45].mxu0  ;;  %v10114_v43 = vpop.f32.mrb[37].mxu1  ;;  %v7788_v9 = vadd.f32 %v7787_v44, %v7757_v53  ;;  %v10462_v18 = vmul.f32 %v13360_v35, %v13360_v35  ;;  %v7761_v4 = vmul.f32 %v13176_v31, %v13176_v31 }
 0x3b3   : > { %v7759_v56 = vmul.f32 %v7437_v14, %v7437_v14  ;;  %v13177_v60 = vpop.f32.mrb[46].mxu0  ;;  %v10421_v10 = vadd.f32 %v10420_v1, %v10114_v43  ;;  %v10460_v50 = vmul.f32 %v10114_v43, %v10114_v43  ;;  %v13361_v52 = vpop.f32.mrb[38].mxu1  ;;  %v7720_v48 = vadd.f32 %v7719_v41, %v7437_v14 }
 0x3b4   : > { %v12049_v12 = vpack.c.bf16 %v13177_v60, %v13176_v31  ;;  %v7440_v34 = vpop.f32.mrb[47].mxu0  ;;  %v12109_v57 = vpack.c.bf16 %v13361_v52, %v13360_v35  ;;  %v10117_v19 = vpop.f32.mrb[39].mxu1  ;;  %v7789_v39 = vadd.f32 %v7788_v9, %v7758_v26  ;;  %v10463_v8 = vmul.f32 %v13361_v52, %v13361_v52 }
 0x3b5   : > { %v10491_v11 = vadd.f32 %v10490_v21, %v10460_v50  ;;  %v12104_v27 = vpack.c.bf16 %v10117_v19, %v10114_v43  ;;  %v10422_v6 = vadd.f32 %v10421_v10, %v10117_v19  ;;  %v10461_v13 = vmul.f32 %v10117_v19, %v10117_v19 }
 0x3b6   : > { %12209 = vst [vmem:[%s16296_s29 + $0x138] sm:$0xff] %v12049_v12   ;;  %12221 = vst [vmem:[%s16296_s29 + $0x198] sm:$0xff] %v12109_v57   ;;  %v7790_v2 = vadd.f32 %v7789_v39, %v7759_v56  ;;  %v12044_v37 = vpack.c.bf16 %v7440_v34, %v7437_v14  ;;  %v7721_v16 = vadd.f32 %v7720_v48, %v7440_v34 }
 0x3b7   : > { %v7760_v47 = vmul.f32 %v7440_v34, %v7440_v34  ;;  %12220 = vst [vmem:[%s16296_s29 + $0x190] sm:$0xff] %v12104_v27   ;;  %v10423_v15 = vadd.f32 %v13360_v35, %v10422_v6  ;;  %v10492_v49 = vadd.f32 %v10491_v11, %v10461_v13  ;;  %v7762_v58 = vmul.f32 %v13177_v60, %v13177_v60 }
 0x3b8   : > { %12208 = vst [vmem:[%s16296_s29 + $0x130] sm:$0xff] %v12044_v37   ;;  %v7722_v36 = vadd.f32 %v13176_v31, %v7721_v16 }
 0x3b9   : > { %v7791_v29 = vadd.f32 %v7790_v2, %v7760_v47  ;;  %v13180_v38 = vpop.f32.mrb[48].mxu0  ;;  %v10493_v25 = vadd.f32 %v10492_v49, %v10462_v18  ;;  %v10424_v5 = vadd.f32 %v13361_v52, %v10423_v15 }
 0x3ba   : > { %v7453_v32 = vpop.f32.mrb[49].mxu0  ;;  %v7723_v61 = vadd.f32 %v13177_v60, %v7722_v36  ;;  %v7765_v54 = vmul.f32 %v13180_v38, %v13180_v38 }
 0x3bb   : > { %v7792_v51 = vadd.f32 %v7791_v29, %v7761_v4  ;;  %v7763_v20 = vmul.f32 %v7453_v32, %v7453_v32  ;;  %v13181_v63 = vpop.f32.mrb[50].mxu0  ;;  %v10494_v3 = vadd.f32 %v10493_v25, %v10463_v8 }
 0x3bc   : > { %v12059_v1 = vpack.c.bf16 %v13181_v63, %v13180_v38  ;;  %v7456_v17 = vpop.f32.mrb[51].mxu0  ;;  %v7724_v62 = vadd.f32 %v7723_v61, %v7453_v32  ;;  %v7766_v30 = vmul.f32 %v13181_v63, %v13181_v63 }
 0x3bd   : > { %v7793_v0 = vadd.f32 %v7792_v51, %v7762_v58  ;;  %v12054_v45 = vpack.c.bf16 %v7456_v17, %v7453_v32  ;;  %v7764_v24 = vmul.f32 %v7456_v17, %v7456_v17 }
 0x3be   : > { %12211 = vst [vmem:[%s16296_s29 + $0x148] sm:$0xff] %v12059_v1   ;;  %v7725_v21 = vadd.f32 %v7724_v62, %v7456_v17 }
 0x3bf   : > { %v7794_v28 = vadd.f32 %v7793_v0, %v7763_v20  ;;  %12210 = vst [vmem:[%s16296_s29 + $0x140] sm:$0xff] %v12054_v45  }
 0x3c0   : > { %v7726_v7 = vadd.f32 %v13180_v38, %v7725_v21 }
 0x3c1   : > { %v7795_v55 = vadd.f32 %v7794_v28, %v7764_v24  ;;  %v13184_v59 = vpop.f32.mrb[52].mxu0 }
 0x3c2   : > { %v7469_v40 = vpop.f32.mrb[53].mxu0  ;;  %v7727_v42 = vadd.f32 %v13181_v63, %v7726_v7  ;;  %v7769_v39 = vmul.f32 %v13184_v59, %v13184_v59 }
 0x3c3   : > { %v7796_v23 = vadd.f32 %v7795_v55, %v7765_v54  ;;  %v7767_v46 = vmul.f32 %v7469_v40, %v7469_v40  ;;  %v13185_v53 = vpop.f32.mrb[54].mxu0 }
 0x3c4   : > { %v12069_v44 = vpack.c.bf16 %v13185_v53, %v13184_v59  ;;  %v7472_v31 = vpop.f32.mrb[55].mxu0  ;;  %v7728_v35 = vadd.f32 %v7727_v42, %v7469_v40  ;;  %v7770_v11 = vmul.f32 %v13185_v53, %v13185_v53 }
 0x3c5   : > { %v7797_v14 = vadd.f32 %v7796_v23, %v7766_v30  ;;  %v12064_v41 = vpack.c.bf16 %v7472_v31, %v7469_v40  ;;  %v7768_v43 = vmul.f32 %v7472_v31, %v7472_v31 }
 0x3c6   : > { %12213 = vst [vmem:[%s16296_s29 + $0x158] sm:$0xff] %v12069_v44   ;;  %v7729_v56 = vadd.f32 %v7728_v35, %v7472_v31 }
 0x3c7   : > { %v13364_v26 = vpop.f32.mrb[40].mxu1  ;;  %v7798_v9 = vadd.f32 %v7797_v14, %v7767_v46  ;;  %12212 = vst [vmem:[%s16296_s29 + $0x150] sm:$0xff] %v12064_v41  }
 0x3c8   : > { %v10130_v60 = vpop.f32.mrb[41].mxu1  ;;  %v7730_v48 = vadd.f32 %v13184_v59, %v7729_v56  ;;  %v10466_v36 = vmul.f32 %v13364_v26, %v13364_v26 }
 0x3c9   : > { %v10425_v10 = vadd.f32 %v10424_v5, %v10130_v60  ;;  %v10464_v50 = vmul.f32 %v10130_v60, %v10130_v60  ;;  %v13365_v52 = vpop.f32.mrb[42].mxu1  ;;  %v7799_v12 = vadd.f32 %v7798_v9, %v7768_v43  ;;  %v13188_v34 = vpop.f32.mrb[56].mxu0 }
 0x3ca   : > { %v12119_v57 = vpack.c.bf16 %v13365_v52, %v13364_v26  ;;  %v10133_v19 = vpop.f32.mrb[43].mxu1  ;;  %v7485_v27 = vpop.f32.mrb[57].mxu0  ;;  %v7731_v18 = vadd.f32 %v13185_v53, %v7730_v48  ;;  %v10467_v58 = vmul.f32 %v13365_v52, %v13365_v52  ;;  %v7773_v0 = vmul.f32 %v13188_v34, %v13188_v34 }
 0x3cb   : > { %v10495_v6 = vadd.f32 %v10494_v3, %v10464_v50  ;;  %v12114_v13 = vpack.c.bf16 %v10133_v19, %v10130_v60  ;;  %v10426_v2 = vadd.f32 %v10425_v10, %v10133_v19  ;;  %v10465_v37 = vmul.f32 %v10133_v19, %v10133_v19  ;;  %v13189_v16 = vpop.f32.mrb[58].mxu0 }
 0x3cc   : > { %12223 = vst [vmem:[%s16296_s29 + $0x1a8] sm:$0xff] %v12119_v57   ;;  %v7800_v47 = vadd.f32 %v7799_v12, %v7769_v39  ;;  %v7771_v15 = vmul.f32 %v7485_v27, %v7485_v27  ;;  %v12079_v49 = vpack.c.bf16 %v13189_v16, %v13188_v34  ;;  %v7488_v4 = vpop.f32.mrb[59].mxu0  ;;  %v7732_v25 = vadd.f32 %v7731_v18, %v7485_v27 }
 0x3cd   : > { %12222 = vst [vmem:[%s16296_s29 + $0x1a0] sm:$0xff] %v12114_v13   ;;  %v10427_v29 = vadd.f32 %v13364_v26, %v10426_v2  ;;  %v10496_v38 = vadd.f32 %v10495_v6, %v10465_v37  ;;  %v12074_v8 = vpack.c.bf16 %v7488_v4, %v7485_v27  ;;  %v7772_v32 = vmul.f32 %v7488_v4, %v7488_v4 }
 0x3ce   : > { %v7801_v5 = vadd.f32 %v7800_v47, %v7770_v11  ;;  %12215 = vst [vmem:[%s16296_s29 + $0x168] sm:$0xff] %v12079_v49   ;;  %v7733_v63 = vadd.f32 %v7732_v25, %v7488_v4  ;;  %v7774_v55 = vmul.f32 %v13189_v16, %v13189_v16 }
 0x3cf   : > { %v10497_v51 = vadd.f32 %v10496_v38, %v10466_v36  ;;  %v10428_v61 = vadd.f32 %v13365_v52, %v10427_v29  ;;  %12214 = vst [vmem:[%s16296_s29 + $0x160] sm:$0xff] %v12074_v8  }
 0x3d0   : > { %v7802_v20 = vadd.f32 %v7801_v5, %v7771_v15  ;;  %v7734_v45 = vadd.f32 %v13188_v34, %v7733_v63 }
 0x3d1   : > { %v13368_v3 = vpop.f32.mrb[44].mxu1  ;;  %v10498_v1 = vadd.f32 %v10497_v51, %v10467_v58  ;;  %v13192_v17 = vpop.f32.mrb[60].mxu0 }
 0x3d2   : > { %v10146_v62 = vpop.f32.mrb[45].mxu1  ;;  %v7803_v24 = vadd.f32 %v7802_v20, %v7772_v32  ;;  %v7501_v28 = vpop.f32.mrb[61].mxu0  ;;  %v7735_v42 = vadd.f32 %v13189_v16, %v7734_v45  ;;  %v10470_v41 = vmul.f32 %v13368_v3, %v13368_v3  ;;  %v7777_v39 = vmul.f32 %v13192_v17, %v13192_v17 }
 0x3d3   : > { %v10429_v21 = vadd.f32 %v10428_v61, %v10146_v62  ;;  %v10468_v54 = vmul.f32 %v10146_v62, %v10146_v62  ;;  %v13369_v7 = vpop.f32.mrb[46].mxu1  ;;  %v13193_v59 = vpop.f32.mrb[62].mxu0  ;;  %v7775_v46 = vmul.f32 %v7501_v28, %v7501_v28 }
 0x3d4   : > { %v12129_v40 = vpack.c.bf16 %v13369_v7, %v13368_v3  ;;  %v10149_v30 = vpop.f32.mrb[47].mxu1  ;;  %v7804_v23 = vadd.f32 %v7803_v24, %v7773_v0  ;;  %v7504_v53 = vpop.f32.mrb[63].mxu0  ;;  %v7736_v43 = vadd.f32 %v7735_v42, %v7501_v28  ;;  %v12089_v9 = vpack.c.bf16 %v13193_v59, %v13192_v17 }
 0x3d5   : > { %v10499_v44 = vadd.f32 %v10498_v1, %v10468_v54  ;;  %v12124_v31 = vpack.c.bf16 %v10149_v30, %v10146_v62  ;;  %v10430_v35 = vadd.f32 %v10429_v21, %v10149_v30  ;;  %v10469_v14 = vmul.f32 %v10149_v30, %v10149_v30 }
 0x3d6   : > { %12225 = vst [vmem:[%s16296_s29 + $0x1b8] sm:$0xff] %v12129_v40   ;;  %v7805_v26 = vadd.f32 %v7804_v23, %v7774_v55  ;;  %v12084_v10 = vpack.c.bf16 %v7504_v53, %v7501_v28  ;;  %v7776_v50 = vmul.f32 %v7504_v53, %v7504_v53  ;;  %12217 = vst [vmem:[%s16296_s29 + $0x178] sm:$0xff] %v12089_v9  }
 0x3d7   : > { %12224 = vst [vmem:[%s16296_s29 + $0x1b0] sm:$0xff] %v12124_v31   ;;  %v10431_v56 = vadd.f32 %v13368_v3, %v10430_v35  ;;  %v10500_v60 = vadd.f32 %v10499_v44, %v10469_v14  ;;  %v7737_v48 = vadd.f32 %v7736_v43, %v7504_v53  ;;  %v10471_v12 = vmul.f32 %v13369_v7, %v13369_v7 }
 0x3d8   : > { %v7806_v52 = vadd.f32 %v7805_v26, %v7775_v46  ;;  %12216 = vst [vmem:[%s16296_s29 + $0x170] sm:$0xff] %v12084_v10   ;;  %v7778_v4 = vmul.f32 %v13193_v59, %v13193_v59 }
 0x3d9   : > { %v10501_v34 = vadd.f32 %v10500_v60, %v10470_v41  ;;  %v10432_v57 = vadd.f32 %v13369_v7, %v10431_v56  ;;  %v13372_v19 = vpop.f32.mrb[48].mxu1  ;;  %v7738_v11 = vadd.f32 %v13192_v17, %v7737_v48 }
 0x3da   : > { %v7807_v27 = vadd.f32 %v7806_v52, %v7776_v50  ;;  %v10162_v6 = vpop.f32.mrb[49].mxu1  ;;  %v10474_v32 = vmul.f32 %v13372_v19, %v13372_v19 }
 0x3db   : > { %v10502_v13 = vadd.f32 %v10501_v34, %v10471_v12  ;;  %v10433_v2 = vadd.f32 %v10432_v57, %v10162_v6  ;;  %v10472_v37 = vmul.f32 %v10162_v6, %v10162_v6  ;;  %v13373_v16 = vpop.f32.mrb[50].mxu1  ;;  %v7739_v47 = vadd.f32 %v13193_v59, %v7738_v11 }
 0x3dc   : > { %v7808_v18 = vadd.f32 %v7807_v27, %v7777_v39  ;;  %v12139_v15 = vpack.c.bf16 %v13373_v16, %v13372_v19  ;;  %v10165_v49 = vpop.f32.mrb[51].mxu1  ;;  %v10475_v63 = vmul.f32 %v13373_v16, %v13373_v16 }
 0x3dd   : > { %v10503_v36 = vadd.f32 %v10502_v13, %v10472_v37  ;;  %v12134_v29 = vpack.c.bf16 %v10165_v49, %v10162_v6  ;;  %v10434_v38 = vadd.f32 %v10433_v2, %v10165_v49  ;;  %v10473_v8 = vmul.f32 %v10165_v49, %v10165_v49 }
 0x3de   : > { %12227 = vst [vmem:[%s16296_s29 + $0x1c8] sm:$0xff] %v12139_v15   ;;  %v7740_v25 = vrot.slane %v7739_v47, 4  ;;  %v7809_v5 = vadd.f32 %v7808_v18, %v7778_v4 }
 0x3df   : > { %12226 = vst [vmem:[%s16296_s29 + $0x1c0] sm:$0xff] %v12134_v29   ;;  %v10435_v58 = vadd.f32 %v13372_v19, %v10434_v38  ;;  %v10504_v51 = vadd.f32 %v10503_v36, %v10473_v8 }
 0x3e0   : > { %v7741_v61 = vadd.f32 %v7740_v25, %v7739_v47  ;;  %v7810_v20 = vrot.slane %v7809_v5, 4 }
 0x3e1   : > { %v10505_v3 = vadd.f32 %v10504_v51, %v10474_v32  ;;  %v13376_v1 = vpop.f32.mrb[52].mxu1  ;;  %v10436_v17 = vadd.f32 %v13373_v16, %v10435_v58 }
 0x3e2   : > { %v10178_v62 = vpop.f32.mrb[53].mxu1  ;;  %v7742_v0 = vrot.slane %v7741_v61, 2  ;;  %v7811_v45 = vadd.f32 %v7810_v20, %v7809_v5  ;;  %v10478_v31 = vmul.f32 %v13376_v1, %v13376_v1 }
 0x3e3   : > { %v10437_v24 = vadd.f32 %v10436_v17, %v10178_v62  ;;  %v10476_v28 = vmul.f32 %v10178_v62, %v10178_v62  ;;  %v10506_v21 = vadd.f32 %v10505_v3, %v10475_v63  ;;  %v13377_v54 = vpop.f32.mrb[54].mxu1 }
 0x3e4   : > { %v12149_v7 = vpack.c.bf16 %v13377_v54, %v13376_v1  ;;  %v10181_v55 = vpop.f32.mrb[55].mxu1  ;;  %v7743_v59 = vadd.f32 %v7742_v0, %v7741_v61  ;;  %v7812_v40 = vrot.slane %v7811_v45, 2  ;;  %v10479_v26 = vmul.f32 %v13377_v54, %v13377_v54 }
 0x3e5   : > { %v10507_v30 = vadd.f32 %v10506_v21, %v10476_v28  ;;  %v12144_v23 = vpack.c.bf16 %v10181_v55, %v10178_v62  ;;  %v10438_v42 = vadd.f32 %v10437_v24, %v10181_v55  ;;  %v10477_v46 = vmul.f32 %v10181_v55, %v10181_v55 }
 0x3e6   : > { %12229 = vst [vmem:[%s16296_s29 + $0x1d8] sm:$0xff] %v12149_v7   ;;  %v7744_v53 = vrot.slane %v7743_v59, 1  ;;  %v7813_v44 = vadd.f32 %v7812_v40, %v7811_v45 }
 0x3e7   : > { %12228 = vst [vmem:[%s16296_s29 + $0x1d0] sm:$0xff] %v12144_v23   ;;  %v10439_v35 = vadd.f32 %v13376_v1, %v10438_v42  ;;  %v10508_v14 = vadd.f32 %v10507_v30, %v10477_v46 }
 0x3e8   : > { %v7745_v41 = vadd.f32 %v7744_v53, %v7743_v59  ;;  %v7814_v43 = vrot.slane %v7813_v44, 1 }
 0x3e9   : > { %v10509_v9 = vadd.f32 %v10508_v14, %v10478_v31  ;;  %v10440_v56 = vadd.f32 %v13377_v54, %v10439_v35 }
 0x3ea   : > { %v16966_v60 = vadd.f32 %v7745_v41, %v16855_v22  ;;  %v7815_v10 = vadd.f32 %v7814_v43, %v7813_v44 }
 0x3eb   : > { %v13380_v50 = vpop.f32.mrb[56].mxu1  ;;  %v10510_v52 = vadd.f32 %v10509_v9, %v10479_v26 }
 0x3ec   : > { %v10194_v48 = vpop.f32.mrb[57].mxu1  ;;  %v16969_v12 = vadd.f32 %v7815_v10, %v16929_v33  ;;  %v10482_v2 = vmul.f32 %v13380_v50, %v13380_v50 }
 0x3ed   : > { %v10441_v34 = vadd.f32 %v10440_v56, %v10194_v48  ;;  %v10480_v57 = vmul.f32 %v10194_v48, %v10194_v48  ;;  %v13381_v19 = vpop.f32.mrb[58].mxu1 }
 0x3ee   : > { %v12159_v39 = vpack.c.bf16 %v13381_v19, %v13380_v50  ;;  %v10197_v11 = vpop.f32.mrb[59].mxu1  ;;  %v10483_v47 = vmul.f32 %v13381_v19, %v13381_v19 }
 0x3ef   : > { %v10511_v27 = vadd.f32 %v10510_v52, %v10480_v57  ;;  %v12154_v6 = vpack.c.bf16 %v10197_v11, %v10194_v48  ;;  %v10442_v13 = vadd.f32 %v10441_v34, %v10197_v11  ;;  %v10481_v22 = vmul.f32 %v10197_v11, %v10197_v11 }
 0x3f0   : > { %12231 = vst [vmem:[%s16296_s29 + $0x1e8] sm:$0xff] %v12159_v39  }
 0x3f1   : > { %12230 = vst [vmem:[%s16296_s29 + $0x1e0] sm:$0xff] %v12154_v6   ;;  %v10443_v37 = vadd.f32 %v13380_v50, %v10442_v13  ;;  %v10512_v16 = vadd.f32 %v10511_v27, %v10481_v22 }
 0x3f3   : > { %v10513_v18 = vadd.f32 %v10512_v16, %v10482_v2  ;;  %v13384_v33 = vpop.f32.mrb[60].mxu1  ;;  %v10444_v15 = vadd.f32 %v13381_v19, %v10443_v37 }
 0x3f4   : > { %v10210_v49 = vpop.f32.mrb[61].mxu1  ;;  %v10486_v61 = vmul.f32 %v13384_v33, %v13384_v33 }
 0x3f5   : > { %v10445_v4 = vadd.f32 %v10444_v15, %v10210_v49  ;;  %v10484_v36 = vmul.f32 %v10210_v49, %v10210_v49  ;;  %v10514_v29 = vadd.f32 %v10513_v18, %v10483_v47  ;;  %v13385_v38 = vpop.f32.mrb[62].mxu1 }
 0x3f6   : > { %v12169_v8 = vpack.c.bf16 %v13385_v38, %v13384_v33  ;;  %v10213_v25 = vpop.f32.mrb[63].mxu1 }
 0x3f7   : > { %v10515_v5 = vadd.f32 %v10514_v29, %v10484_v36  ;;  %v12164_v32 = vpack.c.bf16 %v10213_v25, %v10210_v49  ;;  %v10446_v58 = vadd.f32 %v10445_v4, %v10213_v25  ;;  %v10485_v51 = vmul.f32 %v10213_v25, %v10213_v25 }
 0x3f8   : > { %12233 = vst [vmem:[%s16296_s29 + $0x1f8] sm:$0xff] %v12169_v8  }
 0x3f9   : > { %12232 = vst [vmem:[%s16296_s29 + $0x1f0] sm:$0xff] %v12164_v32   ;;  %v10447_v20 = vadd.f32 %v13384_v33, %v10446_v58  ;;  %v10516_v63 = vadd.f32 %v10515_v5, %v10485_v51 }
 0x3fa   : > { %14139 = shalt.err (!%p14136_p7)
}
 0x3fb   : > { %s14140_s19 = scalar_lea.hbm %s16978_s7, 8192  ;;  %s14144_s25 = scalar_lea.hbm %s17060_s2, 16384 }
 0x3fc   : > { %p14141_p8 = scmp.ne.s32.totalorder %s16978_s7, %s14140_s19  ;;  %p14145_p1 = scmp.lt.u32.totalorder %s16978_s7, %s17060_s2 }
 0x3fd   : > { %p14146_p0 = scmp.lt.u32.totalorder %s14144_s25, %s14140_s19  ;;  %p14148_p6 = scmp.lt.u32.totalorder %s14140_s19, %s16978_s7 }
 0x3fe   : > { %p14142_p11 = pnand %p14141_p8, %p17382_p9 }
 0x3ff   : > { %p14147_p5 = por %p14146_p0, %p14145_p1 }
 0x400   : > { %p14143_p13 = pneg %p14142_p11 }
 0x401   : > { %p14149_p10 = por %p14148_p6, %p14147_p5 }
 0x403   : > { %p14150_p12 = pnand %p14149_p10, %p14143_p13 }
 0x405   : > { %14153 = shalt.err (!%p14150_p12)
}
 0x406   : > { %s14230_s29 = smov 64   ;;  %s14231_s30 = smov 4   ;;  %v10487_v3 = vmul.f32 %v13385_v38, %v13385_v38  ;;  %v10448_v1 = vadd.f32 %v13385_v38, %v10447_v20  ;;  %v10517_v17 = vadd.f32 %v10516_v63, %v10486_v61 }
 0x407   : > { %13775 = dma.vmem_to_hbm [thread:$0]  (%p17382_p9), %s16980_s4, 8192, %s16978_s7, %s10529_s8, %s14230_s29, %s14230_s29, %s14231_s30  }
 0x408   : > { %v10449_v62 = vrot.slane %v10448_v1, 4  ;;  %v10518_v0 = vadd.f32 %v10517_v17, %v10487_v3  ;;  %s10673_s5 = sshll.u32 %s16200_s27, 1  ;;  %s11719_s4 = sshll.u32 %s14274_s16, 5 }
 0x409   : > { %s189_s6 = scalar_lea.vmem [#allocation6], %s10673_s5  ;;  %s17015_s10 = scalar_lea.hbm %s17061_s3, %s11719_s4 }
 0x40a   : > { %v10450_v45 = vadd.f32 %v10449_v62, %v10448_v1  ;;  %v10519_v24 = vrot.slane %v10518_v0, 4  ;;  %s10563_s7 = sshll.u32 %s189_s6, 4  ;;  %s10534_s16 = scalar_lea.sflag [#allocation7], %s16200_s27  ;;  %s17017_s7 = int_to_ptr.vmem [resolvable:$true] %s10563_s7 }
 0x40b   : > { %s14154_s11 = scalar_lea.vmem %s17017_s7, 32  ;;  %s14232_s17 = smov [#allocation6]  }
 0x40c   : > { %v10451_v28 = vrot.slane %v10450_v45, 2  ;;  %v10520_v21 = vadd.f32 %v10519_v24, %v10518_v0  ;;  %p14155_p2 = scmp.ne.s32.totalorder %s17017_s7, %s14154_s11  ;;  %s14158_s19 = sshll.u32 %s14232_s17, 4  ;;  %s14159_s19 = int_to_ptr.vmem [resolvable:$false] %s14158_s19 }
 0x40d   : > { %s14160_s20 = scalar_lea.vmem %s14159_s19, 64  ;;  %p14161_p7 = scmp.lt.s32.totalorder %s17017_s7, %s14159_s19 }
 0x40e   : > { %v10452_v54 = vadd.f32 %v10451_v28, %v10450_v45  ;;  %v10521_v7 = vrot.slane %v10520_v21, 2  ;;  %p14156_p3 = pnand %p14155_p2, %p17382_p9  ;;  %p14162_p8 = scmp.lt.s32.totalorder %s14160_s20, %s14154_s11 }
 0x410   : > { %v10453_v55 = vrot.slane %v10452_v54, 1  ;;  %v10522_v59 = vadd.f32 %v10521_v7, %v10520_v21  ;;  %p14157_p4 = pneg %p14156_p3  ;;  %p14163_p11 = por %p14162_p8, %p14161_p7 }
 0x412   : > { %v10454_v40 = vadd.f32 %v10453_v55, %v10452_v54  ;;  %v10523_v30 = vrot.slane %v10522_v59, 1  ;;  %p14164_p13 = pnand %p14163_p11, %p14157_p4 }
 0x414   : > { %v10524_v23 = vadd.f32 %v10523_v30, %v10522_v59  ;;  %v10455_v42 = vadd.f32 %v10454_v40, %v16966_v60 }
 0x416   : > { %v10525_v46 = vadd.f32 %v10524_v23, %v16969_v12  ;;  %10526 = vst [vmem:[%s189_s6] sm:$0x1] %v10455_v42 }
 0x418   : > { %10527 = vst [vmem:[%s189_s6 + $0x1] sm:$0x1] %v10525_v46 }
 0x419   : > { %14167 = shalt.err (!%p14164_p13)
}
 0x41a   : > { %s14168_s27 = scalar_lea.hbm %s17015_s10, 32  ;;  %s14172_s26 = scalar_lea.hbm %s17061_s3, 64 }
 0x41b   : > { %p14169_p1 = scmp.ne.s32.totalorder %s17015_s10, %s14168_s27  ;;  %p14173_p6 = scmp.lt.u32.totalorder %s17015_s10, %s17061_s3 }
 0x41c   : > { %p14174_p10 = scmp.lt.u32.totalorder %s14172_s26, %s14168_s27  ;;  %p14176_p2 = scmp.lt.u32.totalorder %s14168_s27, %s17015_s10 }
 0x41d   : > { %p14170_p0 = pnand %p14169_p1, %p17382_p9 }
 0x41e   : > { %p14175_p12 = por %p14174_p10, %p14173_p6 }
 0x41f   : > { %p14171_p5 = pneg %p14170_p0 }
 0x420   : > { %p14177_p3 = por %p14176_p2, %p14175_p12 }
 0x422   : > { %p14178_p4 = pnand %p14177_p3, %p14171_p5 }
 0x424   : > { %14181 = shalt.err (!%p14178_p4)
}
 0x425   : > { %13776 = dma.vmem_to_hbm [thread:$0]  (%p17382_p9), %s17017_s7, 32, %s17015_s10, %s10534_s16  }
 0x426 PF: > { %p13792_p7 = scmp.ge.s32.totalorder %s14224_s15, 2  ;;  %s10575_s30 = sand.u32 1, %s14212_s12  }
 0x427   : > { %p17383_p8 = scmp.ne.s32.totalorder %s17139_s23, 0  ;;  %s10576_s5 = scalar_lea.sflag [#allocation4], %s10575_s30 }
 0x429   : > { %p13784_p11 = pnand %p13792_p7, %p17383_p8 }
 0x42b   : > { %14203 = dma.done.wait (!%p13784_p11), %s10576_s5, 8192  }
 0x42c   : > { %14205 = vsyncadd (!%p13784_p11), %s10576_s5, 4294959104  ;;  %s10585_s4 = scalar_lea.sflag [#allocation7], %s10575_s30 }
 0x42d   : > { %14207 = dma.done.wait (!%p13784_p11), %s10585_s4, 32  }
 0x42e   : > { %14209 = vsyncadd (!%p13784_p11), %s10585_s4, 4294967264  ;;  %p18_p9 = scmp.ge.s32.totalorder %s14278_s18, 4   ;;  %s17384_s12 = smov %s14216_s13 }
 0x42f   : > { %s17385_s13 = smov %s14220_s14  ;;  %s17386_s14 = smov %s14289_s21 }
 0x430   : > { %s17387_s15 = smov %s14278_s18  ;;  %20 = sbr.rel (!%p18_p9) target bundleno = 6 (0x6), region = 105 }
 0x437   :  { %10590 = vsyncpa [#allocation3], 1 }
 0x438   :  { %10592 = vsyncpa [#allocation3 + $0x1], 1 }
 0x439   :  { %10593 = vsyncpa [#allocation4], 1 }
 0x43a   :  { %10595 = vsyncpa [#allocation4 + $0x1], 1 }
 0x43b   :  { %10596 = vsyncpa [#allocation7], 1 }
 0x43c   :  { %10598 = vsyncpa [#allocation7 + $0x1], 1 }

</bundles_post_ra>
